<compile_context>
chip_gen: v7x
topology: tpu7x:2x2x1
jax: 0.10.0
libtpu: 0.0.40
codegen_flags: <defaults>
</compile_context>

<pallas_src>
import jax
import jax.numpy as jnp
from jax import lax
from jax.experimental import pallas as pl
from jax.experimental.pallas import tpu as pltpu


def _round_up(x, m):
    return ((x + m - 1) // m) * m


def _vmem_limit_bytes():
    """Per-generation scoped-VMEM limit with headroom (v5e/v6e 128 MiB, v7x 64 MiB)."""
    try:
        cap = int(pltpu.get_tpu_info().vmem_capacity_bytes)
    except Exception:
        cap = 64 * 1024 * 1024                     # conservative fallback
    return min(cap - (16 << 20), int(cap * 0.85))  # ~48-56 MiB on v7x, ~108 MiB on v5e/v6e


def _pick_tile_h(h, n, fixed_bytes, per_row_bytes, vmem_limit):
    """Largest divisor of h whose full VMEM footprint fits the limit, preferring
    >= 4 total grid steps (pipeline depth + v7x megacore occupancy).

    Diffusion-UNet spatial dims are powers of two, so a divisor always exists.
    """
    budget = vmem_limit - fixed_bytes - (2 << 20)   # small safety margin
    divisors = [d for d in range(1, h + 1) if h % d == 0]
    fitting = [d for d in divisors if d * per_row_bytes <= budget]
    if not fitting:
        return 1
    deep = [d for d in fitting if n * (h // d) >= 4]
    return max(deep) if deep else max(fitting)


# _TAP_SETS[parity][tap] -> which of the original 3x3 kernel rows (cols) collapse
# onto that low-res tap. Applies to rows via (a, dr) and to columns via (b, dc).
_TAP_SETS = (((0,), (1, 2)),   # output parity 0: tap 0 -> {0}, tap 1 -> {1, 2}
             ((0, 1), (2,)))   # output parity 1: tap 0 -> {0, 1}, tap 1 -> {2}


def _parities(offset):
    """Output parities (a or b) that read the low-res patch at offset in {0,1,2}."""
    return ((0,), (0, 1), (1,))[offset]


def _patch_layout(cout_p):
    """Static layout of the merged weight matrix.

    For every patch offset (ro, co) in row-major order: the lane offset of that
    patch's weight block inside the (cin_p, 16*cout_p) merged weight and the
    ordered list of (a, b) output phases it feeds (corners 1, edges 2, center 4).
    """
    layout = []
    off = 0
    for ro in range(3):
        for co in range(3):
            ab = [(a, b) for a in _parities(ro) for b in _parities(co)]
            layout.append((ro, co, off, ab))
            off += len(ab) * cout_p
    assert off == 16 * cout_p
    return layout


def _fold_merged_weights(weight_oihw, cin_p, cout_p):
    """(Cout, Cin, 3, 3) torch conv weight -> (cin_p, 16*cout_p) bf16 merged
    phase weights, column layout matching _patch_layout / the kernel loop."""
    cout, cin = weight_oihw.shape[0], weight_oihw.shape[1]
    w_k = jnp.transpose(weight_oihw, (2, 3, 1, 0)).astype(jnp.float32)   # (3,3,Cin,Cout)
    cols = []
    for ro, co, _, ab in _patch_layout(cout_p):
        for a, b in ab:
            dr, dc = ro - a, co - b
            m = jnp.zeros((cin, cout), jnp.float32)
            for ky in _TAP_SETS[a][dr]:
                for kx in _TAP_SETS[b][dc]:
                    m = m + w_k[ky, kx]
            cols.append(jnp.pad(m, ((0, cin_p - cin), (0, cout_p - cout))))
    return jnp.concatenate(cols, axis=-1).astype(jnp.bfloat16)           # (cin_p, 16*cout_p)


def _upsample_conv_kernel(x_ref, w_ref, b_ref, o_ref):
    # x_ref : (1, H+2, Wc, Cin_p)      zero-padded low-res input (bf16), resident
    # w_ref : (Cin_p, 16*Cout_p)       merged folded phase weights (bf16), resident
    # b_ref : (1, Cout_p)              bias (f32), resident
    # o_ref : (1, TH, 2, W, 2*Cout_p)  output row tile; memory-identical to a
    #                                  (2*TH, 2*W, Cout_p) slab of the final output
    th = o_ref.shape[1]
    w = o_ref.shape[3]
    cout_p = o_ref.shape[4] // 2
    cin_p = x_ref.shape[3]
    row0 = pl.multiple_of(pl.program_id(1) * th, th)   # first low-res row of this tile
    bias = b_ref[...].reshape(1, 1, cout_p)            # hoisted once per tile

    written = set()
    for ro, co, off, ab in _patch_layout(cout_p):
        k = len(ab)
        # One of the 9 distinct low-res 2x2-neighborhood patches (shared by all
        # phases that read it) -> single wider matmul on the MXU.
        patch = x_ref[0, pl.ds(row0 + ro, th), pl.ds(co, w), :].reshape(th * w, cin_p)
        wk = w_ref[:, off:off + k * cout_p]             # static, lane-aligned slice
        res = jnp.dot(patch, wk, preferred_element_type=jnp.float32)
        res = res.reshape(th, w, k * cout_p)
        for idx, (a, b) in enumerate(ab):
            contrib = res[:, :, idx * cout_p:(idx + 1) * cout_p]
            if (a, b) not in written:
                # First contribution to this (row-parity, col-parity) slab:
                # fuse the bias add into the store (no separate init pass).
                o_ref[0, :, a, :, b * cout_p:(b + 1) * cout_p] = contrib + bias
                written.add((a, b))
            else:
                # Accumulate in place — no jnp.stack/concatenate full-tile copies.
                o_ref[0, :, a, :, b * cout_p:(b + 1) * cout_p] += contrib


def _upsample_only_kernel(x_ref, o_ref):
    # x_ref : (1, TH, W, C) ; o_ref : (1, TH, 2, W, 2*C)  -- pure bandwidth copy
    x = x_ref[0]                                   # (TH, W, C)
    xd = jnp.concatenate([x, x], axis=-1)          # column duplication in lanes
    o_ref[0, :, 0] = xd                            # row parity 0
    o_ref[0, :, 1] = xd                            # row parity 1


def upsample_forward(x_nchw, weight_oihw=None, bias=None, use_conv=True):
    """Forward pass of Upsample (nearest 2x + optional 3x3 conv). NCHW f32 in/out."""
    # TODO(synk): the NCHW<->NHWC transposes and the [..., :cout] slice are extra
    # HBM passes over the 4x-upsampled tensor; keep the surrounding pipeline NHWC
    # (and ideally bf16) end-to-end to remove them in the mem-bound regime.
    n, c, h, w = x_nchw.shape
    vmem_limit = _vmem_limit_bytes()

    if not use_conv:
        x = jnp.transpose(x_nchw, (0, 2, 3, 1)).astype(jnp.float32)     # NHWC
        per_row = (2 * 2 * w * 2 * c * 4      # output rows, f32, double-buffered
                   + 2 * w * c * 4            # input rows, double-buffered
                   + 2 * w * 2 * c * 4)       # in-kernel duplicated temp
        th = _pick_tile_h(h, n, 0, per_row, vmem_limit)
        out = pl.pallas_call(
            _upsample_only_kernel,
            out_shape=jax.ShapeDtypeStruct((n, h, 2, w, 2 * c), jnp.float32),
            grid_spec=pltpu.PrefetchScalarGridSpec(
                num_scalar_prefetch=0,
                grid=(n, h // th),
                in_specs=[pl.BlockSpec((1, th, w, c), lambda i, t: (i, t, 0, 0))],
                out_specs=pl.BlockSpec((1, th, 2, w, 2 * c),
                                       lambda i, t: (i, t, 0, 0, 0)),
            ),
            compiler_params=pltpu.CompilerParams(
                dimension_semantics=("parallel", "parallel"),
                vmem_limit_bytes=vmem_limit),
        )(x)
        out = out.reshape(n, 2 * h, 2 * w, c)     # free: memory-identical layout
        return jnp.transpose(out, (0, 3, 1, 2))

    cout = weight_oihw.shape[0]
    # TODO(synk): for tiny channel counts (< ~32) an XLA-conv fallback avoids the
    # up-to-32x pad waste; production UNet channels are >=128 so the MXU path is kept.
    cin_p = _round_up(c, 128)        # lane-dense contraction dim for the MXU
    cout_p = _round_up(cout, 128)    # lane-dense output dim -> unmasked stores
    w_cols = _round_up(w + 2, 8)     # sublane-friendly padded low-res width

    # Pad the *low-res* image: 1-pixel conv halo + width to w_cols + channels to cin_p.
    x = jnp.transpose(x_nchw, (0, 2, 3, 1)).astype(jnp.float32)          # NHWC
    x_pad = jnp.pad(
        x, ((0, 0), (1, 1), (1, w_cols - (w + 1)), (0, cin_p - c))
    ).astype(jnp.bfloat16)
    w_merged = _fold_merged_weights(weight_oihw, cin_p, cout_p)          # (cin_p, 16*cout_p)
    b_pad = jnp.pad(bias.astype(jnp.float32), (0, cout_p - cout)).reshape(1, cout_p)

    # VMEM accounting: resident input (x2 buffers), single-buffered weights/bias,
    # double-buffered output tile and in-kernel temporaries (patch + widest result).
    fixed = (2 * (h + 2) * w_cols * cin_p * 2
             + cin_p * 16 * cout_p * 2
             + 2 * cout_p * 4)
    per_row = (2 * 2 * w * 2 * cout_p * 4
               + 2 * (w * cin_p * 2 + w * 4 * cout_p * 4))
    th = _pick_tile_h(h, n, fixed, per_row, vmem_limit)

    def build(resident_buffers):
        kw = dict(pipeline_mode=pl.Buffered(1)) if resident_buffers == 1 else {}
        return pl.pallas_call(
            _upsample_conv_kernel,
            # (n, h, 2, w, 2*cout_p) is bit-identical in memory to
            # (n, 2h, 2w, cout_p), so the reshape after the call is free.
            out_shape=jax.ShapeDtypeStruct((n, h, 2, w, 2 * cout_p), jnp.float32),
            grid_spec=pltpu.PrefetchScalarGridSpec(
                num_scalar_prefetch=0,
                grid=(n, h // th),
                in_specs=[
                    # whole padded low-res image stays resident across the row-tile axis
                    pl.BlockSpec((1, h + 2, w_cols, cin_p), lambda i, t: (i, 0, 0, 0)),
                    # constant index maps -> never re-fetched; single-buffered
                    pl.BlockSpec((cin_p, 16 * cout_p), lambda i, t: (0, 0), **kw),
                    pl.BlockSpec((1, cout_p), lambda i, t: (0, 0), **kw),
                ],
                out_specs=pl.BlockSpec((1, th, 2, w, 2 * cout_p),
                                       lambda i, t: (i, t, 0, 0, 0)),
            ),
            compiler_params=pltpu.CompilerParams(
                dimension_semantics=("parallel", "parallel"),
                vmem_limit_bytes=vmem_limit),
        )

    try:
        out = build(1)(x_pad, w_merged, b_pad)
    except Exception:
        # Defensive fallback for JAX builds that reject Buffered(1) on a
        # pallas_call BlockSpec: double-buffer the resident operands instead.
        out = build(2)(x_pad, w_merged, b_pad)

    out = out.reshape(n, 2 * h, 2 * w, cout_p)[..., :cout]
    return jnp.transpose(out, (0, 3, 1, 2))


def _reference(x_nchw, weight_oihw, bias, use_conv):
    up = jnp.repeat(jnp.repeat(x_nchw, 2, axis=2), 2, axis=3)
    if not use_conv:
        return up
    y = lax.conv_general_dilated(
        up, weight_oihw, window_strides=(1, 1), padding="SAME",
        dimension_numbers=("NCHW", "OIHW", "NCHW"),
        precision=lax.Precision.HIGHEST)
    return y + bias.reshape(1, -1, 1, 1)


def _run_case(key, n, c, cout, h, w):
    kx, kw, kb = jax.random.split(key, 3)
    x = jax.random.normal(kx, (n, c, h, w), dtype=jnp.float32)
    weight = jax.random.normal(kw, (cout, c, 3, 3), dtype=jnp.float32) / jnp.sqrt(c * 9.0)
    bias = jax.random.normal(kb, (cout,), dtype=jnp.float32) * 0.1

    # use_conv=True path (bf16 MXU inputs, f32 accumulation -> loose-ish tolerance;
    # deliberate precision drop vs the f32 HIGHEST reference, fine for diffusion).
    y = jax.block_until_ready(upsample_forward(x, weight, bias, use_conv=True))
    y_ref = _reference(x, weight, bias, use_conv=True)
    assert y.shape == (n, cout, 2 * h, 2 * w)
    assert jnp.allclose(y, y_ref, atol=3e-2, rtol=3e-2), \
        f"conv mismatch: max err {jnp.max(jnp.abs(y - y_ref))}"

    # use_conv=False path (exact copy)
    y2 = jax.block_until_ready(upsample_forward(x, use_conv=False))
    y2_ref = _reference(x, None, None, use_conv=False)
    assert y2.shape == (n, c, 2 * h, 2 * w)
    assert jnp.allclose(y2, y2_ref, atol=1e-6)


if __name__ == "__main__":
    key = jax.random.PRNGKey(0)
    k1, k2 = jax.random.split(key)
    _run_case(k1, n=2, c=4, cout=4, h=16, w=16)   # toy shape from the module spec
    _run_case(k2, n=1, c=32, cout=48, h=8, w=8)   # exercises Cin != Cout + channel padding
    print("KERNEL_OK")
</pallas_src>

<mosaic_0001>
module attributes {stable_mosaic.version = 11 : i64} {
  func.func @_upsample_conv_kernel(%arg0: i32, %arg1: i32, %arg2: memref<1x18x24x128xbf16, #tpu.memory_space<vmem>>, %arg3: memref<128x2048xbf16, #tpu.memory_space<vmem>>, %arg4: memref<1x128xf32, #tpu.memory_space<vmem>>, %arg5: memref<1x8x2x16x256xf32, #tpu.memory_space<vmem>>) attributes {dimension_semantics = [#tpu.dimension_semantics<parallel>, #tpu.dimension_semantics<parallel>], iteration_bounds = array<i64: 2, 2>, scalar_prefetch = 0 : i64, scratch_operands = 0 : i64, tpu.core_type = #tpu.core_type<tc>, window_params = [{transform_indices = @transform_0, window_bounds = array<i64: 1, 18, 24, 128>}, {pipeline_mode = #tpu.pipeline_mode<synchronous>, transform_indices = @transform_1, window_bounds = array<i64: 128, 2048>}, {pipeline_mode = #tpu.pipeline_mode<synchronous>, transform_indices = @transform_2, window_bounds = array<i64: 1, 128>}, {transform_indices = @transform_3, window_bounds = array<i64: 1, 8, 2, 16, 256>}]} {
    %c8_i32 = arith.constant 8 : i32
    %0 = arith.muli %arg1, %c8_i32 : i32
    %1 = tpu.assume_multiple %0, 8 : i32
    %c0 = arith.constant 0 : index
    %c0_0 = arith.constant 0 : index
    %2 = vector.load %arg4[%c0, %c0_0] : memref<1x128xf32, #tpu.memory_space<vmem>>, vector<1x128xf32>
    %3 = vector.shape_cast %2 : vector<1x128xf32> to vector<1x1x128xf32>
    %c0_i32 = arith.constant 0 : i32
    %4 = arith.addi %1, %c0_i32 : i32
    %c0_1 = arith.constant 0 : index
    %5 = arith.index_cast %4 : i32 to index
    %c0_2 = arith.constant 0 : index
    %c0_3 = arith.constant 0 : index
    %6 = vector.load %arg2[%c0_1, %5, %c0_2, %c0_3] : memref<1x18x24x128xbf16, #tpu.memory_space<vmem>>, vector<1x8x16x128xbf16>
    %7 = vector.shape_cast %6 : vector<1x8x16x128xbf16> to vector<8x16x128xbf16>
    %8 = vector.shape_cast %7 : vector<8x16x128xbf16> to vector<128x128xbf16>
    %c0_4 = arith.constant 0 : index
    %c0_5 = arith.constant 0 : index
    %9 = vector.load %arg3[%c0_4, %c0_5] : memref<128x2048xbf16, #tpu.memory_space<vmem>>, vector<128x128xbf16>
    %cst = arith.constant dense<0.000000e+00> : vector<128x128xf32>
    %10 = tpu.matmul %8, %9, %cst {dimension_numbers = #tpu.dot_dimension_numbers<[1], [0], [0], [1], [0, 0, 1, 1], [], []>} : vector<128x128xbf16>, vector<128x128xbf16>, vector<128x128xf32> -> vector<128x128xf32>
    %11 = vector.shape_cast %10 : vector<128x128xf32> to vector<8x16x128xf32>
    %12 = vector.broadcast %3 : vector<1x1x128xf32> to vector<8x16x128xf32>
    %13 = arith.addf %11, %12 : vector<8x16x128xf32>
    %c0_6 = arith.constant 0 : index
    %c0_7 = arith.constant 0 : index
    %c0_8 = arith.constant 0 : index
    %c0_9 = arith.constant 0 : index
    %c0_10 = arith.constant 0 : index
    %14 = vector.load %arg5[%c0_6, %c0_7, %c0_8, %c0_9, %c0_10] : memref<1x8x2x16x256xf32, #tpu.memory_space<vmem>>, vector<1x8x1x16x128xf32>
    %15 = vector.shape_cast %14 : vector<1x8x1x16x128xf32> to vector<8x16x128xf32>
    %16 = vector.shape_cast %13 : vector<8x16x128xf32> to vector<1x8x1x16x128xf32>
    tpu.vector_store %arg5[%c0_6, %c0_7, %c0_8, %c0_9, %c0_10], %16 {strides = array<i32>} : memref<1x8x2x16x256xf32, #tpu.memory_space<vmem>>, vector<1x8x1x16x128xf32>,
    %c0_i32_11 = arith.constant 0 : i32
    %17 = arith.addi %1, %c0_i32_11 : i32
    %c0_12 = arith.constant 0 : index
    %18 = arith.index_cast %17 : i32 to index
    %c1 = arith.constant 1 : index
    %c0_13 = arith.constant 0 : index
    %19 = vector.load %arg2[%c0_12, %18, %c1, %c0_13] : memref<1x18x24x128xbf16, #tpu.memory_space<vmem>>, vector<1x8x16x128xbf16>
    %20 = vector.shape_cast %19 : vector<1x8x16x128xbf16> to vector<8x16x128xbf16>
    %21 = vector.shape_cast %20 : vector<8x16x128xbf16> to vector<128x128xbf16>
    %c0_14 = arith.constant 0 : index
    %c128 = arith.constant 128 : index
    %22 = vector.load %arg3[%c0_14, %c128] : memref<128x2048xbf16, #tpu.memory_space<vmem>>, vector<128x256xbf16>
    %cst_15 = arith.constant dense<0.000000e+00> : vector<128x256xf32>
    %23 = tpu.matmul %21, %22, %cst_15 {dimension_numbers = #tpu.dot_dimension_numbers<[1], [0], [0], [1], [0, 0, 1, 1], [], []>} : vector<128x128xbf16>, vector<128x256xbf16>, vector<128x256xf32> -> vector<128x256xf32>
    %24 = vector.shape_cast %23 : vector<128x256xf32> to vector<8x16x256xf32>
    %25 = vector.extract_strided_slice %24 {offsets = [0, 0, 0], sizes = [8, 16, 128], strides = [1, 1, 1]} : vector<8x16x256xf32> to vector<8x16x128xf32>
    %c0_16 = arith.constant 0 : index
    %c0_17 = arith.constant 0 : index
    %c0_18 = arith.constant 0 : index
    %c0_19 = arith.constant 0 : index
    %c0_20 = arith.constant 0 : index
    %26 = vector.load %arg5[%c0_16, %c0_17, %c0_18, %c0_19, %c0_20] : memref<1x8x2x16x256xf32, #tpu.memory_space<vmem>>, vector<1x8x1x16x128xf32>
    %27 = vector.shape_cast %26 : vector<1x8x1x16x128xf32> to vector<8x16x128xf32>
    %28 = arith.addf %27, %25 : vector<8x16x128xf32>
    %c0_21 = arith.constant 0 : index
    %c0_22 = arith.constant 0 : index
    %c0_23 = arith.constant 0 : index
    %c0_24 = arith.constant 0 : index
    %c0_25 = arith.constant 0 : index
    %29 = vector.load %arg5[%c0_21, %c0_22, %c0_23, %c0_24, %c0_25] : memref<1x8x2x16x256xf32, #tpu.memory_space<vmem>>, vector<1x8x1x16x128xf32>
    %30 = vector.shape_cast %29 : vector<1x8x1x16x128xf32> to vector<8x16x128xf32>
    %31 = vector.shape_cast %28 : vector<8x16x128xf32> to vector<1x8x1x16x128xf32>
    tpu.vector_store %arg5[%c0_21, %c0_22, %c0_23, %c0_24, %c0_25], %31 {strides = array<i32>} : memref<1x8x2x16x256xf32, #tpu.memory_space<vmem>>, vector<1x8x1x16x128xf32>,
    %32 = vector.extract_strided_slice %24 {offsets = [0, 0, 128], sizes = [8, 16, 128], strides = [1, 1, 1]} : vector<8x16x256xf32> to vector<8x16x128xf32>
    %33 = vector.broadcast %3 : vector<1x1x128xf32> to vector<8x16x128xf32>
    %34 = arith.addf %32, %33 : vector<8x16x128xf32>
    %c0_26 = arith.constant 0 : index
    %c0_27 = arith.constant 0 : index
    %c0_28 = arith.constant 0 : index
    %c0_29 = arith.constant 0 : index
    %c128_30 = arith.constant 128 : index
    %35 = vector.load %arg5[%c0_26, %c0_27, %c0_28, %c0_29, %c128_30] : memref<1x8x2x16x256xf32, #tpu.memory_space<vmem>>, vector<1x8x1x16x128xf32>
    %36 = vector.shape_cast %35 : vector<1x8x1x16x128xf32> to vector<8x16x128xf32>
    %37 = vector.shape_cast %34 : vector<8x16x128xf32> to vector<1x8x1x16x128xf32>
    tpu.vector_store %arg5[%c0_26, %c0_27, %c0_28, %c0_29, %c128_30], %37 {strides = array<i32>} : memref<1x8x2x16x256xf32, #tpu.memory_space<vmem>>, vector<1x8x1x16x128xf32>,
    %c0_i32_31 = arith.constant 0 : i32
    %38 = arith.addi %1, %c0_i32_31 : i32
    %c0_32 = arith.constant 0 : index
    %39 = arith.index_cast %38 : i32 to index
    %c2 = arith.constant 2 : index
    %c0_33 = arith.constant 0 : index
    %40 = vector.load %arg2[%c0_32, %39, %c2, %c0_33] : memref<1x18x24x128xbf16, #tpu.memory_space<vmem>>, vector<1x8x16x128xbf16>
    %41 = vector.shape_cast %40 : vector<1x8x16x128xbf16> to vector<8x16x128xbf16>
    %42 = vector.shape_cast %41 : vector<8x16x128xbf16> to vector<128x128xbf16>
    %c0_34 = arith.constant 0 : index
    %c384 = arith.constant 384 : index
    %43 = vector.load %arg3[%c0_34, %c384] : memref<128x2048xbf16, #tpu.memory_space<vmem>>, vector<128x128xbf16>
    %cst_35 = arith.constant dense<0.000000e+00> : vector<128x128xf32>
    %44 = tpu.matmul %42, %43, %cst_35 {dimension_numbers = #tpu.dot_dimension_numbers<[1], [0], [0], [1], [0, 0, 1, 1], [], []>} : vector<128x128xbf16>, vector<128x128xbf16>, vector<128x128xf32> -> vector<128x128xf32>
    %45 = vector.shape_cast %44 : vector<128x128xf32> to vector<8x16x128xf32>
    %c0_36 = arith.constant 0 : index
    %c0_37 = arith.constant 0 : index
    %c0_38 = arith.constant 0 : index
    %c0_39 = arith.constant 0 : index
    %c128_40 = arith.constant 128 : index
    %46 = vector.load %arg5[%c0_36, %c0_37, %c0_38, %c0_39, %c128_40] : memref<1x8x2x16x256xf32, #tpu.memory_space<vmem>>, vector<1x8x1x16x128xf32>
    %47 = vector.shape_cast %46 : vector<1x8x1x16x128xf32> to vector<8x16x128xf32>
    %48 = arith.addf %47, %45 : vector<8x16x128xf32>
    %c0_41 = arith.constant 0 : index
    %c0_42 = arith.constant 0 : index
    %c0_43 = arith.constant 0 : index
    %c0_44 = arith.constant 0 : index
    %c128_45 = arith.constant 128 : index
    %49 = vector.load %arg5[%c0_41, %c0_42, %c0_43, %c0_44, %c128_45] : memref<1x8x2x16x256xf32, #tpu.memory_space<vmem>>, vector<1x8x1x16x128xf32>
    %50 = vector.shape_cast %49 : vector<1x8x1x16x128xf32> to vector<8x16x128xf32>
    %51 = vector.shape_cast %48 : vector<8x16x128xf32> to vector<1x8x1x16x128xf32>
    tpu.vector_store %arg5[%c0_41, %c0_42, %c0_43, %c0_44, %c128_45], %51 {strides = array<i32>} : memref<1x8x2x16x256xf32, #tpu.memory_space<vmem>>, vector<1x8x1x16x128xf32>,
    %c1_i32 = arith.constant 1 : i32
    %52 = arith.addi %1, %c1_i32 : i32
    %c0_46 = arith.constant 0 : index
    %53 = arith.index_cast %52 : i32 to index
    %c0_47 = arith.constant 0 : index
    %c0_48 = arith.constant 0 : index
    %54 = vector.load %arg2[%c0_46, %53, %c0_47, %c0_48] : memref<1x18x24x128xbf16, #tpu.memory_space<vmem>>, vector<1x8x16x128xbf16>
    %55 = vector.shape_cast %54 : vector<1x8x16x128xbf16> to vector<8x16x128xbf16>
    %56 = vector.shape_cast %55 : vector<8x16x128xbf16> to vector<128x128xbf16>
    %c0_49 = arith.constant 0 : index
    %c512 = arith.constant 512 : index
    %57 = vector.load %arg3[%c0_49, %c512] : memref<128x2048xbf16, #tpu.memory_space<vmem>>, vector<128x256xbf16>
    %cst_50 = arith.constant dense<0.000000e+00> : vector<128x256xf32>
    %58 = tpu.matmul %56, %57, %cst_50 {dimension_numbers = #tpu.dot_dimension_numbers<[1], [0], [0], [1], [0, 0, 1, 1], [], []>} : vector<128x128xbf16>, vector<128x256xbf16>, vector<128x256xf32> -> vector<128x256xf32>
    %59 = vector.shape_cast %58 : vector<128x256xf32> to vector<8x16x256xf32>
    %60 = vector.extract_strided_slice %59 {offsets = [0, 0, 0], sizes = [8, 16, 128], strides = [1, 1, 1]} : vector<8x16x256xf32> to vector<8x16x128xf32>
    %c0_51 = arith.constant 0 : index
    %c0_52 = arith.constant 0 : index
    %c0_53 = arith.constant 0 : index
    %c0_54 = arith.constant 0 : index
    %c0_55 = arith.constant 0 : index
    %61 = vector.load %arg5[%c0_51, %c0_52, %c0_53, %c0_54, %c0_55] : memref<1x8x2x16x256xf32, #tpu.memory_space<vmem>>, vector<1x8x1x16x128xf32>
    %62 = vector.shape_cast %61 : vector<1x8x1x16x128xf32> to vector<8x16x128xf32>
    %63 = arith.addf %62, %60 : vector<8x16x128xf32>
    %c0_56 = arith.constant 0 : index
    %c0_57 = arith.constant 0 : index
    %c0_58 = arith.constant 0 : index
    %c0_59 = arith.constant 0 : index
    %c0_60 = arith.constant 0 : index
    %64 = vector.load %arg5[%c0_56, %c0_57, %c0_58, %c0_59, %c0_60] : memref<1x8x2x16x256xf32, #tpu.memory_space<vmem>>, vector<1x8x1x16x128xf32>
    %65 = vector.shape_cast %64 : vector<1x8x1x16x128xf32> to vector<8x16x128xf32>
    %66 = vector.shape_cast %63 : vector<8x16x128xf32> to vector<1x8x1x16x128xf32>
    tpu.vector_store %arg5[%c0_56, %c0_57, %c0_58, %c0_59, %c0_60], %66 {strides = array<i32>} : memref<1x8x2x16x256xf32, #tpu.memory_space<vmem>>, vector<1x8x1x16x128xf32>,
    %67 = vector.extract_strided_slice %59 {offsets = [0, 0, 128], sizes = [8, 16, 128], strides = [1, 1, 1]} : vector<8x16x256xf32> to vector<8x16x128xf32>
    %68 = vector.broadcast %3 : vector<1x1x128xf32> to vector<8x16x128xf32>
    %69 = arith.addf %67, %68 : vector<8x16x128xf32>
    %c0_61 = arith.constant 0 : index
    %c0_62 = arith.constant 0 : index
    %c1_63 = arith.constant 1 : index
    %c0_64 = arith.constant 0 : index
    %c0_65 = arith.constant 0 : index
    %70 = vector.load %arg5[%c0_61, %c0_62, %c1_63, %c0_64, %c0_65] : memref<1x8x2x16x256xf32, #tpu.memory_space<vmem>>, vector<1x8x1x16x128xf32>
    %71 = vector.shape_cast %70 : vector<1x8x1x16x128xf32> to vector<8x16x128xf32>
    %72 = vector.shape_cast %69 : vector<8x16x128xf32> to vector<1x8x1x16x128xf32>
    tpu.vector_store %arg5[%c0_61, %c0_62, %c1_63, %c0_64, %c0_65], %72 {strides = array<i32>} : memref<1x8x2x16x256xf32, #tpu.memory_space<vmem>>, vector<1x8x1x16x128xf32>,
    %c1_i32_66 = arith.constant 1 : i32
    %73 = arith.addi %1, %c1_i32_66 : i32
    %c0_67 = arith.constant 0 : index
    %74 = arith.index_cast %73 : i32 to index
    %c1_68 = arith.constant 1 : index
    %c0_69 = arith.constant 0 : index
    %75 = vector.load %arg2[%c0_67, %74, %c1_68, %c0_69] : memref<1x18x24x128xbf16, #tpu.memory_space<vmem>>, vector<1x8x16x128xbf16>
    %76 = vector.shape_cast %75 : vector<1x8x16x128xbf16> to vector<8x16x128xbf16>
    %77 = vector.shape_cast %76 : vector<8x16x128xbf16> to vector<128x128xbf16>
    %c0_70 = arith.constant 0 : index
    %c768 = arith.constant 768 : index
    %78 = vector.load %arg3[%c0_70, %c768] : memref<128x2048xbf16, #tpu.memory_space<vmem>>, vector<128x512xbf16>
    %cst_71 = arith.constant dense<0.000000e+00> : vector<128x512xf32>
    %79 = tpu.matmul %77, %78, %cst_71 {dimension_numbers = #tpu.dot_dimension_numbers<[1], [0], [0], [1], [0, 0, 1, 1], [], []>} : vector<128x128xbf16>, vector<128x512xbf16>, vector<128x512xf32> -> vector<128x512xf32>
    %80 = vector.shape_cast %79 : vector<128x512xf32> to vector<8x16x512xf32>
    %81 = vector.extract_strided_slice %80 {offsets = [0, 0, 0], sizes = [8, 16, 128], strides = [1, 1, 1]} : vector<8x16x512xf32> to vector<8x16x128xf32>
    %c0_72 = arith.constant 0 : index
    %c0_73 = arith.constant 0 : index
    %c0_74 = arith.constant 0 : index
    %c0_75 = arith.constant 0 : index
    %c0_76 = arith.constant 0 : index
    %82 = vector.load %arg5[%c0_72, %c0_73, %c0_74, %c0_75, %c0_76] : memref<1x8x2x16x256xf32, #tpu.memory_space<vmem>>, vector<1x8x1x16x128xf32>
    %83 = vector.shape_cast %82 : vector<1x8x1x16x128xf32> to vector<8x16x128xf32>
    %84 = arith.addf %83, %81 : vector<8x16x128xf32>
    %c0_77 = arith.constant 0 : index
    %c0_78 = arith.constant 0 : index
    %c0_79 = arith.constant 0 : index
    %c0_80 = arith.constant 0 : index
    %c0_81 = arith.constant 0 : index
    %85 = vector.load %arg5[%c0_77, %c0_78, %c0_79, %c0_80, %c0_81] : memref<1x8x2x16x256xf32, #tpu.memory_space<vmem>>, vector<1x8x1x16x128xf32>
    %86 = vector.shape_cast %85 : vector<1x8x1x16x128xf32> to vector<8x16x128xf32>
    %87 = vector.shape_cast %84 : vector<8x16x128xf32> to vector<1x8x1x16x128xf32>
    tpu.vector_store %arg5[%c0_77, %c0_78, %c0_79, %c0_80, %c0_81], %87 {strides = array<i32>} : memref<1x8x2x16x256xf32, #tpu.memory_space<vmem>>, vector<1x8x1x16x128xf32>,
    %88 = vector.extract_strided_slice %80 {offsets = [0, 0, 128], sizes = [8, 16, 128], strides = [1, 1, 1]} : vector<8x16x512xf32> to vector<8x16x128xf32>
    %c0_82 = arith.constant 0 : index
    %c0_83 = arith.constant 0 : index
    %c0_84 = arith.constant 0 : index
    %c0_85 = arith.constant 0 : index
    %c128_86 = arith.constant 128 : index
    %89 = vector.load %arg5[%c0_82, %c0_83, %c0_84, %c0_85, %c128_86] : memref<1x8x2x16x256xf32, #tpu.memory_space<vmem>>, vector<1x8x1x16x128xf32>
    %90 = vector.shape_cast %89 : vector<1x8x1x16x128xf32> to vector<8x16x128xf32>
    %91 = arith.addf %90, %88 : vector<8x16x128xf32>
    %c0_87 = arith.constant 0 : index
    %c0_88 = arith.constant 0 : index
    %c0_89 = arith.constant 0 : index
    %c0_90 = arith.constant 0 : index
    %c128_91 = arith.constant 128 : index
    %92 = vector.load %arg5[%c0_87, %c0_88, %c0_89, %c0_90, %c128_91] : memref<1x8x2x16x256xf32, #tpu.memory_space<vmem>>, vector<1x8x1x16x128xf32>
    %93 = vector.shape_cast %92 : vector<1x8x1x16x128xf32> to vector<8x16x128xf32>
    %94 = vector.shape_cast %91 : vector<8x16x128xf32> to vector<1x8x1x16x128xf32>
    tpu.vector_store %arg5[%c0_87, %c0_88, %c0_89, %c0_90, %c128_91], %94 {strides = array<i32>} : memref<1x8x2x16x256xf32, #tpu.memory_space<vmem>>, vector<1x8x1x16x128xf32>,
    %95 = vector.extract_strided_slice %80 {offsets = [0, 0, 256], sizes = [8, 16, 128], strides = [1, 1, 1]} : vector<8x16x512xf32> to vector<8x16x128xf32>
    %c0_92 = arith.constant 0 : index
    %c0_93 = arith.constant 0 : index
    %c1_94 = arith.constant 1 : index
    %c0_95 = arith.constant 0 : index
    %c0_96 = arith.constant 0 : index
    %96 = vector.load %arg5[%c0_92, %c0_93, %c1_94, %c0_95, %c0_96] : memref<1x8x2x16x256xf32, #tpu.memory_space<vmem>>, vector<1x8x1x16x128xf32>
    %97 = vector.shape_cast %96 : vector<1x8x1x16x128xf32> to vector<8x16x128xf32>
    %98 = arith.addf %97, %95 : vector<8x16x128xf32>
    %c0_97 = arith.constant 0 : index
    %c0_98 = arith.constant 0 : index
    %c1_99 = arith.constant 1 : index
    %c0_100 = arith.constant 0 : index
    %c0_101 = arith.constant 0 : index
    %99 = vector.load %arg5[%c0_97, %c0_98, %c1_99, %c0_100, %c0_101] : memref<1x8x2x16x256xf32, #tpu.memory_space<vmem>>, vector<1x8x1x16x128xf32>
    %100 = vector.shape_cast %99 : vector<1x8x1x16x128xf32> to vector<8x16x128xf32>
    %101 = vector.shape_cast %98 : vector<8x16x128xf32> to vector<1x8x1x16x128xf32>
    tpu.vector_store %arg5[%c0_97, %c0_98, %c1_99, %c0_100, %c0_101], %101 {strides = array<i32>} : memref<1x8x2x16x256xf32, #tpu.memory_space<vmem>>, vector<1x8x1x16x128xf32>,
    %102 = vector.extract_strided_slice %80 {offsets = [0, 0, 384], sizes = [8, 16, 128], strides = [1, 1, 1]} : vector<8x16x512xf32> to vector<8x16x128xf32>
    %103 = vector.broadcast %3 : vector<1x1x128xf32> to vector<8x16x128xf32>
    %104 = arith.addf %102, %103 : vector<8x16x128xf32>
    %c0_102 = arith.constant 0 : index
    %c0_103 = arith.constant 0 : index
    %c1_104 = arith.constant 1 : index
    %c0_105 = arith.constant 0 : index
    %c128_106 = arith.constant 128 : index
    %105 = vector.load %arg5[%c0_102, %c0_103, %c1_104, %c0_105, %c128_106] : memref<1x8x2x16x256xf32, #tpu.memory_space<vmem>>, vector<1x8x1x16x128xf32>
    %106 = vector.shape_cast %105 : vector<1x8x1x16x128xf32> to vector<8x16x128xf32>
    %107 = vector.shape_cast %104 : vector<8x16x128xf32> to vector<1x8x1x16x128xf32>
    tpu.vector_store %arg5[%c0_102, %c0_103, %c1_104, %c0_105, %c128_106], %107 {strides = array<i32>} : memref<1x8x2x16x256xf32, #tpu.memory_space<vmem>>, vector<1x8x1x16x128xf32>,
    %c1_i32_107 = arith.constant 1 : i32
    %108 = arith.addi %1, %c1_i32_107 : i32
    %c0_108 = arith.constant 0 : index
    %109 = arith.index_cast %108 : i32 to index
    %c2_109 = arith.constant 2 : index
    %c0_110 = arith.constant 0 : index
    %110 = vector.load %arg2[%c0_108, %109, %c2_109, %c0_110] : memref<1x18x24x128xbf16, #tpu.memory_space<vmem>>, vector<1x8x16x128xbf16>
    %111 = vector.shape_cast %110 : vector<1x8x16x128xbf16> to vector<8x16x128xbf16>
    %112 = vector.shape_cast %111 : vector<8x16x128xbf16> to vector<128x128xbf16>
    %c0_111 = arith.constant 0 : index
    %c1280 = arith.constant 1280 : index
    %113 = vector.load %arg3[%c0_111, %c1280] : memref<128x2048xbf16, #tpu.memory_space<vmem>>, vector<128x256xbf16>
    %cst_112 = arith.constant dense<0.000000e+00> : vector<128x256xf32>
    %114 = tpu.matmul %112, %113, %cst_112 {dimension_numbers = #tpu.dot_dimension_numbers<[1], [0], [0], [1], [0, 0, 1, 1], [], []>} : vector<128x128xbf16>, vector<128x256xbf16>, vector<128x256xf32> -> vector<128x256xf32>
    %115 = vector.shape_cast %114 : vector<128x256xf32> to vector<8x16x256xf32>
    %116 = vector.extract_strided_slice %115 {offsets = [0, 0, 0], sizes = [8, 16, 128], strides = [1, 1, 1]} : vector<8x16x256xf32> to vector<8x16x128xf32>
    %c0_113 = arith.constant 0 : index
    %c0_114 = arith.constant 0 : index
    %c0_115 = arith.constant 0 : index
    %c0_116 = arith.constant 0 : index
    %c128_117 = arith.constant 128 : index
    %117 = vector.load %arg5[%c0_113, %c0_114, %c0_115, %c0_116, %c128_117] : memref<1x8x2x16x256xf32, #tpu.memory_space<vmem>>, vector<1x8x1x16x128xf32>
    %118 = vector.shape_cast %117 : vector<1x8x1x16x128xf32> to vector<8x16x128xf32>
    %119 = arith.addf %118, %116 : vector<8x16x128xf32>
    %c0_118 = arith.constant 0 : index
    %c0_119 = arith.constant 0 : index
    %c0_120 = arith.constant 0 : index
    %c0_121 = arith.constant 0 : index
    %c128_122 = arith.constant 128 : index
    %120 = vector.load %arg5[%c0_118, %c0_119, %c0_120, %c0_121, %c128_122] : memref<1x8x2x16x256xf32, #tpu.memory_space<vmem>>, vector<1x8x1x16x128xf32>
    %121 = vector.shape_cast %120 : vector<1x8x1x16x128xf32> to vector<8x16x128xf32>
    %122 = vector.shape_cast %119 : vector<8x16x128xf32> to vector<1x8x1x16x128xf32>
    tpu.vector_store %arg5[%c0_118, %c0_119, %c0_120, %c0_121, %c128_122], %122 {strides = array<i32>} : memref<1x8x2x16x256xf32, #tpu.memory_space<vmem>>, vector<1x8x1x16x128xf32>,
    %123 = vector.extract_strided_slice %115 {offsets = [0, 0, 128], sizes = [8, 16, 128], strides = [1, 1, 1]} : vector<8x16x256xf32> to vector<8x16x128xf32>
    %c0_123 = arith.constant 0 : index
    %c0_124 = arith.constant 0 : index
    %c1_125 = arith.constant 1 : index
    %c0_126 = arith.constant 0 : index
    %c128_127 = arith.constant 128 : index
    %124 = vector.load %arg5[%c0_123, %c0_124, %c1_125, %c0_126, %c128_127] : memref<1x8x2x16x256xf32, #tpu.memory_space<vmem>>, vector<1x8x1x16x128xf32>
    %125 = vector.shape_cast %124 : vector<1x8x1x16x128xf32> to vector<8x16x128xf32>
    %126 = arith.addf %125, %123 : vector<8x16x128xf32>
    %c0_128 = arith.constant 0 : index
    %c0_129 = arith.constant 0 : index
    %c1_130 = arith.constant 1 : index
    %c0_131 = arith.constant 0 : index
    %c128_132 = arith.constant 128 : index
    %127 = vector.load %arg5[%c0_128, %c0_129, %c1_130, %c0_131, %c128_132] : memref<1x8x2x16x256xf32, #tpu.memory_space<vmem>>, vector<1x8x1x16x128xf32>
    %128 = vector.shape_cast %127 : vector<1x8x1x16x128xf32> to vector<8x16x128xf32>
    %129 = vector.shape_cast %126 : vector<8x16x128xf32> to vector<1x8x1x16x128xf32>
    tpu.vector_store %arg5[%c0_128, %c0_129, %c1_130, %c0_131, %c128_132], %129 {strides = array<i32>} : memref<1x8x2x16x256xf32, #tpu.memory_space<vmem>>, vector<1x8x1x16x128xf32>,
    %c2_i32 = arith.constant 2 : i32
    %130 = arith.addi %1, %c2_i32 : i32
    %c0_133 = arith.constant 0 : index
    %131 = arith.index_cast %130 : i32 to index
    %c0_134 = arith.constant 0 : index
    %c0_135 = arith.constant 0 : index
    %132 = vector.load %arg2[%c0_133, %131, %c0_134, %c0_135] : memref<1x18x24x128xbf16, #tpu.memory_space<vmem>>, vector<1x8x16x128xbf16>
    %133 = vector.shape_cast %132 : vector<1x8x16x128xbf16> to vector<8x16x128xbf16>
    %134 = vector.shape_cast %133 : vector<8x16x128xbf16> to vector<128x128xbf16>
    %c0_136 = arith.constant 0 : index
    %c1536 = arith.constant 1536 : index
    %135 = vector.load %arg3[%c0_136, %c1536] : memref<128x2048xbf16, #tpu.memory_space<vmem>>, vector<128x128xbf16>
    %cst_137 = arith.constant dense<0.000000e+00> : vector<128x128xf32>
    %136 = tpu.matmul %134, %135, %cst_137 {dimension_numbers = #tpu.dot_dimension_numbers<[1], [0], [0], [1], [0, 0, 1, 1], [], []>} : vector<128x128xbf16>, vector<128x128xbf16>, vector<128x128xf32> -> vector<128x128xf32>
    %137 = vector.shape_cast %136 : vector<128x128xf32> to vector<8x16x128xf32>
    %c0_138 = arith.constant 0 : index
    %c0_139 = arith.constant 0 : index
    %c1_140 = arith.constant 1 : index
    %c0_141 = arith.constant 0 : index
    %c0_142 = arith.constant 0 : index
    %138 = vector.load %arg5[%c0_138, %c0_139, %c1_140, %c0_141, %c0_142] : memref<1x8x2x16x256xf32, #tpu.memory_space<vmem>>, vector<1x8x1x16x128xf32>
    %139 = vector.shape_cast %138 : vector<1x8x1x16x128xf32> to vector<8x16x128xf32>
    %140 = arith.addf %139, %137 : vector<8x16x128xf32>
    %c0_143 = arith.constant 0 : index
    %c0_144 = arith.constant 0 : index
    %c1_145 = arith.constant 1 : index
    %c0_146 = arith.constant 0 : index
    %c0_147 = arith.constant 0 : index
    %141 = vector.load %arg5[%c0_143, %c0_144, %c1_145, %c0_146, %c0_147] : memref<1x8x2x16x256xf32, #tpu.memory_space<vmem>>, vector<1x8x1x16x128xf32>
    %142 = vector.shape_cast %141 : vector<1x8x1x16x128xf32> to vector<8x16x128xf32>
    %143 = vector.shape_cast %140 : vector<8x16x128xf32> to vector<1x8x1x16x128xf32>
    tpu.vector_store %arg5[%c0_143, %c0_144, %c1_145, %c0_146, %c0_147], %143 {strides = array<i32>} : memref<1x8x2x16x256xf32, #tpu.memory_space<vmem>>, vector<1x8x1x16x128xf32>,
    %c2_i32_148 = arith.constant 2 : i32
    %144 = arith.addi %1, %c2_i32_148 : i32
    %c0_149 = arith.constant 0 : index
    %145 = arith.index_cast %144 : i32 to index
    %c1_150 = arith.constant 1 : index
    %c0_151 = arith.constant 0 : index
    %146 = vector.load %arg2[%c0_149, %145, %c1_150, %c0_151] : memref<1x18x24x128xbf16, #tpu.memory_space<vmem>>, vector<1x8x16x128xbf16>
    %147 = vector.shape_cast %146 : vector<1x8x16x128xbf16> to vector<8x16x128xbf16>
    %148 = vector.shape_cast %147 : vector<8x16x128xbf16> to vector<128x128xbf16>
    %c0_152 = arith.constant 0 : index
    %c1664 = arith.constant 1664 : index
    %149 = vector.load %arg3[%c0_152, %c1664] : memref<128x2048xbf16, #tpu.memory_space<vmem>>, vector<128x256xbf16>
    %cst_153 = arith.constant dense<0.000000e+00> : vector<128x256xf32>
    %150 = tpu.matmul %148, %149, %cst_153 {dimension_numbers = #tpu.dot_dimension_numbers<[1], [0], [0], [1], [0, 0, 1, 1], [], []>} : vector<128x128xbf16>, vector<128x256xbf16>, vector<128x256xf32> -> vector<128x256xf32>
    %151 = vector.shape_cast %150 : vector<128x256xf32> to vector<8x16x256xf32>
    %152 = vector.extract_strided_slice %151 {offsets = [0, 0, 0], sizes = [8, 16, 128], strides = [1, 1, 1]} : vector<8x16x256xf32> to vector<8x16x128xf32>
    %c0_154 = arith.constant 0 : index
    %c0_155 = arith.constant 0 : index
    %c1_156 = arith.constant 1 : index
    %c0_157 = arith.constant 0 : index
    %c0_158 = arith.constant 0 : index
    %153 = vector.load %arg5[%c0_154, %c0_155, %c1_156, %c0_157, %c0_158] : memref<1x8x2x16x256xf32, #tpu.memory_space<vmem>>, vector<1x8x1x16x128xf32>
    %154 = vector.shape_cast %153 : vector<1x8x1x16x128xf32> to vector<8x16x128xf32>
    %155 = arith.addf %154, %152 : vector<8x16x128xf32>
    %c0_159 = arith.constant 0 : index
    %c0_160 = arith.constant 0 : index
    %c1_161 = arith.constant 1 : index
    %c0_162 = arith.constant 0 : index
    %c0_163 = arith.constant 0 : index
    %156 = vector.load %arg5[%c0_159, %c0_160, %c1_161, %c0_162, %c0_163] : memref<1x8x2x16x256xf32, #tpu.memory_space<vmem>>, vector<1x8x1x16x128xf32>
    %157 = vector.shape_cast %156 : vector<1x8x1x16x128xf32> to vector<8x16x128xf32>
    %158 = vector.shape_cast %155 : vector<8x16x128xf32> to vector<1x8x1x16x128xf32>
    tpu.vector_store %arg5[%c0_159, %c0_160, %c1_161, %c0_162, %c0_163], %158 {strides = array<i32>} : memref<1x8x2x16x256xf32, #tpu.memory_space<vmem>>, vector<1x8x1x16x128xf32>,
    %159 = vector.extract_strided_slice %151 {offsets = [0, 0, 128], sizes = [8, 16, 128], strides = [1, 1, 1]} : vector<8x16x256xf32> to vector<8x16x128xf32>
    %c0_164 = arith.constant 0 : index
    %c0_165 = arith.constant 0 : index
    %c1_166 = arith.constant 1 : index
    %c0_167 = arith.constant 0 : index
    %c128_168 = arith.constant 128 : index
    %160 = vector.load %arg5[%c0_164, %c0_165, %c1_166, %c0_167, %c128_168] : memref<1x8x2x16x256xf32, #tpu.memory_space<vmem>>, vector<1x8x1x16x128xf32>
    %161 = vector.shape_cast %160 : vector<1x8x1x16x128xf32> to vector<8x16x128xf32>
    %162 = arith.addf %161, %159 : vector<8x16x128xf32>
    %c0_169 = arith.constant 0 : index
    %c0_170 = arith.constant 0 : index
    %c1_171 = arith.constant 1 : index
    %c0_172 = arith.constant 0 : index
    %c128_173 = arith.constant 128 : index
    %163 = vector.load %arg5[%c0_169, %c0_170, %c1_171, %c0_172, %c128_173] : memref<1x8x2x16x256xf32, #tpu.memory_space<vmem>>, vector<1x8x1x16x128xf32>
    %164 = vector.shape_cast %163 : vector<1x8x1x16x128xf32> to vector<8x16x128xf32>
    %165 = vector.shape_cast %162 : vector<8x16x128xf32> to vector<1x8x1x16x128xf32>
    tpu.vector_store %arg5[%c0_169, %c0_170, %c1_171, %c0_172, %c128_173], %165 {strides = array<i32>} : memref<1x8x2x16x256xf32, #tpu.memory_space<vmem>>, vector<1x8x1x16x128xf32>,
    %c2_i32_174 = arith.constant 2 : i32
    %166 = arith.addi %1, %c2_i32_174 : i32
    %c0_175 = arith.constant 0 : index
    %167 = arith.index_cast %166 : i32 to index
    %c2_176 = arith.constant 2 : index
    %c0_177 = arith.constant 0 : index
    %168 = vector.load %arg2[%c0_175, %167, %c2_176, %c0_177] : memref<1x18x24x128xbf16, #tpu.memory_space<vmem>>, vector<1x8x16x128xbf16>
    %169 = vector.shape_cast %168 : vector<1x8x16x128xbf16> to vector<8x16x128xbf16>
    %170 = vector.shape_cast %169 : vector<8x16x128xbf16> to vector<128x128xbf16>
    %c0_178 = arith.constant 0 : index
    %c1920 = arith.constant 1920 : index
    %171 = vector.load %arg3[%c0_178, %c1920] : memref<128x2048xbf16, #tpu.memory_space<vmem>>, vector<128x128xbf16>
    %cst_179 = arith.constant dense<0.000000e+00> : vector<128x128xf32>
    %172 = tpu.matmul %170, %171, %cst_179 {dimension_numbers = #tpu.dot_dimension_numbers<[1], [0], [0], [1], [0, 0, 1, 1], [], []>} : vector<128x128xbf16>, vector<128x128xbf16>, vector<128x128xf32> -> vector<128x128xf32>
    %173 = vector.shape_cast %172 : vector<128x128xf32> to vector<8x16x128xf32>
    %c0_180 = arith.constant 0 : index
    %c0_181 = arith.constant 0 : index
    %c1_182 = arith.constant 1 : index
    %c0_183 = arith.constant 0 : index
    %c128_184 = arith.constant 128 : index
    %174 = vector.load %arg5[%c0_180, %c0_181, %c1_182, %c0_183, %c128_184] : memref<1x8x2x16x256xf32, #tpu.memory_space<vmem>>, vector<1x8x1x16x128xf32>
    %175 = vector.shape_cast %174 : vector<1x8x1x16x128xf32> to vector<8x16x128xf32>
    %176 = arith.addf %175, %173 : vector<8x16x128xf32>
    %c0_185 = arith.constant 0 : index
    %c0_186 = arith.constant 0 : index
    %c1_187 = arith.constant 1 : index
    %c0_188 = arith.constant 0 : index
    %c128_189 = arith.constant 128 : index
    %177 = vector.load %arg5[%c0_185, %c0_186, %c1_187, %c0_188, %c128_189] : memref<1x8x2x16x256xf32, #tpu.memory_space<vmem>>, vector<1x8x1x16x128xf32>
    %178 = vector.shape_cast %177 : vector<1x8x1x16x128xf32> to vector<8x16x128xf32>
    %179 = vector.shape_cast %176 : vector<8x16x128xf32> to vector<1x8x1x16x128xf32>
    tpu.vector_store %arg5[%c0_185, %c0_186, %c1_187, %c0_188, %c128_189], %179 {strides = array<i32>} : memref<1x8x2x16x256xf32, #tpu.memory_space<vmem>>, vector<1x8x1x16x128xf32>,
    return
  }
  func.func @transform_0(%arg0: i32, %arg1: i32) -> (i32, i32, i32, i32) {
    %c0_i32 = arith.constant 0 : i32
    %c0_i32_0 = arith.constant 0 : i32
    %c0_i32_1 = arith.constant 0 : i32
    %c0_i32_2 = arith.constant 0 : i32
    return %arg0, %c0_i32, %c0_i32_0, %c0_i32_1 : i32, i32, i32, i32
  }
  func.func @transform_1(%arg0: i32, %arg1: i32) -> (i32, i32) {
    %c0_i32 = arith.constant 0 : i32
    %c0_i32_0 = arith.constant 0 : i32
    %c0_i32_1 = arith.constant 0 : i32
    return %c0_i32, %c0_i32_0 : i32, i32
  }
  func.func @transform_2(%arg0: i32, %arg1: i32) -> (i32, i32) {
    %c0_i32 = arith.constant 0 : i32
    %c0_i32_0 = arith.constant 0 : i32
    %c0_i32_1 = arith.constant 0 : i32
    return %c0_i32, %c0_i32_0 : i32, i32
  }
  func.func @transform_3(%arg0: i32, %arg1: i32) -> (i32, i32, i32, i32, i32) {
    %c0_i32 = arith.constant 0 : i32
    %c0_i32_0 = arith.constant 0 : i32
    %c0_i32_1 = arith.constant 0 : i32
    %c0_i32_2 = arith.constant 0 : i32
    return %arg0, %arg1, %c0_i32, %c0_i32_0, %c0_i32_1 : i32, i32, i32, i32, i32
  }
}

module attributes {stable_mosaic.version = 11 : i64} {
  func.func @_upsample_conv_kernel(%arg0: i32, %arg1: i32, %arg2: memref<1x18x24x128xbf16, #tpu.memory_space<vmem>>, %arg3: memref<128x2048xbf16, #tpu.memory_space<vmem>>, %arg4: memref<1x128xf32, #tpu.memory_space<vmem>>, %arg5: memref<1x8x2x16x256xf32, #tpu.memory_space<vmem>>) attributes {dimension_semantics = [#tpu.dimension_semantics<parallel>, #tpu.dimension_semantics<parallel>], iteration_bounds = array<i64: 2, 2>, scalar_prefetch = 0 : i64, scratch_operands = 0 : i64, tpu.core_type = #tpu.core_type<tc>, window_params = [{transform_indices = @transform_0, window_bounds = array<i64: 1, 18, 24, 128>}, {pipeline_mode = #tpu.pipeline_mode<synchronous>, transform_indices = @transform_1, window_bounds = array<i64: 128, 2048>}, {pipeline_mode = #tpu.pipeline_mode<synchronous>, transform_indices = @transform_2, window_bounds = array<i64: 1, 128>}, {transform_indices = @transform_3, window_bounds = array<i64: 1, 8, 2, 16, 256>}]} {
    %c8_i32 = arith.constant 8 : i32
    %0 = arith.muli %arg1, %c8_i32 : i32
    %1 = tpu.assume_multiple %0, 8 : i32
    %c0 = arith.constant 0 : index
    %c0_0 = arith.constant 0 : index
    %2 = vector.load %arg4[%c0, %c0_0] : memref<1x128xf32, #tpu.memory_space<vmem>>, vector<1x128xf32>
    %3 = vector.shape_cast %2 : vector<1x128xf32> to vector<1x1x128xf32>
    %c0_i32 = arith.constant 0 : i32
    %4 = arith.addi %1, %c0_i32 : i32
    %c0_1 = arith.constant 0 : index
    %5 = arith.index_cast %4 : i32 to index
    %c0_2 = arith.constant 0 : index
    %c0_3 = arith.constant 0 : index
    %6 = vector.load %arg2[%c0_1, %5, %c0_2, %c0_3] : memref<1x18x24x128xbf16, #tpu.memory_space<vmem>>, vector<1x8x16x128xbf16>
    %7 = vector.shape_cast %6 : vector<1x8x16x128xbf16> to vector<8x16x128xbf16>
    %8 = vector.shape_cast %7 : vector<8x16x128xbf16> to vector<128x128xbf16>
    %c0_4 = arith.constant 0 : index
    %c0_5 = arith.constant 0 : index
    %9 = vector.load %arg3[%c0_4, %c0_5] : memref<128x2048xbf16, #tpu.memory_space<vmem>>, vector<128x128xbf16>
    %cst = arith.constant dense<0.000000e+00> : vector<128x128xf32>
    %10 = tpu.matmul %8, %9, %cst {dimension_numbers = #tpu.dot_dimension_numbers<[1], [0], [0], [1], [0, 0, 1, 1], [], []>} : vector<128x128xbf16>, vector<128x128xbf16>, vector<128x128xf32> -> vector<128x128xf32>
    %11 = vector.shape_cast %10 : vector<128x128xf32> to vector<8x16x128xf32>
    %12 = vector.broadcast %3 : vector<1x1x128xf32> to vector<8x16x128xf32>
    %13 = arith.addf %11, %12 : vector<8x16x128xf32>
    %c0_6 = arith.constant 0 : index
    %c0_7 = arith.constant 0 : index
    %c0_8 = arith.constant 0 : index
    %c0_9 = arith.constant 0 : index
    %c0_10 = arith.constant 0 : index
    %14 = vector.load %arg5[%c0_6, %c0_7, %c0_8, %c0_9, %c0_10] : memref<1x8x2x16x256xf32, #tpu.memory_space<vmem>>, vector<1x8x1x16x128xf32>
    %15 = vector.shape_cast %14 : vector<1x8x1x16x128xf32> to vector<8x16x128xf32>
    %16 = vector.shape_cast %13 : vector<8x16x128xf32> to vector<1x8x1x16x128xf32>
    tpu.vector_store %arg5[%c0_6, %c0_7, %c0_8, %c0_9, %c0_10], %16 {strides = array<i32>} : memref<1x8x2x16x256xf32, #tpu.memory_space<vmem>>, vector<1x8x1x16x128xf32>,
    %c0_i32_11 = arith.constant 0 : i32
    %17 = arith.addi %1, %c0_i32_11 : i32
    %c0_12 = arith.constant 0 : index
    %18 = arith.index_cast %17 : i32 to index
    %c1 = arith.constant 1 : index
    %c0_13 = arith.constant 0 : index
    %19 = vector.load %arg2[%c0_12, %18, %c1, %c0_13] : memref<1x18x24x128xbf16, #tpu.memory_space<vmem>>, vector<1x8x16x128xbf16>
    %20 = vector.shape_cast %19 : vector<1x8x16x128xbf16> to vector<8x16x128xbf16>
    %21 = vector.shape_cast %20 : vector<8x16x128xbf16> to vector<128x128xbf16>
    %c0_14 = arith.constant 0 : index
    %c128 = arith.constant 128 : index
    %22 = vector.load %arg3[%c0_14, %c128] : memref<128x2048xbf16, #tpu.memory_space<vmem>>, vector<128x256xbf16>
    %cst_15 = arith.constant dense<0.000000e+00> : vector<128x256xf32>
    %23 = tpu.matmul %21, %22, %cst_15 {dimension_numbers = #tpu.dot_dimension_numbers<[1], [0], [0], [1], [0, 0, 1, 1], [], []>} : vector<128x128xbf16>, vector<128x256xbf16>, vector<128x256xf32> -> vector<128x256xf32>
    %24 = vector.shape_cast %23 : vector<128x256xf32> to vector<8x16x256xf32>
    %25 = vector.extract_strided_slice %24 {offsets = [0, 0, 0], sizes = [8, 16, 128], strides = [1, 1, 1]} : vector<8x16x256xf32> to vector<8x16x128xf32>
    %c0_16 = arith.constant 0 : index
    %c0_17 = arith.constant 0 : index
    %c0_18 = arith.constant 0 : index
    %c0_19 = arith.constant 0 : index
    %c0_20 = arith.constant 0 : index
    %26 = vector.load %arg5[%c0_16, %c0_17, %c0_18, %c0_19, %c0_20] : memref<1x8x2x16x256xf32, #tpu.memory_space<vmem>>, vector<1x8x1x16x128xf32>
    %27 = vector.shape_cast %26 : vector<1x8x1x16x128xf32> to vector<8x16x128xf32>
    %28 = arith.addf %27, %25 : vector<8x16x128xf32>
    %c0_21 = arith.constant 0 : index
    %c0_22 = arith.constant 0 : index
    %c0_23 = arith.constant 0 : index
    %c0_24 = arith.constant 0 : index
    %c0_25 = arith.constant 0 : index
    %29 = vector.load %arg5[%c0_21, %c0_22, %c0_23, %c0_24, %c0_25] : memref<1x8x2x16x256xf32, #tpu.memory_space<vmem>>, vector<1x8x1x16x128xf32>
    %30 = vector.shape_cast %29 : vector<1x8x1x16x128xf32> to vector<8x16x128xf32>
    %31 = vector.shape_cast %28 : vector<8x16x128xf32> to vector<1x8x1x16x128xf32>
    tpu.vector_store %arg5[%c0_21, %c0_22, %c0_23, %c0_24, %c0_25], %31 {strides = array<i32>} : memref<1x8x2x16x256xf32, #tpu.memory_space<vmem>>, vector<1x8x1x16x128xf32>,
    %32 = vector.extract_strided_slice %24 {offsets = [0, 0, 128], sizes = [8, 16, 128], strides = [1, 1, 1]} : vector<8x16x256xf32> to vector<8x16x128xf32>
    %33 = vector.broadcast %3 : vector<1x1x128xf32> to vector<8x16x128xf32>
    %34 = arith.addf %32, %33 : vector<8x16x128xf32>
    %c0_26 = arith.constant 0 : index
    %c0_27 = arith.constant 0 : index
    %c0_28 = arith.constant 0 : index
    %c0_29 = arith.constant 0 : index
    %c128_30 = arith.constant 128 : index
    %35 = vector.load %arg5[%c0_26, %c0_27, %c0_28, %c0_29, %c128_30] : memref<1x8x2x16x256xf32, #tpu.memory_space<vmem>>, vector<1x8x1x16x128xf32>
    %36 = vector.shape_cast %35 : vector<1x8x1x16x128xf32> to vector<8x16x128xf32>
    %37 = vector.shape_cast %34 : vector<8x16x128xf32> to vector<1x8x1x16x128xf32>
    tpu.vector_store %arg5[%c0_26, %c0_27, %c0_28, %c0_29, %c128_30], %37 {strides = array<i32>} : memref<1x8x2x16x256xf32, #tpu.memory_space<vmem>>, vector<1x8x1x16x128xf32>,
    %c0_i32_31 = arith.constant 0 : i32
    %38 = arith.addi %1, %c0_i32_31 : i32
    %c0_32 = arith.constant 0 : index
    %39 = arith.index_cast %38 : i32 to index
    %c2 = arith.constant 2 : index
    %c0_33 = arith.constant 0 : index
    %40 = vector.load %arg2[%c0_32, %39, %c2, %c0_33] : memref<1x18x24x128xbf16, #tpu.memory_space<vmem>>, vector<1x8x16x128xbf16>
    %41 = vector.shape_cast %40 : vector<1x8x16x128xbf16> to vector<8x16x128xbf16>
    %42 = vector.shape_cast %41 : vector<8x16x128xbf16> to vector<128x128xbf16>
    %c0_34 = arith.constant 0 : index
    %c384 = arith.constant 384 : index
    %43 = vector.load %arg3[%c0_34, %c384] : memref<128x2048xbf16, #tpu.memory_space<vmem>>, vector<128x128xbf16>
    %cst_35 = arith.constant dense<0.000000e+00> : vector<128x128xf32>
    %44 = tpu.matmul %42, %43, %cst_35 {dimension_numbers = #tpu.dot_dimension_numbers<[1], [0], [0], [1], [0, 0, 1, 1], [], []>} : vector<128x128xbf16>, vector<128x128xbf16>, vector<128x128xf32> -> vector<128x128xf32>
    %45 = vector.shape_cast %44 : vector<128x128xf32> to vector<8x16x128xf32>
    %c0_36 = arith.constant 0 : index
    %c0_37 = arith.constant 0 : index
    %c0_38 = arith.constant 0 : index
    %c0_39 = arith.constant 0 : index
    %c128_40 = arith.constant 128 : index
    %46 = vector.load %arg5[%c0_36, %c0_37, %c0_38, %c0_39, %c128_40] : memref<1x8x2x16x256xf32, #tpu.memory_space<vmem>>, vector<1x8x1x16x128xf32>
    %47 = vector.shape_cast %46 : vector<1x8x1x16x128xf32> to vector<8x16x128xf32>
    %48 = arith.addf %47, %45 : vector<8x16x128xf32>
    %c0_41 = arith.constant 0 : index
    %c0_42 = arith.constant 0 : index
    %c0_43 = arith.constant 0 : index
    %c0_44 = arith.constant 0 : index
    %c128_45 = arith.constant 128 : index
    %49 = vector.load %arg5[%c0_41, %c0_42, %c0_43, %c0_44, %c128_45] : memref<1x8x2x16x256xf32, #tpu.memory_space<vmem>>, vector<1x8x1x16x128xf32>
    %50 = vector.shape_cast %49 : vector<1x8x1x16x128xf32> to vector<8x16x128xf32>
    %51 = vector.shape_cast %48 : vector<8x16x128xf32> to vector<1x8x1x16x128xf32>
    tpu.vector_store %arg5[%c0_41, %c0_42, %c0_43, %c0_44, %c128_45], %51 {strides = array<i32>} : memref<1x8x2x16x256xf32, #tpu.memory_space<vmem>>, vector<1x8x1x16x128xf32>,
    %c1_i32 = arith.constant 1 : i32
    %52 = arith.addi %1, %c1_i32 : i32
    %c0_46 = arith.constant 0 : index
    %53 = arith.index_cast %52 : i32 to index
    %c0_47 = arith.constant 0 : index
    %c0_48 = arith.constant 0 : index
    %54 = vector.load %arg2[%c0_46, %53, %c0_47, %c0_48] : memref<1x18x24x128xbf16, #tpu.memory_space<vmem>>, vector<1x8x16x128xbf16>
    %55 = vector.shape_cast %54 : vector<1x8x16x128xbf16> to vector<8x16x128xbf16>
    %56 = vector.shape_cast %55 : vector<8x16x128xbf16> to vector<128x128xbf16>
    %c0_49 = arith.constant 0 : index
    %c512 = arith.constant 512 : index
    %57 = vector.load %arg3[%c0_49, %c512] : memref<128x2048xbf16, #tpu.memory_space<vmem>>, vector<128x256xbf16>
    %cst_50 = arith.constant dense<0.000000e+00> : vector<128x256xf32>
    %58 = tpu.matmul %56, %57, %cst_50 {dimension_numbers = #tpu.dot_dimension_numbers<[1], [0], [0], [1], [0, 0, 1, 1], [], []>} : vector<128x128xbf16>, vector<128x256xbf16>, vector<128x256xf32> -> vector<128x256xf32>
    %59 = vector.shape_cast %58 : vector<128x256xf32> to vector<8x16x256xf32>
    %60 = vector.extract_strided_slice %59 {offsets = [0, 0, 0], sizes = [8, 16, 128], strides = [1, 1, 1]} : vector<8x16x256xf32> to vector<8x16x128xf32>
    %c0_51 = arith.constant 0 : index
    %c0_52 = arith.constant 0 : index
    %c0_53 = arith.constant 0 : index
    %c0_54 = arith.constant 0 : index
    %c0_55 = arith.constant 0 : index
    %61 = vector.load %arg5[%c0_51, %c0_52, %c0_53, %c0_54, %c0_55] : memref<1x8x2x16x256xf32, #tpu.memory_space<vmem>>, vector<1x8x1x16x128xf32>
    %62 = vector.shape_cast %61 : vector<1x8x1x16x128xf32> to vector<8x16x128xf32>
    %63 = arith.addf %62, %60 : vector<8x16x128xf32>
    %c0_56 = arith.constant 0 : index
    %c0_57 = arith.constant 0 : index
    %c0_58 = arith.constant 0 : index
    %c0_59 = arith.constant 0 : index
    %c0_60 = arith.constant 0 : index
    %64 = vector.load %arg5[%c0_56, %c0_57, %c0_58, %c0_59, %c0_60] : memref<1x8x2x16x256xf32, #tpu.memory_space<vmem>>, vector<1x8x1x16x128xf32>
    %65 = vector.shape_cast %64 : vector<1x8x1x16x128xf32> to vector<8x16x128xf32>
    %66 = vector.shape_cast %63 : vector<8x16x128xf32> to vector<1x8x1x16x128xf32>
    tpu.vector_store %arg5[%c0_56, %c0_57, %c0_58, %c0_59, %c0_60], %66 {strides = array<i32>} : memref<1x8x2x16x256xf32, #tpu.memory_space<vmem>>, vector<1x8x1x16x128xf32>,
    %67 = vector.extract_strided_slice %59 {offsets = [0, 0, 128], sizes = [8, 16, 128], strides = [1, 1, 1]} : vector<8x16x256xf32> to vector<8x16x128xf32>
    %68 = vector.broadcast %3 : vector<1x1x128xf32> to vector<8x16x128xf32>
    %69 = arith.addf %67, %68 : vector<8x16x128xf32>
    %c0_61 = arith.constant 0 : index
    %c0_62 = arith.constant 0 : index
    %c1_63 = arith.constant 1 : index
    %c0_64 = arith.constant 0 : index
    %c0_65 = arith.constant 0 : index
    %70 = vector.load %arg5[%c0_61, %c0_62, %c1_63, %c0_64, %c0_65] : memref<1x8x2x16x256xf32, #tpu.memory_space<vmem>>, vector<1x8x1x16x128xf32>
    %71 = vector.shape_cast %70 : vector<1x8x1x16x128xf32> to vector<8x16x128xf32>
    %72 = vector.shape_cast %69 : vector<8x16x128xf32> to vector<1x8x1x16x128xf32>
    tpu.vector_store %arg5[%c0_61, %c0_62, %c1_63, %c0_64, %c0_65], %72 {strides = array<i32>} : memref<1x8x2x16x256xf32, #tpu.memory_space<vmem>>, vector<1x8x1x16x128xf32>,
    %c1_i32_66 = arith.constant 1 : i32
    %73 = arith.addi %1, %c1_i32_66 : i32
    %c0_67 = arith.constant 0 : index
    %74 = arith.index_cast %73 : i32 to index
    %c1_68 = arith.constant 1 : index
    %c0_69 = arith.constant 0 : index
    %75 = vector.load %arg2[%c0_67, %74, %c1_68, %c0_69] : memref<1x18x24x128xbf16, #tpu.memory_space<vmem>>, vector<1x8x16x128xbf16>
    %76 = vector.shape_cast %75 : vector<1x8x16x128xbf16> to vector<8x16x128xbf16>
    %77 = vector.shape_cast %76 : vector<8x16x128xbf16> to vector<128x128xbf16>
    %c0_70 = arith.constant 0 : index
    %c768 = arith.constant 768 : index
    %78 = vector.load %arg3[%c0_70, %c768] : memref<128x2048xbf16, #tpu.memory_space<vmem>>, vector<128x512xbf16>
    %cst_71 = arith.constant dense<0.000000e+00> : vector<128x512xf32>
    %79 = tpu.matmul %77, %78, %cst_71 {dimension_numbers = #tpu.dot_dimension_numbers<[1], [0], [0], [1], [0, 0, 1, 1], [], []>} : vector<128x128xbf16>, vector<128x512xbf16>, vector<128x512xf32> -> vector<128x512xf32>
    %80 = vector.shape_cast %79 : vector<128x512xf32> to vector<8x16x512xf32>
    %81 = vector.extract_strided_slice %80 {offsets = [0, 0, 0], sizes = [8, 16, 128], strides = [1, 1, 1]} : vector<8x16x512xf32> to vector<8x16x128xf32>
    %c0_72 = arith.constant 0 : index
    %c0_73 = arith.constant 0 : index
    %c0_74 = arith.constant 0 : index
    %c0_75 = arith.constant 0 : index
    %c0_76 = arith.constant 0 : index
    %82 = vector.load %arg5[%c0_72, %c0_73, %c0_74, %c0_75, %c0_76] : memref<1x8x2x16x256xf32, #tpu.memory_space<vmem>>, vector<1x8x1x16x128xf32>
    %83 = vector.shape_cast %82 : vector<1x8x1x16x128xf32> to vector<8x16x128xf32>
    %84 = arith.addf %83, %81 : vector<8x16x128xf32>
    %c0_77 = arith.constant 0 : index
    %c0_78 = arith.constant 0 : index
    %c0_79 = arith.constant 0 : index
    %c0_80 = arith.constant 0 : index
    %c0_81 = arith.constant 0 : index
    %85 = vector.load %arg5[%c0_77, %c0_78, %c0_79, %c0_80, %c0_81] : memref<1x8x2x16x256xf32, #tpu.memory_space<vmem>>, vector<1x8x1x16x128xf32>
    %86 = vector.shape_cast %85 : vector<1x8x1x16x128xf32> to vector<8x16x128xf32>
    %87 = vector.shape_cast %84 : vector<8x16x128xf32> to vector<1x8x1x16x128xf32>
    tpu.vector_store %arg5[%c0_77, %c0_78, %c0_79, %c0_80, %c0_81], %87 {strides = array<i32>} : memref<1x8x2x16x256xf32, #tpu.memory_space<vmem>>, vector<1x8x1x16x128xf32>,
    %88 = vector.extract_strided_slice %80 {offsets = [0, 0, 128], sizes = [8, 16, 128], strides = [1, 1, 1]} : vector<8x16x512xf32> to vector<8x16x128xf32>
    %c0_82 = arith.constant 0 : index
    %c0_83 = arith.constant 0 : index
    %c0_84 = arith.constant 0 : index
    %c0_85 = arith.constant 0 : index
    %c128_86 = arith.constant 128 : index
    %89 = vector.load %arg5[%c0_82, %c0_83, %c0_84, %c0_85, %c128_86] : memref<1x8x2x16x256xf32, #tpu.memory_space<vmem>>, vector<1x8x1x16x128xf32>
    %90 = vector.shape_cast %89 : vector<1x8x1x16x128xf32> to vector<8x16x128xf32>
    %91 = arith.addf %90, %88 : vector<8x16x128xf32>
    %c0_87 = arith.constant 0 : index
    %c0_88 = arith.constant 0 : index
    %c0_89 = arith.constant 0 : index
    %c0_90 = arith.constant 0 : index
    %c128_91 = arith.constant 128 : index
    %92 = vector.load %arg5[%c0_87, %c0_88, %c0_89, %c0_90, %c128_91] : memref<1x8x2x16x256xf32, #tpu.memory_space<vmem>>, vector<1x8x1x16x128xf32>
    %93 = vector.shape_cast %92 : vector<1x8x1x16x128xf32> to vector<8x16x128xf32>
    %94 = vector.shape_cast %91 : vector<8x16x128xf32> to vector<1x8x1x16x128xf32>
    tpu.vector_store %arg5[%c0_87, %c0_88, %c0_89, %c0_90, %c128_91], %94 {strides = array<i32>} : memref<1x8x2x16x256xf32, #tpu.memory_space<vmem>>, vector<1x8x1x16x128xf32>,
    %95 = vector.extract_strided_slice %80 {offsets = [0, 0, 256], sizes = [8, 16, 128], strides = [1, 1, 1]} : vector<8x16x512xf32> to vector<8x16x128xf32>
    %c0_92 = arith.constant 0 : index
    %c0_93 = arith.constant 0 : index
    %c1_94 = arith.constant 1 : index
    %c0_95 = arith.constant 0 : index
    %c0_96 = arith.constant 0 : index
    %96 = vector.load %arg5[%c0_92, %c0_93, %c1_94, %c0_95, %c0_96] : memref<1x8x2x16x256xf32, #tpu.memory_space<vmem>>, vector<1x8x1x16x128xf32>
    %97 = vector.shape_cast %96 : vector<1x8x1x16x128xf32> to vector<8x16x128xf32>
    %98 = arith.addf %97, %95 : vector<8x16x128xf32>
    %c0_97 = arith.constant 0 : index
    %c0_98 = arith.constant 0 : index
    %c1_99 = arith.constant 1 : index
    %c0_100 = arith.constant 0 : index
    %c0_101 = arith.constant 0 : index
    %99 = vector.load %arg5[%c0_97, %c0_98, %c1_99, %c0_100, %c0_101] : memref<1x8x2x16x256xf32, #tpu.memory_space<vmem>>, vector<1x8x1x16x128xf32>
    %100 = vector.shape_cast %99 : vector<1x8x1x16x128xf32> to vector<8x16x128xf32>
    %101 = vector.shape_cast %98 : vector<8x16x128xf32> to vector<1x8x1x16x128xf32>
    tpu.vector_store %arg5[%c0_97, %c0_98, %c1_99, %c0_100, %c0_101], %101 {strides = array<i32>} : memref<1x8x2x16x256xf32, #tpu.memory_space<vmem>>, vector<1x8x1x16x128xf32>,
    %102 = vector.extract_strided_slice %80 {offsets = [0, 0, 384], sizes = [8, 16, 128], strides = [1, 1, 1]} : vector<8x16x512xf32> to vector<8x16x128xf32>
    %103 = vector.broadcast %3 : vector<1x1x128xf32> to vector<8x16x128xf32>
    %104 = arith.addf %102, %103 : vector<8x16x128xf32>
    %c0_102 = arith.constant 0 : index
    %c0_103 = arith.constant 0 : index
    %c1_104 = arith.constant 1 : index
    %c0_105 = arith.constant 0 : index
    %c128_106 = arith.constant 128 : index
    %105 = vector.load %arg5[%c0_102, %c0_103, %c1_104, %c0_105, %c128_106] : memref<1x8x2x16x256xf32, #tpu.memory_space<vmem>>, vector<1x8x1x16x128xf32>
    %106 = vector.shape_cast %105 : vector<1x8x1x16x128xf32> to vector<8x16x128xf32>
    %107 = vector.shape_cast %104 : vector<8x16x128xf32> to vector<1x8x1x16x128xf32>
    tpu.vector_store %arg5[%c0_102, %c0_103, %c1_104, %c0_105, %c128_106], %107 {strides = array<i32>} : memref<1x8x2x16x256xf32, #tpu.memory_space<vmem>>, vector<1x8x1x16x128xf32>,
    %c1_i32_107 = arith.constant 1 : i32
    %108 = arith.addi %1, %c1_i32_107 : i32
    %c0_108 = arith.constant 0 : index
    %109 = arith.index_cast %108 : i32 to index
    %c2_109 = arith.constant 2 : index
    %c0_110 = arith.constant 0 : index
    %110 = vector.load %arg2[%c0_108, %109, %c2_109, %c0_110] : memref<1x18x24x128xbf16, #tpu.memory_space<vmem>>, vector<1x8x16x128xbf16>
    %111 = vector.shape_cast %110 : vector<1x8x16x128xbf16> to vector<8x16x128xbf16>
    %112 = vector.shape_cast %111 : vector<8x16x128xbf16> to vector<128x128xbf16>
    %c0_111 = arith.constant 0 : index
    %c1280 = arith.constant 1280 : index
    %113 = vector.load %arg3[%c0_111, %c1280] : memref<128x2048xbf16, #tpu.memory_space<vmem>>, vector<128x256xbf16>
    %cst_112 = arith.constant dense<0.000000e+00> : vector<128x256xf32>
    %114 = tpu.matmul %112, %113, %cst_112 {dimension_numbers = #tpu.dot_dimension_numbers<[1], [0], [0], [1], [0, 0, 1, 1], [], []>} : vector<128x128xbf16>, vector<128x256xbf16>, vector<128x256xf32> -> vector<128x256xf32>
    %115 = vector.shape_cast %114 : vector<128x256xf32> to vector<8x16x256xf32>
    %116 = vector.extract_strided_slice %115 {offsets = [0, 0, 0], sizes = [8, 16, 128], strides = [1, 1, 1]} : vector<8x16x256xf32> to vector<8x16x128xf32>
    %c0_113 = arith.constant 0 : index
    %c0_114 = arith.constant 0 : index
    %c0_115 = arith.constant 0 : index
    %c0_116 = arith.constant 0 : index
    %c128_117 = arith.constant 128 : index
    %117 = vector.load %arg5[%c0_113, %c0_114, %c0_115, %c0_116, %c128_117] : memref<1x8x2x16x256xf32, #tpu.memory_space<vmem>>, vector<1x8x1x16x128xf32>
    %118 = vector.shape_cast %117 : vector<1x8x1x16x128xf32> to vector<8x16x128xf32>
    %119 = arith.addf %118, %116 : vector<8x16x128xf32>
    %c0_118 = arith.constant 0 : index
    %c0_119 = arith.constant 0 : index
    %c0_120 = arith.constant 0 : index
    %c0_121 = arith.constant 0 : index
    %c128_122 = arith.constant 128 : index
    %120 = vector.load %arg5[%c0_118, %c0_119, %c0_120, %c0_121, %c128_122] : memref<1x8x2x16x256xf32, #tpu.memory_space<vmem>>, vector<1x8x1x16x128xf32>
    %121 = vector.shape_cast %120 : vector<1x8x1x16x128xf32> to vector<8x16x128xf32>
    %122 = vector.shape_cast %119 : vector<8x16x128xf32> to vector<1x8x1x16x128xf32>
    tpu.vector_store %arg5[%c0_118, %c0_119, %c0_120, %c0_121, %c128_122], %122 {strides = array<i32>} : memref<1x8x2x16x256xf32, #tpu.memory_space<vmem>>, vector<1x8x1x16x128xf32>,
    %123 = vector.extract_strided_slice %115 {offsets = [0, 0, 128], sizes = [8, 16, 128], strides = [1, 1, 1]} : vector<8x16x256xf32> to vector<8x16x128xf32>
    %c0_123 = arith.constant 0 : index
    %c0_124 = arith.constant 0 : index
    %c1_125 = arith.constant 1 : index
    %c0_126 = arith.constant 0 : index
    %c128_127 = arith.constant 128 : index
    %124 = vector.load %arg5[%c0_123, %c0_124, %c1_125, %c0_126, %c128_127] : memref<1x8x2x16x256xf32, #tpu.memory_space<vmem>>, vector<1x8x1x16x128xf32>
    %125 = vector.shape_cast %124 : vector<1x8x1x16x128xf32> to vector<8x16x128xf32>
    %126 = arith.addf %125, %123 : vector<8x16x128xf32>
    %c0_128 = arith.constant 0 : index
    %c0_129 = arith.constant 0 : index
    %c1_130 = arith.constant 1 : index
    %c0_131 = arith.constant 0 : index
    %c128_132 = arith.constant 128 : index
    %127 = vector.load %arg5[%c0_128, %c0_129, %c1_130, %c0_131, %c128_132] : memref<1x8x2x16x256xf32, #tpu.memory_space<vmem>>, vector<1x8x1x16x128xf32>
    %128 = vector.shape_cast %127 : vector<1x8x1x16x128xf32> to vector<8x16x128xf32>
    %129 = vector.shape_cast %126 : vector<8x16x128xf32> to vector<1x8x1x16x128xf32>
    tpu.vector_store %arg5[%c0_128, %c0_129, %c1_130, %c0_131, %c128_132], %129 {strides = array<i32>} : memref<1x8x2x16x256xf32, #tpu.memory_space<vmem>>, vector<1x8x1x16x128xf32>,
    %c2_i32 = arith.constant 2 : i32
    %130 = arith.addi %1, %c2_i32 : i32
    %c0_133 = arith.constant 0 : index
    %131 = arith.index_cast %130 : i32 to index
    %c0_134 = arith.constant 0 : index
    %c0_135 = arith.constant 0 : index
    %132 = vector.load %arg2[%c0_133, %131, %c0_134, %c0_135] : memref<1x18x24x128xbf16, #tpu.memory_space<vmem>>, vector<1x8x16x128xbf16>
    %133 = vector.shape_cast %132 : vector<1x8x16x128xbf16> to vector<8x16x128xbf16>
    %134 = vector.shape_cast %133 : vector<8x16x128xbf16> to vector<128x128xbf16>
    %c0_136 = arith.constant 0 : index
    %c1536 = arith.constant 1536 : index
    %135 = vector.load %arg3[%c0_136, %c1536] : memref<128x2048xbf16, #tpu.memory_space<vmem>>, vector<128x128xbf16>
    %cst_137 = arith.constant dense<0.000000e+00> : vector<128x128xf32>
    %136 = tpu.matmul %134, %135, %cst_137 {dimension_numbers = #tpu.dot_dimension_numbers<[1], [0], [0], [1], [0, 0, 1, 1], [], []>} : vector<128x128xbf16>, vector<128x128xbf16>, vector<128x128xf32> -> vector<128x128xf32>
    %137 = vector.shape_cast %136 : vector<128x128xf32> to vector<8x16x128xf32>
    %c0_138 = arith.constant 0 : index
    %c0_139 = arith.constant 0 : index
    %c1_140 = arith.constant 1 : index
    %c0_141 = arith.constant 0 : index
    %c0_142 = arith.constant 0 : index
    %138 = vector.load %arg5[%c0_138, %c0_139, %c1_140, %c0_141, %c0_142] : memref<1x8x2x16x256xf32, #tpu.memory_space<vmem>>, vector<1x8x1x16x128xf32>
    %139 = vector.shape_cast %138 : vector<1x8x1x16x128xf32> to vector<8x16x128xf32>
    %140 = arith.addf %139, %137 : vector<8x16x128xf32>
    %c0_143 = arith.constant 0 : index
    %c0_144 = arith.constant 0 : index
    %c1_145 = arith.constant 1 : index
    %c0_146 = arith.constant 0 : index
    %c0_147 = arith.constant 0 : index
    %141 = vector.load %arg5[%c0_143, %c0_144, %c1_145, %c0_146, %c0_147] : memref<1x8x2x16x256xf32, #tpu.memory_space<vmem>>, vector<1x8x1x16x128xf32>
    %142 = vector.shape_cast %141 : vector<1x8x1x16x128xf32> to vector<8x16x128xf32>
    %143 = vector.shape_cast %140 : vector<8x16x128xf32> to vector<1x8x1x16x128xf32>
    tpu.vector_store %arg5[%c0_143, %c0_144, %c1_145, %c0_146, %c0_147], %143 {strides = array<i32>} : memref<1x8x2x16x256xf32, #tpu.memory_space<vmem>>, vector<1x8x1x16x128xf32>,
    %c2_i32_148 = arith.constant 2 : i32
    %144 = arith.addi %1, %c2_i32_148 : i32
    %c0_149 = arith.constant 0 : index
    %145 = arith.index_cast %144 : i32 to index
    %c1_150 = arith.constant 1 : index
    %c0_151 = arith.constant 0 : index
    %146 = vector.load %arg2[%c0_149, %145, %c1_150, %c0_151] : memref<1x18x24x128xbf16, #tpu.memory_space<vmem>>, vector<1x8x16x128xbf16>
    %147 = vector.shape_cast %146 : vector<1x8x16x128xbf16> to vector<8x16x128xbf16>
    %148 = vector.shape_cast %147 : vector<8x16x128xbf16> to vector<128x128xbf16>
    %c0_152 = arith.constant 0 : index
    %c1664 = arith.constant 1664 : index
    %149 = vector.load %arg3[%c0_152, %c1664] : memref<128x2048xbf16, #tpu.memory_space<vmem>>, vector<128x256xbf16>
    %cst_153 = arith.constant dense<0.000000e+00> : vector<128x256xf32>
    %150 = tpu.matmul %148, %149, %cst_153 {dimension_numbers = #tpu.dot_dimension_numbers<[1], [0], [0], [1], [0, 0, 1, 1], [], []>} : vector<128x128xbf16>, vector<128x256xbf16>, vector<128x256xf32> -> vector<128x256xf32>
    %151 = vector.shape_cast %150 : vector<128x256xf32> to vector<8x16x256xf32>
    %152 = vector.extract_strided_slice %151 {offsets = [0, 0, 0], sizes = [8, 16, 128], strides = [1, 1, 1]} : vector<8x16x256xf32> to vector<8x16x128xf32>
    %c0_154 = arith.constant 0 : index
    %c0_155 = arith.constant 0 : index
    %c1_156 = arith.constant 1 : index
    %c0_157 = arith.constant 0 : index
    %c0_158 = arith.constant 0 : index
    %153 = vector.load %arg5[%c0_154, %c0_155, %c1_156, %c0_157, %c0_158] : memref<1x8x2x16x256xf32, #tpu.memory_space<vmem>>, vector<1x8x1x16x128xf32>
    %154 = vector.shape_cast %153 : vector<1x8x1x16x128xf32> to vector<8x16x128xf32>
    %155 = arith.addf %154, %152 : vector<8x16x128xf32>
    %c0_159 = arith.constant 0 : index
    %c0_160 = arith.constant 0 : index
    %c1_161 = arith.constant 1 : index
    %c0_162 = arith.constant 0 : index
    %c0_163 = arith.constant 0 : index
    %156 = vector.load %arg5[%c0_159, %c0_160, %c1_161, %c0_162, %c0_163] : memref<1x8x2x16x256xf32, #tpu.memory_space<vmem>>, vector<1x8x1x16x128xf32>
    %157 = vector.shape_cast %156 : vector<1x8x1x16x128xf32> to vector<8x16x128xf32>
    %158 = vector.shape_cast %155 : vector<8x16x128xf32> to vector<1x8x1x16x128xf32>
    tpu.vector_store %arg5[%c0_159, %c0_160, %c1_161, %c0_162, %c0_163], %158 {strides = array<i32>} : memref<1x8x2x16x256xf32, #tpu.memory_space<vmem>>, vector<1x8x1x16x128xf32>,
    %159 = vector.extract_strided_slice %151 {offsets = [0, 0, 128], sizes = [8, 16, 128], strides = [1, 1, 1]} : vector<8x16x256xf32> to vector<8x16x128xf32>
    %c0_164 = arith.constant 0 : index
    %c0_165 = arith.constant 0 : index
    %c1_166 = arith.constant 1 : index
    %c0_167 = arith.constant 0 : index
    %c128_168 = arith.constant 128 : index
    %160 = vector.load %arg5[%c0_164, %c0_165, %c1_166, %c0_167, %c128_168] : memref<1x8x2x16x256xf32, #tpu.memory_space<vmem>>, vector<1x8x1x16x128xf32>
    %161 = vector.shape_cast %160 : vector<1x8x1x16x128xf32> to vector<8x16x128xf32>
    %162 = arith.addf %161, %159 : vector<8x16x128xf32>
    %c0_169 = arith.constant 0 : index
    %c0_170 = arith.constant 0 : index
    %c1_171 = arith.constant 1 : index
    %c0_172 = arith.constant 0 : index
    %c128_173 = arith.constant 128 : index
    %163 = vector.load %arg5[%c0_169, %c0_170, %c1_171, %c0_172, %c128_173] : memref<1x8x2x16x256xf32, #tpu.memory_space<vmem>>, vector<1x8x1x16x128xf32>
    %164 = vector.shape_cast %163 : vector<1x8x1x16x128xf32> to vector<8x16x128xf32>
    %165 = vector.shape_cast %162 : vector<8x16x128xf32> to vector<1x8x1x16x128xf32>
    tpu.vector_store %arg5[%c0_169, %c0_170, %c1_171, %c0_172, %c128_173], %165 {strides = array<i32>} : memref<1x8x2x16x256xf32, #tpu.memory_space<vmem>>, vector<1x8x1x16x128xf32>,
    %c2_i32_174 = arith.constant 2 : i32
    %166 = arith.addi %1, %c2_i32_174 : i32
    %c0_175 = arith.constant 0 : index
    %167 = arith.index_cast %166 : i32 to index
    %c2_176 = arith.constant 2 : index
    %c0_177 = arith.constant 0 : index
    %168 = vector.load %arg2[%c0_175, %167, %c2_176, %c0_177] : memref<1x18x24x128xbf16, #tpu.memory_space<vmem>>, vector<1x8x16x128xbf16>
    %169 = vector.shape_cast %168 : vector<1x8x16x128xbf16> to vector<8x16x128xbf16>
    %170 = vector.shape_cast %169 : vector<8x16x128xbf16> to vector<128x128xbf16>
    %c0_178 = arith.constant 0 : index
    %c1920 = arith.constant 1920 : index
    %171 = vector.load %arg3[%c0_178, %c1920] : memref<128x2048xbf16, #tpu.memory_space<vmem>>, vector<128x128xbf16>
    %cst_179 = arith.constant dense<0.000000e+00> : vector<128x128xf32>
    %172 = tpu.matmul %170, %171, %cst_179 {dimension_numbers = #tpu.dot_dimension_numbers<[1], [0], [0], [1], [0, 0, 1, 1], [], []>} : vector<128x128xbf16>, vector<128x128xbf16>, vector<128x128xf32> -> vector<128x128xf32>
    %173 = vector.shape_cast %172 : vector<128x128xf32> to vector<8x16x128xf32>
    %c0_180 = arith.constant 0 : index
    %c0_181 = arith.constant 0 : index
    %c1_182 = arith.constant 1 : index
    %c0_183 = arith.constant 0 : index
    %c128_184 = arith.constant 128 : index
    %174 = vector.load %arg5[%c0_180, %c0_181, %c1_182, %c0_183, %c128_184] : memref<1x8x2x16x256xf32, #tpu.memory_space<vmem>>, vector<1x8x1x16x128xf32>
    %175 = vector.shape_cast %174 : vector<1x8x1x16x128xf32> to vector<8x16x128xf32>
    %176 = arith.addf %175, %173 : vector<8x16x128xf32>
    %c0_185 = arith.constant 0 : index
    %c0_186 = arith.constant 0 : index
    %c1_187 = arith.constant 1 : index
    %c0_188 = arith.constant 0 : index
    %c128_189 = arith.constant 128 : index
    %177 = vector.load %arg5[%c0_185, %c0_186, %c1_187, %c0_188, %c128_189] : memref<1x8x2x16x256xf32, #tpu.memory_space<vmem>>, vector<1x8x1x16x128xf32>
    %178 = vector.shape_cast %177 : vector<1x8x1x16x128xf32> to vector<8x16x128xf32>
    %179 = vector.shape_cast %176 : vector<8x16x128xf32> to vector<1x8x1x16x128xf32>
    tpu.vector_store %arg5[%c0_185, %c0_186, %c1_187, %c0_188, %c128_189], %179 {strides = array<i32>} : memref<1x8x2x16x256xf32, #tpu.memory_space<vmem>>, vector<1x8x1x16x128xf32>,
    return
  }
  func.func @transform_0(%arg0: i32, %arg1: i32) -> (i32, i32, i32, i32) {
    %c0_i32 = arith.constant 0 : i32
    %c0_i32_0 = arith.constant 0 : i32
    %c0_i32_1 = arith.constant 0 : i32
    %c0_i32_2 = arith.constant 0 : i32
    return %arg0, %c0_i32, %c0_i32_0, %c0_i32_1 : i32, i32, i32, i32
  }
  func.func @transform_1(%arg0: i32, %arg1: i32) -> (i32, i32) {
    %c0_i32 = arith.constant 0 : i32
    %c0_i32_0 = arith.constant 0 : i32
    %c0_i32_1 = arith.constant 0 : i32
    return %c0_i32, %c0_i32_0 : i32, i32
  }
  func.func @transform_2(%arg0: i32, %arg1: i32) -> (i32, i32) {
    %c0_i32 = arith.constant 0 : i32
    %c0_i32_0 = arith.constant 0 : i32
    %c0_i32_1 = arith.constant 0 : i32
    return %c0_i32, %c0_i32_0 : i32, i32
  }
  func.func @transform_3(%arg0: i32, %arg1: i32) -> (i32, i32, i32, i32, i32) {
    %c0_i32 = arith.constant 0 : i32
    %c0_i32_0 = arith.constant 0 : i32
    %c0_i32_1 = arith.constant 0 : i32
    %c0_i32_2 = arith.constant 0 : i32
    return %arg0, %arg1, %c0_i32, %c0_i32_0, %c0_i32_1 : i32, i32, i32, i32, i32
  }
}

</mosaic_0001>

<bundles_post_ra>
// kernel: tpu_custom_call.1
= control target key start
LH: loop header
LB: loop body
LE: loop exit
PB: predicated region body
PF: predicated region fallthrough
CT: control target
= control target key end

     0   :  { %s7041_s0 = inlined_call_operand.hbm [shape: bf16[2,18,24,128], index: 0, kind: input, shape index: {}]   ;;  %s7042_s1 = inlined_call_operand.hbm [shape: bf16[128,2048], index: 1, kind: input, shape index: {}]   ;;  %s7043_s2 = inlined_call_operand.vmem [shape: f32[1,128], index: 2, kind: input, shape index: {}]   ;;  %s7044_s3 = inlined_call_operand.hbm [shape: f32[2,16,2,16,256], index: 3, kind: output, shape index: {}]  }
   0x1   :  { %7056 = sst [smem:[#allocation16_spill]] %s7042_s1 }
   0x2   :  { %8 = vsyncpa [#allocation3], 0 }
   0x3   :  { %10 = vsyncpa [#allocation3 + $0x1], 0 }
   0x4   :  { %11 = vsyncpa [#allocation6], 0 }
   0x5   :  { %12 = vsyncpa [#allocation4], 0 }
   0x6   :  { %14 = vsyncpa [#allocation4 + $0x1], 0  ;;  %s5472_s12 = smov 0   ;;  %s5474_s13 = smov 0  }
   0x7   :  { %s5476_s14 = smov 0   ;;  %s5478_s15 = smov 0  }
   0x8   :  { %s5480_s16 = smov 0   ;;  %s5482_s17 = smov 0  }
   0x9   :  { %s5484_s18 = smov 0   ;;  %s5486_s19 = smov 0  }
   0xa   :  { %s5488_s20 = smov 0   ;;  %s5490_s21 = smov 0  }
   0xb   :  { %s5492_s22 = smov 0  }
   0xc LB: > { %7057 = sst [smem:[#allocation11_spill]] %s5401_s12  ;;  %s4316_s23 = sadd.s32 4294967295, %s5441_s22   ;;  %s5441_s22 = sphi %s5492_s22, %s20_s22   ;;  %s5437_s21 = sphi %s5490_s21, %s7093_s21   ;;  %s5433_s20 = sphi %s5488_s20, %s7084_s20   ;;  %s5429_s19 = sphi %s5486_s19, %s7092_s19   ;;  %s5425_s18 = sphi %s5484_s18, %s7083_s18   ;;  %s5421_s17 = sphi %s5482_s17, %s7091_s17   ;;  %s5417_s16 = sphi %s5480_s16, %s7090_s16   ;;  %s5413_s15 = sphi %s5478_s15, %s7089_s15   ;;  %s5409_s14 = sphi %s5476_s14, %s7088_s14   ;;  %s5405_s13 = sphi %s5474_s13, %s7087_s13   ;;  %s5401_s12 = sphi %s5472_s12, %s7086_s12  }
   0xd   : > { %7058 = sst [smem:[#allocation12_spill]] %s5433_s20  ;;  %s4317_s24 = sadd.s32 4294967294, %s5441_s22  }
   0xe   : > { %p52_p0 = scmp.ne.s32.totalorder %s5417_s16, %s5413_s15  ;;  %p5528_p1 = scmp.eq.s32.totalorder %s4316_s23, 0 }
   0xf   : > { %s109_s26 = sadd.s32 1, %s5409_s14  ;;  %p119_p2 = scmp.ne.s32.totalorder %s5409_s14, %s5405_s13 }
  0x10   : > { %s7059_s25 = scalar_select %p5528_p1, 1, 0 }
  0x11   : > { %p5537_p3 = por %p5528_p1, %p52_p0  ;;  %p120_p4 = scmp.eq.s32.totalorder %s4316_s23, 3 }
  0x12   : > { %p125_p5 = scmp.ne.s32.totalorder %s5405_s13, %s5401_s12  ;;  %p126_p6 = scmp.eq.s32.totalorder %s4317_s24, 3 }
  0x13   : > { %s7060_s27 = scalar_select %p5537_p3, 1, 0 }
  0x14   : > { %p5543_p7 = por %p120_p4, %p119_p2  ;;  %p4318_p8 = scmp.ge.s32.totalorder %s5441_s22, 1 }
  0x15   : > { %p5548_p9 = por %p126_p6, %p125_p5  ;;  %p133_p10 = scmp.lt.s32.totalorder %s5441_s22, 5 }
  0x16   : > { %s7061_s28 = scalar_select %p5543_p7, 1, 0 }
  0x17   : > { %s7062_s29 = scalar_select %p5548_p9, 1, 0 }
  0x18   : > { %p5553_p11 = pnand %p4318_p8, %p133_p10  ;;  %s5443_s4 = smov [#allocation5]  }
  0x19   : > { %7063 = sst [smem:[#allocation13_spill]] %s7062_s29  ;;  %s145_s5 = sshll.u32 %s5443_s4, 4  ;;  %s146_s5 = int_to_ptr.vmem [resolvable:$true] %s145_s5 }
  0x1a   : > { %s7064_s30 = scalar_select %p5553_p11, 1, 0 }
  0x1b   : > { %p5121_p12 = pneg %p5553_p11  ;;  %s7066_s1 = sld [smem:[#allocation16_spill]] }
  0x1d   : > { %p5561_p13 = pnand %p5121_p12, %p5528_p1 }
  0x1f   : > { %p5259_p2 = pneg %p5561_p13 }
  0x21   : > { %s5257_s9 = scalar_lea.hbm %s7066_s1, 16384 }
  0x22   : > { %p5258_p0 = scmp.ne.s32.totalorder %s7066_s1, %s5257_s9  ;;  %p5264_p6 = scmp.lt.u32.totalorder %s5257_s9, %s7066_s1 }
  0x24   : > { %p5260_p4 = pnand %p5259_p2, %p5258_p0 }
  0x26   : > { %p5261_p5 = pneg %p5260_p4 }
  0x28   : > { %p5266_p8 = pnand %p5264_p6, %p5261_p5 }
  0x2a   : > { %5269 = shalt.err (!%p5266_p8)
}
  0x2b   : > { %s5270_s24 = scalar_lea.vmem %s146_s5, 16384  ;;  %p5278_p7 = scmp.lt.s32.totalorder %s146_s5, %s146_s5 }
  0x2c   : > { %p5271_p10 = scmp.ne.s32.totalorder %s146_s5, %s5270_s24  ;;  %p5279_p1 = scmp.lt.s32.totalorder %s5270_s24, %s5270_s24 }
  0x2e   : > { %p5273_p12 = pnand %p5271_p10, %p5259_p2  ;;  %p5280_p3 = por %p5279_p1, %p5278_p7 }
  0x30   : > { %p5274_p9 = pneg %p5273_p12 }
  0x32   : > { %p5281_p11 = pnand %p5280_p3, %p5274_p9 }
  0x34   : > { %5284 = shalt.err (!%p5281_p11)
}
  0x35   : > { %s5444_s4 = smov 1024   ;;  %s7050_s7 = smov 64  }
  0x36   : > { %5124 = dma.hbm_to_vmem [thread:$0]  (!%p5561_p13), %s7066_s1, 16384, %s146_s5, [#allocation6], %s5444_s4, %s5444_s4, %s7050_s7  }
  0x37   : > { %s29_s10 = sadd.s32 1, %s5433_s20  ;;  %s32_s11 = sadd.s32 1, %s5437_s21 }
  0x38   : > { %p30_p1 = scmp.ge.s32.totalorder %s29_s10, 2  ;;  %s39_s15 = sadd.s32 1, %s5421_s17 }
  0x39   : > { %p46_p3 = scmp.ne.s32.totalorder %s5421_s17, %s5417_s16  ;;  %p47_p7 = scmp.eq.s32.totalorder %s5441_s22, 0 }
  0x3a   : > { %s7095_s10 = smov (%p30_p1, %s29_s10), 0  ;;  %s7097_s11 = smov (!%p30_p1, %s32_s11), %s5437_s21 }
  0x3b   : > { %7067 = sst [smem:[#allocation14_spill]] %s7095_s10  ;;  %s105_s6 = ssub.s32 %s5433_s20, %s7095_s10 }
  0x3c   : > { %p34_p9 = scmp.ge.s32.totalorder %s7097_s11, 2  ;;  %p5134_p11 = scmp.lt.s32.totalorder %s5441_s22, 4 }
  0x3d   : > { %p5594_p13 = por %p47_p7, %p46_p3  ;;  %s162_s23 = sand.u32 1, %s5421_s17  }
  0x3e   : > { %s7099_s11 = smov (%p34_p9, %s7097_s11), 0  ;;  %s5110_s24 = smul.u32 216, %s162_s23 }
  0x3f   : > { %7069 = sst [smem:[#allocation15_spill]] %s7099_s11  ;;  %s36_s4 = ssub.s32 %s5437_s21, %s7099_s11 }
  0x40   : > { %s5111_s8 = smul.u32 3456, %s5437_s21  ;;  %p37_p0 = scmp.eq.s32.totalorder %s36_s4, 0 }
  0x41   : > { %s106_s9 = sor.u32 %s105_s6, %s36_s4  ;;  %s166_s12 = scalar_lea.vmem [#allocation2], %s5110_s24 }
  0x42   : > { %p107_p2 = scmp.eq.s32.totalorder %s106_s9, 0  ;;  %s5615_s29 = scalar_lea.hbm %s7041_s0, %s5111_s8 }
  0x43   : > { %s5605_s7 = scalar_select %p37_p0, %s5421_s17, %s39_s15  }
  0x44   : > { %s5610_s1 = scalar_select %p107_p2, %s5409_s14, %s109_s26  }
  0x45   : > { %s173_s11 = sshll.u32 %s166_s12, 4  ;;  %p5623_p4 = pnand %p5134_p11, %p5594_p13  ;;  %s5617_s11 = int_to_ptr.vmem [resolvable:$true] %s173_s11 }
  0x46   : > { %s5627_s26 = scalar_lea.sflag [#allocation3], %s162_s23  ;;  %s5285_s20 = scalar_lea.hbm %s5615_s29, 3456 }
  0x47   : > { %p5286_p5 = scmp.ne.s32.totalorder %s5615_s29, %s5285_s20  ;;  %p5287_p6 = pneg %p5623_p4 }
  0x48   : > { %s5290_s6 = scalar_lea.hbm %s7041_s0, 6912  ;;  %p5291_p12 = scmp.lt.u32.totalorder %s5615_s29, %s7041_s0 }
  0x49   : > { %p5288_p8 = pnand %p5287_p6, %p5286_p5  ;;  %p5292_p1 = scmp.lt.u32.totalorder %s5290_s6, %s5285_s20 }
  0x4a   : > { %p5294_p7 = scmp.lt.u32.totalorder %s5285_s20, %s5615_s29 }
  0x4b   : > { %p5289_p10 = pneg %p5288_p8  ;;  %p5293_p3 = por %p5292_p1, %p5291_p12 }
  0x4d   : > { %p5295_p9 = por %p5294_p7, %p5293_p3 }
  0x4f   : > { %p5296_p11 = pnand %p5295_p9, %p5289_p10 }
  0x51   : > { %5299 = shalt.err (!%p5296_p11)
}
  0x52   : > { %s5300_s23 = scalar_lea.vmem %s5617_s11, 3456  ;;  %s5446_s4 = smov [#allocation2]  }
  0x53   : > { %p5301_p13 = scmp.ne.s32.totalorder %s5617_s11, %s5300_s23  ;;  %s5305_s8 = sshll.u32 %s5446_s4, 4  ;;  %s5306_s8 = int_to_ptr.vmem [resolvable:$false] %s5305_s8 }
  0x54   : > { %s5307_s9 = scalar_lea.vmem %s5306_s8, 6912  ;;  %p5308_p5 = scmp.lt.s32.totalorder %s5617_s11, %s5306_s8 }
  0x55   : > { %p5303_p0 = pnand %p5301_p13, %p5287_p6  ;;  %p5309_p8 = scmp.lt.s32.totalorder %s5307_s9, %s5300_s23 }
  0x57   : > { %p5304_p2 = pneg %p5303_p0  ;;  %p5310_p12 = por %p5309_p8, %p5308_p5 }
  0x59   : > { %p5311_p1 = pnand %p5310_p12, %p5304_p2 }
  0x5b   : > { %5314 = shalt.err (!%p5311_p1)
}
  0x5c   : > { %s5447_s20 = smov 4   ;;  %s7071_s12 = smov 64  }
  0x5d   : > { %5128 = dma.hbm_to_vmem [thread:$0]  (!%p5623_p4), %s5615_s29, 3456, %s5617_s11, %s5627_s26, %s7071_s12, %s7071_s12, %s5447_s20  }
  0x5e   : > { %p7072_p6 = scmp.ne.s32.totalorder %s7064_s30, 0 }
  0x5f   : > { %s187_s10 = sand.u32 (!%p7072_p6), 1, %s5417_s16   ;;  %p7073_p10 = scmp.ne.s32.totalorder (!%p7072_p6), %s7060_s27, 0 }
  0x60   : > { %185 = sbr.rel (%p7072_p6) target bundleno = 626 (0x272), region = 32  ;;  %s188_s5 = scalar_lea.sflag (!%p7072_p6), [#allocation3], %s187_s10 }
  0x61   : > { %s5660_s6 = smul.u32 (!%p7072_p6), 216, %s187_s10 }
  0x63   : > { %s191_s24 = scalar_lea.vmem (!%p7072_p6), [#allocation2], %s5660_s6 }
  0x67   : > { %5388 = dma.done.wait (%p7073_p10), %s188_s5, 3456  }
  0x68   : > { %5390 = vsyncadd (%p7073_p10), %s188_s5, 4294963840  ;;  %p7074_p3 = scmp.ne.s32.totalorder %s7059_s25, 0 }
  0x6a   : > { %5392 = dma.done.wait (%p7074_p3), [#allocation6], 16384  }
  0x6b   : > { %5394 = vsyncadd (%p7074_p3), [#allocation6], 4294950912  ;;  %v5448_v0 = vmov 0   ;;  %v241_v1 = vld [vmem:[#allocation5] sm:$0xf]  ;;  %v707_v3 = vld [vmem:[#allocation5 + $0x4] sm:$0xff] }
  0x6c   : > { %867 = vmatprep.mubr.bf16.mxu1 %v5448_v0  ;;  %v242_v2 = vld [vmem:[#allocation5 + $0x40] sm:$0xf]  ;;  %v708_v5 = vld [vmem:[#allocation5 + $0x44] sm:$0xff]  ;;  %s4916_s25 = smul.u32 96, %s5425_s18  ;;  %vm512_vm0 = vsmask.f32 3328 }
  0x6d   : > { %v4336_v4 = vcombine.low %v241_v1, %v242_v2  ;;  %v243_v6 = vld [vmem:[#allocation5 + $0x80] sm:$0xf]  ;;  %v4354_v8 = vcombine.high %v707_v3, %v708_v5  ;;  %v4353_v9 = vcombine.low %v707_v3, %v708_v5  ;;  %v709_v11 = vld [vmem:[#allocation5 + $0x84] sm:$0xff]  ;;  %vm513_vm1 = vsmask.f32 7440  ;;  %s215_s11 = sand.u32 1, %s5405_s13  }
  0x6e   : > { %v244_v7 = vld [vmem:[#allocation5 + $0xc0] sm:$0xf]  ;;  %v710_v12 = vld [vmem:[#allocation5 + $0xc4] sm:$0xff]  ;;  %s5675_s27 = scalar_lea.vmem %s191_s24, %s4916_s25 [#allocation2]  ;;  %vm5691_vm2 = vmor %vm512_vm0, %vm513_vm1  ;;  %vm1076_vm3 = vcmask 1042432   ;;  %vm1077_vm4 = vcmask 1046532   ;;  %s4324_s15 = sshll.u32 %s215_s11, 9 }
  0x6f   : > { %v4337_v10 = vcombine.low %v243_v6, %v244_v7  ;;  %v245_v13 = vld [vmem:[#allocation5 + $0x100] sm:$0xf]  ;;  %4982 = vmatprep.subr.bf16.mxu0 %v4336_v4  ;;  %v4356_v14 = vcombine.high %v709_v11, %v710_v12  ;;  %v711_v16 = vld [vmem:[#allocation5 + $0x104] sm:$0xff]  ;;  %835 = vmatprep.subr.bf16.mxu1 %v4354_v8  ;;  %v4355_v18 = vcombine.low %v709_v11, %v710_v12  ;;  %v5232_v32 = vld [vmem:[%s5675_s27] sm:$0xff]   ;;  %s6643_s26 = scalar_lea.vmem [#allocation7], %s4324_s15  ;;  %s4917_s8 = sshll.u32 %s5425_s18, 6 }
  0x70   : > { %v246_v15 = vld [vmem:[#allocation5 + $0x140] sm:$0xf]  ;;  %v712_v17 = vld [vmem:[#allocation5 + $0x144] sm:$0xff]  ;;  %4983 = vmatpush3.bf16.msra.mxu0 %v4336_v4  ;;  %836 = vmatpush1.bf16.msra.mxu1 %v4353_v9  ;;  %v488_v33 = vld [vmem:[%s5675_s27] sm:$0xf]  ;;  %s4912_s9 = sshll.u32 %s5429_s19, 7 }
  0x71   : > { %4984 = vmatprep.subr.bf16.mxu0 %v4337_v10  ;;  %v4338_v19 = vcombine.low %v245_v13, %v246_v15  ;;  %837 = vmatprep.subr.bf16.mxu1 %v4356_v14  ;;  %v4358_v20 = vcombine.high %v711_v16, %v712_v17  ;;  %v247_v21 = vld [vmem:[#allocation5 + $0x180] sm:$0xf]  ;;  %v713_v23 = vld [vmem:[#allocation5 + $0x184] sm:$0xff]  ;;  %v4357_v25 = vcombine.low %v711_v16, %v712_v17  ;;  %v489_v36 = vld [vmem:[%s5675_s27 + $0x4] sm:$0xf]  ;;  %v516_v37 = vshrl.u32 %v488_v33, 16  ;;  %s4206_s20 = sadd.s32 %s4917_s8, %s4912_s9 }
  0x72   : > { %v248_v22 = vld [vmem:[#allocation5 + $0x1c0] sm:$0xf]  ;;  %v714_v24 = vld [vmem:[#allocation5 + $0x1c4] sm:$0xff]  ;;  %v519_v38 = vshll.u32 %v488_v33, 16  ;;  %4998 = vmatprep.mubr.bf16.mxu0 %v5232_v32  ;;  %v525_v42 = vshll.u32 %v489_v36, 16  ;;  %v529_v43 = vshrl.u32 %v489_v36, 16  ;;  %vm5781_vm5 = vmor %vm1076_vm3, %vm1077_vm4 }
  0x73   : > { %v4339_v26 = vcombine.low %v247_v21, %v248_v22  ;;  %v249_v27 = vld [vmem:[#allocation5 + $0x200] sm:$0xf]  ;;  %v4360_v29 = vcombine.high %v713_v23, %v714_v24  ;;  %v715_v30 = vld [vmem:[#allocation5 + $0x204] sm:$0xff]  ;;  %v4359_v34 = vcombine.low %v713_v23, %v714_v24  ;;  %v518_v46 = vrot.slane %v516_v37, 4  ;;  %v490_v49 = vld [vmem:[%s5675_s27 + $0x8] sm:$0x1] }
  0x74   : > { %4985 = vmatpush3.bf16.msra.mxu0 %v4337_v10  ;;  %838 = vmatpush1.bf16.msra.mxu1 %v4355_v18  ;;  %v250_v28 = vld [vmem:[#allocation5 + $0x240] sm:$0xf]  ;;  %v716_v31 = vld [vmem:[#allocation5 + $0x244] sm:$0xff]  ;;  %v521_v47 = vrot.slane %v519_v38, 5  ;;  %v5681_v50 = vrot.slane %v525_v42, 5  ;;  %v531_v51 = vrot.slane %v529_v43, 4 }
  0x75   : > { %4986 = vmatprep.subr.bf16.mxu0 %v4338_v19  ;;  %839 = vmatprep.subr.bf16.mxu1 %v4358_v20  ;;  %v4340_v35 = vcombine.low %v249_v27, %v250_v28  ;;  %v4362_v39 = vcombine.high %v715_v30, %v716_v31  ;;  %v251_v40 = vld [vmem:[#allocation5 + $0x280] sm:$0xf]  ;;  %v717_v44 = vld [vmem:[#allocation5 + $0x284] sm:$0xff]  ;;  %v4361_v52 = vcombine.low %v715_v30, %v716_v31  ;;  %v491_v56 = vld [vmem:[%s5675_s27 + $0xc] sm:$0xf]  ;;  %v535_v61 = vshll.u32 %v490_v49, 16 }
  0x76   : > { %v252_v41 = vld [vmem:[#allocation5 + $0x2c0] sm:$0xf]  ;;  %v718_v45 = vld [vmem:[#allocation5 + $0x2c4] sm:$0xff]  ;;  %v522_v59 = vor.u32 %v521_v47, %v518_v46  ;;  %v532_v60 = vor.u32 %v531_v51, %v5681_v50  ;;  %v540_v63 = vshrl.u32 %v491_v56, 16  ;;  %v543_v2 = vshll.u32 %v491_v56, 16  ;;  %v1952_v36 = vld [vmem:[#allocation5 + $0x58] sm:$0xff] }
  0x77   : > { %v253_v48 = vld [vmem:[#allocation5 + $0x300] sm:$0xf]  ;;  %v4341_v53 = vcombine.low %v251_v40, %v252_v41  ;;  %v4364_v55 = vcombine.high %v717_v44, %v718_v45  ;;  %v719_v57 = vld [vmem:[#allocation5 + $0x304] sm:$0xff]  ;;  %v4363_v5 = vcombine.low %v717_v44, %v718_v45  ;;  %v1135_v13 = vld [vmem:[#allocation5 + $0xc] sm:$0xf]  ;;  %v537_v21 = vrot.slane %v535_v61, 5 }
  0x78   : > { %4987 = vmatpush3.bf16.msra.mxu0 %v4338_v19  ;;  %840 = vmatpush1.bf16.msra.mxu1 %v4357_v25  ;;  %v254_v54 = vld [vmem:[#allocation5 + $0x340] sm:$0xf]  ;;  %v720_v58 = vld [vmem:[#allocation5 + $0x344] sm:$0xff]  ;;  %v542_v10 = vrot.slane %v540_v63, 4  ;;  %v1136_v14 = vld [vmem:[#allocation5 + $0x4c] sm:$0xf] }
  0x79   : > { %4988 = vmatprep.subr.bf16.mxu0 %v4339_v26  ;;  %841 = vmatprep.subr.bf16.mxu1 %v4360_v29  ;;  %v492_v62 = vld [vmem:[%s5675_s27 + $0x10] sm:$0xf]  ;;  %v493_v1 = vld [vmem:[%s5675_s27 + $0x14] sm:$0x1]  ;;  %v4342_v6 = vcombine.low %v253_v48, %v254_v54  ;;  %v4366_v11 = vcombine.high %v719_v57, %v720_v58  ;;  %v545_v15 = vrot.slane %v543_v2, 5  ;;  %v523_v19 = vrot.slane %v522_v59, 4 }
  0x7a   : > { %v549_v3 = vshll.u32 %v492_v62, 16  ;;  %v553_v4 = vshrl.u32 %v492_v62, 16  ;;  %v255_v7 = vld [vmem:[#allocation5 + $0x380] sm:$0xf]  ;;  %v721_v9 = vld [vmem:[#allocation5 + $0x384] sm:$0xff]  ;;  %v533_v20 = vrot.slane %v532_v60, 4  ;;  %v4365_v23 = vcombine.low %v719_v57, %v720_v58 }
  0x7b   : > { %v256_v8 = vld [vmem:[#allocation5 + $0x3c0] sm:$0xf]  ;;  %v722_v12 = vld [vmem:[#allocation5 + $0x3c4] sm:$0xff]  ;;  %v559_v22 = vshll.u32 %v493_v1, 16  ;;  %v546_v25 = vor.u32 %v545_v15, %v542_v10  ;;  %v495_v28 = vld [vmem:[%s5675_s27 + $0x1c] sm:$0xf]  ;;  %v528_v33 = vsel %vm5691_vm2, %v523_v19, %v5681_v50 }
  0x7c   : > { %4989 = vmatpush3.bf16.msra.mxu0 %v4339_v26  ;;  %842 = vmatpush1.bf16.msra.mxu1 %v4359_v34  ;;  %v5687_v16 = vrot.slane %v549_v3, 5  ;;  %v555_v17 = vrot.slane %v553_v4, 4  ;;  %v4343_v24 = vcombine.low %v255_v7, %v256_v8  ;;  %v494_v27 = vld [vmem:[%s5675_s27 + $0x18] sm:$0xf]  ;;  %v4368_v29 = vcombine.high %v721_v9, %v722_v12  ;;  %v1137_v40 = vld [vmem:[#allocation5 + $0x8c] sm:$0xf] }
  0x7d   : > { %4990 = vmatprep.subr.bf16.mxu0 %v4340_v35  ;;  %843 = vmatprep.subr.bf16.mxu1 %v4362_v39  ;;  %v4367_v30 = vcombine.low %v721_v9, %v722_v12  ;;  %v564_v31 = vshrl.u32 %v494_v27, 16  ;;  %v567_v32 = vshll.u32 %v494_v27, 16  ;;  %v4385_v34 = vcombine.low %v1135_v13, %v1136_v14  ;;  %v1138_v41 = vld [vmem:[#allocation5 + $0xcc] sm:$0xf]  ;;  %v5233_v45 = vld [vmem:[%s5675_s27 + $0xc] sm:$0xff]   ;;  %s4913_s18 = sshll.u32 %s4206_s20, 7 }
  0x7e   : > { %v556_v26 = vor.u32 %v555_v17, %v5687_v16  ;;  %v573_v37 = vshll.u32 %v495_v28, 16  ;;  %v577_v38 = vshrl.u32 %v495_v28, 16  ;;  %v538_v39 = vsel %vm5691_vm2, %v533_v20, %v537_v21  ;;  %v496_v48 = vld [vmem:[%s5675_s27 + $0x20] sm:$0x1]  ;;  %v498_v54 = vld [vmem:[%s5675_s27 + $0x28] sm:$0xf]  ;;  %s6972_s6 = scalar_lea.hbm %s7044_s3, %s4913_s18 }
  0x7f   : > { %v5703_v42 = vrot.slane %v559_v22, 5  ;;  %v566_v43 = vrot.slane %v564_v31, 4  ;;  %v569_v44 = vrot.slane %v567_v32, 5  ;;  %v547_v46 = vrot.slane %v546_v25, 4  ;;  %v5713_v56 = vld [vmem:[#allocation5 + $0xd8] sm:$0xff]  ;;  %v5234_v1 = vld [vmem:[%s5675_s27 + $0x18] sm:$0xff]  }
  0x80   : > { %4991 = vmatpush3.bf16.msra.mxu0 %v4340_v35  ;;  %844 = vmatpush1.bf16.msra.mxu1 %v4361_v52  ;;  %v1950_v35 = vld [vmem:[#allocation5 + $0x18] sm:$0xff]  ;;  %v557_v47 = vrot.slane %v556_v26, 4  ;;  %v5707_v49 = vrot.slane %v573_v37, 5  ;;  %v579_v50 = vrot.slane %v577_v38, 4  ;;  %v4345_v52 = vcombine.low %v528_v33, %v538_v39  ;;  %v1139_v2 = vld [vmem:[#allocation5 + $0x10c] sm:$0xf] }
  0x81   : > { %4992 = vmatprep.subr.bf16.mxu0 %v4341_v53  ;;  %845 = vmatprep.subr.bf16.mxu1 %v4364_v55  ;;  %v4484_v51 = vcombine.high %v1950_v35, %v1952_v36  ;;  %v5711_v55 = vld [vmem:[#allocation5 + $0x98] sm:$0xff]  ;;  %v570_v57 = vor.u32 %v569_v44, %v566_v43  ;;  %v597_v60 = vshll.u32 %v498_v54, 16  ;;  %v4483_v61 = vcombine.low %v1950_v35, %v1952_v36  ;;  %v1140_v3 = vld [vmem:[#allocation5 + $0x14c] sm:$0xf]  ;;  %v5737_v21 = vld [vmem:[%s5675_s27 + $0x4] sm:$0xf] }
  0x82   : > { %v4386_v62 = vcombine.low %v1137_v40, %v1138_v41  ;;  %v601_v63 = vshrl.u32 %v498_v54, 16  ;;  %v580_v4 = vor.u32 %v579_v50, %v5707_v49  ;;  %v4488_v7 = vcombine.high %v5711_v55, %v5713_v56  ;;  %v5722_v8 = vld [vmem:[#allocation5 + $0x118] sm:$0xff]  ;;  %v1141_v14 = vld [vmem:[#allocation5 + $0x18c] sm:$0xf]  ;;  %v500_v22 = vld [vmem:[%s5675_s27 + $0x30] sm:$0xf] }
  0x83   : > { %v5724_v9 = vld [vmem:[#allocation5 + $0x158] sm:$0xff]  ;;  %v562_v13 = vsel %vm5691_vm2, %v557_v47, %v5703_v42  ;;  %v5730_v15 = vrot.slane %v570_v57, 4  ;;  %v4387_v19 = vcombine.low %v1139_v2, %v1140_v3  ;;  %v4487_v20 = vcombine.low %v5711_v55, %v5713_v56  ;;  %v1142_v25 = vld [vmem:[#allocation5 + $0x1cc] sm:$0xf]  ;;  %v5236_v37 = vld [vmem:[%s5675_s27 + $0x30] sm:$0xff]   ;;  %s4209_s19 = sshll.u32 %s6643_s26, 4  ;;  %s6974_s19 = int_to_ptr.vmem [resolvable:$true] %s4209_s19 }
  0x84   : > { %4993 = vmatpush3.bf16.msra.mxu0 %v4341_v53  ;;  %846 = vmatpush1.bf16.msra.mxu1 %v4363_v5  ;;  %v497_v53 = vld [vmem:[%s5675_s27 + $0x24] sm:$0xf]  ;;  %v583_v5 = vshll.u32 %v496_v48, 16  ;;  %v499_v10 = vld [vmem:[%s5675_s27 + $0x2c] sm:$0x1]  ;;  %v603_v17 = vrot.slane %v601_v63, 4  ;;  %v4492_v28 = vcombine.high %v5722_v8, %v5724_v9  ;;  %v4388_v44 = vcombine.low %v1141_v14, %v1142_v25 }
  0x85   : > { %4994 = vmatprep.subr.bf16.mxu0 %v4342_v6  ;;  %847 = vmatprep.subr.bf16.mxu1 %v4366_v11  ;;  %v588_v58 = vshrl.u32 %v497_v53, 16  ;;  %v591_v59 = vshll.u32 %v497_v53, 16  ;;  %v581_v26 = vrot.slane %v580_v4, 4  ;;  %v5745_v32 = vld [vmem:[#allocation5 + $0x198] sm:$0xff]  ;;  %v612_v35 = vshrl.u32 %v500_v22, 16  ;;  %v5237_v4 = vld [vmem:[%s5675_s27 + $0x3c] sm:$0xff]  }
  0x86   : > { %v585_v27 = vrot.slane %v583_v5, 5  ;;  %v5747_v33 = vld [vmem:[#allocation5 + $0x1d8] sm:$0xff]  ;;  %v615_v36 = vshll.u32 %v500_v22, 16  ;;  %v1143_v38 = vld [vmem:[#allocation5 + $0x20c] sm:$0xf]  ;;  %v1081_v41 = vrot.slane %v5737_v21, 5  ;;  %v4491_v47 = vcombine.low %v5722_v8, %v5724_v9 }
  0x87   : > { %v590_v11 = vrot.slane %v588_v58, 4  ;;  %v593_v12 = vrot.slane %v591_v59, 5  ;;  %v1030_v40 = vld [vmem:[%s5675_s27 + $0x8] sm:$0x1]  ;;  %v1145_v48 = vld [vmem:[#allocation5 + $0x28c] sm:$0xf]  ;;  %v4496_v55 = vcombine.high %v5745_v32, %v5747_v33 }
  0x88   : > { %4995 = vmatpush3.bf16.msra.mxu0 %v4342_v6  ;;  %848 = vmatpush1.bf16.msra.mxu1 %v4365_v23  ;;  %v552_v6 = vsel %vm5691_vm2, %v547_v46, %v5687_v16  ;;  %v5732_v16 = vrot.slane %v597_v60, 5  ;;  %v501_v23 = vld [vmem:[%s5675_s27 + $0x34] sm:$0xf]  ;;  %v1144_v46 = vld [vmem:[#allocation5 + $0x24c] sm:$0xf]  ;;  %v1084_v57 = vrot.slane %v1030_v40, 5 }
  0x89   : > { %4996 = vmatprep.subr.bf16.mxu0 %v4343_v24  ;;  %849 = vmatprep.subr.bf16.mxu1 %v4368_v29  ;;  %v607_v29 = vshll.u32 %v499_v10, 16  ;;  %v594_v31 = vor.u32 %v593_v12, %v590_v11  ;;  %v621_v42 = vshll.u32 %v501_v23, 16  ;;  %v625_v43 = vshrl.u32 %v501_v23, 16  ;;  %v1146_v50 = vld [vmem:[#allocation5 + $0x2cc] sm:$0xf]  ;;  %v5772_v2 = vld [vmem:[#allocation5 + $0x218] sm:$0xff] }
  0x8a   : > { %v604_v39 = vor.u32 %v603_v17, %v5732_v16  ;;  %v1147_v53 = vld [vmem:[#allocation5 + $0x30c] sm:$0xf]  ;;  %v502_v58 = vld [vmem:[%s5675_s27 + $0x38] sm:$0x1]  ;;  %v614_v59 = vrot.slane %v612_v35, 4  ;;  %v617_v60 = vrot.slane %v615_v36, 5  ;;  %v4389_v5 = vcombine.low %v1143_v38, %v1144_v46 }
  0x8b   : > { %v1148_v54 = vld [vmem:[#allocation5 + $0x34c] sm:$0xf]  ;;  %v5770_v63 = vrot.slane %v621_v42, 5  ;;  %v5774_v3 = vld [vmem:[#allocation5 + $0x258] sm:$0xff]  ;;  %v4495_v11 = vcombine.low %v5745_v32, %v5747_v33  ;;  %v504_v14 = vld [vmem:[%s5675_s27 + $0x40] sm:$0xf] }
  0x8c   : > { %4997 = vmatpush3.bf16.msra.mxu0 %v4343_v24  ;;  %850 = vmatpush1.bf16.msra.mxu1 %v4367_v30  ;;  %v5235_v24 = vld [vmem:[%s5675_s27 + $0x24] sm:$0xff]   ;;  %v4346_v30 = vcombine.low %v552_v6, %v562_v13  ;;  %v5777_v6 = vcombine.low %v1145_v48, %v1146_v50  ;;  %v5786_v10 = vcombine.low %v1147_v53, %v1148_v54  ;;  %v1150_v12 = vld [vmem:[#allocation5 + $0x3cc] sm:$0xf]  ;;  %v1031_v21 = vld [vmem:[%s5675_s27 + $0xc] sm:$0xe]  ;;  %v645_v33 = vshll.u32 %v504_v14, 16 }
  0x8d   : > { %5014 = vmatprep.subr.bf16.mxu0 %v4385_v34  ;;  %2174 = vmatprep.subr.bf16.mxu1 %v4484_v51  ;;  %v586_v51 = vsel %vm5691_vm2, %v581_v26, %v585_v27  ;;  %v503_v13 = vld [vmem:[%s5675_s27 + $0x3c] sm:$0xf]  ;;  %v1032_v22 = vld [vmem:[%s5675_s27 + $0x10] sm:$0xf]  ;;  %v4500_v23 = vcombine.high %v5772_v2, %v5774_v3  ;;  %v5813_v27 = vld [vmem:[%s5675_s27 + $0x14] sm:$0x1]  ;;  %v4499_v38 = vcombine.low %v5772_v2, %v5774_v3 }
  0x8e   : > { %v639_v32 = vshll.u32 %v503_v13, 16  ;;  %v4370_v36 = vrot.slane %v1031_v21, 9  ;;  %v1034_v40 = vld [vmem:[%s5675_s27 + $0x18] sm:$0xe]  ;;  %v1036_v46 = vld [vmem:[%s5675_s27 + $0x20] sm:$0x1] }
  0x8f   : > { %4999 = vmatmul.mubr.bf16.vlgmr.msra.gmra.mrb[0].mxu0 %v5233_v45  ;;  %868 = vmatmul.mubr.bf16.vlgmr.msra.gmra.mrb[0].mxu1 %v4345_v52  ;;  %v576_v45 = vsel %vm5691_vm2, %v5730_v15, %v5707_v49  ;;  %v5764_v52 = vrot.slane %v607_v29, 5  ;;  %v595_v49 = vrot.slane %v594_v31, 4  ;;  %v5238_v15 = vld [vmem:[%s5675_s27 + $0x48] sm:$0xff]   ;;  %v5817_v29 = vld [vmem:[#allocation5 + $0x50] sm:$0xff]  ;;  %v636_v31 = vshrl.u32 %v503_v13, 16  ;;  %s6980_s5 = scalar_lea.sflag [#allocation4], %s215_s11 }
  0x90   : > { %5015 = vmatpush3.bf16.msra.mxu0 %v4385_v34  ;;  %2175 = vmatpush1.bf16.msra.mxu1 %v4483_v61  ;;  %v5750_v34 = vld [vmem:[%s5675_s27] sm:$0xe]  ;;  %v605_v61 = vrot.slane %v604_v39, 4  ;;  %v4347_v9 = vcombine.low %v576_v45, %v586_v51  ;;  %v1970_v53 = vld [vmem:[#allocation5 + $0x298] sm:$0xff]  ;;  %s5315_s24 = scalar_lea.vmem %s6974_s19, 8192  ;;  %p7079_p7 = scmp.ne.s32.totalorder %s7061_s28, 0 }
  0x91   : > { %5016 = vmatprep.subr.bf16.mxu0 %v4386_v62  ;;  %5002 = vmatprep.mubr.bf16.mxu0 %v5234_v1  ;;  %v4369_v56 = vrot.slane %v5750_v34, 9  ;;  %v627_v1 = vrot.slane %v625_v43, 4  ;;  %v600_v17 = vsel %vm5691_vm2, %v595_v49, %v5732_v16  ;;  %v649_v34 = vshrl.u32 %v504_v14, 16  ;;  %v5826_v39 = vld [vmem:[#allocation5 + $0x90] sm:$0xff]  ;;  %v1972_v54 = vld [vmem:[#allocation5 + $0x2d8] sm:$0xff]  ;;  %p5316_p4 = scmp.ne.s32.totalorder %s6974_s19, %s5315_s24  ;;  %s5449_s25 = smov [#allocation7]  }
  0x92   : > { %877 = vmatprep.mubr.bf16.mxu1 %v5448_v0  ;;  %2176 = vmatprep.subr.bf16.mxu1 %v4488_v7  ;;  %v1149_v7 = vld [vmem:[#allocation5 + $0x38c] sm:$0xf]  ;;  %v5834_v45 = vld [vmem:[#allocation5 + $0xd0] sm:$0xff]  ;;  %v5846_v49 = vrot.slane %v645_v33, 5 }
  0x93   : > { %v5805_v25 = vsel %vm5781_vm5, %v4369_v56, %v1081_v41  ;;  %v628_v26 = vor.u32 %v627_v1, %v5770_v63  ;;  %v5822_v35 = vcombine.low %v1149_v7, %v1150_v12  ;;  %v641_v56 = vrot.slane %v639_v32, 5  ;;  %v5239_v1 = vld [vmem:[%s5675_s27 + $0x54] sm:$0xff]   ;;  %p5317_p9 = pnand %p5316_p4, %p7079_p7 }
  0x94   : > { %5017 = vmatpush3.bf16.msra.mxu0 %v4386_v62  ;;  %2177 = vmatpush1.bf16.msra.mxu1 %v4487_v20  ;;  %v1083_v62 = vrot.slane %v1081_v41, 4  ;;  %v631_v20 = vshll.u32 %v502_v58, 16  ;;  %v5849_v58 = vld [vmem:[%s5675_s27 + $0x28] sm:$0xf]  ;;  %v4421_v3 = vcombine.low %v5826_v39, %v5834_v45  ;;  %v4504_v7 = vcombine.high %v1970_v53, %v1972_v54 }
  0x95   : > { %5018 = vmatprep.subr.bf16.mxu0 %v4387_v19  ;;  %2178 = vmatprep.subr.bf16.mxu1 %v4492_v28  ;;  %v5815_v28 = vld [vmem:[#allocation5 + $0x10] sm:$0xff]  ;;  %v5839_v48 = vrot.slane %v628_v26, 4  ;;  %v1098_v12 = vrot.slane %v1036_v46, 5  ;;  %v1102_v14 = vrot.slane %v5849_v58, 5  ;;  %v4422_v21 = vcombine.high %v5826_v39, %v5834_v45  ;;  %v1974_v46 = vld [vmem:[#allocation5 + $0x318] sm:$0xff]  ;;  %v5987_v39 = vld [vmem:[#allocation5 + $0x28] sm:$0xff]  ;;  %p5318_p11 = pneg %p5317_p9 }
  0x96   : > { %v5809_v16 = vsel %vm5781_vm5, %v1083_v62, %v1084_v57  ;;  %v5831_v43 = vrot.slane %v631_v20, 5  ;;  %v4419_v50 = vcombine.low %v5815_v28, %v5817_v29  ;;  %v651_v57 = vrot.slane %v649_v34, 4  ;;  %v1039_v20 = vld [vmem:[%s5675_s27 + $0x2c] sm:$0x1] }
  0x97   : > { %5003 = vmatmul.mubr.bf16.gmra.mrb[4].mxu0 %v5235_v24  ;;  %878 = vmatmul.mubr.bf16.gmra.mrb[4].mxu1 %v4346_v30  ;;  %v610_v24 = vsel %vm5691_vm2, %v605_v61, %v5764_v52  ;;  %v5820_v30 = vld [vmem:[%s5675_s27 + $0x1c] sm:$0xf]  ;;  %v505_v52 = vld [vmem:[%s5675_s27 + $0x44] sm:$0x1]  ;;  %v4420_v61 = vcombine.high %v5815_v28, %v5817_v29  ;;  %v4371_v62 = vrot.slane %v1034_v40, 9 }
  0x98   : > { %5019 = vmatpush3.bf16.msra.mxu0 %v4387_v19  ;;  %5006 = vmatprep.mubr.bf16.mxu0 %v5236_v37  ;;  %v618_v19 = vor.u32 %v617_v60, %v614_v59  ;;  %v1088_v37 = vrot.slane %v1032_v22, 5  ;;  %v4348_v41 = vcombine.low %v600_v17, %v610_v24  ;;  %v1095_v51 = vrot.slane %v5820_v30, 5  ;;  %v5889_v24 = vld [vmem:[%s5675_s27 + $0x34] sm:$0xf]  ;;  %v5891_v30 = vld [vmem:[#allocation5 + $0x110] sm:$0xff] }
  0x99   : > { %5020 = vmatprep.subr.bf16.mxu0 %v4388_v44  ;;  %887 = vmatprep.mubr.bf16.mxu1 %v5448_v0  ;;  %v655_v13 = vshll.u32 %v505_v52, 16  ;;  %v5898_v40 = vld [vmem:[#allocation5 + $0x150] sm:$0xff] }
  0x9a   : > { %2179 = vmatpush1.bf16.msra.mxu1 %v4491_v47  ;;  %v5829_v42 = vrot.slane %v618_v19, 4  ;;  %v4377_v47 = vcombine.low %v5805_v25, %v5809_v16  ;;  %v5854_v59 = vsel %vm5781_vm5, %v4370_v36, %v1088_v37  ;;  %v1090_v60 = vrot.slane %v1088_v37, 4  ;;  %v5969_v29 = vld [vmem:[#allocation5 + $0x210] sm:$0xff] }
  0x9b   : > { %2180 = vmatprep.subr.bf16.mxu1 %v4496_v55  ;;  %v638_v55 = vrot.slane %v636_v31, 4  ;;  %v652_v19 = vor.u32 %v651_v57, %v5846_v49  ;;  %v5883_v22 = vsel %vm5781_vm5, %v4371_v62, %v1095_v51  ;;  %v657_v36 = vrot.slane %v655_v13, 5 }
  0x9c   : > { %5021 = vmatpush3.bf16.msra.mxu0 %v4388_v44  ;;  %v1091_v44 = vrot.slane %v5813_v27, 5  ;;  %v624_v2 = vsel %vm5691_vm2, %v5829_v42, %v5770_v63  ;;  %v634_v63 = vsel %vm5691_vm2, %v5839_v48, %v5831_v43  ;;  %v1104_v37 = vrot.slane %v1102_v14, 4  ;;  %v1042_v42 = vld [vmem:[%s5675_s27 + $0x38] sm:$0x1]  ;;  %v1976_v48 = vld [vmem:[#allocation5 + $0x358] sm:$0xff] }
  0x9d   : > { %5022 = vmatprep.subr.bf16.mxu0 %v4389_v5  ;;  %v642_v17 = vor.u32 %v641_v56, %v638_v55  ;;  %v508_v55 = vld [vmem:[%s5675_s27 + $0x50] sm:$0x1]  ;;  %v4423_v62 = vcombine.low %v5891_v30, %v5898_v40  ;;  %v4424_v13 = vcombine.high %v5891_v30, %v5898_v40 }
  0x9e   : > { %2181 = vmatpush1.bf16.msra.mxu1 %v4495_v11  ;;  %v1097_v11 = vrot.slane %v1095_v51, 4  ;;  %v4349_v51 = vcombine.low %v624_v2, %v634_v63  ;;  %v4508_v2 = vcombine.high %v1974_v46, %v1976_v48  ;;  %v1043_v63 = vld [vmem:[%s5675_s27 + $0x3c] sm:$0xe] }
  0x9f   : > { %5007 = vmatmul.mubr.bf16.gmra.mrb[8].mxu0 %v5237_v4  ;;  %2182 = vmatprep.subr.bf16.mxu1 %v4500_v23  ;;  %v1037_v4 = vld [vmem:[%s5675_s27 + $0x24] sm:$0xe]  ;;  %v5886_v23 = vld [vmem:[%s5675_s27 + $0x30] sm:$0xe]  ;;  %v643_v43 = vrot.slane %v642_v17, 4  ;;  %v4374_v28 = vrot.slane %v1043_v63, 9 }
  0xa0   : > { %888 = vmatmul.mubr.bf16.gmra.mrb[8].mxu1 %v4347_v9  ;;  %5023 = vmatpush3.bf16.msra.mxu0 %v4389_v5  ;;  %v4503_v5 = vcombine.low %v1970_v53, %v1972_v54  ;;  %v506_v9 = vld [vmem:[%s5675_s27 + $0x48] sm:$0xf]  ;;  %v4372_v27 = vrot.slane %v1037_v4, 9  ;;  %v5896_v34 = vsel %vm5781_vm5, %v1097_v11, %v1098_v12  ;;  %v5909_v53 = vld [vmem:[#allocation5 + $0x190] sm:$0xff]  ;;  %v5933_v4 = vld [vmem:[%s5675_s27 + $0x4c] sm:$0xf] }
  0xa1   : > { %5024 = vmatprep.subr.bf16.mxu0 %v5777_v6  ;;  %5010 = vmatprep.mubr.bf16.mxu0 %v5238_v15  ;;  %v507_v15 = vld [vmem:[%s5675_s27 + $0x4c] sm:$0xf]  ;;  %v660_v26 = vshrl.u32 %v506_v9, 16  ;;  %v663_v31 = vshll.u32 %v506_v9, 16  ;;  %v5911_v54 = vld [vmem:[#allocation5 + $0x1d0] sm:$0xff]  ;;  %v4379_v58 = vcombine.low %v5883_v22, %v5896_v34  ;;  %v1112_v11 = vrot.slane %v1042_v42, 5 }
  0xa2   : > { %897 = vmatprep.mubr.bf16.mxu1 %v5448_v0  ;;  %2183 = vmatpush1.bf16.msra.mxu1 %v4499_v38  ;;  %v669_v32 = vshll.u32 %v507_v15, 16  ;;  %v673_v33 = vshrl.u32 %v507_v15, 16  ;;  %v1105_v38 = vrot.slane %v1039_v20, 5  ;;  %v510_v12 = vld [vmem:[%s5675_s27 + $0x58] sm:$0xf]  ;;  %v679_v15 = vshll.u32 %v508_v55, 16 }
  0xa3   : > { %2184 = vmatprep.subr.bf16.mxu1 %v4504_v7  ;;  %v662_v56 = vrot.slane %v660_v26, 4  ;;  %v665_v57 = vrot.slane %v663_v31, 5  ;;  %v4425_v17 = vcombine.low %v5909_v53, %v5911_v54  ;;  %v1045_v20 = vld [vmem:[%s5675_s27 + $0x44] sm:$0x1]  ;;  %v1123_v22 = vrot.slane %v5933_v4, 5 }
  0xa4   : > { %5025 = vmatpush3.bf16.msra.mxu0 %v5777_v6  ;;  %v1092_v6 = vsel %vm5781_vm5, %v1090_v60, %v1091_v44  ;;  %v653_v44 = vrot.slane %v652_v19, 4  ;;  %v5918_v60 = vsel %vm5781_vm5, %v4372_v27, %v1102_v14  ;;  %v5920_v25 = vrot.slane %v669_v32, 5  ;;  %v4452_v4 = vld [vmem:[%s5675_s27 + $0x10] sm:$0xf]  ;;  %v1051_v63 = vld [vmem:[%s5675_s27 + $0x5c] sm:$0x1] }
  0xa5   : > { %5026 = vmatprep.subr.bf16.mxu0 %v5786_v10  ;;  %v4378_v52 = vcombine.low %v5854_v59, %v1092_v6  ;;  %v675_v16 = vrot.slane %v673_v33, 4  ;;  %v5928_v59 = vsel %vm5781_vm5, %v1104_v37, %v1105_v38  ;;  %v666_v14 = vor.u32 %v665_v57, %v662_v56  ;;  %v1046_v6 = vld [vmem:[%s5675_s27 + $0x48] sm:$0xe]  ;;  %v5980_v57 = vld [vmem:[%s5675_s27 + $0x58] sm:$0xf] }
  0xa6   : > { %2185 = vmatpush1.bf16.msra.mxu1 %v4503_v5  ;;  %v509_v5 = vld [vmem:[%s5675_s27 + $0x54] sm:$0xf]  ;;  %v658_v7 = vsel %vm5691_vm2, %v653_v44, %v657_v36  ;;  %v693_v31 = vshll.u32 %v510_v12, 16  ;;  %v697_v34 = vshrl.u32 %v510_v12, 16  ;;  %v1978_v36 = vld [vmem:[#allocation5 + $0x398] sm:$0xff]  ;;  %v681_v38 = vrot.slane %v679_v15, 5 }
  0xa7   : > { %5011 = vmatmul.mubr.bf16.gmra.mrb[12].mxu0 %v5239_v1  ;;  %v4507_v1 = vcombine.low %v1974_v46, %v1976_v48  ;;  %2186 = vmatprep.subr.bf16.mxu1 %v4508_v2  ;;  %v676_v19 = vor.u32 %v675_v16, %v5920_v25  ;;  %v684_v26 = vshrl.u32 %v509_v5, 16  ;;  %v687_v27 = vshll.u32 %v509_v5, 16  ;;  %v1980_v37 = vld [vmem:[#allocation5 + $0x3d8] sm:$0xff]  ;;  %v511_v48 = vld [vmem:[%s5675_s27 + $0x5c] sm:$0x1] }
  0xa8   : > { %898 = vmatmul.mubr.bf16.gmra.mrb[12].mxu1 %v4348_v41  ;;  %5027 = vmatpush3.bf16.msra.mxu0 %v5786_v10  ;;  %v4373_v41 = vrot.slane %v5886_v23, 9  ;;  %v1109_v10 = vrot.slane %v5889_v24, 5  ;;  %v1048_v24 = vld [vmem:[%s5675_s27 + $0x50] sm:$0x1]  ;;  %v5977_v55 = vrot.slane %v693_v31, 5  ;;  %v699_v56 = vrot.slane %v697_v34, 4 }
  0xa9   : > { %5028 = vmatprep.subr.bf16.mxu0 %v5822_v35  ;;  %907 = vmatprep.mubr.bf16.mxu1 %v5448_v0  ;;  %v677_v44 = vrot.slane %v676_v19, 4  ;;  %v1126_v46 = vrot.slane %v1048_v24, 5  ;;  %v4511_v2 = vcombine.low %v1978_v36, %v1980_v37  ;;  %v5997_v5 = vld [vmem:[#allocation5 + $0x68] sm:$0xff]  ;;  %v703_v12 = vshll.u32 %v511_v48, 16  ;;  %v1049_v15 = vld [vmem:[%s5675_s27 + $0x54] sm:$0xe] }
  0xaa   : > { %5030 = vmatprep.mubr.bf16.mxu0 %v4377_v47  ;;  %v5923_v47 = vld [vmem:[%s5675_s27 + $0x40] sm:$0xf]  ;;  %v1111_v9 = vrot.slane %v1109_v10, 4  ;;  %2187 = vmatpush1.bf16.msra.mxu1 %v4507_v1  ;;  %v1110_v32 = vsel %vm5781_vm5, %v4373_v41, %v1109_v10  ;;  %v4375_v41 = vrot.slane %v1046_v6, 9  ;;  %v1125_v10 = vrot.slane %v1123_v22, 4 }
  0xab   : > { %v1772_v6 = vshrl.u32 %v4452_v4, 16  ;;  %v4604_v30 = vcombine.high %v5987_v39, %v5997_v5  ;;  %v4454_v31 = vld [vmem:[%s5675_s27 + $0x18] sm:$0xf]  ;;  %v705_v34 = vrot.slane %v703_v12, 5 }
  0xac   : > { %5029 = vmatpush3.bf16.msra.mxu0 %v5822_v35  ;;  %v648_v35 = vsel %vm5691_vm2, %v643_v43, %v5846_v49  ;;  %v4380_v49 = vcombine.low %v5918_v60, %v5928_v59  ;;  %v1113_v33 = vsel %vm5781_vm5, %v1111_v9, %v1112_v11  ;;  %v1119_v43 = vrot.slane %v1045_v20, 5  ;;  %v4451_v59 = vld [vmem:[%s5675_s27 + $0xc] sm:$0xf]  ;;  %v6003_v9 = vld [vmem:[#allocation5 + $0x2d0] sm:$0xff] }
  0xad   : > { %1540 = vmatprep.subr.bf16.mxu0 %v4420_v61  ;;  %v1116_v61 = vrot.slane %v5923_v47, 5  ;;  %v4350_v23 = vcombine.low %v648_v35, %v658_v7  ;;  %v4381_v60 = vcombine.low %v1110_v32, %v1113_v33  ;;  %v4512_v47 = vcombine.high %v1978_v36, %v1980_v37  ;;  %v6001_v7 = vld [vmem:[#allocation5 + $0x290] sm:$0xff]  ;;  %v4455_v32 = vld [vmem:[%s5675_s27 + $0x1c] sm:$0xf]  ;;  %v4453_v37 = vld [vmem:[%s5675_s27 + $0x14] sm:$0x1] }
  0xae   : > { %v682_v35 = vsel %vm5691_vm2, %v677_v44, %v681_v38  ;;  %v1127_v11 = vsel %vm5781_vm5, %v1125_v10, %v1126_v46  ;;  %v1762_v19 = vshll.u32 %v4451_v59, 16  ;;  %v1768_v20 = vshll.u32 %v4452_v4, 16  ;;  %v1409_v36 = vld [vmem:[#allocation5 + $0x350] sm:$0xff] }
  0xaf   : > { %5031 = vmatmul.mubr.bf16.vlgmr.msra.gmra.mrb[16].mxu0 %v4378_v52  ;;  %v1118_v42 = vrot.slane %v1116_v61, 4  ;;  %v689_v52 = vrot.slane %v687_v27, 5  ;;  %v1117_v16 = vsel %vm5781_vm5, %v4374_v28, %v1116_v61  ;;  %2188 = vmatprep.subr.bf16.mxu1 %v4512_v47  ;;  %v1130_v61 = vrot.slane %v5980_v57, 5 }
  0xb0   : > { %908 = vmatmul.mubr.bf16.gmra.mrb[16].mxu1 %v4349_v51  ;;  %1541 = vmatpush1.bf16.msra.mxu0 %v4419_v50  ;;  %v5971_v50 = vld [vmem:[#allocation5 + $0x250] sm:$0xff]  ;;  %v686_v51 = vrot.slane %v684_v26, 4  ;;  %v4376_v26 = vrot.slane %v1049_v15, 9  ;;  %v1133_v27 = vrot.slane %v1051_v63, 5  ;;  %v1764_v38 = vrot.slane %v1762_v19, 5  ;;  %v1951_v63 = vld [vmem:[#allocation5 + $0x20] sm:$0xff] }
  0xb1   : > { %1542 = vmatprep.subr.bf16.mxu0 %v4422_v21  ;;  %917 = vmatprep.mubr.bf16.mxu1 %v5448_v0  ;;  %v667_v21 = vrot.slane %v666_v14, 4  ;;  %v4428_v1 = vcombine.high %v5969_v29, %v5971_v50  ;;  %v700_v14 = vor.u32 %v699_v56, %v5977_v55  ;;  %v1783_v44 = vshrl.u32 %v4454_v31, 16 }
  0xb2   : > { %5034 = vmatprep.mubr.bf16.mxu0 %v4379_v58  ;;  %v4426_v58 = vcombine.high %v5909_v53, %v5911_v54  ;;  %2189 = vmatpush1.bf16.msra.mxu1 %v4511_v2  ;;  %v1792_v10 = vshll.u32 %v4455_v32, 16  ;;  %v1796_v46 = vshrl.u32 %v4455_v32, 16  ;;  %v4429_v53 = vcombine.low %v6001_v7, %v6003_v9  ;;  %v2683_v32 = vld [vmem:[#allocation5 + $0xe8] sm:$0xff] }
  0xb3   : > { %v672_v45 = vsel %vm5691_vm2, %v667_v21, %v5920_v25  ;;  %v1124_v25 = vsel %vm5781_vm5, %v4375_v41, %v1123_v22  ;;  %v4430_v22 = vcombine.high %v6001_v7, %v6003_v9  ;;  %2808 = vmatprep.subr.bf16.mxu1 %v4604_v30  ;;  %v701_v28 = vrot.slane %v700_v14, 4  ;;  %v4458_v7 = vld [vmem:[%s5675_s27 + $0x28] sm:$0xf] }
  0xb4   : > { %1543 = vmatpush1.bf16.msra.mxu0 %v4421_v3  ;;  %v1120_v3 = vsel %vm5781_vm5, %v1118_v42, %v1119_v43  ;;  %v4383_v24 = vcombine.low %v1124_v25, %v1127_v11  ;;  %v6029_v42 = vrot.slane %v1768_v20, 5  ;;  %v1774_v43 = vrot.slane %v1772_v6, 4 }
  0xb5   : > { %1544 = vmatprep.subr.bf16.mxu0 %v4424_v13  ;;  %v690_v13 = vor.u32 %v689_v52, %v686_v51  ;;  %v4382_v40 = vcombine.low %v1117_v16, %v1120_v3  ;;  %v1786_v41 = vshll.u32 %v4454_v31, 16  ;;  %v1131_v54 = vsel %vm5781_vm5, %v4376_v26, %v1130_v61  ;;  %v2682_v31 = vld [vmem:[#allocation5 + $0xa8] sm:$0xff] }
  0xb6   : > { %v706_v52 = vsel %vm5691_vm2, %v701_v28, %v705_v34  ;;  %v1775_v57 = vor.u32 %v1774_v43, %v6029_v42  ;;  %v1785_v16 = vrot.slane %v1783_v44, 4  ;;  %v1816_v20 = vshll.u32 %v4458_v7, 16  ;;  %v4461_v43 = vld [vmem:[%s5675_s27 + $0x34] sm:$0xf] }
  0xb7   : > { %5035 = vmatmul.mubr.bf16.gmra.mrb[20].mxu0 %v4380_v49  ;;  %v1759_v49 = vshrl.u32 %v4451_v59, 16  ;;  %v691_v33 = vrot.slane %v690_v13, 4  ;;  %v1788_v47 = vrot.slane %v1786_v41, 5  ;;  %v6044_v59 = vrot.slane %v1792_v10, 5 }
  0xb8   : > { %918 = vmatmul.mubr.bf16.gmra.mrb[20].mxu1 %v4350_v23  ;;  %1545 = vmatpush1.bf16.msra.mxu0 %v4423_v62  ;;  %v4427_v62 = vcombine.low %v5969_v29, %v5971_v50  ;;  %v4351_v23 = vcombine.low %v672_v45, %v682_v35  ;;  %v1132_v29 = vrot.slane %v1130_v61, 4  ;;  %v1408_v50 = vld [vmem:[#allocation5 + $0x310] sm:$0xff]  ;;  %v1798_v45 = vrot.slane %v1796_v46, 4  ;;  %v1953_v61 = vld [vmem:[#allocation5 + $0x60] sm:$0xff] }
  0xb9   : > { %1546 = vmatprep.subr.bf16.mxu0 %v4426_v58  ;;  %927 = vmatprep.mubr.bf16.mxu1 %v5448_v0  ;;  %v1761_v21 = vrot.slane %v1759_v49, 4  ;;  %v4432_v51 = vcombine.high %v1408_v50, %v1409_v36  ;;  %v1778_v58 = vshll.u32 %v4453_v37, 16  ;;  %v4431_v4 = vcombine.low %v1408_v50, %v1409_v36  ;;  %v4457_v35 = vld [vmem:[%s5675_s27 + $0x24] sm:$0xf]  ;;  %v1955_v37 = vld [vmem:[#allocation5 + $0xa0] sm:$0xff] }
  0xba   : > { %5038 = vmatprep.mubr.bf16.mxu0 %v4381_v60  ;;  %v1134_v48 = vsel %vm5781_vm5, %v1132_v29, %v1133_v27  ;;  %v1410_v60 = vld [vmem:[#allocation5 + $0x390] sm:$0xff]  ;;  %v1776_v11 = vrot.slane %v1775_v57, 4  ;;  %v1789_v13 = vor.u32 %v1788_v47, %v1785_v16  ;;  %v1799_v14 = vor.u32 %v1798_v45, %v6044_v59  ;;  %v5241_v16 = vld [vmem:[%s5675_s27 + $0x18] sm:$0xff]  }
  0xbb   : > { %v1765_v56 = vor.u32 %v1764_v38, %v1761_v21  ;;  %v4384_v3 = vcombine.low %v1131_v54, %v1134_v48  ;;  %v1780_v12 = vrot.slane %v1778_v58, 5  ;;  %v1807_v49 = vshrl.u32 %v4457_v35, 16  ;;  %v1957_v21 = vld [vmem:[#allocation5 + $0xe0] sm:$0xff]  ;;  %v2684_v48 = vld [vmem:[#allocation5 + $0x128] sm:$0xff] }
  0xbc   : > { %1547 = vmatpush1.bf16.msra.mxu0 %v4425_v17  ;;  %v696_v17 = vsel %vm5691_vm2, %v691_v33, %v5977_v55  ;;  %v1411_v55 = vld [vmem:[#allocation5 + $0x3d0] sm:$0xff]  ;;  %v1810_v19 = vshll.u32 %v4457_v35, 16  ;;  %v1820_v6 = vshrl.u32 %v4458_v7, 16  ;;  %v1800_v26 = vrot.slane %v1799_v14, 4  ;;  %v4459_v33 = vld [vmem:[%s5675_s27 + $0x2c] sm:$0x1] }
  0xbd   : > { %1548 = vmatprep.subr.bf16.mxu0 %v4428_v1  ;;  %v4456_v1 = vld [vmem:[%s5675_s27 + $0x20] sm:$0x1]  ;;  %v4352_v2 = vcombine.low %v696_v17, %v706_v52  ;;  %v4434_v9 = vcombine.high %v1410_v60, %v1411_v55  ;;  %v1766_v25 = vrot.slane %v1765_v56, 4  ;;  %v4433_v30 = vcombine.low %v1410_v60, %v1411_v55  ;;  %v1959_v58 = vld [vmem:[#allocation5 + $0x120] sm:$0xff]  ;;  %v2686_v35 = vld [vmem:[#allocation5 + $0x1a8] sm:$0xff] }
  0xbe   : > { %v1802_v15 = vshll.u32 %v4456_v1, 16  ;;  %v1809_v28 = vrot.slane %v1807_v49, 4  ;;  %v1812_v34 = vrot.slane %v1810_v19, 5  ;;  %v6059_v29 = vrot.slane %v1816_v20, 5  ;;  %v1961_v60 = vld [vmem:[#allocation5 + $0x160] sm:$0xff]  ;;  %v2687_v7 = vld [vmem:[#allocation5 + $0x1e8] sm:$0xff] }
  0xbf   : > { %5039 = vmatmul.mubr.bf16.gmra.mrb[24].mxu0 %v4382_v40  ;;  %v1771_v40 = vsel %vm5691_vm2, %v1766_v25, %v6029_v42  ;;  %v1822_v50 = vrot.slane %v1820_v6, 4  ;;  %v4603_v38 = vcombine.low %v5987_v39, %v5997_v5  ;;  %v4460_v42 = vld [vmem:[%s5675_s27 + $0x30] sm:$0xf]  ;;  %v4606_v41 = vcombine.high %v2682_v31, %v2683_v32  ;;  %v2685_v39 = vld [vmem:[#allocation5 + $0x168] sm:$0xff]  ;;  %v4464_v20 = vld [vmem:[%s5675_s27 + $0x40] sm:$0xf] }
  0xc0   : > { %928 = vmatmul.mubr.bf16.gmra.mrb[24].mxu1 %v4351_v23  ;;  %1549 = vmatpush1.bf16.msra.mxu0 %v4427_v62  ;;  %v1781_v62 = vsel %vm5691_vm2, %v1776_v11, %v1780_v12  ;;  %v5240_v23 = vld [vmem:[%s5675_s27 + $0xc] sm:$0xff]   ;;  %v1804_v27 = vrot.slane %v1802_v15, 5  ;;  %v4485_v10 = vcombine.low %v1951_v63, %v1953_v61  ;;  %v1826_v46 = vshll.u32 %v4459_v33, 16  ;;  %v4463_v19 = vld [vmem:[%s5675_s27 + $0x3c] sm:$0xf] }
  0xc1   : > { %1550 = vmatprep.subr.bf16.mxu0 %v4430_v22  ;;  %937 = vmatprep.mubr.bf16.mxu1 %v5448_v0  ;;  %v4486_v22 = vcombine.high %v1951_v63, %v1953_v61  ;;  %v6061_v36 = vcombine.low %v1771_v40, %v1781_v62  ;;  %v1813_v54 = vor.u32 %v1812_v34, %v1809_v28  ;;  %v1834_v52 = vshll.u32 %v4460_v42, 16  ;;  %v1963_v14 = vld [vmem:[#allocation5 + $0x1a0] sm:$0xff]  ;;  %v6087_v62 = vld [vmem:[#allocation5 + $0x228] sm:$0xff] }
  0xc2   : > { %5042 = vmatprep.mubr.bf16.mxu0 %v4383_v24  ;;  %v1790_v24 = vrot.slane %v1789_v13, 4  ;;  %v1823_v17 = vor.u32 %v1822_v50, %v6059_v29  ;;  %v4490_v5 = vcombine.high %v1955_v37, %v1957_v21  ;;  %v1840_v56 = vshll.u32 %v4461_v43, 16  ;;  %v1965_v15 = vld [vmem:[#allocation5 + $0x1e0] sm:$0xff]  ;;  %v5242_v50 = vld [vmem:[%s5675_s27 + $0x24] sm:$0xff]  }
  0xc3   : > { %v1844_v57 = vshrl.u32 %v4461_v43, 16  ;;  %v4605_v55 = vcombine.low %v2682_v31, %v2683_v32  ;;  %v1828_v47 = vrot.slane %v1826_v46, 5  ;;  %v4489_v45 = vcombine.low %v1955_v37, %v1957_v21  ;;  %v1967_v31 = vld [vmem:[#allocation5 + $0x220] sm:$0xff]  ;;  %v2690_v43 = vld [vmem:[#allocation5 + $0x2a8] sm:$0xff] }
  0xc4   : > { %1551 = vmatpush1.bf16.msra.mxu0 %v4429_v53  ;;  %v1795_v44 = vsel %vm5691_vm2, %v1790_v24, %v6044_v59  ;;  %v1805_v53 = vsel %vm5691_vm2, %v1800_v26, %v1804_v27  ;;  %v4608_v59 = vcombine.high %v2684_v48, %v2685_v39  ;;  %v1814_v1 = vrot.slane %v1813_v54, 4  ;;  %v1969_v32 = vld [vmem:[#allocation5 + $0x260] sm:$0xff] }
  0xc5   : > { %1552 = vmatprep.subr.bf16.mxu0 %v4432_v51  ;;  %v1831_v51 = vshrl.u32 %v4460_v42, 16  ;;  %v1836_v11 = vrot.slane %v1834_v52, 5  ;;  %v6080_v12 = vrot.slane %v1840_v56, 5  ;;  %v1846_v13 = vrot.slane %v1844_v57, 4  ;;  %v4466_v42 = vld [vmem:[%s5675_s27 + $0x48] sm:$0xf] }
  0xc6   : > { %v4607_v63 = vcombine.low %v2684_v48, %v2685_v39  ;;  %v4610_v61 = vcombine.high %v2686_v35, %v2687_v7  ;;  %v4493_v49 = vcombine.low %v1959_v58, %v1961_v60  ;;  %v1819_v6 = vsel %vm5691_vm2, %v1814_v1, %v6059_v29  ;;  %v1971_v48 = vld [vmem:[#allocation5 + $0x2a0] sm:$0xff]  ;;  %v4465_v57 = vld [vmem:[%s5675_s27 + $0x44] sm:$0x1]  ;;  %v2693_v1 = vld [vmem:[#allocation5 + $0x368] sm:$0xff] }
  0xc7   : > { %5043 = vmatmul.mubr.bf16.gmra.mrb[28].mxu0 %v4384_v3  ;;  %v6077_v3 = vcombine.low %v1795_v44, %v1805_v53  ;;  %v1833_v25 = vrot.slane %v1831_v51, 4  ;;  %v4609_v40 = vcombine.low %v2686_v35, %v2687_v7  ;;  %v1847_v27 = vor.u32 %v1846_v13, %v6080_v12  ;;  %v2691_v44 = vld [vmem:[#allocation5 + $0x2e8] sm:$0xff]  ;;  %v1973_v39 = vld [vmem:[#allocation5 + $0x2e0] sm:$0xff] }
  0xc8   : > { %938 = vmatmul.mubr.bf16.gmra.mrb[28].mxu1 %v4352_v2  ;;  %1553 = vmatpush1.bf16.msra.mxu0 %v4431_v4  ;;  %v1824_v2 = vrot.slane %v1823_v17, 4  ;;  %v4462_v4 = vld [vmem:[%s5675_s27 + $0x38] sm:$0x1]  ;;  %v1855_v33 = vshrl.u32 %v4463_v19, 16  ;;  %v1858_v28 = vshll.u32 %v4463_v19, 16  ;;  %v1864_v34 = vshll.u32 %v4464_v20, 16 }
  0xc9   : > { %1554 = vmatprep.subr.bf16.mxu0 %v4434_v9  ;;  %1572 = vmatprep.mubr.bf16.mxu0 %v5448_v0  ;;  %v4494_v9 = vcombine.high %v1959_v58, %v1961_v60  ;;  %v1837_v26 = vor.u32 %v1836_v11, %v1833_v25  ;;  %v1868_v29 = vshrl.u32 %v4464_v20, 16  ;;  %v4497_v21 = vcombine.low %v1963_v14, %v1965_v15  ;;  %v4467_v17 = vld [vmem:[%s5675_s27 + $0x4c] sm:$0xf]  ;;  %v1975_v7 = vld [vmem:[#allocation5 + $0x320] sm:$0xff] }
  0xca   : > { %2206 = vmatprep.mubr.bf16.mxu1 %v5448_v0  ;;  %v1829_v24 = vsel %vm5691_vm2, %v1824_v2, %v1828_v47  ;;  %v1848_v53 = vrot.slane %v1847_v27, 4  ;;  %v1860_v51 = vrot.slane %v1858_v28, 5  ;;  %v6102_v52 = vrot.slane %v1864_v34, 5  ;;  %v4468_v19 = vld [vmem:[%s5675_s27 + $0x50] sm:$0x1]  ;;  %v6126_v34 = vld [vmem:[#allocation5 + $0x34] sm:$0xff] }
  0xcb   : > { %v1838_v46 = vrot.slane %v1837_v26, 4  ;;  %v1870_v56 = vrot.slane %v1868_v29, 4  ;;  %v1879_v58 = vshrl.u32 %v4466_v42, 16  ;;  %v1882_v60 = vshll.u32 %v4466_v42, 16  ;;  %v1981_v26 = vld [vmem:[#allocation5 + $0x3e0] sm:$0xff] }
  0xcc   : > { %1555 = vmatpush1.bf16.msra.mxu0 %v4433_v30  ;;  %v1850_v30 = vshll.u32 %v4462_v4, 16  ;;  %v1888_v47 = vshll.u32 %v4467_v17, 16  ;;  %v4506_v2 = vcombine.high %v1971_v48, %v1973_v39  ;;  %v1874_v13 = vshll.u32 %v4465_v57, 16  ;;  %v3037_v42 = vld [vmem:[#allocation5 + $0x30] sm:$0xf] }
  0xcd   : > { %2287 = vmatprep.subr.bf16.mxu0 %v4486_v22  ;;  %v2689_v22 = vld [vmem:[#allocation5 + $0x268] sm:$0xff]  ;;  %v1843_v4 = vsel %vm5691_vm2, %v1838_v46, %v6080_v12  ;;  %v1871_v11 = vor.u32 %v1870_v56, %v6102_v52 }
  0xce   : > { %v4612_v37 = vcombine.high %v6087_v62, %v2689_v22  ;;  %v4611_v54 = vcombine.low %v6087_v62, %v2689_v22  ;;  %v6119_v20 = vrot.slane %v1888_v47, 5  ;;  %v2695_v62 = vld [vmem:[#allocation5 + $0x3e8] sm:$0xff] }
  0xcf   : > { %1573 = vmatmul.mubr.bf16.vlgmr.msra.gmra.mrb[32].mxu0 %v5240_v23  ;;  %v4498_v23 = vcombine.high %v1963_v14, %v1965_v15  ;;  %v4613_v14 = vcombine.low %v2690_v43, %v2691_v44  ;;  %v5243_v15 = vld [vmem:[%s5675_s27 + $0x30] sm:$0xff]  }
  0xd0   : > { %2207 = vmatmul.mubr.bf16.vlgmr.msra.gmra.mrb[32].mxu1 %v6061_v36  ;;  %1582 = vmatprep.mubr.bf16.mxu0 %v5448_v0 }
  0xd1   : > { %2809 = vmatpush1.bf16.msra.mxu1 %v4603_v38  ;;  %2216 = vmatprep.mubr.bf16.mxu1 %v5448_v0  ;;  %v1852_v38 = vrot.slane %v1850_v30, 5 }
  0xd2   : > { %2810 = vmatprep.subr.bf16.mxu1 %v4606_v41  ;;  %2288 = vmatpush1.bf16.msra.mxu0 %v4485_v10  ;;  %v4502_v41 = vcombine.high %v1967_v31, %v1969_v32  ;;  %v6098_v10 = vcombine.low %v1819_v6, %v1829_v24  ;;  %v1979_v24 = vld [vmem:[#allocation5 + $0x3a0] sm:$0xff] }
  0xd3   : > { %2289 = vmatprep.subr.bf16.mxu0 %v4490_v5  ;;  %v1857_v5 = vrot.slane %v1855_v33, 4  ;;  %v1853_v35 = vsel %vm5691_vm2, %v1848_v53, %v1852_v38  ;;  %v4470_v33 = vld [vmem:[%s5675_s27 + $0x58] sm:$0xf]  ;;  %v6128_v38 = vld [vmem:[#allocation5 + $0x74] sm:$0xff]  ;;  %v4514_v46 = vcombine.high %v1979_v24, %v1981_v26  ;;  %v4513_v57 = vcombine.low %v1979_v24, %v1981_v26 }
  0xd4   : > { %v6121_v22 = vcombine.low %v1843_v4, %v1853_v35  ;;  %v1912_v53 = vshll.u32 %v4470_v33, 16  ;;  %v4472_v4 = vld [vmem:[%s5675_s27 + $0x60] sm:$0xf]  ;;  %v4473_v35 = vld [vmem:[%s5675_s27 + $0x64] sm:$0xf] }
  0xd5   : > { %2811 = vmatpush1.bf16.msra.mxu1 %v4605_v55  ;;  %v4614_v55 = vcombine.high %v2690_v43, %v2691_v44  ;;  %v1861_v25 = vor.u32 %v1860_v51, %v1857_v5 }
  0xd6   : > { %2812 = vmatprep.subr.bf16.mxu1 %v4608_v59  ;;  %2290 = vmatpush1.bf16.msra.mxu0 %v4489_v45  ;;  %v1892_v59 = vshrl.u32 %v4467_v17, 16  ;;  %v6105_v45 = vld [vmem:[#allocation5 + $0x328] sm:$0xff]  ;;  %v3038_v17 = vld [vmem:[#allocation5 + $0x70] sm:$0xf] }
  0xd7   : > { %1583 = vmatmul.mubr.bf16.gmra.mrb[36].mxu0 %v5241_v16  ;;  %2291 = vmatprep.subr.bf16.mxu0 %v4494_v9  ;;  %v4501_v16 = vcombine.low %v1967_v31, %v1969_v32  ;;  %v1977_v9 = vld [vmem:[#allocation5 + $0x360] sm:$0xff]  ;;  %v4616_v12 = vcombine.high %v6105_v45, %v2693_v1  ;;  %v1862_v27 = vrot.slane %v1861_v25, 4  ;;  %v1872_v31 = vrot.slane %v1871_v11, 4 }
  0xd8   : > { %2217 = vmatmul.mubr.bf16.gmra.mrb[36].mxu1 %v6077_v3  ;;  %1592 = vmatprep.mubr.bf16.mxu0 %v5448_v0  ;;  %v1894_v6 = vrot.slane %v1892_v59, 4  ;;  %v4510_v30 = vcombine.high %v1975_v7, %v1977_v9  ;;  %v1876_v32 = vrot.slane %v1874_v13, 5  ;;  %v4615_v28 = vcombine.low %v6105_v45, %v2693_v1 }
  0xd9   : > { %2226 = vmatprep.mubr.bf16.mxu1 %v5448_v0  ;;  %2813 = vmatpush1.bf16.msra.mxu1 %v4607_v63  ;;  %v1881_v63 = vrot.slane %v1879_v58, 4  ;;  %v4750_v58 = vcombine.high %v6126_v34, %v6128_v38  ;;  %v6142_v47 = vcombine.low %v3037_v42, %v3038_v17  ;;  %v1914_v45 = vrot.slane %v1912_v53, 5  ;;  %v4564_v42 = vld [vmem:[%s5675_s27 + $0x10] sm:$0xf]  ;;  %v4565_v53 = vld [vmem:[%s5675_s27 + $0x14] sm:$0x1] }
  0xda   : > { %2814 = vmatprep.subr.bf16.mxu1 %v4610_v61  ;;  %2292 = vmatpush1.bf16.msra.mxu0 %v4493_v49  ;;  %v1884_v61 = vrot.slane %v1882_v60, 5  ;;  %v4505_v49 = vcombine.low %v1971_v48, %v1973_v39  ;;  %v1895_v43 = vor.u32 %v1894_v6, %v6119_v20  ;;  %v1867_v48 = vsel %vm5691_vm2, %v1862_v27, %v6102_v52  ;;  %v5244_v60 = vld [vmem:[%s5675_s27 + $0x3c] sm:$0xff]  }
  0xdb   : > { %2293 = vmatprep.subr.bf16.mxu0 %v4498_v23  ;;  %v4469_v23 = vld [vmem:[%s5675_s27 + $0x54] sm:$0xf]  ;;  %v1877_v39 = vsel %vm5691_vm2, %v1872_v31, %v1876_v32 }
  0xdc   : > { %v1885_v29 = vor.u32 %v1884_v61, %v1881_v63  ;;  %v1903_v44 = vshrl.u32 %v4469_v23, 16  ;;  %v6144_v59 = vcombine.low %v1867_v48, %v1877_v39  ;;  %v1936_v63 = vshll.u32 %v4473_v35, 16 }
  0xdd   : > { %2815 = vmatpush1.bf16.msra.mxu1 %v4609_v40  ;;  %v2694_v40 = vld [vmem:[#allocation5 + $0x3a8] sm:$0xff]  ;;  %v1940_v61 = vshrl.u32 %v4473_v35, 16 }
  0xde   : > { %2816 = vmatprep.subr.bf16.mxu1 %v4612_v37  ;;  %2294 = vmatpush1.bf16.msra.mxu0 %v4497_v21  ;;  %v4509_v37 = vcombine.low %v1975_v7, %v1977_v9  ;;  %v4618_v21 = vcombine.high %v2694_v40, %v2695_v62  ;;  %v4617_v5 = vcombine.low %v2694_v40, %v2695_v62  ;;  %v1886_v51 = vrot.slane %v1885_v29, 4 }
  0xdf   : > { %1593 = vmatmul.mubr.bf16.gmra.mrb[40].mxu0 %v5242_v50  ;;  %2295 = vmatprep.subr.bf16.mxu0 %v4502_v41  ;;  %v1898_v50 = vshll.u32 %v4468_v19, 16  ;;  %v1906_v41 = vshll.u32 %v4469_v23, 16  ;;  %v1938_v23 = vrot.slane %v1936_v63, 5  ;;  %v1942_v24 = vrot.slane %v1940_v61, 4  ;;  %v3041_v63 = vld [vmem:[#allocation5 + $0x130] sm:$0xf] }
  0xe0   : > { %2227 = vmatmul.mubr.bf16.gmra.mrb[40].mxu1 %v6098_v10  ;;  %1602 = vmatprep.mubr.bf16.mxu0 %v5448_v0  ;;  %v1891_v7 = vsel %vm5691_vm2, %v1886_v51, %v6119_v20  ;;  %v4567_v51 = vld [vmem:[%s5675_s27 + $0x1c] sm:$0xf]  ;;  %v3042_v61 = vld [vmem:[#allocation5 + $0x170] sm:$0xf] }
  0xe1   : > { %2236 = vmatprep.mubr.bf16.mxu1 %v5448_v0  ;;  %2817 = vmatpush1.bf16.msra.mxu1 %v4611_v54  ;;  %v1916_v54 = vshrl.u32 %v4470_v33, 16  ;;  %v1900_v56 = vrot.slane %v1898_v50, 5  ;;  %v1908_v52 = vrot.slane %v1906_v41, 5  ;;  %v1943_v33 = vor.u32 %v1942_v24, %v1938_v23  ;;  %v3043_v24 = vld [vmem:[#allocation5 + $0x1b0] sm:$0xf] }
  0xe2   : > { %2818 = vmatprep.subr.bf16.mxu1 %v4614_v55  ;;  %2296 = vmatpush1.bf16.msra.mxu0 %v4501_v16  ;;  %v1896_v55 = vrot.slane %v1895_v43, 4  ;;  %v1905_v16 = vrot.slane %v1903_v44, 4  ;;  %v2626_v41 = vrot.slane %v4564_v42, 5  ;;  %v3045_v42 = vld [vmem:[#allocation5 + $0x230] sm:$0xf] }
  0xe3   : > { %2297 = vmatprep.subr.bf16.mxu0 %v4506_v2  ;;  %v1918_v1 = vrot.slane %v1916_v54, 4  ;;  %v4471_v2 = vld [vmem:[%s5675_s27 + $0x5c] sm:$0x1]  ;;  %v5247_v54 = vld [vmem:[%s5675_s27 + $0x60] sm:$0xff]  }
  0xe4   : > { %v1901_v9 = vsel %vm5691_vm2, %v1896_v55, %v1900_v56  ;;  %v1909_v25 = vor.u32 %v1908_v52, %v1905_v16  ;;  %v1922_v13 = vshll.u32 %v4471_v2, 16  ;;  %v2628_v39 = vrot.slane %v2626_v41, 4  ;;  %v4568_v55 = vld [vmem:[%s5675_s27 + $0x20] sm:$0x1]  ;;  %v3512_v16 = vld [vmem:[#allocation5 + $0xb4] sm:$0xff] }
  0xe5   : > { %2819 = vmatpush1.bf16.msra.mxu1 %v4613_v14  ;;  %v1919_v11 = vor.u32 %v1918_v1, %v1914_v45  ;;  %v1927_v14 = vshrl.u32 %v4472_v4, 16  ;;  %v3513_v52 = vld [vmem:[#allocation5 + $0xf4] sm:$0xff]  ;;  %v3039_v1 = vld [vmem:[#allocation5 + $0xb0] sm:$0xf] }
  0xe6   : > { %2820 = vmatprep.subr.bf16.mxu1 %v4616_v12  ;;  %2298 = vmatpush1.bf16.msra.mxu0 %v4505_v49  ;;  %v5245_v12 = vld [vmem:[%s5675_s27 + $0x48] sm:$0xff]   ;;  %v6159_v49 = vcombine.low %v1891_v7, %v1901_v9  ;;  %v1910_v19 = vrot.slane %v1909_v25, 4  ;;  %v1924_v6 = vrot.slane %v1922_v13, 5  ;;  %v3040_v2 = vld [vmem:[#allocation5 + $0xf0] sm:$0xf]  ;;  %v2636_v9 = vrot.slane %v4568_v55, 5 }
  0xe7   : > { %1603 = vmatmul.mubr.bf16.gmra.mrb[44].mxu0 %v5243_v15  ;;  %2299 = vmatprep.subr.bf16.mxu0 %v4510_v30  ;;  %v1930_v15 = vshll.u32 %v4472_v4, 16  ;;  %v1920_v20 = vrot.slane %v1919_v11, 4  ;;  %v4474_v30 = vld [vmem:[%s5675_s27 + $0x68] sm:$0x1]  ;;  %v1929_v40 = vrot.slane %v1927_v14, 4  ;;  %v4749_v4 = vcombine.low %v6126_v34, %v6128_v38 }
  0xe8   : > { %2237 = vmatmul.mubr.bf16.gmra.mrb[44].mxu1 %v6121_v22  ;;  %1612 = vmatprep.mubr.bf16.mxu0 %v5448_v0  ;;  %v1946_v26 = vshll.u32 %v4474_v30, 16  ;;  %v1915_v27 = vsel %vm5691_vm2, %v1910_v19, %v1914_v45  ;;  %v4752_v25 = vcombine.high %v3512_v16, %v3513_v52  ;;  %v4570_v11 = vld [vmem:[%s5675_s27 + $0x28] sm:$0xf]  ;;  %v4569_v19 = vld [vmem:[%s5675_s27 + $0x24] sm:$0xe] }
  0xe9   : > { %2246 = vmatprep.mubr.bf16.mxu1 %v5448_v0  ;;  %2821 = vmatpush1.bf16.msra.mxu1 %v4615_v28  ;;  %v1932_v62 = vrot.slane %v1930_v15, 5  ;;  %v1925_v31 = vsel %vm5691_vm2, %v1920_v20, %v1924_v6  ;;  %v5246_v28 = vld [vmem:[%s5675_s27 + $0x54] sm:$0xff]   ;;  %v3514_v13 = vld [vmem:[#allocation5 + $0x134] sm:$0xff]  ;;  %v4678_v15 = vcombine.low %v3039_v1, %v3040_v2  ;;  %v4571_v20 = vld [vmem:[%s5675_s27 + $0x2c] sm:$0x1] }
  0xea   : > { %2822 = vmatprep.subr.bf16.mxu1 %v4618_v21  ;;  %2300 = vmatpush1.bf16.msra.mxu0 %v4509_v37  ;;  %v6170_v29 = vcombine.low %v1915_v27, %v1925_v31  ;;  %v1944_v37 = vrot.slane %v1943_v33, 4  ;;  %v1948_v21 = vrot.slane %v1946_v26, 5  ;;  %v3515_v14 = vld [vmem:[#allocation5 + $0x174] sm:$0xff]  ;;  %v3044_v26 = vld [vmem:[#allocation5 + $0x1f0] sm:$0xf]  ;;  %v4589_v27 = vrot.slane %v4569_v19, 9 }
  0xeb   : > { %2301 = vmatprep.subr.bf16.mxu0 %v4514_v46  ;;  %v1933_v32 = vor.u32 %v1932_v62, %v1929_v40  ;;  %v4563_v46 = vld [vmem:[%s5675_s27 + $0xc] sm:$0xe]  ;;  %v4754_v6 = vcombine.high %v3514_v13, %v3515_v14  ;;  %v3516_v30 = vld [vmem:[#allocation5 + $0x1b4] sm:$0xff]  ;;  %v4679_v62 = vcombine.low %v3041_v63, %v3042_v61  ;;  %v4753_v33 = vcombine.low %v3514_v13, %v3515_v14  ;;  %v4575_v14 = vld [vmem:[%s5675_s27 + $0x3c] sm:$0xe] }
  0xec   : > { %v1949_v44 = vsel %vm5691_vm2, %v1944_v37, %v1948_v21  ;;  %v4587_v48 = vrot.slane %v4563_v46, 9  ;;  %v3517_v40 = vld [vmem:[#allocation5 + $0x1f4] sm:$0xff]  ;;  %v4680_v21 = vcombine.low %v3043_v24, %v3044_v26  ;;  %v3052_v19 = vld [vmem:[#allocation5 + $0x3f0] sm:$0xf]  ;;  %v3951_v26 = vld [vmem:[#allocation5 + $0x3c] sm:$0xf] }
  0xed   : > { %2823 = vmatpush1.bf16.msra.mxu1 %v4617_v5  ;;  %v1934_v50 = vrot.slane %v1933_v32, 4  ;;  %v2629_v5 = vrot.slane %v4565_v53, 5  ;;  %v2643_v32 = vrot.slane %v4571_v20, 5  ;;  %v3519_v37 = vld [vmem:[#allocation5 + $0x274] sm:$0xff]  ;;  %v4755_v46 = vcombine.low %v3516_v30, %v3517_v40  ;;  %v4572_v53 = vld [vmem:[%s5675_s27 + $0x30] sm:$0xe] }
  0xee   : > { %2302 = vmatpush1.bf16.msra.mxu0 %v4513_v57  ;;  %3638 = vmatprep.subr.bf16.mxu1 %v4750_v58  ;;  %v2627_v56 = vsel %vm5781_vm5, %v4587_v48, %v2626_v41  ;;  %v2633_v58 = vrot.slane %v4567_v51, 5  ;;  %v3522_v2 = vld [vmem:[#allocation5 + $0x334] sm:$0xff]  ;;  %v4591_v20 = vrot.slane %v4575_v14, 9 }
  0xef   : > { %1613 = vmatmul.mubr.bf16.gmra.mrb[48].mxu0 %v5244_v60  ;;  %5046 = vmatprep.subr.bf16.mxu0 %v6142_v47  ;;  %v1939_v43 = vsel %vm5691_vm2, %v1934_v50, %v1938_v23  ;;  %v2630_v57 = vsel %vm5781_vm5, %v2628_v39, %v2629_v5  ;;  %v4566_v60 = vld [vmem:[%s5675_s27 + $0x18] sm:$0xe]  ;;  %v3518_v50 = vld [vmem:[#allocation5 + $0x234] sm:$0xff] }
  0xf0   : > { %2247 = vmatmul.mubr.bf16.gmra.mrb[48].mxu1 %v6144_v59  ;;  %1622 = vmatprep.mubr.bf16.mxu0 %v5448_v0  ;;  %v6183_v17 = vcombine.low %v1939_v43, %v1949_v44  ;;  %v4595_v45 = vcombine.low %v2627_v56, %v2630_v57  ;;  %v4588_v35 = vrot.slane %v4566_v60, 9  ;;  %v2635_v7 = vrot.slane %v2633_v58, 4  ;;  %v3046_v43 = vld [vmem:[#allocation5 + $0x270] sm:$0xf]  ;;  %v3520_v39 = vld [vmem:[#allocation5 + $0x2b4] sm:$0xff] }
  0xf1   : > { %2256 = vmatprep.mubr.bf16.mxu1 %v5448_v0  ;;  %v4758_v48 = vcombine.high %v3518_v50, %v3519_v37  ;;  %v3521_v5 = vld [vmem:[#allocation5 + $0x2f4] sm:$0xff]  ;;  %v4681_v51 = vcombine.low %v3045_v42, %v3046_v43  ;;  %v3047_v57 = vld [vmem:[#allocation5 + $0x2b0] sm:$0xf]  ;;  %v4590_v60 = vrot.slane %v4572_v53, 9 }
  0xf2   : > { %v2634_v34 = vsel %vm5781_vm5, %v4588_v35, %v2633_v58  ;;  %v2637_v38 = vsel %vm5781_vm5, %v2635_v7, %v2636_v9  ;;  %v3048_v58 = vld [vmem:[#allocation5 + $0x2f0] sm:$0xf]  ;;  %v4760_v1 = vcombine.high %v3520_v39, %v3521_v5 }
  0xf3   : > { %v4596_v23 = vcombine.low %v2634_v34, %v2637_v38  ;;  %v4682_v35 = vcombine.low %v3047_v57, %v3048_v58  ;;  %v3049_v7 = vld [vmem:[#allocation5 + $0x330] sm:$0xf]  ;;  %v3524_v34 = vld [vmem:[#allocation5 + $0x3b4] sm:$0xff]  ;;  %v4718_v57 = vld [vmem:[%s5675_s27 + $0x1c] sm:$0xf] }
  0xf4   : > { %v3050_v9 = vld [vmem:[#allocation5 + $0x370] sm:$0xf]  ;;  %v3525_v38 = vld [vmem:[#allocation5 + $0x3f4] sm:$0xff] }
  0xf5   : > { %v4683_v61 = vcombine.low %v3049_v7, %v3050_v9  ;;  %v4719_v7 = vld [vmem:[%s5675_s27 + $0x20] sm:$0x1] }
  0xf7   : > { %1623 = vmatmul.mubr.bf16.gmra.mrb[52].mxu0 %v5245_v12  ;;  %v2640_v12 = vrot.slane %v4570_v11, 5 }
  0xf8   : > { %2257 = vmatmul.mubr.bf16.gmra.mrb[52].mxu1 %v6159_v49  ;;  %1632 = vmatprep.mubr.bf16.mxu0 %v5448_v0 }
  0xf9   : > { %2266 = vmatprep.mubr.bf16.mxu1 %v5448_v0  ;;  %v2642_v31 = vrot.slane %v2640_v12, 4  ;;  %v2641_v44 = vsel %vm5781_vm5, %v4589_v27, %v2640_v12  ;;  %v3051_v12 = vld [vmem:[#allocation5 + $0x3b0] sm:$0xf]  ;;  %v3952_v27 = vld [vmem:[#allocation5 + $0x7c] sm:$0xf] }
  0xfa   : > { %v4684_v24 = vcombine.low %v3051_v12, %v3052_v19 }
  0xfb   : > { %v2644_v41 = vsel %vm5781_vm5, %v2642_v31, %v2643_v32 }
  0xfc   : > { %v4597_v56 = vcombine.low %v2641_v44, %v2644_v41  ;;  %v4582_v44 = vld [vmem:[%s5675_s27 + $0x58] sm:$0xf] }
  0xfd   : > { %v2668_v53 = vrot.slane %v4582_v44, 5 }
  0xff   : > { %1633 = vmatmul.mubr.bf16.gmra.mrb[56].mxu0 %v5246_v28  ;;  %v4573_v28 = vld [vmem:[%s5675_s27 + $0x34] sm:$0xf] }
 0x100   : > { %2267 = vmatmul.mubr.bf16.gmra.mrb[56].mxu1 %v6170_v29  ;;  %1642 = vmatprep.mubr.bf16.mxu0 %v5448_v0 }
 0x101   : > { %2276 = vmatprep.mubr.bf16.mxu1 %v5448_v0 }
 0x107   : > { %1643 = vmatmul.mubr.bf16.gmra.mrb[60].mxu0 %v5247_v54  ;;  %v4574_v54 = vld [vmem:[%s5675_s27 + $0x38] sm:$0x1] }
 0x108   : > { %2277 = vmatmul.mubr.bf16.gmra.mrb[60].mxu1 %v6183_v17  ;;  %2319 = vmatprep.mubr.bf16.mxu0 %v5448_v0 }
 0x109   : > { %2840 = vmatprep.mubr.bf16.mxu1 %v5448_v0 }
 0x10f   : > { %2320 = vmatmul.mubr.bf16.vlgmr.msra.gmra.mrb[64].mxu0 %v6061_v36  ;;  %v4751_v36 = vcombine.low %v3512_v16, %v3513_v52  ;;  %v2650_v16 = vrot.slane %v4574_v54, 5  ;;  %v4757_v52 = vcombine.low %v3518_v50, %v3519_v37  ;;  %v6238_v50 = vcombine.low %v3951_v26, %v3952_v27  ;;  %v4583_v54 = vld [vmem:[%s5675_s27 + $0x5c] sm:$0x1] }
 0x110   : > { %2841 = vmatmul.mubr.bf16.vlgmr.msra.gmra.mrb[64].mxu1 %v4595_v45  ;;  %2329 = vmatprep.mubr.bf16.mxu0 %v5448_v0  ;;  %v4576_v45 = vld [vmem:[%s5675_s27 + $0x40] sm:$0xf] }
 0x111   : > { %3639 = vmatpush1.bf16.msra.mxu1 %v4749_v4  ;;  %2850 = vmatprep.mubr.bf16.mxu1 %v5448_v0  ;;  %v3523_v4 = vld [vmem:[#allocation5 + $0x374] sm:$0xff]  ;;  %v2654_v13 = vrot.slane %v4576_v45, 5 }
 0x112   : > { %3640 = vmatprep.subr.bf16.mxu1 %v4752_v25  ;;  %5047 = vmatpush3.bf16.msra.mxu0 %v6142_v47  ;;  %v4756_v47 = vcombine.high %v3516_v30, %v3517_v40  ;;  %v4762_v63 = vcombine.high %v3522_v2, %v3523_v4  ;;  %v4761_v40 = vcombine.low %v3522_v2, %v3523_v4  ;;  %v3332_v2 = vshrl.u32 %v4718_v57, 16 }
 0x113   : > { %5048 = vmatprep.subr.bf16.mxu0 %v4678_v15  ;;  %v2655_v31 = vsel %vm5781_vm5, %v4591_v20, %v2654_v13 }
 0x114   : > { %v3334_v14 = vrot.slane %v3332_v2, 4  ;;  %v4725_v2 = vld [vmem:[%s5675_s27 + $0x38] sm:$0x1] }
 0x115   : > { %3641 = vmatpush1.bf16.msra.mxu1 %v4751_v36 }
 0x116   : > { %3642 = vmatprep.subr.bf16.mxu1 %v4754_v6  ;;  %5049 = vmatpush3.bf16.msra.mxu0 %v4678_v15  ;;  %v4577_v15 = vld [vmem:[%s5675_s27 + $0x44] sm:$0x1]  ;;  %v2656_v6 = vrot.slane %v2654_v13, 4 }
 0x117   : > { %2330 = vmatmul.mubr.bf16.gmra.mrb[68].mxu0 %v6077_v3  ;;  %5050 = vmatprep.subr.bf16.mxu0 %v4679_v62  ;;  %v2647_v3 = vrot.slane %v4573_v28, 5  ;;  %v2657_v30 = vrot.slane %v4577_v15, 5  ;;  %v4763_v28 = vcombine.low %v3524_v34, %v3525_v38  ;;  %v4720_v15 = vld [vmem:[%s5675_s27 + $0x24] sm:$0xf] }
 0x118   : > { %2851 = vmatmul.mubr.bf16.gmra.mrb[68].mxu1 %v4596_v23  ;;  %2339 = vmatprep.mubr.bf16.mxu0 %v5448_v0  ;;  %v4764_v23 = vcombine.high %v3524_v34, %v3525_v38  ;;  %v3338_v38 = vshll.u32 %v4719_v7, 16  ;;  %v3346_v12 = vshll.u32 %v4720_v15, 16 }
 0x119   : > { %2860 = vmatprep.mubr.bf16.mxu1 %v5448_v0  ;;  %3643 = vmatpush1.bf16.msra.mxu1 %v4753_v33  ;;  %v2649_v55 = vrot.slane %v2647_v3, 4  ;;  %v2648_v25 = vsel %vm5781_vm5, %v4590_v60, %v2647_v3  ;;  %v2658_v32 = vsel %vm5781_vm5, %v2656_v6, %v2657_v30  ;;  %v4584_v60 = vld [vmem:[%s5675_s27 + $0x60] sm:$0xe] }
 0x11a   : > { %3644 = vmatprep.subr.bf16.mxu1 %v4756_v47  ;;  %5051 = vmatpush3.bf16.msra.mxu0 %v4679_v62  ;;  %v4579_v62 = vld [vmem:[%s5675_s27 + $0x4c] sm:$0xf]  ;;  %v4580_v47 = vld [vmem:[%s5675_s27 + $0x50] sm:$0x1]  ;;  %v4599_v37 = vcombine.low %v2655_v31, %v2658_v32  ;;  %v4594_v4 = vrot.slane %v4584_v60, 9  ;;  %v3348_v26 = vrot.slane %v3346_v12, 5 }
 0x11b   : > { %5052 = vmatprep.subr.bf16.mxu0 %v4680_v21  ;;  %v2651_v11 = vsel %vm5781_vm5, %v2649_v55, %v2650_v16  ;;  %v2661_v33 = vrot.slane %v4579_v62, 5  ;;  %v2664_v43 = vrot.slane %v4580_v47, 5  ;;  %v3340_v31 = vrot.slane %v3338_v38, 5  ;;  %v4728_v38 = vld [vmem:[%s5675_s27 + $0x44] sm:$0x1] }
 0x11c   : > { %v4598_v36 = vcombine.low %v2648_v25, %v2651_v11 }
 0x11d   : > { %3645 = vmatpush1.bf16.msra.mxu1 %v4755_v46  ;;  %v2663_v42 = vrot.slane %v2661_v33, 4  ;;  %v4581_v46 = vld [vmem:[%s5675_s27 + $0x54] sm:$0xe] }
 0x11e   : > { %3646 = vmatprep.subr.bf16.mxu1 %v4758_v48  ;;  %5053 = vmatpush3.bf16.msra.mxu0 %v4680_v21 }
 0x11f   : > { %2340 = vmatmul.mubr.bf16.gmra.mrb[72].mxu0 %v6098_v10  ;;  %5054 = vmatprep.subr.bf16.mxu0 %v4681_v51  ;;  %v4759_v10 = vcombine.low %v3520_v39, %v3521_v5  ;;  %v2665_v3 = vsel %vm5781_vm5, %v2663_v42, %v2664_v43  ;;  %v2670_v39 = vrot.slane %v2668_v53, 4  ;;  %v2671_v5 = vrot.slane %v4583_v54, 5  ;;  %v3954_v42 = vld [vmem:[#allocation5 + $0xfc] sm:$0xf]  ;;  %v5249_v54 = vld [vmem:[%s5675_s27 + $0x24] sm:$0xff]  }
 0x120   : > { %2861 = vmatmul.mubr.bf16.gmra.mrb[72].mxu1 %v4597_v56  ;;  %2349 = vmatprep.mubr.bf16.mxu0 %v5448_v0  ;;  %v4585_v56 = vld [vmem:[%s5675_s27 + $0x64] sm:$0xf] }
 0x121   : > { %2870 = vmatprep.mubr.bf16.mxu1 %v5448_v0  ;;  %3647 = vmatpush1.bf16.msra.mxu1 %v4757_v52  ;;  %v2672_v52 = vsel %vm5781_vm5, %v2670_v39, %v2671_v5  ;;  %v2675_v45 = vrot.slane %v4585_v56, 5  ;;  %v4727_v39 = vld [vmem:[%s5675_s27 + $0x40] sm:$0xf] }
 0x122   : > { %3648 = vmatprep.subr.bf16.mxu1 %v4760_v1  ;;  %5055 = vmatpush3.bf16.msra.mxu0 %v4681_v51  ;;  %v4717_v51 = vld [vmem:[%s5675_s27 + $0x18] sm:$0xf]  ;;  %v3328_v1 = vshll.u32 %v4718_v57, 16  ;;  %v3955_v57 = vld [vmem:[#allocation5 + $0x13c] sm:$0xf]  ;;  %v3404_v7 = vshrl.u32 %v4727_v39, 16 }
 0x123   : > { %5056 = vmatprep.subr.bf16.mxu0 %v4682_v35  ;;  %v3319_v55 = vshrl.u32 %v4717_v51, 16  ;;  %v3322_v16 = vshll.u32 %v4717_v51, 16  ;;  %v2677_v11 = vrot.slane %v2675_v45, 4  ;;  %v5250_v51 = vld [vmem:[%s5675_s27 + $0x30] sm:$0xff]  }
 0x125   : > { %3649 = vmatpush1.bf16.msra.mxu1 %v4759_v10  ;;  %v3321_v9 = vrot.slane %v3319_v55, 4  ;;  %v3324_v25 = vrot.slane %v3322_v16, 5  ;;  %v3330_v10 = vrot.slane %v3328_v1, 5 }
 0x126   : > { %3650 = vmatprep.subr.bf16.mxu1 %v4762_v63  ;;  %5057 = vmatpush3.bf16.msra.mxu0 %v4682_v35  ;;  %v4721_v63 = vld [vmem:[%s5675_s27 + $0x28] sm:$0xf] }
 0x127   : > { %2350 = vmatmul.mubr.bf16.gmra.mrb[76].mxu0 %v6121_v22  ;;  %5058 = vmatprep.subr.bf16.mxu0 %v4683_v61  ;;  %v4578_v22 = vld [vmem:[%s5675_s27 + $0x48] sm:$0xe]  ;;  %v3325_v34 = vor.u32 %v3324_v25, %v3321_v9  ;;  %v3335_v20 = vor.u32 %v3334_v14, %v3330_v10  ;;  %v3356_v6 = vshrl.u32 %v4721_v63, 16 }
 0x128   : > { %2871 = vmatmul.mubr.bf16.gmra.mrb[76].mxu1 %v4598_v36  ;;  %2359 = vmatprep.mubr.bf16.mxu0 %v5448_v0  ;;  %v4592_v21 = vrot.slane %v4578_v22, 9  ;;  %v3343_v36 = vshrl.u32 %v4720_v15, 16  ;;  %v4724_v22 = vld [vmem:[%s5675_s27 + $0x34] sm:$0xf] }
 0x129   : > { %2880 = vmatprep.mubr.bf16.mxu1 %v5448_v0  ;;  %3651 = vmatpush1.bf16.msra.mxu1 %v4761_v40  ;;  %v5248_v40 = vld [vmem:[%s5675_s27 + $0x18] sm:$0xff]   ;;  %v3326_v62 = vrot.slane %v3325_v34, 4  ;;  %v3336_v27 = vrot.slane %v3335_v20, 4  ;;  %v3406_v20 = vrot.slane %v3404_v7, 4 }
 0x12a   : > { %3652 = vmatprep.subr.bf16.mxu1 %v4764_v23  ;;  %5059 = vmatpush3.bf16.msra.mxu0 %v4683_v61  ;;  %v2662_v41 = vsel %vm5781_vm5, %v4592_v21, %v2661_v33  ;;  %v2676_v61 = vsel %vm5781_vm5, %v4594_v4, %v2675_v45  ;;  %v4722_v23 = vld [vmem:[%s5675_s27 + $0x2c] sm:$0x1]  ;;  %v3358_v33 = vrot.slane %v3356_v6, 4 }
 0x12b   : > { %5060 = vmatprep.subr.bf16.mxu0 %v4684_v24  ;;  %v4600_v48 = vcombine.low %v2662_v41, %v2665_v3  ;;  %v3362_v47 = vshll.u32 %v4722_v23, 16  ;;  %v3953_v21 = vld [vmem:[#allocation5 + $0xbc] sm:$0xf]  ;;  %v3341_v3 = vsel %vm5691_vm2, %v3336_v27, %v3340_v31 }
 0x12c   : > { %v5252_v31 = vld [vmem:[%s5675_s27 + $0x48] sm:$0xff]  }
 0x12d   : > { %3653 = vmatpush1.bf16.msra.mxu1 %v4763_v28  ;;  %v4723_v28 = vld [vmem:[%s5675_s27 + $0x30] sm:$0xf]  ;;  %v3364_v56 = vrot.slane %v3362_v47, 5  ;;  %v3961_v47 = vld [vmem:[#allocation5 + $0x2bc] sm:$0xf] }
 0x12e   : > { %5061 = vmatpush3.bf16.msra.mxu0 %v4684_v24  ;;  %v3345_v24 = vrot.slane %v3343_v36, 4  ;;  %v3367_v44 = vshrl.u32 %v4723_v28, 16  ;;  %v3370_v41 = vshll.u32 %v4723_v28, 16  ;;  %v3960_v28 = vld [vmem:[#allocation5 + $0x27c] sm:$0xf] }
 0x12f   : > { %2360 = vmatmul.mubr.bf16.gmra.mrb[80].mxu0 %v6144_v59  ;;  %5078 = vmatprep.subr.bf16.mxu0 %v6238_v50  ;;  %v4593_v59 = vrot.slane %v4581_v46, 9  ;;  %v3376_v46 = vshll.u32 %v4724_v22, 16 }
 0x130   : > { %2881 = vmatmul.mubr.bf16.gmra.mrb[80].mxu1 %v4599_v37  ;;  %2369 = vmatprep.mubr.bf16.mxu0 %v5448_v0  ;;  %v3331_v37 = vsel %vm5691_vm2, %v3326_v62, %v3330_v10  ;;  %v3349_v43 = vor.u32 %v3348_v26, %v3345_v24  ;;  %v3372_v60 = vrot.slane %v3370_v41, 5  ;;  %v5251_v10 = vld [vmem:[%s5675_s27 + $0x3c] sm:$0xff]   ;;  %v3959_v26 = vld [vmem:[#allocation5 + $0x23c] sm:$0xf]  ;;  %v6315_v41 = vld [vmem:[%s5675_s27 + $0x28] sm:$0xf] }
 0x131   : > { %2890 = vmatprep.mubr.bf16.mxu1 %v5448_v0  ;;  %v2669_v58 = vsel %vm5781_vm5, %v4593_v59, %v2668_v53  ;;  %v3380_v53 = vshrl.u32 %v4724_v22, 16  ;;  %v4726_v59 = vld [vmem:[%s5675_s27 + $0x3c] sm:$0xf]  ;;  %v4741_v5 = vcombine.low %v3331_v37, %v3341_v3  ;;  %v6290_v45 = vrot.slane %v3376_v46, 5  ;;  %v3962_v37 = vld [vmem:[#allocation5 + $0x2fc] sm:$0xf] }
 0x132   : > { %v4601_v35 = vcombine.low %v2669_v58, %v2672_v52  ;;  %v3369_v58 = vrot.slane %v3367_v44, 4  ;;  %v3350_v55 = vrot.slane %v3349_v43, 4  ;;  %v3956_v52 = vld [vmem:[#allocation5 + $0x17c] sm:$0xf]  ;;  %v3394_v4 = vshll.u32 %v4726_v59, 16 }
 0x133   : > { %v3382_v1 = vrot.slane %v3380_v53, 4  ;;  %v4871_v9 = vcombine.low %v3955_v57, %v3956_v52  ;;  %v3410_v22 = vshll.u32 %v4728_v38, 16  ;;  %v4829_v43 = vld [vmem:[%s5675_s27 + $0x18] sm:$0xe]  ;;  %v3963_v3 = vld [vmem:[#allocation5 + $0x33c] sm:$0xf]  ;;  %v4874_v7 = vcombine.low %v3961_v47, %v3962_v37 }
 0x134   : > { %v3373_v25 = vor.u32 %v3372_v60, %v3369_v58  ;;  %v3396_v12 = vrot.slane %v3394_v4, 5  ;;  %v4831_v46 = vld [vmem:[%s5675_s27 + $0x20] sm:$0x1]  ;;  %v4834_v57 = vld [vmem:[%s5675_s27 + $0x2c] sm:$0x1] }
 0x135   : > { %v3383_v34 = vor.u32 %v3382_v1, %v6290_v45  ;;  %v6328_v60 = vrot.slane %v3410_v22, 5  ;;  %v6332_v52 = vld [vmem:[%s5675_s27 + $0x34] sm:$0xf]  ;;  %v6366_v22 = vld [vmem:[%s7043_s2] ss:$0 sm:$0xff] }
 0x136   : > { %v3374_v24 = vrot.slane %v3373_v25, 4  ;;  %v4732_v4 = vld [vmem:[%s5675_s27 + $0x54] sm:$0xf]  ;;  %v3911_v38 = vrot.slane %v6332_v52, 5 }
 0x137   : > { %2370 = vmatmul.mubr.bf16.gmra.mrb[84].mxu0 %v6159_v49  ;;  %v4586_v49 = vld [vmem:[%s5675_s27 + $0x68] sm:$0x1] }
 0x138   : > { %2891 = vmatmul.mubr.bf16.gmra.mrb[84].mxu1 %v4600_v48  ;;  %2379 = vmatprep.mubr.bf16.mxu0 %v5448_v0  ;;  %v2678_v13 = vrot.slane %v4586_v49, 5  ;;  %v4870_v48 = vcombine.low %v3953_v21, %v3954_v42  ;;  %v3391_v49 = vshrl.u32 %v4726_v59, 16  ;;  %v3913_v37 = vrot.slane %v3911_v38, 4 }
 0x139   : > { %2900 = vmatprep.mubr.bf16.mxu1 %v5448_v0 }
 0x13a   : > { %v2679_v19 = vsel %vm5781_vm5, %v2677_v11, %v2678_v13  ;;  %v4729_v11 = vld [vmem:[%s5675_s27 + $0x48] sm:$0xf]  ;;  %v4730_v13 = vld [vmem:[%s5675_s27 + $0x4c] sm:$0xf]  ;;  %v3393_v36 = vrot.slane %v3391_v49, 4  ;;  %v3900_v49 = vrot.slane %v4831_v46, 5 }
 0x13b   : > { %v4602_v30 = vcombine.low %v2676_v61, %v2679_v19  ;;  %v3958_v61 = vld [vmem:[#allocation5 + $0x1fc] sm:$0xf]  ;;  %v3415_v6 = vshrl.u32 %v4729_v11, 16  ;;  %v3428_v62 = vshrl.u32 %v4730_v13, 16  ;;  %v6380_v46 = vld [vmem:[%s5675_s27 + $0x40] sm:$0xf] }
 0x13c   : > { %v3397_v21 = vor.u32 %v3396_v12, %v3393_v36  ;;  %v4733_v36 = vld [vmem:[%s5675_s27 + $0x58] sm:$0xf]  ;;  %v3439_v12 = vshrl.u32 %v4732_v4, 16 }
 0x13d   : > { %v3417_v53 = vrot.slane %v3415_v6, 4  ;;  %v3430_v59 = vrot.slane %v3428_v62, 4 }
 0x13f   : > { %2380 = vmatmul.mubr.bf16.gmra.mrb[88].mxu0 %v6170_v29  ;;  %v3352_v29 = vshll.u32 %v4721_v63, 16  ;;  %v3957_v63 = vld [vmem:[#allocation5 + $0x1bc] sm:$0xf] }
 0x140   : > { %2901 = vmatmul.mubr.bf16.gmra.mrb[88].mxu1 %v4601_v35  ;;  %2389 = vmatprep.mubr.bf16.mxu0 %v5448_v0  ;;  %v3400_v35 = vshll.u32 %v4727_v39, 16  ;;  %v4872_v27 = vcombine.low %v3957_v63, %v3958_v61  ;;  %v3379_v39 = vsel %vm5691_vm2, %v3374_v24, %v6290_v45  ;;  %v3398_v45 = vrot.slane %v3397_v21, 4  ;;  %v4835_v61 = vld [vmem:[%s5675_s27 + $0x30] sm:$0xe] }
 0x141   : > { %2910 = vmatprep.mubr.bf16.mxu1 %v5448_v0  ;;  %v6275_v32 = vrot.slane %v3352_v29, 5  ;;  %v6308_v29 = vld [vmem:[%s5675_s27 + $0x1c] sm:$0xf]  ;;  %v3907_v63 = vrot.slane %v4834_v57, 5  ;;  %v3441_v21 = vrot.slane %v3439_v12, 4 }
 0x142   : > { %v6305_v19 = vrot.slane %v3400_v35, 5  ;;  %v3897_v44 = vrot.slane %v6308_v29, 5  ;;  %v5253_v35 = vld [vmem:[%s5675_s27 + $0x54] sm:$0xff]   ;;  %v4735_v57 = vld [vmem:[%s5675_s27 + $0x60] sm:$0xf] }
 0x143   : > { %v3355_v14 = vsel %vm5691_vm2, %v3350_v55, %v6275_v32  ;;  %v4853_v55 = vrot.slane %v4829_v43, 9 }
 0x144   : > { %v3407_v42 = vor.u32 %v3406_v20, %v6305_v19  ;;  %v3442_v20 = vshll.u32 %v4732_v4, 16  ;;  %v3403_v29 = vsel %vm5691_vm2, %v3398_v45, %v6305_v19  ;;  %v6401_v45 = vld [vmem:[%s5675_s27 + $0x44] sm:$0x1] }
 0x146   : > { %v3408_v1 = vrot.slane %v3407_v42, 4  ;;  %v3444_v42 = vrot.slane %v3442_v20, 5 }
 0x147   : > { %2390 = vmatmul.mubr.bf16.gmra.mrb[92].mxu0 %v6183_v17  ;;  %v3359_v17 = vor.u32 %v3358_v33, %v6275_v32  ;;  %v3384_v32 = vrot.slane %v3383_v34, 4  ;;  %v4837_v34 = vld [vmem:[%s5675_s27 + $0x38] sm:$0x1] }
 0x148   : > { %2911 = vmatmul.mubr.bf16.gmra.mrb[92].mxu1 %v4602_v30  ;;  %5062 = vmatprep.mubr.bf16.mxu0 %v5248_v40  ;;  %v3418_v30 = vshll.u32 %v4729_v11, 16  ;;  %v3424_v40 = vshll.u32 %v4730_v13, 16  ;;  %v3413_v6 = vsel %vm5691_vm2, %v3408_v1, %v6328_v60  ;;  %v4736_v1 = vld [vmem:[%s5675_s27 + $0x64] sm:$0xf] }
 0x149   : > { %3670 = vmatprep.mubr.bf16.mxu1 %v5448_v0  ;;  %v3360_v16 = vrot.slane %v3359_v17, 4  ;;  %v3964_v17 = vld [vmem:[#allocation5 + $0x37c] sm:$0xf] }
 0x14b   : > { %v3365_v15 = vsel %vm5691_vm2, %v3360_v16, %v3364_v56  ;;  %v4832_v56 = vld [vmem:[%s5675_s27 + $0x24] sm:$0xe]  ;;  %v3904_v16 = vrot.slane %v6315_v41, 5 }
 0x14c   : > { %v4742_v23 = vcombine.low %v3355_v14, %v3365_v15  ;;  %v6339_v14 = vcombine.low %v3963_v3, %v3964_v17  ;;  %v4854_v15 = vrot.slane %v4832_v56, 9  ;;  %v4734_v17 = vld [vmem:[%s5675_s27 + $0x5c] sm:$0x1]  ;;  %v4838_v56 = vld [vmem:[%s5675_s27 + $0x3c] sm:$0xe] }
 0x14e   : > { %v6361_v19 = vsel %vm5781_vm5, %v4854_v15, %v3904_v16  ;;  %v4841_v15 = vld [vmem:[%s5675_s27 + $0x48] sm:$0xe] }
 0x14f   : > { %5063 = vmatmul.mubr.bf16.vlgmr.msra.gmra.mrb[96].mxu0 %v5249_v54  ;;  %v3420_v54 = vrot.slane %v3418_v30, 5  ;;  %v3965_v30 = vld [vmem:[#allocation5 + $0x3bc] sm:$0xf] }
 0x150   : > { %3671 = vmatmul.mubr.bf16.vlgmr.msra.gmra.mrb[96].mxu1 %v4741_v5  ;;  %5079 = vmatpush3.bf16.msra.mxu0 %v6238_v50  ;;  %v3386_v50 = vshll.u32 %v4725_v2, 16  ;;  %v4873_v5 = vcombine.low %v3959_v26, %v3960_v28  ;;  %v3899_v2 = vrot.slane %v3897_v44, 4  ;;  %v3452_v28 = vshrl.u32 %v4733_v36, 16 }
 0x151   : > { %5080 = vmatprep.subr.bf16.mxu0 %v4870_v48  ;;  %5066 = vmatprep.mubr.bf16.mxu0 %v5250_v51  ;;  %v4731_v51 = vld [vmem:[%s5675_s27 + $0x50] sm:$0x1]  ;;  %v3421_v25 = vor.u32 %v3420_v54, %v3417_v53 }
 0x152   : > { %3680 = vmatprep.mubr.bf16.mxu1 %v5448_v0  ;;  %v3388_v33 = vrot.slane %v3386_v50, 5  ;;  %v3434_v13 = vshll.u32 %v4731_v51, 16  ;;  %v3906_v50 = vrot.slane %v3904_v16, 4  ;;  %v6357_v62 = vsel %vm5781_vm5, %v3899_v2, %v3900_v49 }
 0x153   : > { %v3422_v24 = vrot.slane %v3421_v25, 4  ;;  %v3454_v52 = vrot.slane %v3452_v28, 4  ;;  %v4842_v25 = vld [vmem:[%s5675_s27 + $0x4c] sm:$0xf] }
 0x154   : > { %5081 = vmatpush3.bf16.msra.mxu0 %v4870_v48  ;;  %v6318_v48 = vrot.slane %v3424_v40, 5  ;;  %v3389_v58 = vsel %vm5691_vm2, %v3384_v32, %v3388_v33  ;;  %v6353_v40 = vsel %vm5781_vm5, %v4853_v55, %v3897_v44  ;;  %v3914_v32 = vrot.slane %v4837_v34, 5  ;;  %v5255_v44 = vld [vmem:[%s5675_s27 + $0x6c] sm:$0xff]  }
 0x155   : > { %5082 = vmatprep.subr.bf16.mxu0 %v4871_v9  ;;  %v3448_v33 = vshll.u32 %v4733_v36, 16  ;;  %v6370_v47 = vsel %vm5781_vm5, %v3906_v50, %v3907_v63  ;;  %v4861_v3 = vcombine.low %v6353_v40, %v6357_v62  ;;  %v3463_v63 = vshrl.u32 %v4735_v57, 16  ;;  %v4737_v40 = vld [vmem:[%s5675_s27 + $0x68] sm:$0x1] }
 0x156   : > { %v3431_v11 = vor.u32 %v3430_v59, %v6318_v48  ;;  %v4744_v59 = vcombine.low %v3403_v29, %v3413_v6  ;;  %v4862_v16 = vcombine.low %v6361_v19, %v6370_v47  ;;  %v6407_v4 = vsel %vm5781_vm5, %v3913_v37, %v3914_v32  ;;  %v4843_v6 = vld [vmem:[%s5675_s27 + $0x50] sm:$0x1]  ;;  %v4738_v37 = vld [vmem:[%s5675_s27 + $0x6c] sm:$0xf] }
 0x157   : > { %5067 = vmatmul.mubr.bf16.gmra.mrb[100].mxu0 %v5251_v10  ;;  %v4743_v10 = vcombine.low %v3379_v39, %v3389_v58  ;;  %v3427_v39 = vsel %vm5691_vm2, %v3422_v24, %v6318_v48  ;;  %v6398_v48 = vrot.slane %v3448_v33, 5  ;;  %v4856_v50 = vrot.slane %v4838_v56, 9  ;;  %v4739_v56 = vld [vmem:[%s5675_s27 + $0x70] sm:$0xf] }
 0x158   : > { %3681 = vmatmul.mubr.bf16.gmra.mrb[100].mxu1 %v4742_v23  ;;  %5083 = vmatpush3.bf16.msra.mxu0 %v4871_v9  ;;  %v5254_v9 = vld [vmem:[%s5675_s27 + $0x60] sm:$0xff]   ;;  %v3966_v23 = vld [vmem:[#allocation5 + $0x3fc] sm:$0xf]  ;;  %v3432_v26 = vrot.slane %v3431_v11, 4  ;;  %v3476_v36 = vshrl.u32 %v4736_v1, 16  ;;  %v3921_v24 = vrot.slane %v6401_v45, 5 }
 0x159   : > { %5084 = vmatprep.subr.bf16.mxu0 %v4872_v27  ;;  %5070 = vmatprep.mubr.bf16.mxu0 %v5252_v31  ;;  %v4855_v31 = vrot.slane %v4835_v61, 9  ;;  %v6374_v41 = vcombine.low %v3965_v30, %v3966_v23  ;;  %v3466_v61 = vshll.u32 %v4735_v57, 16  ;;  %v3455_v29 = vor.u32 %v3454_v52, %v6398_v48 }
 0x15a   : > { %3690 = vmatprep.mubr.bf16.mxu1 %v5448_v0  ;;  %v3925_v30 = vrot.slane %v4842_v25, 5  ;;  %v3465_v33 = vrot.slane %v3463_v63, 4  ;;  %v3490_v25 = vshll.u32 %v4738_v37, 16 }
 0x15b   : > { %v6389_v51 = vsel %vm5781_vm5, %v4855_v31, %v3911_v38  ;;  %v3472_v38 = vshll.u32 %v4736_v1, 16  ;;  %v3468_v28 = vrot.slane %v3466_v61, 5  ;;  %v3482_v1 = vshll.u32 %v4737_v40, 16 }
 0x15c   : > { %5085 = vmatpush3.bf16.msra.mxu0 %v4872_v27  ;;  %v3436_v27 = vrot.slane %v3434_v13, 5  ;;  %v4863_v20 = vcombine.low %v6389_v51, %v6407_v4  ;;  %v4844_v51 = vld [vmem:[%s5675_s27 + $0x54] sm:$0xe] }
 0x15d   : > { %5086 = vmatprep.subr.bf16.mxu0 %v4873_v5  ;;  %v3469_v4 = vor.u32 %v3468_v28, %v3465_v33  ;;  %v3484_v19 = vrot.slane %v3482_v1, 5  ;;  %v4858_v47 = vrot.slane %v4844_v51, 9 }
 0x15f   : > { %5071 = vmatmul.mubr.bf16.gmra.mrb[104].mxu0 %v5253_v35  ;;  %v3445_v35 = vor.u32 %v3444_v42, %v3441_v21 }
 0x160   : > { %3691 = vmatmul.mubr.bf16.gmra.mrb[104].mxu1 %v4743_v10  ;;  %5087 = vmatpush3.bf16.msra.mxu0 %v4873_v5  ;;  %v3437_v5 = vsel %vm5691_vm2, %v3432_v26, %v3436_v27  ;;  %v4857_v26 = vrot.slane %v4841_v15, 9  ;;  %v3500_v15 = vshrl.u32 %v4739_v56, 16 }
 0x161   : > { %5088 = vmatprep.subr.bf16.mxu0 %v4874_v7  ;;  %5074 = vmatprep.mubr.bf16.mxu0 %v5254_v9  ;;  %v3918_v9 = vrot.slane %v6380_v46, 5  ;;  %v4745_v34 = vcombine.low %v3427_v39, %v3437_v5  ;;  %v6427_v62 = vrot.slane %v3445_v35, 4  ;;  %v6443_v46 = vrot.slane %v3472_v38, 5  ;;  %v4740_v38 = vld [vmem:[%s5675_s27 + $0x74] sm:$0x1] }
 0x162   : > { %v5000_v43 = vpop.f32.mrb[0].mxu0  ;;  %3700 = vmatprep.mubr.bf16.mxu1 %v5448_v0  ;;  %v869_v53 = vpop.f32.mrb[0].mxu1  ;;  %v3456_v39 = vrot.slane %v3455_v29, 4  ;;  %v3927_v5 = vrot.slane %v3925_v30, 4  ;;  %v3926_v45 = vsel %vm5781_vm5, %v4857_v26, %v3925_v30 }
 0x163   : > { %v387_v54 = vpop.f32.mrb[1].mxu0  ;;  %v6394_v60 = vpop.f32.mrb[1].mxu1  ;;  %v3920_v23 = vrot.slane %v3918_v9, 4  ;;  %v458_v27 = vadd.f32 %v5000_v43, %v6366_v22  ;;  %v3478_v43 = vrot.slane %v3476_v36, 4  ;;  %v4847_v36 = vld [vmem:[%s5675_s27 + $0x60] sm:$0xe] }
 0x164   : > { %v456_v58 = vadd.f32 %v6366_v22, %v387_v54  ;;  %v5001_v55 = vpop.f32.mrb[2].mxu0  ;;  %5089 = vmatpush3.bf16.msra.mxu0 %v4874_v7  ;;  %v873_v2 = vpop.f32.mrb[2].mxu1  ;;  %v3458_v7 = vshll.u32 %v4734_v17, 16  ;;  %v3928_v17 = vrot.slane %v4843_v6, 5  ;;  %v3470_v6 = vrot.slane %v3469_v4, 4 }
 0x165   : > { %v390_v49 = vpop.f32.mrb[3].mxu0  ;;  %5090 = vmatprep.subr.bf16.mxu0 %v6339_v14  ;;  %v6414_v10 = vpop.f32.mrb[3].mxu1  ;;  %v3922_v52 = vsel %vm5781_vm5, %v3920_v23, %v3921_v24 }
 0x166   : > { %v6411_v11 = vadd.f32 %v869_v53, %v456_v58  ;;  %v457_v13 = vadd.f32 %v6366_v22, %v390_v49  ;;  %v6436_v32 = vrot.slane %v3458_v7, 5  ;;  %v3487_v7 = vshrl.u32 %v4738_v37, 16 }
 0x167   : > { %5075 = vmatmul.mubr.bf16.gmra.mrb[108].mxu0 %v5255_v44  ;;  %v6441_v44 = vsel %vm5781_vm5, %v4856_v50, %v3918_v9  ;;  %v4848_v9 = vld [vmem:[%s5675_s27 + $0x64] sm:$0xf]  ;;  %v3929_v50 = vsel %vm5781_vm5, %v3927_v5, %v3928_v17  ;;  %v4851_v17 = vld [vmem:[%s5675_s27 + $0x70] sm:$0xf] }
 0x168   : > { %v6417_v12 = vadd.f32 %v873_v2, %v457_v13  ;;  %3701 = vmatmul.mubr.bf16.gmra.mrb[108].mxu1 %v4744_v59  ;;  %5091 = vmatpush3.bf16.msra.mxu0 %v6339_v14  ;;  %v6431_v14 = vld [vmem:[%s5675_s27 + $0x58] sm:$0xf]  ;;  %v3496_v13 = vshll.u32 %v4739_v56, 16  ;;  %v3461_v63 = vsel %vm5691_vm2, %v3456_v39, %v6436_v32  ;;  %v4864_v61 = vcombine.low %v6441_v44, %v3922_v52 }
 0x169   : > { %5092 = vmatprep.subr.bf16.mxu0 %v6374_v41  ;;  %3710 = vmatprep.mubr.bf16.mxu1 %v5448_v0  ;;  %v3932_v35 = vrot.slane %v6431_v14, 5  ;;  %v3939_v29 = vrot.slane %v4848_v9, 5  ;;  %v3489_v40 = vrot.slane %v3487_v7, 4  ;;  %v3492_v14 = vrot.slane %v3490_v25, 5  ;;  %v4850_v7 = vld [vmem:[%s5675_s27 + $0x6c] sm:$0xe] }
 0x16a   : > { %v6434_v31 = vpop.f32.mrb[4].mxu0  ;;  %5094 = vmatprep.mubr.bf16.mxu0 %v4861_v3  ;;  %v879_v21 = vpop.f32.mrb[4].mxu1  ;;  %v459_v3 = vadd.f32 %v5001_v55, %v6366_v22  ;;  %v3451_v55 = vsel %vm5691_vm2, %v6427_v62, %v6398_v48  ;;  %v3479_v48 = vor.u32 %v3478_v43, %v6443_v46  ;;  %v4849_v62 = vld [vmem:[%s5675_s27 + $0x68] sm:$0x1]  ;;  %v3502_v32 = vrot.slane %v3500_v15, 4 }
 0x16b   : > { %v403_v42 = vpop.f32.mrb[5].mxu0  ;;  %v6446_v53 = vadd.f32 %v879_v21, %v458_v27  ;;  %v6448_v54 = vpop.f32.mrb[5].mxu1  ;;  %v3934_v30 = vrot.slane %v3932_v35, 4  ;;  %v6489_v27 = vrot.slane %v3496_v13, 5  ;;  %v4746_v21 = vcombine.low %v3451_v55, %v3461_v63  ;;  %v4852_v9 = vld [vmem:[%s5675_s27 + $0x74] sm:$0x1] }
 0x16c   : > { %v6450_v59 = vpop.f32.mrb[6].mxu0  ;;  %5093 = vmatpush3.bf16.msra.mxu0 %v6374_v41  ;;  %v883_v57 = vpop.f32.mrb[6].mxu1  ;;  %v4846_v41 = vld [vmem:[%s5675_s27 + $0x5c] sm:$0x1]  ;;  %v3480_v26 = vrot.slane %v3479_v48, 4  ;;  %v4865_v44 = vcombine.low %v3926_v45, %v3929_v50  ;;  %v4859_v39 = vrot.slane %v4847_v36, 9  ;;  %v3933_v55 = vsel %vm5781_vm5, %v4858_v47, %v3932_v35 }
 0x16d   : > { %v406_v58 = vpop.f32.mrb[7].mxu0  ;;  %v6464_v2 = vadd.f32 %v883_v57, %v459_v3  ;;  %v6466_v49 = vpop.f32.mrb[7].mxu1  ;;  %v3941_v5 = vrot.slane %v3939_v29, 4  ;;  %v3942_v51 = vrot.slane %v4849_v62, 5  ;;  %v3506_v52 = vshll.u32 %v4740_v38, 16  ;;  %s5319_s27 = sshll.u32 %s5449_s25, 4  ;;  %s5320_s27 = int_to_ptr.vmem [resolvable:$false] %s5319_s27 }
 0x16e   : > { %v461_v33 = vadd.f32 %v6366_v22, %v406_v58  ;;  %v3475_v58 = vsel %vm5691_vm2, %v3470_v6, %v6443_v46  ;;  %v3485_v45 = vsel %vm5691_vm2, %v3480_v26, %v3484_v19  ;;  %v3503_v4 = vor.u32 %v3502_v32, %v6489_v27  ;;  %s5321_s29 = scalar_lea.vmem %s5320_s27, 16384  ;;  %p5322_p13 = scmp.lt.s32.totalorder %s6974_s19, %s5320_s27 }
 0x16f   : > { %5095 = vmatmul.mubr.bf16.vlgmr.msra.gmra.mrb[112].mxu0 %v4862_v16  ;;  %v3935_v16 = vrot.slane %v4846_v41, 5  ;;  %v3493_v41 = vor.u32 %v3492_v14, %v3489_v40  ;;  %v3946_v48 = vrot.slane %v4851_v17, 5  ;;  %v3940_v46 = vsel %vm5781_vm5, %v4859_v39, %v3939_v29  ;;  %p5323_p0 = scmp.lt.s32.totalorder %s5321_s29, %s5315_s24 }
 0x170   : > { %3711 = vmatmul.mubr.bf16.gmra.mrb[112].mxu1 %v4745_v34  ;;  %5098 = vmatprep.mubr.bf16.mxu0 %v4863_v20  ;;  %v460_v34 = vadd.f32 %v6366_v22, %v403_v42  ;;  %v3943_v35 = vsel %vm5781_vm5, %v3941_v5, %v3942_v51  ;;  %v462_v25 = vadd.f32 %v6434_v31, %v6366_v22  ;;  %v4860_v38 = vrot.slane %v4850_v7, 9 }
 0x171   : > { %3720 = vmatprep.mubr.bf16.mxu1 %v5448_v0  ;;  %v3936_v1 = vsel %vm5781_vm5, %v3934_v30, %v3935_v16  ;;  %v4747_v15 = vcombine.low %v3475_v58, %v3485_v45  ;;  %v3494_v47 = vrot.slane %v3493_v41, 4  ;;  %v3504_v16 = vrot.slane %v3503_v4, 4  ;;  %p5324_p2 = por %p5323_p0, %p5322_p13 }
 0x172   : > { %v6484_v20 = vpop.f32.mrb[8].mxu0  ;;  %v4866_v63 = vcombine.low %v3933_v55, %v3936_v1  ;;  %v3949_v36 = vrot.slane %v4852_v9, 5  ;;  %v463_v29 = vadd.f32 %v6450_v59, %v6366_v22  ;;  %v4867_v31 = vcombine.low %v3940_v46, %v3943_v35 }
 0x173   : > { %v889_v23 = vpop.f32.mrb[8].mxu1  ;;  %v6487_v24 = vpop.f32.mrb[9].mxu0  ;;  %v3948_v40 = vrot.slane %v3946_v48, 4  ;;  %v3499_v32 = vsel %vm5691_vm2, %v3494_v47, %v6489_v27  ;;  %v996_v17 = vadd.f32 %v6366_v22, %v6394_v60  ;;  %v466_v9 = vadd.f32 %v6484_v20, %v6366_v22  ;;  %p5325_p5 = pnand %p5324_p2, %p5318_p11 }
 0x174   : > { %v6492_v28 = vadd.f32 %v889_v23, %v460_v34  ;;  %v6494_v37 = vpop.f32.mrb[9].mxu1  ;;  %v6496_v42 = vpop.f32.mrb[10].mxu0  ;;  %v464_v27 = vadd.f32 %v6366_v22, %v6487_v24 }
 0x175   : > { %v893_v43 = vpop.f32.mrb[10].mxu1  ;;  %v422_v3 = vpop.f32.mrb[11].mxu0 }
 0x176   : > { %v6499_v56 = vadd.f32 %v893_v43, %v461_v33  ;;  %v6501_v57 = vpop.f32.mrb[11].mxu1  ;;  %v3947_v33 = vsel %vm5781_vm5, %v4860_v38, %v3946_v48  ;;  %v999_v43 = vadd.f32 %v6366_v22, %v6466_v49 }
 0x177   : > { %5099 = vmatmul.mubr.bf16.gmra.mrb[116].mxu0 %v4864_v61  ;;  %v3508_v61 = vrot.slane %v3506_v52, 5 }
 0x178   : > { %3721 = vmatmul.mubr.bf16.gmra.mrb[116].mxu1 %v4746_v21  ;;  %5102 = vmatprep.mubr.bf16.mxu0 %v4865_v44  ;;  %v3950_v21 = vsel %vm5781_vm5, %v3948_v40, %v3949_v36  ;;  %v998_v44 = vadd.f32 %v6366_v22, %v6448_v54  ;;  %v997_v54 = vadd.f32 %v6366_v22, %v6414_v10 }
 0x179   : > { %3730 = vmatprep.mubr.bf16.mxu1 %v5448_v0  ;;  %v3509_v59 = vsel %vm5691_vm2, %v3504_v16, %v3508_v61  ;;  %v4868_v58 = vcombine.low %v3947_v33, %v3950_v21  ;;  %v467_v61 = vadd.f32 %v6496_v42, %v6366_v22 }
 0x17a   : > { %v6522_v13 = vpop.f32.mrb[12].mxu0  ;;  %v4748_v51 = vcombine.low %v3499_v32, %v3509_v59 }
 0x17b   : > { %v899_v50 = vpop.f32.mrb[12].mxu1  ;;  %v6524_v19 = vpop.f32.mrb[13].mxu0 }
 0x17c   : > { %v6528_v34 = vadd.f32 %v899_v50, %v462_v25  ;;  %v901_v6 = vpop.f32.mrb[13].mxu1  ;;  %v6530_v30 = vpop.f32.mrb[14].mxu0  ;;  %v468_v42 = vadd.f32 %v6366_v22, %v6524_v19 }
 0x17d   : > { %v903_v62 = vpop.f32.mrb[14].mxu1  ;;  %v6532_v23 = vpop.f32.mrb[15].mxu0  ;;  %v1002_v10 = vadd.f32 %v6366_v22, %v901_v6 }
 0x17e   : > { %v6534_v26 = vadd.f32 %v903_v62, %v463_v29  ;;  %v905_v14 = vpop.f32.mrb[15].mxu1  ;;  %v469_v21 = vadd.f32 %v6366_v22, %v6532_v23  ;;  %v470_v23 = vadd.f32 %v6522_v13, %v6366_v22 }
 0x17f   : > { %5103 = vmatmul.mubr.bf16.gmra.mrb[120].mxu0 %v4866_v63  ;;  %v1003_v46 = vadd.f32 %v6366_v22, %v905_v14  ;;  %v1001_v63 = vadd.f32 %v6366_v22, %v6501_v57 }
 0x180   : > { %3731 = vmatmul.mubr.bf16.gmra.mrb[120].mxu1 %v4747_v15  ;;  %5106 = vmatprep.mubr.bf16.mxu0 %v4867_v31 }
 0x181   : > { %3740 = vmatprep.mubr.bf16.mxu1 %v5448_v0  ;;  %v465_v0 = vadd.f32 %v6366_v22, %v422_v3  ;;  %v1000_v3 = vadd.f32 %v6366_v22, %v6494_v37 }
 0x182   : > { %v5032_v18 = vpop.f32.mrb[16].mxu0 }
 0x183   : > { %v909_v39 = vpop.f32.mrb[16].mxu1  ;;  %v6554_v5 = vadd.f32 %v5032_v18, %v998_v44  ;;  %v1265_v8 = vpop.f32.mrb[17].mxu0 }
 0x184   : > { %v6559_v55 = vadd.f32 %v909_v39, %v464_v27  ;;  %v911_v60 = vpop.f32.mrb[17].mxu1  ;;  %v6561_v52 = vadd.f32 %v1265_v8, %v996_v17  ;;  %v5033_v24 = vpop.f32.mrb[18].mxu0 }
 0x185   : > { %v913_v45 = vpop.f32.mrb[18].mxu1  ;;  %v6563_v1 = vadd.f32 %v5033_v24, %v999_v43  ;;  %v1268_v49 = vpop.f32.mrb[19].mxu0  ;;  %v1004_v40 = vadd.f32 %v6366_v22, %v911_v60 }
 0x186   : > { %v6565_v41 = vadd.f32 %v913_v45, %v465_v0  ;;  %v915_v4 = vpop.f32.mrb[19].mxu1  ;;  %v6567_v7 = vadd.f32 %v1268_v49, %v997_v54  ;;  %v471_v49 = vadd.f32 %v6530_v30, %v6366_v22 }
 0x187   : > { %5107 = vmatmul.mubr.bf16.gmra.mrb[124].mxu0 %v4868_v58  ;;  %v1005_v44 = vadd.f32 %v6366_v22, %v915_v4 }
 0x188   : > { %3741 = vmatmul.mubr.bf16.gmra.mrb[124].mxu1 %v4748_v51 }
 0x18a   : > { %v5036_v48 = vpop.f32.mrb[20].mxu0 }
 0x18b   : > { %v919_v35 = vpop.f32.mrb[20].mxu1  ;;  %v6575_v25 = vadd.f32 %v5036_v48, %v1002_v10  ;;  %v1281_v15 = vpop.f32.mrb[21].mxu0 }
 0x18c   : > { %v6581_v50 = vadd.f32 %v919_v35, %v466_v9  ;;  %v921_v47 = vpop.f32.mrb[21].mxu1  ;;  %v6583_v37 = vadd.f32 %v1281_v15, %v1000_v3  ;;  %v5037_v16 = vpop.f32.mrb[22].mxu0 }
 0x18d   : > { %v923_v20 = vpop.f32.mrb[22].mxu1  ;;  %v6585_v38 = vadd.f32 %v5037_v16, %v1003_v46  ;;  %v1284_v36 = vpop.f32.mrb[23].mxu0  ;;  %v1006_v57 = vadd.f32 %v6366_v22, %v921_v47 }
 0x18e   : > { %v6587_v29 = vadd.f32 %v923_v20, %v467_v61  ;;  %v925_v6 = vpop.f32.mrb[23].mxu1  ;;  %v6589_v31 = vadd.f32 %v1284_v36, %v1001_v63 }
 0x18f   : > { %v1007_v14 = vadd.f32 %v6366_v22, %v925_v6 }
 0x192   : > { %v5040_v62 = vpop.f32.mrb[24].mxu0 }
 0x193   : > { %v929_v32 = vpop.f32.mrb[24].mxu1  ;;  %v6596_v59 = vadd.f32 %v5040_v62, %v1006_v57  ;;  %v1297_v33 = vpop.f32.mrb[25].mxu0 }
 0x194   : > { %v6601_v17 = vadd.f32 %v929_v32, %v468_v42  ;;  %v931_v27 = vpop.f32.mrb[25].mxu1  ;;  %v6603_v18 = vadd.f32 %v1297_v33, %v1004_v40  ;;  %v5041_v19 = vpop.f32.mrb[26].mxu0 }
 0x195   : > { %v933_v43 = vpop.f32.mrb[26].mxu1  ;;  %v6605_v39 = vadd.f32 %v5041_v19, %v1007_v14  ;;  %v1300_v8 = vpop.f32.mrb[27].mxu0  ;;  %v1008_v0 = vadd.f32 %v6366_v22, %v931_v27 }
 0x196   : > { %v6607_v51 = vadd.f32 %v933_v43, %v469_v21  ;;  %v935_v58 = vpop.f32.mrb[27].mxu1  ;;  %v6609_v54 = vadd.f32 %v1300_v8, %v1005_v44 }
 0x197   : > { %v1009_v4 = vadd.f32 %v6366_v22, %v935_v58 }
 0x19a   : > { %v5044_v60 = vpop.f32.mrb[28].mxu0 }
 0x19b   : > { %v939_v24 = vpop.f32.mrb[28].mxu1  ;;  %v1313_v45 = vpop.f32.mrb[29].mxu0 }
 0x19c   : > { %v6617_v10 = vadd.f32 %v939_v24, %v470_v23  ;;  %v941_v3 = vpop.f32.mrb[29].mxu1  ;;  %v6619_v9 = vadd.f32 %v1313_v45, %v1008_v0  ;;  %v5045_v48 = vpop.f32.mrb[30].mxu0 }
 0x19d   : > { %v1010_v46 = vadd.f32 %v6366_v22, %v941_v3  ;;  %v943_v13 = vpop.f32.mrb[30].mxu1  ;;  %v1316_v35 = vpop.f32.mrb[31].mxu0 }
 0x19e   : > { %v6623_v15 = vadd.f32 %v943_v13, %v471_v49  ;;  %v945_v63 = vpop.f32.mrb[31].mxu1  ;;  %v6625_v61 = vadd.f32 %v1316_v35, %v1009_v4 }
 0x19f   : > { %v6627_v47 = vadd.f32 %v5044_v60, %v1010_v46  ;;  %v1011_v30 = vadd.f32 %v6366_v22, %v945_v63 }
 0x1a1   : > { %v6632_v16 = vadd.f32 %v5045_v48, %v1011_v30 }
 0x1a2   : > { %v1574_v20 = vpop.f32.mrb[32].mxu0 }
 0x1a3   : > { %v1669_v36 = vadd.f32 %v1574_v20, %v6411_v11  ;;  %v2208_v6 = vpop.f32.mrb[32].mxu1  ;;  %v6635_v57 = vpop.f32.mrb[33].mxu0 }
 0x1a4   : > { %v2210_v42 = vpop.f32.mrb[33].mxu1  ;;  %v1578_v40 = vpop.f32.mrb[34].mxu0 }
 0x1a5   : > { %v2416_v62 = vadd.f32 %v2208_v6, %v1669_v36  ;;  %v6638_v14 = vadd.f32 %v2210_v42, %v6561_v52  ;;  %v1670_v32 = vadd.f32 %v1578_v40, %v6417_v12  ;;  %v2212_v33 = vpop.f32.mrb[34].mxu1  ;;  %v6641_v21 = vpop.f32.mrb[35].mxu0 }
 0x1a6   : > { %v2214_v44 = vpop.f32.mrb[35].mxu1 }
 0x1a7   : > { %2432 = vst [vmem:[%s6643_s26] sm:$0xff] %v2416_v62  ;;  %v2417_v11 = vadd.f32 %v2212_v33, %v1670_v32  ;;  %v6647_v27 = vadd.f32 %v2214_v44, %v6567_v7 }
 0x1a9   : > { %2433 = vst [vmem:[%s6643_s26 + $0x10] sm:$0xff] %v2417_v11 }
 0x1aa   : > { %v1584_v52 = vpop.f32.mrb[36].mxu0 }
 0x1ab   : > { %v1671_v19 = vadd.f32 %v1584_v52, %v6446_v53  ;;  %v2218_v12 = vpop.f32.mrb[36].mxu1  ;;  %v6651_v43 = vpop.f32.mrb[37].mxu0 }
 0x1ac   : > { %v2220_v8 = vpop.f32.mrb[37].mxu1  ;;  %v1588_v58 = vpop.f32.mrb[38].mxu0 }
 0x1ad   : > { %v2418_v23 = vadd.f32 %v2218_v12, %v1671_v19  ;;  %v6654_v0 = vadd.f32 %v2220_v8, %v6554_v5  ;;  %v1672_v60 = vadd.f32 %v1588_v58, %v6464_v2  ;;  %v2222_v24 = vpop.f32.mrb[38].mxu1  ;;  %v6657_v45 = vpop.f32.mrb[39].mxu0 }
 0x1ae   : > { %v2224_v7 = vpop.f32.mrb[39].mxu1 }
 0x1af   : > { %2434 = vst [vmem:[%s6643_s26 + $0x40] sm:$0xff] %v2418_v23  ;;  %v2419_v49 = vadd.f32 %v2222_v24, %v1672_v60  ;;  %v6661_v53 = vadd.f32 %v2224_v7, %v6563_v1 }
 0x1b1   : > { %2435 = vst [vmem:[%s6643_s26 + $0x50] sm:$0xff] %v2419_v49 }
 0x1b2   : > { %v1594_v4 = vpop.f32.mrb[40].mxu0 }
 0x1b3   : > { %v1673_v3 = vadd.f32 %v1594_v4, %v6492_v28  ;;  %v2228_v48 = vpop.f32.mrb[40].mxu1  ;;  %v6665_v5 = vpop.f32.mrb[41].mxu0 }
 0x1b4   : > { %v2230_v46 = vpop.f32.mrb[41].mxu1  ;;  %v1598_v2 = vpop.f32.mrb[42].mxu0 }
 0x1b5   : > { %v2420_v13 = vadd.f32 %v2228_v48, %v1673_v3  ;;  %v6668_v35 = vadd.f32 %v2230_v46, %v6583_v37  ;;  %v1674_v63 = vadd.f32 %v1598_v2, %v6499_v56  ;;  %v2232_v30 = vpop.f32.mrb[42].mxu1  ;;  %v6671_v20 = vpop.f32.mrb[43].mxu0 }
 0x1b6   : > { %v2234_v1 = vpop.f32.mrb[43].mxu1 }
 0x1b7   : > { %2436 = vst [vmem:[%s6643_s26 + $0x80] sm:$0xff] %v2420_v13  ;;  %v2421_v36 = vadd.f32 %v2232_v30, %v1674_v63  ;;  %v6675_v28 = vadd.f32 %v2234_v1, %v6589_v31 }
 0x1b9   : > { %2437 = vst [vmem:[%s6643_s26 + $0x90] sm:$0xff] %v2421_v36 }
 0x1ba   : > { %v1604_v6 = vpop.f32.mrb[44].mxu0 }
 0x1bb   : > { %v1675_v42 = vadd.f32 %v1604_v6, %v6528_v34  ;;  %v2238_v40 = vpop.f32.mrb[44].mxu1  ;;  %v6679_v37 = vpop.f32.mrb[45].mxu0 }
 0x1bc   : > { %v2240_v62 = vpop.f32.mrb[45].mxu1  ;;  %v1608_v56 = vpop.f32.mrb[46].mxu0 }
 0x1bd   : > { %v2422_v32 = vadd.f32 %v2238_v40, %v1675_v42  ;;  %v6682_v33 = vadd.f32 %v2240_v62, %v6575_v25  ;;  %v1676_v44 = vadd.f32 %v1608_v56, %v6534_v26  ;;  %v2242_v11 = vpop.f32.mrb[46].mxu1  ;;  %v6685_v52 = vpop.f32.mrb[47].mxu0 }
 0x1be   : > { %v2244_v31 = vpop.f32.mrb[47].mxu1 }
 0x1bf   : > { %2438 = vst [vmem:[%s6643_s26 + $0xc0] sm:$0xff] %v2422_v32  ;;  %v2423_v19 = vadd.f32 %v2242_v11, %v1676_v44  ;;  %v6689_v34 = vadd.f32 %v2244_v31, %v6585_v38 }
 0x1c1   : > { %2439 = vst [vmem:[%s6643_s26 + $0xd0] sm:$0xff] %v2423_v19 }
 0x1c2   : > { %v1614_v12 = vpop.f32.mrb[48].mxu0 }
 0x1c3   : > { %v1677_v8 = vadd.f32 %v1614_v12, %v6559_v55  ;;  %v2248_v58 = vpop.f32.mrb[48].mxu1  ;;  %v6693_v25 = vpop.f32.mrb[49].mxu0 }
 0x1c4   : > { %v2250_v23 = vpop.f32.mrb[49].mxu1  ;;  %v1618_v26 = vpop.f32.mrb[50].mxu0 }
 0x1c5   : > { %v2424_v60 = vadd.f32 %v2248_v58, %v1677_v8  ;;  %v6696_v24 = vadd.f32 %v2250_v23, %v6603_v18  ;;  %v1678_v7 = vadd.f32 %v1618_v26, %v6565_v41  ;;  %v2252_v49 = vpop.f32.mrb[50].mxu1  ;;  %v6699_v4 = vpop.f32.mrb[51].mxu0 }
 0x1c6   : > { %v2254_v38 = vpop.f32.mrb[51].mxu1 }
 0x1c7   : > { %2440 = vst [vmem:[%s6643_s26 + $0x100] sm:$0xff] %v2424_v60  ;;  %v2425_v3 = vadd.f32 %v2252_v49, %v1678_v7  ;;  %v6703_v55 = vadd.f32 %v2254_v38, %v6609_v54 }
 0x1c9   : > { %2441 = vst [vmem:[%s6643_s26 + $0x110] sm:$0xff] %v2425_v3 }
 0x1ca   : > { %v1624_v48 = vpop.f32.mrb[52].mxu0 }
 0x1cb   : > { %v1679_v46 = vadd.f32 %v1624_v48, %v6581_v50  ;;  %v2258_v2 = vpop.f32.mrb[52].mxu1  ;;  %v6707_v18 = vpop.f32.mrb[53].mxu0 }
 0x1cc   : > { %v2260_v13 = vpop.f32.mrb[53].mxu1  ;;  %v1628_v41 = vpop.f32.mrb[54].mxu0 }
 0x1cd   : > { %v2426_v63 = vadd.f32 %v2258_v2, %v1679_v46  ;;  %v6710_v30 = vadd.f32 %v2260_v13, %v6596_v59  ;;  %v1680_v1 = vadd.f32 %v1628_v41, %v6587_v29  ;;  %v2262_v36 = vpop.f32.mrb[54].mxu1  ;;  %v6713_v6 = vpop.f32.mrb[55].mxu0  ;;  %v1701_v2 = vadd.f32 %v6366_v22, %v6635_v57 }
 0x1ce   : > { %v2264_v54 = vpop.f32.mrb[55].mxu1 }
 0x1cf   : > { %2442 = vst [vmem:[%s6643_s26 + $0x140] sm:$0xff] %v2426_v63  ;;  %v2427_v42 = vadd.f32 %v2262_v36, %v1680_v1  ;;  %v6717_v50 = vadd.f32 %v2264_v54, %v6605_v39 }
 0x1d1   : > { %2443 = vst [vmem:[%s6643_s26 + $0x150] sm:$0xff] %v2427_v42 }
 0x1d2   : > { %v1634_v40 = vpop.f32.mrb[56].mxu0 }
 0x1d3   : > { %v1681_v62 = vadd.f32 %v1634_v40, %v6601_v17  ;;  %v2268_v56 = vpop.f32.mrb[56].mxu1  ;;  %v6721_v59 = vpop.f32.mrb[57].mxu0 }
 0x1d4   : > { %v2270_v32 = vpop.f32.mrb[57].mxu1  ;;  %v1638_v29 = vpop.f32.mrb[58].mxu0 }
 0x1d5   : > { %v2428_v44 = vadd.f32 %v2268_v56, %v1681_v62  ;;  %v6724_v11 = vadd.f32 %v2270_v32, %v6619_v9  ;;  %v1682_v31 = vadd.f32 %v1638_v29, %v6607_v51  ;;  %v2272_v19 = vpop.f32.mrb[58].mxu1  ;;  %v6727_v12 = vpop.f32.mrb[59].mxu0 }
 0x1d6   : > { %v2274_v39 = vpop.f32.mrb[59].mxu1 }
 0x1d7   : > { %2444 = vst [vmem:[%s6643_s26 + $0x180] sm:$0xff] %v2428_v44  ;;  %v2429_v8 = vadd.f32 %v2272_v19, %v1682_v31  ;;  %v6731_v17 = vadd.f32 %v2274_v39, %v6625_v61  ;;  %v1704_v31 = vadd.f32 %v6366_v22, %v6657_v45 }
 0x1d9   : > { %2445 = vst [vmem:[%s6643_s26 + $0x190] sm:$0xff] %v2429_v8 }
 0x1da   : > { %v1644_v58 = vpop.f32.mrb[60].mxu0 }
 0x1db   : > { %v1683_v23 = vadd.f32 %v1644_v58, %v6617_v10  ;;  %v2278_v26 = vpop.f32.mrb[60].mxu1  ;;  %v6735_v9 = vpop.f32.mrb[61].mxu0 }
 0x1dc   : > { %v2280_v60 = vpop.f32.mrb[61].mxu1  ;;  %v1648_v51 = vpop.f32.mrb[62].mxu0 }
 0x1dd   : > { %v2430_v7 = vadd.f32 %v2278_v26, %v1683_v23  ;;  %v6738_v49 = vadd.f32 %v2280_v60, %v6627_v47  ;;  %v1684_v38 = vadd.f32 %v1648_v51, %v6623_v15  ;;  %v2282_v3 = vpop.f32.mrb[62].mxu1  ;;  %v6741_v48 = vpop.f32.mrb[63].mxu0  ;;  %v1702_v47 = vadd.f32 %v6366_v22, %v6641_v21 }
 0x1de   : > { %v2284_v61 = vpop.f32.mrb[63].mxu1 }
 0x1df   : > { %2446 = vst [vmem:[%s6643_s26 + $0x1c0] sm:$0xff] %v2430_v7  ;;  %v2431_v46 = vadd.f32 %v2282_v3, %v1684_v38  ;;  %v6745_v10 = vadd.f32 %v2284_v61, %v6632_v16 }
 0x1e1   : > { %2447 = vst [vmem:[%s6643_s26 + $0x1d0] sm:$0xff] %v2431_v46 }
 0x1e2   : > { %v2321_v13 = vpop.f32.mrb[64].mxu0 }
 0x1e3   : > { %v6752_v15 = vadd.f32 %v2321_v13, %v1701_v2  ;;  %v2842_v41 = vpop.f32.mrb[64].mxu1  ;;  %v2323_v63 = vpop.f32.mrb[65].mxu0  ;;  %v1706_v2 = vadd.f32 %v6366_v22, %v6671_v20 }
 0x1e4   : > { %v2937_v1 = vadd.f32 %v2842_v41, %v6638_v14  ;;  %v2544_v36 = vadd.f32 %v6366_v22, %v2323_v63  ;;  %v2844_v54 = vpop.f32.mrb[65].mxu1  ;;  %v2325_v16 = vpop.f32.mrb[66].mxu0  ;;  %v1703_v14 = vadd.f32 %v6366_v22, %v6651_v43 }
 0x1e5   : > { %v6756_v42 = vadd.f32 %v2325_v16, %v1702_v47  ;;  %v2846_v40 = vpop.f32.mrb[66].mxu1  ;;  %v2327_v57 = vpop.f32.mrb[67].mxu0 }
 0x1e6   : > { %2953 = vst [vmem:[%s6643_s26 + $0x8] sm:$0xff] %v2937_v1  ;;  %v6759_v62 = vadd.f32 %v2844_v54, %v2544_v36  ;;  %v2938_v21 = vadd.f32 %v2846_v40, %v6647_v27  ;;  %v2545_v56 = vadd.f32 %v6366_v22, %v2327_v57  ;;  %v2848_v32 = vpop.f32.mrb[67].mxu1 }
 0x1e8   : > { %2954 = vst [vmem:[%s6643_s26 + $0x18] sm:$0xff] %v2938_v21  ;;  %v6764_v29 = vadd.f32 %v2848_v32, %v2545_v56 }
 0x1ea   : > { %v2331_v44 = vpop.f32.mrb[68].mxu0 }
 0x1eb   : > { %v6770_v19 = vadd.f32 %v2331_v44, %v1703_v14  ;;  %v2852_v39 = vpop.f32.mrb[68].mxu1  ;;  %v2333_v8 = vpop.f32.mrb[69].mxu0  ;;  %v1708_v14 = vadd.f32 %v6366_v22, %v6685_v52 }
 0x1ec   : > { %v2939_v27 = vadd.f32 %v2852_v39, %v6654_v0  ;;  %v2546_v58 = vadd.f32 %v6366_v22, %v2333_v8  ;;  %v2854_v23 = vpop.f32.mrb[69].mxu1  ;;  %v2335_v26 = vpop.f32.mrb[70].mxu0  ;;  %v1705_v0 = vadd.f32 %v6366_v22, %v6665_v5 }
 0x1ed   : > { %v6774_v60 = vadd.f32 %v2335_v26, %v1704_v31  ;;  %v2856_v51 = vpop.f32.mrb[70].mxu1  ;;  %v2337_v7 = vpop.f32.mrb[71].mxu0 }
 0x1ee   : > { %2955 = vst [vmem:[%s6643_s26 + $0x48] sm:$0xff] %v2939_v27  ;;  %v6777_v43 = vadd.f32 %v2854_v23, %v2546_v58  ;;  %v2940_v45 = vadd.f32 %v2856_v51, %v6661_v53  ;;  %v2547_v38 = vadd.f32 %v6366_v22, %v2337_v7  ;;  %v2858_v3 = vpop.f32.mrb[71].mxu1 }
 0x1f0   : > { %2956 = vst [vmem:[%s6643_s26 + $0x58] sm:$0xff] %v2940_v45  ;;  %v6782_v61 = vadd.f32 %v2858_v3, %v2547_v38 }
 0x1f2   : > { %v2341_v46 = vpop.f32.mrb[72].mxu0 }
 0x1f3   : > { %v6788_v13 = vadd.f32 %v2341_v46, %v1705_v0  ;;  %v2862_v47 = vpop.f32.mrb[72].mxu1  ;;  %v2343_v41 = vpop.f32.mrb[73].mxu0  ;;  %v1710_v0 = vadd.f32 %v6366_v22, %v6699_v4 }
 0x1f4   : > { %v2941_v53 = vadd.f32 %v2862_v47, %v6668_v35  ;;  %v2548_v63 = vadd.f32 %v6366_v22, %v2343_v41  ;;  %v2864_v1 = vpop.f32.mrb[73].mxu1  ;;  %v2345_v36 = vpop.f32.mrb[74].mxu0  ;;  %v1707_v35 = vadd.f32 %v6366_v22, %v6679_v37 }
 0x1f5   : > { %v6792_v54 = vadd.f32 %v2345_v36, %v1706_v2  ;;  %v2866_v16 = vpop.f32.mrb[74].mxu1  ;;  %v2347_v40 = vpop.f32.mrb[75].mxu0 }
 0x1f6   : > { %2957 = vst [vmem:[%s6643_s26 + $0x88] sm:$0xff] %v2941_v53  ;;  %v6795_v5 = vadd.f32 %v2864_v1, %v2548_v63  ;;  %v2942_v20 = vadd.f32 %v2866_v16, %v6675_v28  ;;  %v2549_v57 = vadd.f32 %v6366_v22, %v2347_v40  ;;  %v2868_v21 = vpop.f32.mrb[75].mxu1 }
 0x1f8   : > { %2958 = vst [vmem:[%s6643_s26 + $0x98] sm:$0xff] %v2942_v20  ;;  %v6800_v56 = vadd.f32 %v2868_v21, %v2549_v57 }
 0x1fa   : > { %v2351_v32 = vpop.f32.mrb[76].mxu0 }
 0x1fb   : > { %v6806_v44 = vadd.f32 %v2351_v32, %v1707_v35  ;;  %v2872_v31 = vpop.f32.mrb[76].mxu1  ;;  %v2353_v39 = vpop.f32.mrb[77].mxu0  ;;  %v1712_v35 = vadd.f32 %v6366_v22, %v6713_v6 }
 0x1fc   : > { %v2943_v28 = vadd.f32 %v2872_v31, %v6682_v33  ;;  %v2550_v8 = vadd.f32 %v6366_v22, %v2353_v39  ;;  %v2874_v27 = vpop.f32.mrb[77].mxu1  ;;  %v2355_v58 = vpop.f32.mrb[78].mxu0  ;;  %v1709_v33 = vadd.f32 %v6366_v22, %v6693_v25 }
 0x1fd   : > { %v6810_v23 = vadd.f32 %v2355_v58, %v1708_v14  ;;  %v2876_v26 = vpop.f32.mrb[78].mxu1  ;;  %v2357_v51 = vpop.f32.mrb[79].mxu0 }
 0x1fe   : > { %2959 = vst [vmem:[%s6643_s26 + $0xc8] sm:$0xff] %v2943_v28  ;;  %v6813_v37 = vadd.f32 %v2874_v27, %v2550_v8  ;;  %v2944_v52 = vadd.f32 %v2876_v26, %v6689_v34  ;;  %v2551_v7 = vadd.f32 %v6366_v22, %v2357_v51  ;;  %v2878_v45 = vpop.f32.mrb[79].mxu1  ;;  %v5256_v51 = vld [vmem:[%s7043_s2] ss:$0 sm:$0xff] }
 0x200   : > { %2960 = vst [vmem:[%s6643_s26 + $0xd8] sm:$0xff] %v2944_v52  ;;  %v6818_v38 = vadd.f32 %v2878_v45, %v2551_v7 }
 0x202   : > { %v2361_v3 = vpop.f32.mrb[80].mxu0 }
 0x203   : > { %v6824_v46 = vadd.f32 %v2361_v3, %v1709_v33  ;;  %v2882_v2 = vpop.f32.mrb[80].mxu1  ;;  %v2363_v47 = vpop.f32.mrb[81].mxu0  ;;  %v1714_v33 = vadd.f32 %v5256_v51, %v6727_v12 }
 0x204   : > { %v2945_v34 = vadd.f32 %v2882_v2, %v6696_v24  ;;  %v2552_v41 = vadd.f32 %v6366_v22, %v2363_v47  ;;  %v2884_v53 = vpop.f32.mrb[81].mxu1  ;;  %v2365_v63 = vpop.f32.mrb[82].mxu0  ;;  %v1711_v24 = vadd.f32 %v6366_v22, %v6707_v18 }
 0x205   : > { %v6828_v1 = vadd.f32 %v2365_v63, %v1710_v0  ;;  %v2886_v36 = vpop.f32.mrb[82].mxu1  ;;  %v2367_v16 = vpop.f32.mrb[83].mxu0 }
 0x206   : > { %2961 = vst [vmem:[%s6643_s26 + $0x108] sm:$0xff] %v2945_v34  ;;  %v6831_v25 = vadd.f32 %v2884_v53, %v2552_v41  ;;  %v2946_v4 = vadd.f32 %v2886_v36, %v6703_v55  ;;  %v2553_v40 = vadd.f32 %v6366_v22, %v2367_v16  ;;  %v2888_v20 = vpop.f32.mrb[83].mxu1 }
 0x208   : > { %2962 = vst [vmem:[%s6643_s26 + $0x118] sm:$0xff] %v2946_v4  ;;  %v6836_v57 = vadd.f32 %v2888_v20, %v2553_v40 }
 0x20a   : > { %v2371_v21 = vpop.f32.mrb[84].mxu0 }
 0x20b   : > { %v6842_v32 = vadd.f32 %v2371_v21, %v1711_v24  ;;  %v2892_v14 = vpop.f32.mrb[84].mxu1  ;;  %v2373_v31 = vpop.f32.mrb[85].mxu0  ;;  %v1716_v24 = vadd.f32 %v5256_v51, %v6741_v48 }
 0x20c   : > { %v2947_v55 = vadd.f32 %v2892_v14, %v6710_v30  ;;  %v2554_v39 = vadd.f32 %v6366_v22, %v2373_v31  ;;  %v2894_v28 = vpop.f32.mrb[85].mxu1  ;;  %v2375_v8 = vpop.f32.mrb[86].mxu0  ;;  %v1713_v30 = vadd.f32 %v5256_v51, %v6721_v59 }
 0x20d   : > { %v6846_v27 = vadd.f32 %v2375_v8, %v1712_v35  ;;  %v2896_v58 = vpop.f32.mrb[86].mxu1  ;;  %v2377_v26 = vpop.f32.mrb[87].mxu0 }
 0x20e   : > { %2963 = vst [vmem:[%s6643_s26 + $0x148] sm:$0xff] %v2947_v55  ;;  %v6849_v18 = vadd.f32 %v2894_v28, %v2554_v39  ;;  %v2948_v6 = vadd.f32 %v2896_v58, %v6717_v50  ;;  %v2555_v52 = vadd.f32 %v5256_v51, %v2377_v26  ;;  %v2898_v7 = vpop.f32.mrb[87].mxu1 }
 0x210   : > { %2964 = vst [vmem:[%s6643_s26 + $0x158] sm:$0xff] %v2948_v6  ;;  %v6856_v22 = vadd.f32 %v2898_v7, %v2555_v52 }
 0x212   : > { %v2381_v45 = vpop.f32.mrb[88].mxu0 }
 0x213   : > { %v6860_v3 = vadd.f32 %v2381_v45, %v1713_v30  ;;  %v2902_v0 = vpop.f32.mrb[88].mxu1  ;;  %v2383_v50 = vpop.f32.mrb[89].mxu0 }
 0x214   : > { %v2949_v2 = vadd.f32 %v2902_v0, %v6724_v11  ;;  %v2556_v47 = vadd.f32 %v5256_v51, %v2383_v50  ;;  %v2904_v34 = vpop.f32.mrb[89].mxu1  ;;  %v2385_v41 = vpop.f32.mrb[90].mxu0  ;;  %v1715_v11 = vadd.f32 %v5256_v51, %v6735_v9 }
 0x215   : > { %v6863_v53 = vadd.f32 %v2385_v41, %v1714_v33  ;;  %v2906_v63 = vpop.f32.mrb[90].mxu1  ;;  %v2387_v36 = vpop.f32.mrb[91].mxu0 }
 0x216   : > { %2965 = vst [vmem:[%s6643_s26 + $0x188] sm:$0xff] %v2949_v2  ;;  %v6866_v16 = vadd.f32 %v2904_v34, %v2556_v47  ;;  %v2950_v59 = vadd.f32 %v2906_v63, %v6731_v17  ;;  %v2557_v12 = vadd.f32 %v5256_v51, %v2387_v36  ;;  %v2908_v4 = vpop.f32.mrb[91].mxu1 }
 0x218   : > { %2966 = vst [vmem:[%s6643_s26 + $0x198] sm:$0xff] %v2950_v59  ;;  %v6870_v40 = vadd.f32 %v2908_v4, %v2557_v12 }
 0x21a   : > { %v2391_v20 = vpop.f32.mrb[92].mxu0 }
 0x21b   : > { %v6874_v21 = vadd.f32 %v2391_v20, %v1715_v11  ;;  %v2912_v35 = vpop.f32.mrb[92].mxu1  ;;  %v2393_v14 = vpop.f32.mrb[93].mxu0 }
 0x21c   : > { %v2951_v31 = vadd.f32 %v2912_v35, %v6738_v49  ;;  %v2558_v55 = vadd.f32 %v5256_v51, %v2393_v14  ;;  %v2914_v17 = vpop.f32.mrb[93].mxu1  ;;  %v2395_v39 = vpop.f32.mrb[94].mxu0 }
 0x21d   : > { %v6877_v28 = vadd.f32 %v2395_v39, %v1716_v24  ;;  %v2916_v8 = vpop.f32.mrb[94].mxu1  ;;  %v2397_v58 = vpop.f32.mrb[95].mxu0 }
 0x21e   : > { %2967 = vst [vmem:[%s6643_s26 + $0x1c8] sm:$0xff] %v2951_v31  ;;  %v6880_v26 = vadd.f32 %v2914_v17, %v2558_v55  ;;  %v2952_v9 = vadd.f32 %v2916_v8, %v6745_v10  ;;  %v2559_v48 = vadd.f32 %v5256_v51, %v2397_v58  ;;  %v2918_v6 = vpop.f32.mrb[95].mxu1 }
 0x220   : > { %2968 = vst [vmem:[%s6643_s26 + $0x1d8] sm:$0xff] %v2952_v9  ;;  %v6884_v52 = vadd.f32 %v2918_v6, %v2559_v48 }
 0x222   : > { %v5064_v7 = vpop.f32.mrb[96].mxu0 }
 0x223   : > { %v3264_v49 = vadd.f32 %v5064_v7, %v6770_v19  ;;  %v3672_v30 = vpop.f32.mrb[96].mxu1  ;;  %v3183_v45 = vpop.f32.mrb[97].mxu0 }
 0x224   : > { %v3262_v33 = vadd.f32 %v3183_v45, %v6752_v15  ;;  %v3674_v0 = vpop.f32.mrb[97].mxu1  ;;  %v5065_v50 = vpop.f32.mrb[98].mxu0 }
 0x225   : > { %v6889_v2 = vadd.f32 %v3674_v0, %v6759_v62  ;;  %v3265_v10 = vadd.f32 %v5065_v50, %v6774_v60  ;;  %v3676_v51 = vpop.f32.mrb[98].mxu1  ;;  %v3186_v47 = vpop.f32.mrb[99].mxu0 }
 0x226   : > { %v3767_v34 = vadd.f32 %v3672_v30, %v3262_v33  ;;  %v3263_v41 = vadd.f32 %v3186_v47, %v6756_v42  ;;  %v3678_v63 = vpop.f32.mrb[99].mxu1 }
 0x227   : > { %v6894_v19 = vadd.f32 %v3678_v63, %v6764_v29 }
 0x228   : > { %4781 = vst [vmem:[%s6643_s26 + $0x20] sm:$0xff] %v3767_v34  ;;  %v3768_v36 = vadd.f32 %v3676_v51, %v3263_v41 }
 0x22a   : > { %4782 = vst [vmem:[%s6643_s26 + $0x30] sm:$0xff] %v3768_v36  ;;  %v5068_v15 = vpop.f32.mrb[100].mxu0 }
 0x22b   : > { %v3268_v59 = vadd.f32 %v5068_v15, %v6806_v44  ;;  %v3682_v62 = vpop.f32.mrb[100].mxu1  ;;  %v3199_v12 = vpop.f32.mrb[101].mxu0 }
 0x22c   : > { %v3769_v60 = vadd.f32 %v3682_v62, %v3264_v49  ;;  %v3266_v4 = vadd.f32 %v3199_v12, %v6788_v13  ;;  %v3684_v11 = vpop.f32.mrb[101].mxu1  ;;  %v5069_v20 = vpop.f32.mrb[102].mxu0 }
 0x22d   : > { %v3817_v42 = vadd.f32 %v3684_v11, %v6777_v43  ;;  %v3269_v29 = vadd.f32 %v5069_v20, %v6810_v23  ;;  %v3686_v24 = vpop.f32.mrb[102].mxu1  ;;  %v3202_v35 = vpop.f32.mrb[103].mxu0 }
 0x22e   : > { %4783 = vst [vmem:[%s6643_s26 + $0x60] sm:$0xff] %v3769_v60  ;;  %v3770_v14 = vadd.f32 %v3686_v24, %v3265_v10  ;;  %v3267_v31 = vadd.f32 %v3202_v35, %v6792_v54  ;;  %v3688_v44 = vpop.f32.mrb[103].mxu1 }
 0x22f   : > { %v3818_v55 = vadd.f32 %v3688_v44, %v6782_v61 }
 0x230   : > { %4784 = vst [vmem:[%s6643_s26 + $0x70] sm:$0xff] %v3770_v14 }
 0x232   : > { %v5072_v17 = vpop.f32.mrb[104].mxu0 }
 0x233   : > { %v3272_v13 = vadd.f32 %v5072_v17, %v6842_v32  ;;  %v3692_v39 = vpop.f32.mrb[104].mxu1  ;;  %v3215_v8 = vpop.f32.mrb[105].mxu0 }
 0x234   : > { %v3771_v43 = vadd.f32 %v3692_v39, %v3266_v4  ;;  %v3270_v23 = vadd.f32 %v3215_v8, %v6824_v46  ;;  %v3694_v58 = vpop.f32.mrb[105].mxu1  ;;  %v5073_v9 = vpop.f32.mrb[106].mxu0 }
 0x235   : > { %v3819_v48 = vadd.f32 %v3694_v58, %v6795_v5  ;;  %v6910_v54 = vadd.f32 %v5073_v9, %v6846_v27  ;;  %v3696_v6 = vpop.f32.mrb[106].mxu1  ;;  %v3218_v7 = vpop.f32.mrb[107].mxu0 }
 0x236   : > { %4785 = vst [vmem:[%s6643_s26 + $0xa0] sm:$0xff] %v3771_v43  ;;  %v3772_v61 = vadd.f32 %v3696_v6, %v3267_v31  ;;  %v3271_v49 = vadd.f32 %v3218_v7, %v6828_v1  ;;  %v3698_v32 = vpop.f32.mrb[107].mxu1 }
 0x237   : > { %v3820_v30 = vadd.f32 %v3698_v32, %v6800_v56 }
 0x238   : > { %4786 = vst [vmem:[%s6643_s26 + $0xb0] sm:$0xff] %v3772_v61 }
 0x23a   : > { %v5076_v45 = vpop.f32.mrb[108].mxu0 }
 0x23b   : > { %v6917_v46 = vadd.f32 %v5076_v45, %v6874_v21  ;;  %v3702_v5 = vpop.f32.mrb[108].mxu1  ;;  %v3231_v33 = vpop.f32.mrb[109].mxu0 }
 0x23c   : > { %v3773_v27 = vadd.f32 %v3702_v5, %v3268_v59  ;;  %v3274_v0 = vadd.f32 %v3231_v33, %v6860_v3  ;;  %v3704_v50 = vpop.f32.mrb[109].mxu1  ;;  %v5077_v10 = vpop.f32.mrb[110].mxu0 }
 0x23d   : > { %v3821_v51 = vadd.f32 %v3704_v50, %v6813_v37  ;;  %v6922_v1 = vadd.f32 %v5077_v10, %v6877_v28  ;;  %v3706_v47 = vpop.f32.mrb[110].mxu1  ;;  %v3234_v56 = vpop.f32.mrb[111].mxu0 }
 0x23e   : > { %4787 = vst [vmem:[%s6643_s26 + $0xe0] sm:$0xff] %v3773_v27  ;;  %v3774_v34 = vadd.f32 %v3706_v47, %v3269_v29  ;;  %v6926_v21 = vadd.f32 %v3234_v56, %v6863_v53  ;;  %v3708_v41 = vpop.f32.mrb[111].mxu1 }
 0x23f   : > { %v3822_v63 = vadd.f32 %v3708_v41, %v6818_v38 }
 0x240   : > { %4788 = vst [vmem:[%s6643_s26 + $0xf0] sm:$0xff] %v3774_v34 }
 0x242   : > { %v5096_v3 = vpop.f32.mrb[112].mxu0 }
 0x243   : > { %v3712_v36 = vpop.f32.mrb[112].mxu1  ;;  %v4162_v37 = vadd.f32 %v5096_v3, %v3817_v42  ;;  %v4081_v28 = vpop.f32.mrb[113].mxu0 }
 0x244   : > { %v3775_v15 = vadd.f32 %v3712_v36, %v3270_v23  ;;  %v3714_v59 = vpop.f32.mrb[113].mxu1  ;;  %v4160_v62 = vadd.f32 %v4081_v28, %v6889_v2  ;;  %v5097_v12 = vpop.f32.mrb[114].mxu0 }
 0x245   : > { %4895 = vst [vmem:[%s6643_s26 + $0x68] sm:$0xff] %v4162_v37  ;;  %v3823_v53 = vadd.f32 %v3714_v59, %v6831_v25  ;;  %v3716_v60 = vpop.f32.mrb[114].mxu1  ;;  %v4163_v4 = vadd.f32 %v5097_v12, %v3818_v55  ;;  %v4084_v38 = vpop.f32.mrb[115].mxu0 }
 0x246   : > { %4789 = vst [vmem:[%s6643_s26 + $0x120] sm:$0xff] %v3775_v15  ;;  %4893 = vst [vmem:[%s6643_s26 + $0x28] sm:$0xff] %v4160_v62  ;;  %v3776_v11 = vadd.f32 %v3716_v60, %v3271_v49  ;;  %v3718_v20 = vpop.f32.mrb[115].mxu1  ;;  %v4161_v42 = vadd.f32 %v4084_v38, %v6894_v19 }
 0x247   : > { %4896 = vst [vmem:[%s6643_s26 + $0x78] sm:$0xff] %v4163_v4  ;;  %v3824_v29 = vadd.f32 %v3718_v20, %v6836_v57 }
 0x248   : > { %4790 = vst [vmem:[%s6643_s26 + $0x130] sm:$0xff] %v3776_v11  ;;  %4894 = vst [vmem:[%s6643_s26 + $0x38] sm:$0xff] %v4161_v42 }
 0x24a   : > { %v5100_v2 = vpop.f32.mrb[116].mxu0 }
 0x24b   : > { %v3722_v24 = vpop.f32.mrb[116].mxu1  ;;  %v4166_v25 = vadd.f32 %v5100_v2, %v3821_v51  ;;  %v4097_v35 = vpop.f32.mrb[117].mxu0 }
 0x24c   : > { %v3777_v14 = vadd.f32 %v3722_v24, %v3272_v13  ;;  %v3724_v31 = vpop.f32.mrb[117].mxu1  ;;  %v4164_v44 = vadd.f32 %v4097_v35, %v3819_v48  ;;  %v5101_v55 = vpop.f32.mrb[118].mxu0 }
 0x24d   : > { %4899 = vst [vmem:[%s6643_s26 + $0xe8] sm:$0xff] %v4166_v25  ;;  %v3825_v19 = vadd.f32 %v3724_v31, %v6849_v18  ;;  %v3726_v17 = vpop.f32.mrb[118].mxu1  ;;  %v4167_v57 = vadd.f32 %v5101_v55, %v3822_v63  ;;  %v4100_v39 = vpop.f32.mrb[119].mxu0 }
 0x24e   : > { %4791 = vst [vmem:[%s6643_s26 + $0x160] sm:$0xff] %v3777_v14  ;;  %4897 = vst [vmem:[%s6643_s26 + $0xa8] sm:$0xff] %v4164_v44  ;;  %v3778_v8 = vadd.f32 %v3726_v17, %v6910_v54  ;;  %v3728_v43 = vpop.f32.mrb[119].mxu1  ;;  %v4165_v23 = vadd.f32 %v4100_v39, %v3820_v30 }
 0x24f   : > { %4900 = vst [vmem:[%s6643_s26 + $0xf8] sm:$0xff] %v4167_v57  ;;  %v3826_v13 = vadd.f32 %v3728_v43, %v6856_v22 }
 0x250   : > { %4792 = vst [vmem:[%s6643_s26 + $0x170] sm:$0xff] %v3778_v8  ;;  %4898 = vst [vmem:[%s6643_s26 + $0xb8] sm:$0xff] %v4165_v23 }
 0x252   : > { %v5104_v58 = vpop.f32.mrb[120].mxu0 }
 0x253   : > { %v3732_v9 = vpop.f32.mrb[120].mxu1  ;;  %v4170_v18 = vadd.f32 %v5104_v58, %v3825_v19  ;;  %v4113_v48 = vpop.f32.mrb[121].mxu0 }
 0x254   : > { %v3779_v6 = vadd.f32 %v3732_v9, %v3274_v0  ;;  %v3734_v7 = vpop.f32.mrb[121].mxu1  ;;  %v4168_v61 = vadd.f32 %v4113_v48, %v3823_v53  ;;  %v5105_v54 = vpop.f32.mrb[122].mxu0 }
 0x255   : > { %4903 = vst [vmem:[%s6643_s26 + $0x168] sm:$0xff] %v4170_v18  ;;  %v3827_v22 = vadd.f32 %v3734_v7, %v6866_v16  ;;  %v3736_v49 = vpop.f32.mrb[122].mxu1  ;;  %v4171_v32 = vadd.f32 %v5105_v54, %v3826_v13  ;;  %v4116_v30 = vpop.f32.mrb[123].mxu0 }
 0x256   : > { %4793 = vst [vmem:[%s6643_s26 + $0x1a0] sm:$0xff] %v3779_v6  ;;  %4901 = vst [vmem:[%s6643_s26 + $0x128] sm:$0xff] %v4168_v61  ;;  %v3780_v45 = vadd.f32 %v3736_v49, %v6926_v21  ;;  %v3738_v5 = vpop.f32.mrb[123].mxu1  ;;  %v4169_v33 = vadd.f32 %v4116_v30, %v3824_v29 }
 0x257   : > { %4904 = vst [vmem:[%s6643_s26 + $0x178] sm:$0xff] %v4171_v32  ;;  %v3828_v27 = vadd.f32 %v3738_v5, %v6870_v40 }
 0x258   : > { %4794 = vst [vmem:[%s6643_s26 + $0x1b0] sm:$0xff] %v3780_v45  ;;  %4902 = vst [vmem:[%s6643_s26 + $0x138] sm:$0xff] %v4169_v33 }
 0x25a   : > { %v5108_v0 = vpop.f32.mrb[124].mxu0 }
 0x25b   : > { %v3742_v16 = vpop.f32.mrb[124].mxu1  ;;  %v4129_v50 = vpop.f32.mrb[125].mxu0 }
 0x25c   : > { %v3781_v10 = vadd.f32 %v3742_v16, %v6917_v46  ;;  %v3744_v51 = vpop.f32.mrb[125].mxu1  ;;  %v4172_v47 = vadd.f32 %v4129_v50, %v3827_v22  ;;  %v5109_v56 = vpop.f32.mrb[126].mxu0 }
 0x25d   : > { %v3829_v40 = vadd.f32 %v3744_v51, %v6880_v26  ;;  %v3746_v34 = vpop.f32.mrb[126].mxu1  ;;  %v4132_v21 = vpop.f32.mrb[127].mxu0 }
 0x25e   : > { %4795 = vst [vmem:[%s6643_s26 + $0x1e0] sm:$0xff] %v3781_v10  ;;  %v3782_v41 = vadd.f32 %v3746_v34, %v6922_v1  ;;  %v3748_v63 = vpop.f32.mrb[127].mxu1  ;;  %4905 = vst [vmem:[%s6643_s26 + $0x1a8] sm:$0xff] %v4172_v47  ;;  %v4173_v46 = vadd.f32 %v4132_v21, %v3828_v27 }
 0x25f   : > { %v4174_v3 = vadd.f32 %v5108_v0, %v3829_v40  ;;  %v3830_v36 = vadd.f32 %v3748_v63, %v6884_v52 }
 0x260   : > { %4796 = vst [vmem:[%s6643_s26 + $0x1f0] sm:$0xff] %v3782_v41  ;;  %4906 = vst [vmem:[%s6643_s26 + $0x1b8] sm:$0xff] %v4173_v46 }
 0x261   : > { %4907 = vst [vmem:[%s6643_s26 + $0x1e8] sm:$0xff] %v4174_v3  ;;  %v4175_v26 = vadd.f32 %v5109_v56, %v3830_v36 }
 0x263   : > { %4908 = vst [vmem:[%s6643_s26 + $0x1f8] sm:$0xff] %v4175_v26 }
 0x264   : > { %5328 = shalt.err (!%p5325_p5)
}
 0x265   : > { %s5329_s30 = scalar_lea.hbm %s6972_s6, 8192  ;;  %s5333_s26 = scalar_lea.hbm %s7044_s3, 32768 }
 0x266   : > { %p5330_p8 = scmp.ne.s32.totalorder %s6972_s6, %s5329_s30  ;;  %p5334_p6 = scmp.lt.u32.totalorder %s6972_s6, %s7044_s3 }
 0x267   : > { %p5335_p10 = scmp.lt.u32.totalorder %s5333_s26, %s5329_s30  ;;  %p5337_p4 = scmp.lt.u32.totalorder %s5329_s30, %s6972_s6 }
 0x268   : > { %p5331_p12 = pnand %p5330_p8, %p7079_p7 }
 0x269   : > { %p5336_p3 = por %p5335_p10, %p5334_p6 }
 0x26a   : > { %p5332_p1 = pneg %p5331_p12 }
 0x26b   : > { %p5338_p9 = por %p5337_p4, %p5336_p3 }
 0x26d   : > { %p5339_p11 = pnand %p5338_p9, %p5332_p1 }
 0x26f   : > { %5342 = shalt.err (!%p5339_p11)
}
 0x270   : > { %s5450_s8 = smov 256   ;;  %s5451_s9 = smov 16  }
 0x271   : > { %5119 = dma.vmem_to_hbm [thread:$0]  (%p7079_p7), %s6974_s19, 8192, %s6972_s6, %s6980_s5, %s5450_s8, %s5450_s8, %s5451_s9  }
 0x272 PF: > { %s7080_s20 = sld [smem:[#allocation11_spill]]  ;;  %s7081_s18 = sld [smem:[#allocation13_spill]] }
 0x273   : > { %p5136_p13 = scmp.ge.s32.totalorder %s5441_s22, 2 }
 0x278   : > { %s4224_s12 = sand.u32 1, %s7080_s20   ;;  %p7082_p0 = scmp.ne.s32.totalorder %s7081_s18, 0 }
 0x279   : > { %s4225_s10 = scalar_lea.sflag [#allocation4], %s4224_s12 }
 0x27a   : > { %p5130_p2 = pnand %p5136_p13, %p7082_p0 }
 0x27c   : > { %5396 = dma.done.wait (!%p5130_p2), %s4225_s10, 8192  }
 0x27d   : > { %5398 = vsyncadd (!%p5130_p2), %s4225_s10, 4294959104  ;;  %s20_s22 = sadd.s32 1, %s5441_s22   ;;  %s7083_s18 = sld [smem:[#allocation12_spill]] }
 0x27e   : > { %p17_p5 = scmp.ge.s32.totalorder %s20_s22, 6   ;;  %s7084_s20 = sld [smem:[#allocation14_spill]] }
 0x27f   : > { %s7085_s28 = sld [smem:[#allocation15_spill]]  ;;  %s7086_s12 = smov %s5405_s13 }
 0x280   : > { %s7087_s13 = smov %s5409_s14  ;;  %s7088_s14 = smov %s5610_s1 }
 0x281   : > { %s7089_s15 = smov %s5417_s16  ;;  %s7090_s16 = smov %s5421_s17 }
 0x282   : > { %s7091_s17 = smov %s5605_s7  ;;  %s7092_s19 = smov %s5437_s21 }
 0x283   :  { %19 = sbr.rel (!%p17_p5) target bundleno = 12 (0xc), region = 85 }
 0x285   : > { %s7093_s21 = smov %s7085_s28 }
 0x28a   :  { %4230 = vsyncpa [#allocation3], 1 }
 0x28b   :  { %4232 = vsyncpa [#allocation3 + $0x1], 1 }
 0x28c   :  { %4233 = vsyncpa [#allocation6], 1 }
 0x28d   :  { %4234 = vsyncpa [#allocation4], 1 }
 0x28e   :  { %4236 = vsyncpa [#allocation4 + $0x1], 1 }

// kernel: tpu_custom_call.1
= control target key start
LH: loop header
LB: loop body
LE: loop exit
PB: predicated region body
PF: predicated region fallthrough
CT: control target
= control target key end

     0   :  { %s7041_s0 = inlined_call_operand.hbm [shape: bf16[2,18,24,128], index: 0, kind: input, shape index: {}]   ;;  %s7042_s1 = inlined_call_operand.hbm [shape: bf16[128,2048], index: 1, kind: input, shape index: {}]   ;;  %s7043_s2 = inlined_call_operand.vmem [shape: f32[1,128], index: 2, kind: input, shape index: {}]   ;;  %s7044_s3 = inlined_call_operand.hbm [shape: f32[2,16,2,16,256], index: 3, kind: output, shape index: {}]  }
   0x1   :  { %7056 = sst [smem:[#allocation16_spill]] %s7042_s1 }
   0x2   :  { %8 = vsyncpa [#allocation3], 0 }
   0x3   :  { %10 = vsyncpa [#allocation3 + $0x1], 0 }
   0x4   :  { %11 = vsyncpa [#allocation6], 0 }
   0x5   :  { %12 = vsyncpa [#allocation4], 0 }
   0x6   :  { %14 = vsyncpa [#allocation4 + $0x1], 0  ;;  %s5472_s12 = smov 0   ;;  %s5474_s13 = smov 0  }
   0x7   :  { %s5476_s14 = smov 0   ;;  %s5478_s15 = smov 0  }
   0x8   :  { %s5480_s16 = smov 0   ;;  %s5482_s17 = smov 0  }
   0x9   :  { %s5484_s18 = smov 0   ;;  %s5486_s19 = smov 0  }
   0xa   :  { %s5488_s20 = smov 0   ;;  %s5490_s21 = smov 0  }
   0xb   :  { %s5492_s22 = smov 0  }
   0xc LB: > { %7057 = sst [smem:[#allocation11_spill]] %s5401_s12  ;;  %s4316_s23 = sadd.s32 4294967295, %s5441_s22   ;;  %s5441_s22 = sphi %s5492_s22, %s20_s22   ;;  %s5437_s21 = sphi %s5490_s21, %s7093_s21   ;;  %s5433_s20 = sphi %s5488_s20, %s7084_s20   ;;  %s5429_s19 = sphi %s5486_s19, %s7092_s19   ;;  %s5425_s18 = sphi %s5484_s18, %s7083_s18   ;;  %s5421_s17 = sphi %s5482_s17, %s7091_s17   ;;  %s5417_s16 = sphi %s5480_s16, %s7090_s16   ;;  %s5413_s15 = sphi %s5478_s15, %s7089_s15   ;;  %s5409_s14 = sphi %s5476_s14, %s7088_s14   ;;  %s5405_s13 = sphi %s5474_s13, %s7087_s13   ;;  %s5401_s12 = sphi %s5472_s12, %s7086_s12  }
   0xd   : > { %7058 = sst [smem:[#allocation12_spill]] %s5433_s20  ;;  %s4317_s24 = sadd.s32 4294967294, %s5441_s22  }
   0xe   : > { %p52_p0 = scmp.ne.s32.totalorder %s5417_s16, %s5413_s15  ;;  %p5528_p1 = scmp.eq.s32.totalorder %s4316_s23, 0 }
   0xf   : > { %s109_s26 = sadd.s32 1, %s5409_s14  ;;  %p119_p2 = scmp.ne.s32.totalorder %s5409_s14, %s5405_s13 }
  0x10   : > { %s7059_s25 = scalar_select %p5528_p1, 1, 0 }
  0x11   : > { %p5537_p3 = por %p5528_p1, %p52_p0  ;;  %p120_p4 = scmp.eq.s32.totalorder %s4316_s23, 3 }
  0x12   : > { %p125_p5 = scmp.ne.s32.totalorder %s5405_s13, %s5401_s12  ;;  %p126_p6 = scmp.eq.s32.totalorder %s4317_s24, 3 }
  0x13   : > { %s7060_s27 = scalar_select %p5537_p3, 1, 0 }
  0x14   : > { %p5543_p7 = por %p120_p4, %p119_p2  ;;  %p4318_p8 = scmp.ge.s32.totalorder %s5441_s22, 1 }
  0x15   : > { %p5548_p9 = por %p126_p6, %p125_p5  ;;  %p133_p10 = scmp.lt.s32.totalorder %s5441_s22, 5 }
  0x16   : > { %s7061_s28 = scalar_select %p5543_p7, 1, 0 }
  0x17   : > { %s7062_s29 = scalar_select %p5548_p9, 1, 0 }
  0x18   : > { %p5553_p11 = pnand %p4318_p8, %p133_p10  ;;  %s5443_s4 = smov [#allocation5]  }
  0x19   : > { %7063 = sst [smem:[#allocation13_spill]] %s7062_s29  ;;  %s145_s5 = sshll.u32 %s5443_s4, 4  ;;  %s146_s5 = int_to_ptr.vmem [resolvable:$true] %s145_s5 }
  0x1a   : > { %s7064_s30 = scalar_select %p5553_p11, 1, 0 }
  0x1b   : > { %p5121_p12 = pneg %p5553_p11  ;;  %s7066_s1 = sld [smem:[#allocation16_spill]] }
  0x1d   : > { %p5561_p13 = pnand %p5121_p12, %p5528_p1 }
  0x1f   : > { %p5259_p2 = pneg %p5561_p13 }
  0x21   : > { %s5257_s9 = scalar_lea.hbm %s7066_s1, 16384 }
  0x22   : > { %p5258_p0 = scmp.ne.s32.totalorder %s7066_s1, %s5257_s9  ;;  %p5264_p6 = scmp.lt.u32.totalorder %s5257_s9, %s7066_s1 }
  0x24   : > { %p5260_p4 = pnand %p5259_p2, %p5258_p0 }
  0x26   : > { %p5261_p5 = pneg %p5260_p4 }
  0x28   : > { %p5266_p8 = pnand %p5264_p6, %p5261_p5 }
  0x2a   : > { %5269 = shalt.err (!%p5266_p8)
}
  0x2b   : > { %s5270_s24 = scalar_lea.vmem %s146_s5, 16384  ;;  %p5278_p7 = scmp.lt.s32.totalorder %s146_s5, %s146_s5 }
  0x2c   : > { %p5271_p10 = scmp.ne.s32.totalorder %s146_s5, %s5270_s24  ;;  %p5279_p1 = scmp.lt.s32.totalorder %s5270_s24, %s5270_s24 }
  0x2e   : > { %p5273_p12 = pnand %p5271_p10, %p5259_p2  ;;  %p5280_p3 = por %p5279_p1, %p5278_p7 }
  0x30   : > { %p5274_p9 = pneg %p5273_p12 }
  0x32   : > { %p5281_p11 = pnand %p5280_p3, %p5274_p9 }
  0x34   : > { %5284 = shalt.err (!%p5281_p11)
}
  0x35   : > { %s5444_s4 = smov 1024   ;;  %s7050_s7 = smov 64  }
  0x36   : > { %5124 = dma.hbm_to_vmem [thread:$0]  (!%p5561_p13), %s7066_s1, 16384, %s146_s5, [#allocation6], %s5444_s4, %s5444_s4, %s7050_s7  }
  0x37   : > { %s29_s10 = sadd.s32 1, %s5433_s20  ;;  %s32_s11 = sadd.s32 1, %s5437_s21 }
  0x38   : > { %p30_p1 = scmp.ge.s32.totalorder %s29_s10, 2  ;;  %s39_s15 = sadd.s32 1, %s5421_s17 }
  0x39   : > { %p46_p3 = scmp.ne.s32.totalorder %s5421_s17, %s5417_s16  ;;  %p47_p7 = scmp.eq.s32.totalorder %s5441_s22, 0 }
  0x3a   : > { %s7095_s10 = smov (%p30_p1, %s29_s10), 0  ;;  %s7097_s11 = smov (!%p30_p1, %s32_s11), %s5437_s21 }
  0x3b   : > { %7067 = sst [smem:[#allocation14_spill]] %s7095_s10  ;;  %s105_s6 = ssub.s32 %s5433_s20, %s7095_s10 }
  0x3c   : > { %p34_p9 = scmp.ge.s32.totalorder %s7097_s11, 2  ;;  %p5134_p11 = scmp.lt.s32.totalorder %s5441_s22, 4 }
  0x3d   : > { %p5594_p13 = por %p47_p7, %p46_p3  ;;  %s162_s23 = sand.u32 1, %s5421_s17  }
  0x3e   : > { %s7099_s11 = smov (%p34_p9, %s7097_s11), 0  ;;  %s5110_s24 = smul.u32 216, %s162_s23 }
  0x3f   : > { %7069 = sst [smem:[#allocation15_spill]] %s7099_s11  ;;  %s36_s4 = ssub.s32 %s5437_s21, %s7099_s11 }
  0x40   : > { %s5111_s8 = smul.u32 3456, %s5437_s21  ;;  %p37_p0 = scmp.eq.s32.totalorder %s36_s4, 0 }
  0x41   : > { %s106_s9 = sor.u32 %s105_s6, %s36_s4  ;;  %s166_s12 = scalar_lea.vmem [#allocation2], %s5110_s24 }
  0x42   : > { %p107_p2 = scmp.eq.s32.totalorder %s106_s9, 0  ;;  %s5615_s29 = scalar_lea.hbm %s7041_s0, %s5111_s8 }
  0x43   : > { %s5605_s7 = scalar_select %p37_p0, %s5421_s17, %s39_s15  }
  0x44   : > { %s5610_s1 = scalar_select %p107_p2, %s5409_s14, %s109_s26  }
  0x45   : > { %s173_s11 = sshll.u32 %s166_s12, 4  ;;  %p5623_p4 = pnand %p5134_p11, %p5594_p13  ;;  %s5617_s11 = int_to_ptr.vmem [resolvable:$true] %s173_s11 }
  0x46   : > { %s5627_s26 = scalar_lea.sflag [#allocation3], %s162_s23  ;;  %s5285_s20 = scalar_lea.hbm %s5615_s29, 3456 }
  0x47   : > { %p5286_p5 = scmp.ne.s32.totalorder %s5615_s29, %s5285_s20  ;;  %p5287_p6 = pneg %p5623_p4 }
  0x48   : > { %s5290_s6 = scalar_lea.hbm %s7041_s0, 6912  ;;  %p5291_p12 = scmp.lt.u32.totalorder %s5615_s29, %s7041_s0 }
  0x49   : > { %p5288_p8 = pnand %p5287_p6, %p5286_p5  ;;  %p5292_p1 = scmp.lt.u32.totalorder %s5290_s6, %s5285_s20 }
  0x4a   : > { %p5294_p7 = scmp.lt.u32.totalorder %s5285_s20, %s5615_s29 }
  0x4b   : > { %p5289_p10 = pneg %p5288_p8  ;;  %p5293_p3 = por %p5292_p1, %p5291_p12 }
  0x4d   : > { %p5295_p9 = por %p5294_p7, %p5293_p3 }
  0x4f   : > { %p5296_p11 = pnand %p5295_p9, %p5289_p10 }
  0x51   : > { %5299 = shalt.err (!%p5296_p11)
}
  0x52   : > { %s5300_s23 = scalar_lea.vmem %s5617_s11, 3456  ;;  %s5446_s4 = smov [#allocation2]  }
  0x53   : > { %p5301_p13 = scmp.ne.s32.totalorder %s5617_s11, %s5300_s23  ;;  %s5305_s8 = sshll.u32 %s5446_s4, 4  ;;  %s5306_s8 = int_to_ptr.vmem [resolvable:$false] %s5305_s8 }
  0x54   : > { %s5307_s9 = scalar_lea.vmem %s5306_s8, 6912  ;;  %p5308_p5 = scmp.lt.s32.totalorder %s5617_s11, %s5306_s8 }
  0x55   : > { %p5303_p0 = pnand %p5301_p13, %p5287_p6  ;;  %p5309_p8 = scmp.lt.s32.totalorder %s5307_s9, %s5300_s23 }
  0x57   : > { %p5304_p2 = pneg %p5303_p0  ;;  %p5310_p12 = por %p5309_p8, %p5308_p5 }
  0x59   : > { %p5311_p1 = pnand %p5310_p12, %p5304_p2 }
  0x5b   : > { %5314 = shalt.err (!%p5311_p1)
}
  0x5c   : > { %s5447_s20 = smov 4   ;;  %s7071_s12 = smov 64  }
  0x5d   : > { %5128 = dma.hbm_to_vmem [thread:$0]  (!%p5623_p4), %s5615_s29, 3456, %s5617_s11, %s5627_s26, %s7071_s12, %s7071_s12, %s5447_s20  }
  0x5e   : > { %p7072_p6 = scmp.ne.s32.totalorder %s7064_s30, 0 }
  0x5f   : > { %s187_s10 = sand.u32 (!%p7072_p6), 1, %s5417_s16   ;;  %p7073_p10 = scmp.ne.s32.totalorder (!%p7072_p6), %s7060_s27, 0 }
  0x60   : > { %185 = sbr.rel (%p7072_p6) target bundleno = 626 (0x272), region = 32  ;;  %s188_s5 = scalar_lea.sflag (!%p7072_p6), [#allocation3], %s187_s10 }
  0x61   : > { %s5660_s6 = smul.u32 (!%p7072_p6), 216, %s187_s10 }
  0x63   : > { %s191_s24 = scalar_lea.vmem (!%p7072_p6), [#allocation2], %s5660_s6 }
  0x67   : > { %5388 = dma.done.wait (%p7073_p10), %s188_s5, 3456  }
  0x68   : > { %5390 = vsyncadd (%p7073_p10), %s188_s5, 4294963840  ;;  %p7074_p3 = scmp.ne.s32.totalorder %s7059_s25, 0 }
  0x6a   : > { %5392 = dma.done.wait (%p7074_p3), [#allocation6], 16384  }
  0x6b   : > { %5394 = vsyncadd (%p7074_p3), [#allocation6], 4294950912  ;;  %v5448_v0 = vmov 0   ;;  %v241_v1 = vld [vmem:[#allocation5] sm:$0xf]  ;;  %v707_v3 = vld [vmem:[#allocation5 + $0x4] sm:$0xff] }
  0x6c   : > { %867 = vmatprep.mubr.bf16.mxu1 %v5448_v0  ;;  %v242_v2 = vld [vmem:[#allocation5 + $0x40] sm:$0xf]  ;;  %v708_v5 = vld [vmem:[#allocation5 + $0x44] sm:$0xff]  ;;  %s4916_s25 = smul.u32 96, %s5425_s18  ;;  %vm512_vm0 = vsmask.f32 3328 }
  0x6d   : > { %v4336_v4 = vcombine.low %v241_v1, %v242_v2  ;;  %v243_v6 = vld [vmem:[#allocation5 + $0x80] sm:$0xf]  ;;  %v4354_v8 = vcombine.high %v707_v3, %v708_v5  ;;  %v4353_v9 = vcombine.low %v707_v3, %v708_v5  ;;  %v709_v11 = vld [vmem:[#allocation5 + $0x84] sm:$0xff]  ;;  %vm513_vm1 = vsmask.f32 7440  ;;  %s215_s11 = sand.u32 1, %s5405_s13  }
  0x6e   : > { %v244_v7 = vld [vmem:[#allocation5 + $0xc0] sm:$0xf]  ;;  %v710_v12 = vld [vmem:[#allocation5 + $0xc4] sm:$0xff]  ;;  %s5675_s27 = scalar_lea.vmem %s191_s24, %s4916_s25 [#allocation2]  ;;  %vm5691_vm2 = vmor %vm512_vm0, %vm513_vm1  ;;  %vm1076_vm3 = vcmask 1042432   ;;  %vm1077_vm4 = vcmask 1046532   ;;  %s4324_s15 = sshll.u32 %s215_s11, 9 }
  0x6f   : > { %v4337_v10 = vcombine.low %v243_v6, %v244_v7  ;;  %v245_v13 = vld [vmem:[#allocation5 + $0x100] sm:$0xf]  ;;  %4982 = vmatprep.subr.bf16.mxu0 %v4336_v4  ;;  %v4356_v14 = vcombine.high %v709_v11, %v710_v12  ;;  %v711_v16 = vld [vmem:[#allocation5 + $0x104] sm:$0xff]  ;;  %835 = vmatprep.subr.bf16.mxu1 %v4354_v8  ;;  %v4355_v18 = vcombine.low %v709_v11, %v710_v12  ;;  %v5232_v32 = vld [vmem:[%s5675_s27] sm:$0xff]   ;;  %s6643_s26 = scalar_lea.vmem [#allocation7], %s4324_s15  ;;  %s4917_s8 = sshll.u32 %s5425_s18, 6 }
  0x70   : > { %v246_v15 = vld [vmem:[#allocation5 + $0x140] sm:$0xf]  ;;  %v712_v17 = vld [vmem:[#allocation5 + $0x144] sm:$0xff]  ;;  %4983 = vmatpush3.bf16.msra.mxu0 %v4336_v4  ;;  %836 = vmatpush1.bf16.msra.mxu1 %v4353_v9  ;;  %v488_v33 = vld [vmem:[%s5675_s27] sm:$0xf]  ;;  %s4912_s9 = sshll.u32 %s5429_s19, 7 }
  0x71   : > { %4984 = vmatprep.subr.bf16.mxu0 %v4337_v10  ;;  %v4338_v19 = vcombine.low %v245_v13, %v246_v15  ;;  %837 = vmatprep.subr.bf16.mxu1 %v4356_v14  ;;  %v4358_v20 = vcombine.high %v711_v16, %v712_v17  ;;  %v247_v21 = vld [vmem:[#allocation5 + $0x180] sm:$0xf]  ;;  %v713_v23 = vld [vmem:[#allocation5 + $0x184] sm:$0xff]  ;;  %v4357_v25 = vcombine.low %v711_v16, %v712_v17  ;;  %v489_v36 = vld [vmem:[%s5675_s27 + $0x4] sm:$0xf]  ;;  %v516_v37 = vshrl.u32 %v488_v33, 16  ;;  %s4206_s20 = sadd.s32 %s4917_s8, %s4912_s9 }
  0x72   : > { %v248_v22 = vld [vmem:[#allocation5 + $0x1c0] sm:$0xf]  ;;  %v714_v24 = vld [vmem:[#allocation5 + $0x1c4] sm:$0xff]  ;;  %v519_v38 = vshll.u32 %v488_v33, 16  ;;  %4998 = vmatprep.mubr.bf16.mxu0 %v5232_v32  ;;  %v525_v42 = vshll.u32 %v489_v36, 16  ;;  %v529_v43 = vshrl.u32 %v489_v36, 16  ;;  %vm5781_vm5 = vmor %vm1076_vm3, %vm1077_vm4 }
  0x73   : > { %v4339_v26 = vcombine.low %v247_v21, %v248_v22  ;;  %v249_v27 = vld [vmem:[#allocation5 + $0x200] sm:$0xf]  ;;  %v4360_v29 = vcombine.high %v713_v23, %v714_v24  ;;  %v715_v30 = vld [vmem:[#allocation5 + $0x204] sm:$0xff]  ;;  %v4359_v34 = vcombine.low %v713_v23, %v714_v24  ;;  %v518_v46 = vrot.slane %v516_v37, 4  ;;  %v490_v49 = vld [vmem:[%s5675_s27 + $0x8] sm:$0x1] }
  0x74   : > { %4985 = vmatpush3.bf16.msra.mxu0 %v4337_v10  ;;  %838 = vmatpush1.bf16.msra.mxu1 %v4355_v18  ;;  %v250_v28 = vld [vmem:[#allocation5 + $0x240] sm:$0xf]  ;;  %v716_v31 = vld [vmem:[#allocation5 + $0x244] sm:$0xff]  ;;  %v521_v47 = vrot.slane %v519_v38, 5  ;;  %v5681_v50 = vrot.slane %v525_v42, 5  ;;  %v531_v51 = vrot.slane %v529_v43, 4 }
  0x75   : > { %4986 = vmatprep.subr.bf16.mxu0 %v4338_v19  ;;  %839 = vmatprep.subr.bf16.mxu1 %v4358_v20  ;;  %v4340_v35 = vcombine.low %v249_v27, %v250_v28  ;;  %v4362_v39 = vcombine.high %v715_v30, %v716_v31  ;;  %v251_v40 = vld [vmem:[#allocation5 + $0x280] sm:$0xf]  ;;  %v717_v44 = vld [vmem:[#allocation5 + $0x284] sm:$0xff]  ;;  %v4361_v52 = vcombine.low %v715_v30, %v716_v31  ;;  %v491_v56 = vld [vmem:[%s5675_s27 + $0xc] sm:$0xf]  ;;  %v535_v61 = vshll.u32 %v490_v49, 16 }
  0x76   : > { %v252_v41 = vld [vmem:[#allocation5 + $0x2c0] sm:$0xf]  ;;  %v718_v45 = vld [vmem:[#allocation5 + $0x2c4] sm:$0xff]  ;;  %v522_v59 = vor.u32 %v521_v47, %v518_v46  ;;  %v532_v60 = vor.u32 %v531_v51, %v5681_v50  ;;  %v540_v63 = vshrl.u32 %v491_v56, 16  ;;  %v543_v2 = vshll.u32 %v491_v56, 16  ;;  %v1952_v36 = vld [vmem:[#allocation5 + $0x58] sm:$0xff] }
  0x77   : > { %v253_v48 = vld [vmem:[#allocation5 + $0x300] sm:$0xf]  ;;  %v4341_v53 = vcombine.low %v251_v40, %v252_v41  ;;  %v4364_v55 = vcombine.high %v717_v44, %v718_v45  ;;  %v719_v57 = vld [vmem:[#allocation5 + $0x304] sm:$0xff]  ;;  %v4363_v5 = vcombine.low %v717_v44, %v718_v45  ;;  %v1135_v13 = vld [vmem:[#allocation5 + $0xc] sm:$0xf]  ;;  %v537_v21 = vrot.slane %v535_v61, 5 }
  0x78   : > { %4987 = vmatpush3.bf16.msra.mxu0 %v4338_v19  ;;  %840 = vmatpush1.bf16.msra.mxu1 %v4357_v25  ;;  %v254_v54 = vld [vmem:[#allocation5 + $0x340] sm:$0xf]  ;;  %v720_v58 = vld [vmem:[#allocation5 + $0x344] sm:$0xff]  ;;  %v542_v10 = vrot.slane %v540_v63, 4  ;;  %v1136_v14 = vld [vmem:[#allocation5 + $0x4c] sm:$0xf] }
  0x79   : > { %4988 = vmatprep.subr.bf16.mxu0 %v4339_v26  ;;  %841 = vmatprep.subr.bf16.mxu1 %v4360_v29  ;;  %v492_v62 = vld [vmem:[%s5675_s27 + $0x10] sm:$0xf]  ;;  %v493_v1 = vld [vmem:[%s5675_s27 + $0x14] sm:$0x1]  ;;  %v4342_v6 = vcombine.low %v253_v48, %v254_v54  ;;  %v4366_v11 = vcombine.high %v719_v57, %v720_v58  ;;  %v545_v15 = vrot.slane %v543_v2, 5  ;;  %v523_v19 = vrot.slane %v522_v59, 4 }
  0x7a   : > { %v549_v3 = vshll.u32 %v492_v62, 16  ;;  %v553_v4 = vshrl.u32 %v492_v62, 16  ;;  %v255_v7 = vld [vmem:[#allocation5 + $0x380] sm:$0xf]  ;;  %v721_v9 = vld [vmem:[#allocation5 + $0x384] sm:$0xff]  ;;  %v533_v20 = vrot.slane %v532_v60, 4  ;;  %v4365_v23 = vcombine.low %v719_v57, %v720_v58 }
  0x7b   : > { %v256_v8 = vld [vmem:[#allocation5 + $0x3c0] sm:$0xf]  ;;  %v722_v12 = vld [vmem:[#allocation5 + $0x3c4] sm:$0xff]  ;;  %v559_v22 = vshll.u32 %v493_v1, 16  ;;  %v546_v25 = vor.u32 %v545_v15, %v542_v10  ;;  %v495_v28 = vld [vmem:[%s5675_s27 + $0x1c] sm:$0xf]  ;;  %v528_v33 = vsel %vm5691_vm2, %v523_v19, %v5681_v50 }
  0x7c   : > { %4989 = vmatpush3.bf16.msra.mxu0 %v4339_v26  ;;  %842 = vmatpush1.bf16.msra.mxu1 %v4359_v34  ;;  %v5687_v16 = vrot.slane %v549_v3, 5  ;;  %v555_v17 = vrot.slane %v553_v4, 4  ;;  %v4343_v24 = vcombine.low %v255_v7, %v256_v8  ;;  %v494_v27 = vld [vmem:[%s5675_s27 + $0x18] sm:$0xf]  ;;  %v4368_v29 = vcombine.high %v721_v9, %v722_v12  ;;  %v1137_v40 = vld [vmem:[#allocation5 + $0x8c] sm:$0xf] }
  0x7d   : > { %4990 = vmatprep.subr.bf16.mxu0 %v4340_v35  ;;  %843 = vmatprep.subr.bf16.mxu1 %v4362_v39  ;;  %v4367_v30 = vcombine.low %v721_v9, %v722_v12  ;;  %v564_v31 = vshrl.u32 %v494_v27, 16  ;;  %v567_v32 = vshll.u32 %v494_v27, 16  ;;  %v4385_v34 = vcombine.low %v1135_v13, %v1136_v14  ;;  %v1138_v41 = vld [vmem:[#allocation5 + $0xcc] sm:$0xf]  ;;  %v5233_v45 = vld [vmem:[%s5675_s27 + $0xc] sm:$0xff]   ;;  %s4913_s18 = sshll.u32 %s4206_s20, 7 }
  0x7e   : > { %v556_v26 = vor.u32 %v555_v17, %v5687_v16  ;;  %v573_v37 = vshll.u32 %v495_v28, 16  ;;  %v577_v38 = vshrl.u32 %v495_v28, 16  ;;  %v538_v39 = vsel %vm5691_vm2, %v533_v20, %v537_v21  ;;  %v496_v48 = vld [vmem:[%s5675_s27 + $0x20] sm:$0x1]  ;;  %v498_v54 = vld [vmem:[%s5675_s27 + $0x28] sm:$0xf]  ;;  %s6972_s6 = scalar_lea.hbm %s7044_s3, %s4913_s18 }
  0x7f   : > { %v5703_v42 = vrot.slane %v559_v22, 5  ;;  %v566_v43 = vrot.slane %v564_v31, 4  ;;  %v569_v44 = vrot.slane %v567_v32, 5  ;;  %v547_v46 = vrot.slane %v546_v25, 4  ;;  %v5713_v56 = vld [vmem:[#allocation5 + $0xd8] sm:$0xff]  ;;  %v5234_v1 = vld [vmem:[%s5675_s27 + $0x18] sm:$0xff]  }
  0x80   : > { %4991 = vmatpush3.bf16.msra.mxu0 %v4340_v35  ;;  %844 = vmatpush1.bf16.msra.mxu1 %v4361_v52  ;;  %v1950_v35 = vld [vmem:[#allocation5 + $0x18] sm:$0xff]  ;;  %v557_v47 = vrot.slane %v556_v26, 4  ;;  %v5707_v49 = vrot.slane %v573_v37, 5  ;;  %v579_v50 = vrot.slane %v577_v38, 4  ;;  %v4345_v52 = vcombine.low %v528_v33, %v538_v39  ;;  %v1139_v2 = vld [vmem:[#allocation5 + $0x10c] sm:$0xf] }
  0x81   : > { %4992 = vmatprep.subr.bf16.mxu0 %v4341_v53  ;;  %845 = vmatprep.subr.bf16.mxu1 %v4364_v55  ;;  %v4484_v51 = vcombine.high %v1950_v35, %v1952_v36  ;;  %v5711_v55 = vld [vmem:[#allocation5 + $0x98] sm:$0xff]  ;;  %v570_v57 = vor.u32 %v569_v44, %v566_v43  ;;  %v597_v60 = vshll.u32 %v498_v54, 16  ;;  %v4483_v61 = vcombine.low %v1950_v35, %v1952_v36  ;;  %v1140_v3 = vld [vmem:[#allocation5 + $0x14c] sm:$0xf]  ;;  %v5737_v21 = vld [vmem:[%s5675_s27 + $0x4] sm:$0xf] }
  0x82   : > { %v4386_v62 = vcombine.low %v1137_v40, %v1138_v41  ;;  %v601_v63 = vshrl.u32 %v498_v54, 16  ;;  %v580_v4 = vor.u32 %v579_v50, %v5707_v49  ;;  %v4488_v7 = vcombine.high %v5711_v55, %v5713_v56  ;;  %v5722_v8 = vld [vmem:[#allocation5 + $0x118] sm:$0xff]  ;;  %v1141_v14 = vld [vmem:[#allocation5 + $0x18c] sm:$0xf]  ;;  %v500_v22 = vld [vmem:[%s5675_s27 + $0x30] sm:$0xf] }
  0x83   : > { %v5724_v9 = vld [vmem:[#allocation5 + $0x158] sm:$0xff]  ;;  %v562_v13 = vsel %vm5691_vm2, %v557_v47, %v5703_v42  ;;  %v5730_v15 = vrot.slane %v570_v57, 4  ;;  %v4387_v19 = vcombine.low %v1139_v2, %v1140_v3  ;;  %v4487_v20 = vcombine.low %v5711_v55, %v5713_v56  ;;  %v1142_v25 = vld [vmem:[#allocation5 + $0x1cc] sm:$0xf]  ;;  %v5236_v37 = vld [vmem:[%s5675_s27 + $0x30] sm:$0xff]   ;;  %s4209_s19 = sshll.u32 %s6643_s26, 4  ;;  %s6974_s19 = int_to_ptr.vmem [resolvable:$true] %s4209_s19 }
  0x84   : > { %4993 = vmatpush3.bf16.msra.mxu0 %v4341_v53  ;;  %846 = vmatpush1.bf16.msra.mxu1 %v4363_v5  ;;  %v497_v53 = vld [vmem:[%s5675_s27 + $0x24] sm:$0xf]  ;;  %v583_v5 = vshll.u32 %v496_v48, 16  ;;  %v499_v10 = vld [vmem:[%s5675_s27 + $0x2c] sm:$0x1]  ;;  %v603_v17 = vrot.slane %v601_v63, 4  ;;  %v4492_v28 = vcombine.high %v5722_v8, %v5724_v9  ;;  %v4388_v44 = vcombine.low %v1141_v14, %v1142_v25 }
  0x85   : > { %4994 = vmatprep.subr.bf16.mxu0 %v4342_v6  ;;  %847 = vmatprep.subr.bf16.mxu1 %v4366_v11  ;;  %v588_v58 = vshrl.u32 %v497_v53, 16  ;;  %v591_v59 = vshll.u32 %v497_v53, 16  ;;  %v581_v26 = vrot.slane %v580_v4, 4  ;;  %v5745_v32 = vld [vmem:[#allocation5 + $0x198] sm:$0xff]  ;;  %v612_v35 = vshrl.u32 %v500_v22, 16  ;;  %v5237_v4 = vld [vmem:[%s5675_s27 + $0x3c] sm:$0xff]  }
  0x86   : > { %v585_v27 = vrot.slane %v583_v5, 5  ;;  %v5747_v33 = vld [vmem:[#allocation5 + $0x1d8] sm:$0xff]  ;;  %v615_v36 = vshll.u32 %v500_v22, 16  ;;  %v1143_v38 = vld [vmem:[#allocation5 + $0x20c] sm:$0xf]  ;;  %v1081_v41 = vrot.slane %v5737_v21, 5  ;;  %v4491_v47 = vcombine.low %v5722_v8, %v5724_v9 }
  0x87   : > { %v590_v11 = vrot.slane %v588_v58, 4  ;;  %v593_v12 = vrot.slane %v591_v59, 5  ;;  %v1030_v40 = vld [vmem:[%s5675_s27 + $0x8] sm:$0x1]  ;;  %v1145_v48 = vld [vmem:[#allocation5 + $0x28c] sm:$0xf]  ;;  %v4496_v55 = vcombine.high %v5745_v32, %v5747_v33 }
  0x88   : > { %4995 = vmatpush3.bf16.msra.mxu0 %v4342_v6  ;;  %848 = vmatpush1.bf16.msra.mxu1 %v4365_v23  ;;  %v552_v6 = vsel %vm5691_vm2, %v547_v46, %v5687_v16  ;;  %v5732_v16 = vrot.slane %v597_v60, 5  ;;  %v501_v23 = vld [vmem:[%s5675_s27 + $0x34] sm:$0xf]  ;;  %v1144_v46 = vld [vmem:[#allocation5 + $0x24c] sm:$0xf]  ;;  %v1084_v57 = vrot.slane %v1030_v40, 5 }
  0x89   : > { %4996 = vmatprep.subr.bf16.mxu0 %v4343_v24  ;;  %849 = vmatprep.subr.bf16.mxu1 %v4368_v29  ;;  %v607_v29 = vshll.u32 %v499_v10, 16  ;;  %v594_v31 = vor.u32 %v593_v12, %v590_v11  ;;  %v621_v42 = vshll.u32 %v501_v23, 16  ;;  %v625_v43 = vshrl.u32 %v501_v23, 16  ;;  %v1146_v50 = vld [vmem:[#allocation5 + $0x2cc] sm:$0xf]  ;;  %v5772_v2 = vld [vmem:[#allocation5 + $0x218] sm:$0xff] }
  0x8a   : > { %v604_v39 = vor.u32 %v603_v17, %v5732_v16  ;;  %v1147_v53 = vld [vmem:[#allocation5 + $0x30c] sm:$0xf]  ;;  %v502_v58 = vld [vmem:[%s5675_s27 + $0x38] sm:$0x1]  ;;  %v614_v59 = vrot.slane %v612_v35, 4  ;;  %v617_v60 = vrot.slane %v615_v36, 5  ;;  %v4389_v5 = vcombine.low %v1143_v38, %v1144_v46 }
  0x8b   : > { %v1148_v54 = vld [vmem:[#allocation5 + $0x34c] sm:$0xf]  ;;  %v5770_v63 = vrot.slane %v621_v42, 5  ;;  %v5774_v3 = vld [vmem:[#allocation5 + $0x258] sm:$0xff]  ;;  %v4495_v11 = vcombine.low %v5745_v32, %v5747_v33  ;;  %v504_v14 = vld [vmem:[%s5675_s27 + $0x40] sm:$0xf] }
  0x8c   : > { %4997 = vmatpush3.bf16.msra.mxu0 %v4343_v24  ;;  %850 = vmatpush1.bf16.msra.mxu1 %v4367_v30  ;;  %v5235_v24 = vld [vmem:[%s5675_s27 + $0x24] sm:$0xff]   ;;  %v4346_v30 = vcombine.low %v552_v6, %v562_v13  ;;  %v5777_v6 = vcombine.low %v1145_v48, %v1146_v50  ;;  %v5786_v10 = vcombine.low %v1147_v53, %v1148_v54  ;;  %v1150_v12 = vld [vmem:[#allocation5 + $0x3cc] sm:$0xf]  ;;  %v1031_v21 = vld [vmem:[%s5675_s27 + $0xc] sm:$0xe]  ;;  %v645_v33 = vshll.u32 %v504_v14, 16 }
  0x8d   : > { %5014 = vmatprep.subr.bf16.mxu0 %v4385_v34  ;;  %2174 = vmatprep.subr.bf16.mxu1 %v4484_v51  ;;  %v586_v51 = vsel %vm5691_vm2, %v581_v26, %v585_v27  ;;  %v503_v13 = vld [vmem:[%s5675_s27 + $0x3c] sm:$0xf]  ;;  %v1032_v22 = vld [vmem:[%s5675_s27 + $0x10] sm:$0xf]  ;;  %v4500_v23 = vcombine.high %v5772_v2, %v5774_v3  ;;  %v5813_v27 = vld [vmem:[%s5675_s27 + $0x14] sm:$0x1]  ;;  %v4499_v38 = vcombine.low %v5772_v2, %v5774_v3 }
  0x8e   : > { %v639_v32 = vshll.u32 %v503_v13, 16  ;;  %v4370_v36 = vrot.slane %v1031_v21, 9  ;;  %v1034_v40 = vld [vmem:[%s5675_s27 + $0x18] sm:$0xe]  ;;  %v1036_v46 = vld [vmem:[%s5675_s27 + $0x20] sm:$0x1] }
  0x8f   : > { %4999 = vmatmul.mubr.bf16.vlgmr.msra.gmra.mrb[0].mxu0 %v5233_v45  ;;  %868 = vmatmul.mubr.bf16.vlgmr.msra.gmra.mrb[0].mxu1 %v4345_v52  ;;  %v576_v45 = vsel %vm5691_vm2, %v5730_v15, %v5707_v49  ;;  %v5764_v52 = vrot.slane %v607_v29, 5  ;;  %v595_v49 = vrot.slane %v594_v31, 4  ;;  %v5238_v15 = vld [vmem:[%s5675_s27 + $0x48] sm:$0xff]   ;;  %v5817_v29 = vld [vmem:[#allocation5 + $0x50] sm:$0xff]  ;;  %v636_v31 = vshrl.u32 %v503_v13, 16  ;;  %s6980_s5 = scalar_lea.sflag [#allocation4], %s215_s11 }
  0x90   : > { %5015 = vmatpush3.bf16.msra.mxu0 %v4385_v34  ;;  %2175 = vmatpush1.bf16.msra.mxu1 %v4483_v61  ;;  %v5750_v34 = vld [vmem:[%s5675_s27] sm:$0xe]  ;;  %v605_v61 = vrot.slane %v604_v39, 4  ;;  %v4347_v9 = vcombine.low %v576_v45, %v586_v51  ;;  %v1970_v53 = vld [vmem:[#allocation5 + $0x298] sm:$0xff]  ;;  %s5315_s24 = scalar_lea.vmem %s6974_s19, 8192  ;;  %p7079_p7 = scmp.ne.s32.totalorder %s7061_s28, 0 }
  0x91   : > { %5016 = vmatprep.subr.bf16.mxu0 %v4386_v62  ;;  %5002 = vmatprep.mubr.bf16.mxu0 %v5234_v1  ;;  %v4369_v56 = vrot.slane %v5750_v34, 9  ;;  %v627_v1 = vrot.slane %v625_v43, 4  ;;  %v600_v17 = vsel %vm5691_vm2, %v595_v49, %v5732_v16  ;;  %v649_v34 = vshrl.u32 %v504_v14, 16  ;;  %v5826_v39 = vld [vmem:[#allocation5 + $0x90] sm:$0xff]  ;;  %v1972_v54 = vld [vmem:[#allocation5 + $0x2d8] sm:$0xff]  ;;  %p5316_p4 = scmp.ne.s32.totalorder %s6974_s19, %s5315_s24  ;;  %s5449_s25 = smov [#allocation7]  }
  0x92   : > { %877 = vmatprep.mubr.bf16.mxu1 %v5448_v0  ;;  %2176 = vmatprep.subr.bf16.mxu1 %v4488_v7  ;;  %v1149_v7 = vld [vmem:[#allocation5 + $0x38c] sm:$0xf]  ;;  %v5834_v45 = vld [vmem:[#allocation5 + $0xd0] sm:$0xff]  ;;  %v5846_v49 = vrot.slane %v645_v33, 5 }
  0x93   : > { %v5805_v25 = vsel %vm5781_vm5, %v4369_v56, %v1081_v41  ;;  %v628_v26 = vor.u32 %v627_v1, %v5770_v63  ;;  %v5822_v35 = vcombine.low %v1149_v7, %v1150_v12  ;;  %v641_v56 = vrot.slane %v639_v32, 5  ;;  %v5239_v1 = vld [vmem:[%s5675_s27 + $0x54] sm:$0xff]   ;;  %p5317_p9 = pnand %p5316_p4, %p7079_p7 }
  0x94   : > { %5017 = vmatpush3.bf16.msra.mxu0 %v4386_v62  ;;  %2177 = vmatpush1.bf16.msra.mxu1 %v4487_v20  ;;  %v1083_v62 = vrot.slane %v1081_v41, 4  ;;  %v631_v20 = vshll.u32 %v502_v58, 16  ;;  %v5849_v58 = vld [vmem:[%s5675_s27 + $0x28] sm:$0xf]  ;;  %v4421_v3 = vcombine.low %v5826_v39, %v5834_v45  ;;  %v4504_v7 = vcombine.high %v1970_v53, %v1972_v54 }
  0x95   : > { %5018 = vmatprep.subr.bf16.mxu0 %v4387_v19  ;;  %2178 = vmatprep.subr.bf16.mxu1 %v4492_v28  ;;  %v5815_v28 = vld [vmem:[#allocation5 + $0x10] sm:$0xff]  ;;  %v5839_v48 = vrot.slane %v628_v26, 4  ;;  %v1098_v12 = vrot.slane %v1036_v46, 5  ;;  %v1102_v14 = vrot.slane %v5849_v58, 5  ;;  %v4422_v21 = vcombine.high %v5826_v39, %v5834_v45  ;;  %v1974_v46 = vld [vmem:[#allocation5 + $0x318] sm:$0xff]  ;;  %v5987_v39 = vld [vmem:[#allocation5 + $0x28] sm:$0xff]  ;;  %p5318_p11 = pneg %p5317_p9 }
  0x96   : > { %v5809_v16 = vsel %vm5781_vm5, %v1083_v62, %v1084_v57  ;;  %v5831_v43 = vrot.slane %v631_v20, 5  ;;  %v4419_v50 = vcombine.low %v5815_v28, %v5817_v29  ;;  %v651_v57 = vrot.slane %v649_v34, 4  ;;  %v1039_v20 = vld [vmem:[%s5675_s27 + $0x2c] sm:$0x1] }
  0x97   : > { %5003 = vmatmul.mubr.bf16.gmra.mrb[4].mxu0 %v5235_v24  ;;  %878 = vmatmul.mubr.bf16.gmra.mrb[4].mxu1 %v4346_v30  ;;  %v610_v24 = vsel %vm5691_vm2, %v605_v61, %v5764_v52  ;;  %v5820_v30 = vld [vmem:[%s5675_s27 + $0x1c] sm:$0xf]  ;;  %v505_v52 = vld [vmem:[%s5675_s27 + $0x44] sm:$0x1]  ;;  %v4420_v61 = vcombine.high %v5815_v28, %v5817_v29  ;;  %v4371_v62 = vrot.slane %v1034_v40, 9 }
  0x98   : > { %5019 = vmatpush3.bf16.msra.mxu0 %v4387_v19  ;;  %5006 = vmatprep.mubr.bf16.mxu0 %v5236_v37  ;;  %v618_v19 = vor.u32 %v617_v60, %v614_v59  ;;  %v1088_v37 = vrot.slane %v1032_v22, 5  ;;  %v4348_v41 = vcombine.low %v600_v17, %v610_v24  ;;  %v1095_v51 = vrot.slane %v5820_v30, 5  ;;  %v5889_v24 = vld [vmem:[%s5675_s27 + $0x34] sm:$0xf]  ;;  %v5891_v30 = vld [vmem:[#allocation5 + $0x110] sm:$0xff] }
  0x99   : > { %5020 = vmatprep.subr.bf16.mxu0 %v4388_v44  ;;  %887 = vmatprep.mubr.bf16.mxu1 %v5448_v0  ;;  %v655_v13 = vshll.u32 %v505_v52, 16  ;;  %v5898_v40 = vld [vmem:[#allocation5 + $0x150] sm:$0xff] }
  0x9a   : > { %2179 = vmatpush1.bf16.msra.mxu1 %v4491_v47  ;;  %v5829_v42 = vrot.slane %v618_v19, 4  ;;  %v4377_v47 = vcombine.low %v5805_v25, %v5809_v16  ;;  %v5854_v59 = vsel %vm5781_vm5, %v4370_v36, %v1088_v37  ;;  %v1090_v60 = vrot.slane %v1088_v37, 4  ;;  %v5969_v29 = vld [vmem:[#allocation5 + $0x210] sm:$0xff] }
  0x9b   : > { %2180 = vmatprep.subr.bf16.mxu1 %v4496_v55  ;;  %v638_v55 = vrot.slane %v636_v31, 4  ;;  %v652_v19 = vor.u32 %v651_v57, %v5846_v49  ;;  %v5883_v22 = vsel %vm5781_vm5, %v4371_v62, %v1095_v51  ;;  %v657_v36 = vrot.slane %v655_v13, 5 }
  0x9c   : > { %5021 = vmatpush3.bf16.msra.mxu0 %v4388_v44  ;;  %v1091_v44 = vrot.slane %v5813_v27, 5  ;;  %v624_v2 = vsel %vm5691_vm2, %v5829_v42, %v5770_v63  ;;  %v634_v63 = vsel %vm5691_vm2, %v5839_v48, %v5831_v43  ;;  %v1104_v37 = vrot.slane %v1102_v14, 4  ;;  %v1042_v42 = vld [vmem:[%s5675_s27 + $0x38] sm:$0x1]  ;;  %v1976_v48 = vld [vmem:[#allocation5 + $0x358] sm:$0xff] }
  0x9d   : > { %5022 = vmatprep.subr.bf16.mxu0 %v4389_v5  ;;  %v642_v17 = vor.u32 %v641_v56, %v638_v55  ;;  %v508_v55 = vld [vmem:[%s5675_s27 + $0x50] sm:$0x1]  ;;  %v4423_v62 = vcombine.low %v5891_v30, %v5898_v40  ;;  %v4424_v13 = vcombine.high %v5891_v30, %v5898_v40 }
  0x9e   : > { %2181 = vmatpush1.bf16.msra.mxu1 %v4495_v11  ;;  %v1097_v11 = vrot.slane %v1095_v51, 4  ;;  %v4349_v51 = vcombine.low %v624_v2, %v634_v63  ;;  %v4508_v2 = vcombine.high %v1974_v46, %v1976_v48  ;;  %v1043_v63 = vld [vmem:[%s5675_s27 + $0x3c] sm:$0xe] }
  0x9f   : > { %5007 = vmatmul.mubr.bf16.gmra.mrb[8].mxu0 %v5237_v4  ;;  %2182 = vmatprep.subr.bf16.mxu1 %v4500_v23  ;;  %v1037_v4 = vld [vmem:[%s5675_s27 + $0x24] sm:$0xe]  ;;  %v5886_v23 = vld [vmem:[%s5675_s27 + $0x30] sm:$0xe]  ;;  %v643_v43 = vrot.slane %v642_v17, 4  ;;  %v4374_v28 = vrot.slane %v1043_v63, 9 }
  0xa0   : > { %888 = vmatmul.mubr.bf16.gmra.mrb[8].mxu1 %v4347_v9  ;;  %5023 = vmatpush3.bf16.msra.mxu0 %v4389_v5  ;;  %v4503_v5 = vcombine.low %v1970_v53, %v1972_v54  ;;  %v506_v9 = vld [vmem:[%s5675_s27 + $0x48] sm:$0xf]  ;;  %v4372_v27 = vrot.slane %v1037_v4, 9  ;;  %v5896_v34 = vsel %vm5781_vm5, %v1097_v11, %v1098_v12  ;;  %v5909_v53 = vld [vmem:[#allocation5 + $0x190] sm:$0xff]  ;;  %v5933_v4 = vld [vmem:[%s5675_s27 + $0x4c] sm:$0xf] }
  0xa1   : > { %5024 = vmatprep.subr.bf16.mxu0 %v5777_v6  ;;  %5010 = vmatprep.mubr.bf16.mxu0 %v5238_v15  ;;  %v507_v15 = vld [vmem:[%s5675_s27 + $0x4c] sm:$0xf]  ;;  %v660_v26 = vshrl.u32 %v506_v9, 16  ;;  %v663_v31 = vshll.u32 %v506_v9, 16  ;;  %v5911_v54 = vld [vmem:[#allocation5 + $0x1d0] sm:$0xff]  ;;  %v4379_v58 = vcombine.low %v5883_v22, %v5896_v34  ;;  %v1112_v11 = vrot.slane %v1042_v42, 5 }
  0xa2   : > { %897 = vmatprep.mubr.bf16.mxu1 %v5448_v0  ;;  %2183 = vmatpush1.bf16.msra.mxu1 %v4499_v38  ;;  %v669_v32 = vshll.u32 %v507_v15, 16  ;;  %v673_v33 = vshrl.u32 %v507_v15, 16  ;;  %v1105_v38 = vrot.slane %v1039_v20, 5  ;;  %v510_v12 = vld [vmem:[%s5675_s27 + $0x58] sm:$0xf]  ;;  %v679_v15 = vshll.u32 %v508_v55, 16 }
  0xa3   : > { %2184 = vmatprep.subr.bf16.mxu1 %v4504_v7  ;;  %v662_v56 = vrot.slane %v660_v26, 4  ;;  %v665_v57 = vrot.slane %v663_v31, 5  ;;  %v4425_v17 = vcombine.low %v5909_v53, %v5911_v54  ;;  %v1045_v20 = vld [vmem:[%s5675_s27 + $0x44] sm:$0x1]  ;;  %v1123_v22 = vrot.slane %v5933_v4, 5 }
  0xa4   : > { %5025 = vmatpush3.bf16.msra.mxu0 %v5777_v6  ;;  %v1092_v6 = vsel %vm5781_vm5, %v1090_v60, %v1091_v44  ;;  %v653_v44 = vrot.slane %v652_v19, 4  ;;  %v5918_v60 = vsel %vm5781_vm5, %v4372_v27, %v1102_v14  ;;  %v5920_v25 = vrot.slane %v669_v32, 5  ;;  %v4452_v4 = vld [vmem:[%s5675_s27 + $0x10] sm:$0xf]  ;;  %v1051_v63 = vld [vmem:[%s5675_s27 + $0x5c] sm:$0x1] }
  0xa5   : > { %5026 = vmatprep.subr.bf16.mxu0 %v5786_v10  ;;  %v4378_v52 = vcombine.low %v5854_v59, %v1092_v6  ;;  %v675_v16 = vrot.slane %v673_v33, 4  ;;  %v5928_v59 = vsel %vm5781_vm5, %v1104_v37, %v1105_v38  ;;  %v666_v14 = vor.u32 %v665_v57, %v662_v56  ;;  %v1046_v6 = vld [vmem:[%s5675_s27 + $0x48] sm:$0xe]  ;;  %v5980_v57 = vld [vmem:[%s5675_s27 + $0x58] sm:$0xf] }
  0xa6   : > { %2185 = vmatpush1.bf16.msra.mxu1 %v4503_v5  ;;  %v509_v5 = vld [vmem:[%s5675_s27 + $0x54] sm:$0xf]  ;;  %v658_v7 = vsel %vm5691_vm2, %v653_v44, %v657_v36  ;;  %v693_v31 = vshll.u32 %v510_v12, 16  ;;  %v697_v34 = vshrl.u32 %v510_v12, 16  ;;  %v1978_v36 = vld [vmem:[#allocation5 + $0x398] sm:$0xff]  ;;  %v681_v38 = vrot.slane %v679_v15, 5 }
  0xa7   : > { %5011 = vmatmul.mubr.bf16.gmra.mrb[12].mxu0 %v5239_v1  ;;  %v4507_v1 = vcombine.low %v1974_v46, %v1976_v48  ;;  %2186 = vmatprep.subr.bf16.mxu1 %v4508_v2  ;;  %v676_v19 = vor.u32 %v675_v16, %v5920_v25  ;;  %v684_v26 = vshrl.u32 %v509_v5, 16  ;;  %v687_v27 = vshll.u32 %v509_v5, 16  ;;  %v1980_v37 = vld [vmem:[#allocation5 + $0x3d8] sm:$0xff]  ;;  %v511_v48 = vld [vmem:[%s5675_s27 + $0x5c] sm:$0x1] }
  0xa8   : > { %898 = vmatmul.mubr.bf16.gmra.mrb[12].mxu1 %v4348_v41  ;;  %5027 = vmatpush3.bf16.msra.mxu0 %v5786_v10  ;;  %v4373_v41 = vrot.slane %v5886_v23, 9  ;;  %v1109_v10 = vrot.slane %v5889_v24, 5  ;;  %v1048_v24 = vld [vmem:[%s5675_s27 + $0x50] sm:$0x1]  ;;  %v5977_v55 = vrot.slane %v693_v31, 5  ;;  %v699_v56 = vrot.slane %v697_v34, 4 }
  0xa9   : > { %5028 = vmatprep.subr.bf16.mxu0 %v5822_v35  ;;  %907 = vmatprep.mubr.bf16.mxu1 %v5448_v0  ;;  %v677_v44 = vrot.slane %v676_v19, 4  ;;  %v1126_v46 = vrot.slane %v1048_v24, 5  ;;  %v4511_v2 = vcombine.low %v1978_v36, %v1980_v37  ;;  %v5997_v5 = vld [vmem:[#allocation5 + $0x68] sm:$0xff]  ;;  %v703_v12 = vshll.u32 %v511_v48, 16  ;;  %v1049_v15 = vld [vmem:[%s5675_s27 + $0x54] sm:$0xe] }
  0xaa   : > { %5030 = vmatprep.mubr.bf16.mxu0 %v4377_v47  ;;  %v5923_v47 = vld [vmem:[%s5675_s27 + $0x40] sm:$0xf]  ;;  %v1111_v9 = vrot.slane %v1109_v10, 4  ;;  %2187 = vmatpush1.bf16.msra.mxu1 %v4507_v1  ;;  %v1110_v32 = vsel %vm5781_vm5, %v4373_v41, %v1109_v10  ;;  %v4375_v41 = vrot.slane %v1046_v6, 9  ;;  %v1125_v10 = vrot.slane %v1123_v22, 4 }
  0xab   : > { %v1772_v6 = vshrl.u32 %v4452_v4, 16  ;;  %v4604_v30 = vcombine.high %v5987_v39, %v5997_v5  ;;  %v4454_v31 = vld [vmem:[%s5675_s27 + $0x18] sm:$0xf]  ;;  %v705_v34 = vrot.slane %v703_v12, 5 }
  0xac   : > { %5029 = vmatpush3.bf16.msra.mxu0 %v5822_v35  ;;  %v648_v35 = vsel %vm5691_vm2, %v643_v43, %v5846_v49  ;;  %v4380_v49 = vcombine.low %v5918_v60, %v5928_v59  ;;  %v1113_v33 = vsel %vm5781_vm5, %v1111_v9, %v1112_v11  ;;  %v1119_v43 = vrot.slane %v1045_v20, 5  ;;  %v4451_v59 = vld [vmem:[%s5675_s27 + $0xc] sm:$0xf]  ;;  %v6003_v9 = vld [vmem:[#allocation5 + $0x2d0] sm:$0xff] }
  0xad   : > { %1540 = vmatprep.subr.bf16.mxu0 %v4420_v61  ;;  %v1116_v61 = vrot.slane %v5923_v47, 5  ;;  %v4350_v23 = vcombine.low %v648_v35, %v658_v7  ;;  %v4381_v60 = vcombine.low %v1110_v32, %v1113_v33  ;;  %v4512_v47 = vcombine.high %v1978_v36, %v1980_v37  ;;  %v6001_v7 = vld [vmem:[#allocation5 + $0x290] sm:$0xff]  ;;  %v4455_v32 = vld [vmem:[%s5675_s27 + $0x1c] sm:$0xf]  ;;  %v4453_v37 = vld [vmem:[%s5675_s27 + $0x14] sm:$0x1] }
  0xae   : > { %v682_v35 = vsel %vm5691_vm2, %v677_v44, %v681_v38  ;;  %v1127_v11 = vsel %vm5781_vm5, %v1125_v10, %v1126_v46  ;;  %v1762_v19 = vshll.u32 %v4451_v59, 16  ;;  %v1768_v20 = vshll.u32 %v4452_v4, 16  ;;  %v1409_v36 = vld [vmem:[#allocation5 + $0x350] sm:$0xff] }
  0xaf   : > { %5031 = vmatmul.mubr.bf16.vlgmr.msra.gmra.mrb[16].mxu0 %v4378_v52  ;;  %v1118_v42 = vrot.slane %v1116_v61, 4  ;;  %v689_v52 = vrot.slane %v687_v27, 5  ;;  %v1117_v16 = vsel %vm5781_vm5, %v4374_v28, %v1116_v61  ;;  %2188 = vmatprep.subr.bf16.mxu1 %v4512_v47  ;;  %v1130_v61 = vrot.slane %v5980_v57, 5 }
  0xb0   : > { %908 = vmatmul.mubr.bf16.gmra.mrb[16].mxu1 %v4349_v51  ;;  %1541 = vmatpush1.bf16.msra.mxu0 %v4419_v50  ;;  %v5971_v50 = vld [vmem:[#allocation5 + $0x250] sm:$0xff]  ;;  %v686_v51 = vrot.slane %v684_v26, 4  ;;  %v4376_v26 = vrot.slane %v1049_v15, 9  ;;  %v1133_v27 = vrot.slane %v1051_v63, 5  ;;  %v1764_v38 = vrot.slane %v1762_v19, 5  ;;  %v1951_v63 = vld [vmem:[#allocation5 + $0x20] sm:$0xff] }
  0xb1   : > { %1542 = vmatprep.subr.bf16.mxu0 %v4422_v21  ;;  %917 = vmatprep.mubr.bf16.mxu1 %v5448_v0  ;;  %v667_v21 = vrot.slane %v666_v14, 4  ;;  %v4428_v1 = vcombine.high %v5969_v29, %v5971_v50  ;;  %v700_v14 = vor.u32 %v699_v56, %v5977_v55  ;;  %v1783_v44 = vshrl.u32 %v4454_v31, 16 }
  0xb2   : > { %5034 = vmatprep.mubr.bf16.mxu0 %v4379_v58  ;;  %v4426_v58 = vcombine.high %v5909_v53, %v5911_v54  ;;  %2189 = vmatpush1.bf16.msra.mxu1 %v4511_v2  ;;  %v1792_v10 = vshll.u32 %v4455_v32, 16  ;;  %v1796_v46 = vshrl.u32 %v4455_v32, 16  ;;  %v4429_v53 = vcombine.low %v6001_v7, %v6003_v9  ;;  %v2683_v32 = vld [vmem:[#allocation5 + $0xe8] sm:$0xff] }
  0xb3   : > { %v672_v45 = vsel %vm5691_vm2, %v667_v21, %v5920_v25  ;;  %v1124_v25 = vsel %vm5781_vm5, %v4375_v41, %v1123_v22  ;;  %v4430_v22 = vcombine.high %v6001_v7, %v6003_v9  ;;  %2808 = vmatprep.subr.bf16.mxu1 %v4604_v30  ;;  %v701_v28 = vrot.slane %v700_v14, 4  ;;  %v4458_v7 = vld [vmem:[%s5675_s27 + $0x28] sm:$0xf] }
  0xb4   : > { %1543 = vmatpush1.bf16.msra.mxu0 %v4421_v3  ;;  %v1120_v3 = vsel %vm5781_vm5, %v1118_v42, %v1119_v43  ;;  %v4383_v24 = vcombine.low %v1124_v25, %v1127_v11  ;;  %v6029_v42 = vrot.slane %v1768_v20, 5  ;;  %v1774_v43 = vrot.slane %v1772_v6, 4 }
  0xb5   : > { %1544 = vmatprep.subr.bf16.mxu0 %v4424_v13  ;;  %v690_v13 = vor.u32 %v689_v52, %v686_v51  ;;  %v4382_v40 = vcombine.low %v1117_v16, %v1120_v3  ;;  %v1786_v41 = vshll.u32 %v4454_v31, 16  ;;  %v1131_v54 = vsel %vm5781_vm5, %v4376_v26, %v1130_v61  ;;  %v2682_v31 = vld [vmem:[#allocation5 + $0xa8] sm:$0xff] }
  0xb6   : > { %v706_v52 = vsel %vm5691_vm2, %v701_v28, %v705_v34  ;;  %v1775_v57 = vor.u32 %v1774_v43, %v6029_v42  ;;  %v1785_v16 = vrot.slane %v1783_v44, 4  ;;  %v1816_v20 = vshll.u32 %v4458_v7, 16  ;;  %v4461_v43 = vld [vmem:[%s5675_s27 + $0x34] sm:$0xf] }
  0xb7   : > { %5035 = vmatmul.mubr.bf16.gmra.mrb[20].mxu0 %v4380_v49  ;;  %v1759_v49 = vshrl.u32 %v4451_v59, 16  ;;  %v691_v33 = vrot.slane %v690_v13, 4  ;;  %v1788_v47 = vrot.slane %v1786_v41, 5  ;;  %v6044_v59 = vrot.slane %v1792_v10, 5 }
  0xb8   : > { %918 = vmatmul.mubr.bf16.gmra.mrb[20].mxu1 %v4350_v23  ;;  %1545 = vmatpush1.bf16.msra.mxu0 %v4423_v62  ;;  %v4427_v62 = vcombine.low %v5969_v29, %v5971_v50  ;;  %v4351_v23 = vcombine.low %v672_v45, %v682_v35  ;;  %v1132_v29 = vrot.slane %v1130_v61, 4  ;;  %v1408_v50 = vld [vmem:[#allocation5 + $0x310] sm:$0xff]  ;;  %v1798_v45 = vrot.slane %v1796_v46, 4  ;;  %v1953_v61 = vld [vmem:[#allocation5 + $0x60] sm:$0xff] }
  0xb9   : > { %1546 = vmatprep.subr.bf16.mxu0 %v4426_v58  ;;  %927 = vmatprep.mubr.bf16.mxu1 %v5448_v0  ;;  %v1761_v21 = vrot.slane %v1759_v49, 4  ;;  %v4432_v51 = vcombine.high %v1408_v50, %v1409_v36  ;;  %v1778_v58 = vshll.u32 %v4453_v37, 16  ;;  %v4431_v4 = vcombine.low %v1408_v50, %v1409_v36  ;;  %v4457_v35 = vld [vmem:[%s5675_s27 + $0x24] sm:$0xf]  ;;  %v1955_v37 = vld [vmem:[#allocation5 + $0xa0] sm:$0xff] }
  0xba   : > { %5038 = vmatprep.mubr.bf16.mxu0 %v4381_v60  ;;  %v1134_v48 = vsel %vm5781_vm5, %v1132_v29, %v1133_v27  ;;  %v1410_v60 = vld [vmem:[#allocation5 + $0x390] sm:$0xff]  ;;  %v1776_v11 = vrot.slane %v1775_v57, 4  ;;  %v1789_v13 = vor.u32 %v1788_v47, %v1785_v16  ;;  %v1799_v14 = vor.u32 %v1798_v45, %v6044_v59  ;;  %v5241_v16 = vld [vmem:[%s5675_s27 + $0x18] sm:$0xff]  }
  0xbb   : > { %v1765_v56 = vor.u32 %v1764_v38, %v1761_v21  ;;  %v4384_v3 = vcombine.low %v1131_v54, %v1134_v48  ;;  %v1780_v12 = vrot.slane %v1778_v58, 5  ;;  %v1807_v49 = vshrl.u32 %v4457_v35, 16  ;;  %v1957_v21 = vld [vmem:[#allocation5 + $0xe0] sm:$0xff]  ;;  %v2684_v48 = vld [vmem:[#allocation5 + $0x128] sm:$0xff] }
  0xbc   : > { %1547 = vmatpush1.bf16.msra.mxu0 %v4425_v17  ;;  %v696_v17 = vsel %vm5691_vm2, %v691_v33, %v5977_v55  ;;  %v1411_v55 = vld [vmem:[#allocation5 + $0x3d0] sm:$0xff]  ;;  %v1810_v19 = vshll.u32 %v4457_v35, 16  ;;  %v1820_v6 = vshrl.u32 %v4458_v7, 16  ;;  %v1800_v26 = vrot.slane %v1799_v14, 4  ;;  %v4459_v33 = vld [vmem:[%s5675_s27 + $0x2c] sm:$0x1] }
  0xbd   : > { %1548 = vmatprep.subr.bf16.mxu0 %v4428_v1  ;;  %v4456_v1 = vld [vmem:[%s5675_s27 + $0x20] sm:$0x1]  ;;  %v4352_v2 = vcombine.low %v696_v17, %v706_v52  ;;  %v4434_v9 = vcombine.high %v1410_v60, %v1411_v55  ;;  %v1766_v25 = vrot.slane %v1765_v56, 4  ;;  %v4433_v30 = vcombine.low %v1410_v60, %v1411_v55  ;;  %v1959_v58 = vld [vmem:[#allocation5 + $0x120] sm:$0xff]  ;;  %v2686_v35 = vld [vmem:[#allocation5 + $0x1a8] sm:$0xff] }
  0xbe   : > { %v1802_v15 = vshll.u32 %v4456_v1, 16  ;;  %v1809_v28 = vrot.slane %v1807_v49, 4  ;;  %v1812_v34 = vrot.slane %v1810_v19, 5  ;;  %v6059_v29 = vrot.slane %v1816_v20, 5  ;;  %v1961_v60 = vld [vmem:[#allocation5 + $0x160] sm:$0xff]  ;;  %v2687_v7 = vld [vmem:[#allocation5 + $0x1e8] sm:$0xff] }
  0xbf   : > { %5039 = vmatmul.mubr.bf16.gmra.mrb[24].mxu0 %v4382_v40  ;;  %v1771_v40 = vsel %vm5691_vm2, %v1766_v25, %v6029_v42  ;;  %v1822_v50 = vrot.slane %v1820_v6, 4  ;;  %v4603_v38 = vcombine.low %v5987_v39, %v5997_v5  ;;  %v4460_v42 = vld [vmem:[%s5675_s27 + $0x30] sm:$0xf]  ;;  %v4606_v41 = vcombine.high %v2682_v31, %v2683_v32  ;;  %v2685_v39 = vld [vmem:[#allocation5 + $0x168] sm:$0xff]  ;;  %v4464_v20 = vld [vmem:[%s5675_s27 + $0x40] sm:$0xf] }
  0xc0   : > { %928 = vmatmul.mubr.bf16.gmra.mrb[24].mxu1 %v4351_v23  ;;  %1549 = vmatpush1.bf16.msra.mxu0 %v4427_v62  ;;  %v1781_v62 = vsel %vm5691_vm2, %v1776_v11, %v1780_v12  ;;  %v5240_v23 = vld [vmem:[%s5675_s27 + $0xc] sm:$0xff]   ;;  %v1804_v27 = vrot.slane %v1802_v15, 5  ;;  %v4485_v10 = vcombine.low %v1951_v63, %v1953_v61  ;;  %v1826_v46 = vshll.u32 %v4459_v33, 16  ;;  %v4463_v19 = vld [vmem:[%s5675_s27 + $0x3c] sm:$0xf] }
  0xc1   : > { %1550 = vmatprep.subr.bf16.mxu0 %v4430_v22  ;;  %937 = vmatprep.mubr.bf16.mxu1 %v5448_v0  ;;  %v4486_v22 = vcombine.high %v1951_v63, %v1953_v61  ;;  %v6061_v36 = vcombine.low %v1771_v40, %v1781_v62  ;;  %v1813_v54 = vor.u32 %v1812_v34, %v1809_v28  ;;  %v1834_v52 = vshll.u32 %v4460_v42, 16  ;;  %v1963_v14 = vld [vmem:[#allocation5 + $0x1a0] sm:$0xff]  ;;  %v6087_v62 = vld [vmem:[#allocation5 + $0x228] sm:$0xff] }
  0xc2   : > { %5042 = vmatprep.mubr.bf16.mxu0 %v4383_v24  ;;  %v1790_v24 = vrot.slane %v1789_v13, 4  ;;  %v1823_v17 = vor.u32 %v1822_v50, %v6059_v29  ;;  %v4490_v5 = vcombine.high %v1955_v37, %v1957_v21  ;;  %v1840_v56 = vshll.u32 %v4461_v43, 16  ;;  %v1965_v15 = vld [vmem:[#allocation5 + $0x1e0] sm:$0xff]  ;;  %v5242_v50 = vld [vmem:[%s5675_s27 + $0x24] sm:$0xff]  }
  0xc3   : > { %v1844_v57 = vshrl.u32 %v4461_v43, 16  ;;  %v4605_v55 = vcombine.low %v2682_v31, %v2683_v32  ;;  %v1828_v47 = vrot.slane %v1826_v46, 5  ;;  %v4489_v45 = vcombine.low %v1955_v37, %v1957_v21  ;;  %v1967_v31 = vld [vmem:[#allocation5 + $0x220] sm:$0xff]  ;;  %v2690_v43 = vld [vmem:[#allocation5 + $0x2a8] sm:$0xff] }
  0xc4   : > { %1551 = vmatpush1.bf16.msra.mxu0 %v4429_v53  ;;  %v1795_v44 = vsel %vm5691_vm2, %v1790_v24, %v6044_v59  ;;  %v1805_v53 = vsel %vm5691_vm2, %v1800_v26, %v1804_v27  ;;  %v4608_v59 = vcombine.high %v2684_v48, %v2685_v39  ;;  %v1814_v1 = vrot.slane %v1813_v54, 4  ;;  %v1969_v32 = vld [vmem:[#allocation5 + $0x260] sm:$0xff] }
  0xc5   : > { %1552 = vmatprep.subr.bf16.mxu0 %v4432_v51  ;;  %v1831_v51 = vshrl.u32 %v4460_v42, 16  ;;  %v1836_v11 = vrot.slane %v1834_v52, 5  ;;  %v6080_v12 = vrot.slane %v1840_v56, 5  ;;  %v1846_v13 = vrot.slane %v1844_v57, 4  ;;  %v4466_v42 = vld [vmem:[%s5675_s27 + $0x48] sm:$0xf] }
  0xc6   : > { %v4607_v63 = vcombine.low %v2684_v48, %v2685_v39  ;;  %v4610_v61 = vcombine.high %v2686_v35, %v2687_v7  ;;  %v4493_v49 = vcombine.low %v1959_v58, %v1961_v60  ;;  %v1819_v6 = vsel %vm5691_vm2, %v1814_v1, %v6059_v29  ;;  %v1971_v48 = vld [vmem:[#allocation5 + $0x2a0] sm:$0xff]  ;;  %v4465_v57 = vld [vmem:[%s5675_s27 + $0x44] sm:$0x1]  ;;  %v2693_v1 = vld [vmem:[#allocation5 + $0x368] sm:$0xff] }
  0xc7   : > { %5043 = vmatmul.mubr.bf16.gmra.mrb[28].mxu0 %v4384_v3  ;;  %v6077_v3 = vcombine.low %v1795_v44, %v1805_v53  ;;  %v1833_v25 = vrot.slane %v1831_v51, 4  ;;  %v4609_v40 = vcombine.low %v2686_v35, %v2687_v7  ;;  %v1847_v27 = vor.u32 %v1846_v13, %v6080_v12  ;;  %v2691_v44 = vld [vmem:[#allocation5 + $0x2e8] sm:$0xff]  ;;  %v1973_v39 = vld [vmem:[#allocation5 + $0x2e0] sm:$0xff] }
  0xc8   : > { %938 = vmatmul.mubr.bf16.gmra.mrb[28].mxu1 %v4352_v2  ;;  %1553 = vmatpush1.bf16.msra.mxu0 %v4431_v4  ;;  %v1824_v2 = vrot.slane %v1823_v17, 4  ;;  %v4462_v4 = vld [vmem:[%s5675_s27 + $0x38] sm:$0x1]  ;;  %v1855_v33 = vshrl.u32 %v4463_v19, 16  ;;  %v1858_v28 = vshll.u32 %v4463_v19, 16  ;;  %v1864_v34 = vshll.u32 %v4464_v20, 16 }
  0xc9   : > { %1554 = vmatprep.subr.bf16.mxu0 %v4434_v9  ;;  %1572 = vmatprep.mubr.bf16.mxu0 %v5448_v0  ;;  %v4494_v9 = vcombine.high %v1959_v58, %v1961_v60  ;;  %v1837_v26 = vor.u32 %v1836_v11, %v1833_v25  ;;  %v1868_v29 = vshrl.u32 %v4464_v20, 16  ;;  %v4497_v21 = vcombine.low %v1963_v14, %v1965_v15  ;;  %v4467_v17 = vld [vmem:[%s5675_s27 + $0x4c] sm:$0xf]  ;;  %v1975_v7 = vld [vmem:[#allocation5 + $0x320] sm:$0xff] }
  0xca   : > { %2206 = vmatprep.mubr.bf16.mxu1 %v5448_v0  ;;  %v1829_v24 = vsel %vm5691_vm2, %v1824_v2, %v1828_v47  ;;  %v1848_v53 = vrot.slane %v1847_v27, 4  ;;  %v1860_v51 = vrot.slane %v1858_v28, 5  ;;  %v6102_v52 = vrot.slane %v1864_v34, 5  ;;  %v4468_v19 = vld [vmem:[%s5675_s27 + $0x50] sm:$0x1]  ;;  %v6126_v34 = vld [vmem:[#allocation5 + $0x34] sm:$0xff] }
  0xcb   : > { %v1838_v46 = vrot.slane %v1837_v26, 4  ;;  %v1870_v56 = vrot.slane %v1868_v29, 4  ;;  %v1879_v58 = vshrl.u32 %v4466_v42, 16  ;;  %v1882_v60 = vshll.u32 %v4466_v42, 16  ;;  %v1981_v26 = vld [vmem:[#allocation5 + $0x3e0] sm:$0xff] }
  0xcc   : > { %1555 = vmatpush1.bf16.msra.mxu0 %v4433_v30  ;;  %v1850_v30 = vshll.u32 %v4462_v4, 16  ;;  %v1888_v47 = vshll.u32 %v4467_v17, 16  ;;  %v4506_v2 = vcombine.high %v1971_v48, %v1973_v39  ;;  %v1874_v13 = vshll.u32 %v4465_v57, 16  ;;  %v3037_v42 = vld [vmem:[#allocation5 + $0x30] sm:$0xf] }
  0xcd   : > { %2287 = vmatprep.subr.bf16.mxu0 %v4486_v22  ;;  %v2689_v22 = vld [vmem:[#allocation5 + $0x268] sm:$0xff]  ;;  %v1843_v4 = vsel %vm5691_vm2, %v1838_v46, %v6080_v12  ;;  %v1871_v11 = vor.u32 %v1870_v56, %v6102_v52 }
  0xce   : > { %v4612_v37 = vcombine.high %v6087_v62, %v2689_v22  ;;  %v4611_v54 = vcombine.low %v6087_v62, %v2689_v22  ;;  %v6119_v20 = vrot.slane %v1888_v47, 5  ;;  %v2695_v62 = vld [vmem:[#allocation5 + $0x3e8] sm:$0xff] }
  0xcf   : > { %1573 = vmatmul.mubr.bf16.vlgmr.msra.gmra.mrb[32].mxu0 %v5240_v23  ;;  %v4498_v23 = vcombine.high %v1963_v14, %v1965_v15  ;;  %v4613_v14 = vcombine.low %v2690_v43, %v2691_v44  ;;  %v5243_v15 = vld [vmem:[%s5675_s27 + $0x30] sm:$0xff]  }
  0xd0   : > { %2207 = vmatmul.mubr.bf16.vlgmr.msra.gmra.mrb[32].mxu1 %v6061_v36  ;;  %1582 = vmatprep.mubr.bf16.mxu0 %v5448_v0 }
  0xd1   : > { %2809 = vmatpush1.bf16.msra.mxu1 %v4603_v38  ;;  %2216 = vmatprep.mubr.bf16.mxu1 %v5448_v0  ;;  %v1852_v38 = vrot.slane %v1850_v30, 5 }
  0xd2   : > { %2810 = vmatprep.subr.bf16.mxu1 %v4606_v41  ;;  %2288 = vmatpush1.bf16.msra.mxu0 %v4485_v10  ;;  %v4502_v41 = vcombine.high %v1967_v31, %v1969_v32  ;;  %v6098_v10 = vcombine.low %v1819_v6, %v1829_v24  ;;  %v1979_v24 = vld [vmem:[#allocation5 + $0x3a0] sm:$0xff] }
  0xd3   : > { %2289 = vmatprep.subr.bf16.mxu0 %v4490_v5  ;;  %v1857_v5 = vrot.slane %v1855_v33, 4  ;;  %v1853_v35 = vsel %vm5691_vm2, %v1848_v53, %v1852_v38  ;;  %v4470_v33 = vld [vmem:[%s5675_s27 + $0x58] sm:$0xf]  ;;  %v6128_v38 = vld [vmem:[#allocation5 + $0x74] sm:$0xff]  ;;  %v4514_v46 = vcombine.high %v1979_v24, %v1981_v26  ;;  %v4513_v57 = vcombine.low %v1979_v24, %v1981_v26 }
  0xd4   : > { %v6121_v22 = vcombine.low %v1843_v4, %v1853_v35  ;;  %v1912_v53 = vshll.u32 %v4470_v33, 16  ;;  %v4472_v4 = vld [vmem:[%s5675_s27 + $0x60] sm:$0xf]  ;;  %v4473_v35 = vld [vmem:[%s5675_s27 + $0x64] sm:$0xf] }
  0xd5   : > { %2811 = vmatpush1.bf16.msra.mxu1 %v4605_v55  ;;  %v4614_v55 = vcombine.high %v2690_v43, %v2691_v44  ;;  %v1861_v25 = vor.u32 %v1860_v51, %v1857_v5 }
  0xd6   : > { %2812 = vmatprep.subr.bf16.mxu1 %v4608_v59  ;;  %2290 = vmatpush1.bf16.msra.mxu0 %v4489_v45  ;;  %v1892_v59 = vshrl.u32 %v4467_v17, 16  ;;  %v6105_v45 = vld [vmem:[#allocation5 + $0x328] sm:$0xff]  ;;  %v3038_v17 = vld [vmem:[#allocation5 + $0x70] sm:$0xf] }
  0xd7   : > { %1583 = vmatmul.mubr.bf16.gmra.mrb[36].mxu0 %v5241_v16  ;;  %2291 = vmatprep.subr.bf16.mxu0 %v4494_v9  ;;  %v4501_v16 = vcombine.low %v1967_v31, %v1969_v32  ;;  %v1977_v9 = vld [vmem:[#allocation5 + $0x360] sm:$0xff]  ;;  %v4616_v12 = vcombine.high %v6105_v45, %v2693_v1  ;;  %v1862_v27 = vrot.slane %v1861_v25, 4  ;;  %v1872_v31 = vrot.slane %v1871_v11, 4 }
  0xd8   : > { %2217 = vmatmul.mubr.bf16.gmra.mrb[36].mxu1 %v6077_v3  ;;  %1592 = vmatprep.mubr.bf16.mxu0 %v5448_v0  ;;  %v1894_v6 = vrot.slane %v1892_v59, 4  ;;  %v4510_v30 = vcombine.high %v1975_v7, %v1977_v9  ;;  %v1876_v32 = vrot.slane %v1874_v13, 5  ;;  %v4615_v28 = vcombine.low %v6105_v45, %v2693_v1 }
  0xd9   : > { %2226 = vmatprep.mubr.bf16.mxu1 %v5448_v0  ;;  %2813 = vmatpush1.bf16.msra.mxu1 %v4607_v63  ;;  %v1881_v63 = vrot.slane %v1879_v58, 4  ;;  %v4750_v58 = vcombine.high %v6126_v34, %v6128_v38  ;;  %v6142_v47 = vcombine.low %v3037_v42, %v3038_v17  ;;  %v1914_v45 = vrot.slane %v1912_v53, 5  ;;  %v4564_v42 = vld [vmem:[%s5675_s27 + $0x10] sm:$0xf]  ;;  %v4565_v53 = vld [vmem:[%s5675_s27 + $0x14] sm:$0x1] }
  0xda   : > { %2814 = vmatprep.subr.bf16.mxu1 %v4610_v61  ;;  %2292 = vmatpush1.bf16.msra.mxu0 %v4493_v49  ;;  %v1884_v61 = vrot.slane %v1882_v60, 5  ;;  %v4505_v49 = vcombine.low %v1971_v48, %v1973_v39  ;;  %v1895_v43 = vor.u32 %v1894_v6, %v6119_v20  ;;  %v1867_v48 = vsel %vm5691_vm2, %v1862_v27, %v6102_v52  ;;  %v5244_v60 = vld [vmem:[%s5675_s27 + $0x3c] sm:$0xff]  }
  0xdb   : > { %2293 = vmatprep.subr.bf16.mxu0 %v4498_v23  ;;  %v4469_v23 = vld [vmem:[%s5675_s27 + $0x54] sm:$0xf]  ;;  %v1877_v39 = vsel %vm5691_vm2, %v1872_v31, %v1876_v32 }
  0xdc   : > { %v1885_v29 = vor.u32 %v1884_v61, %v1881_v63  ;;  %v1903_v44 = vshrl.u32 %v4469_v23, 16  ;;  %v6144_v59 = vcombine.low %v1867_v48, %v1877_v39  ;;  %v1936_v63 = vshll.u32 %v4473_v35, 16 }
  0xdd   : > { %2815 = vmatpush1.bf16.msra.mxu1 %v4609_v40  ;;  %v2694_v40 = vld [vmem:[#allocation5 + $0x3a8] sm:$0xff]  ;;  %v1940_v61 = vshrl.u32 %v4473_v35, 16 }
  0xde   : > { %2816 = vmatprep.subr.bf16.mxu1 %v4612_v37  ;;  %2294 = vmatpush1.bf16.msra.mxu0 %v4497_v21  ;;  %v4509_v37 = vcombine.low %v1975_v7, %v1977_v9  ;;  %v4618_v21 = vcombine.high %v2694_v40, %v2695_v62  ;;  %v4617_v5 = vcombine.low %v2694_v40, %v2695_v62  ;;  %v1886_v51 = vrot.slane %v1885_v29, 4 }
  0xdf   : > { %1593 = vmatmul.mubr.bf16.gmra.mrb[40].mxu0 %v5242_v50  ;;  %2295 = vmatprep.subr.bf16.mxu0 %v4502_v41  ;;  %v1898_v50 = vshll.u32 %v4468_v19, 16  ;;  %v1906_v41 = vshll.u32 %v4469_v23, 16  ;;  %v1938_v23 = vrot.slane %v1936_v63, 5  ;;  %v1942_v24 = vrot.slane %v1940_v61, 4  ;;  %v3041_v63 = vld [vmem:[#allocation5 + $0x130] sm:$0xf] }
  0xe0   : > { %2227 = vmatmul.mubr.bf16.gmra.mrb[40].mxu1 %v6098_v10  ;;  %1602 = vmatprep.mubr.bf16.mxu0 %v5448_v0  ;;  %v1891_v7 = vsel %vm5691_vm2, %v1886_v51, %v6119_v20  ;;  %v4567_v51 = vld [vmem:[%s5675_s27 + $0x1c] sm:$0xf]  ;;  %v3042_v61 = vld [vmem:[#allocation5 + $0x170] sm:$0xf] }
  0xe1   : > { %2236 = vmatprep.mubr.bf16.mxu1 %v5448_v0  ;;  %2817 = vmatpush1.bf16.msra.mxu1 %v4611_v54  ;;  %v1916_v54 = vshrl.u32 %v4470_v33, 16  ;;  %v1900_v56 = vrot.slane %v1898_v50, 5  ;;  %v1908_v52 = vrot.slane %v1906_v41, 5  ;;  %v1943_v33 = vor.u32 %v1942_v24, %v1938_v23  ;;  %v3043_v24 = vld [vmem:[#allocation5 + $0x1b0] sm:$0xf] }
  0xe2   : > { %2818 = vmatprep.subr.bf16.mxu1 %v4614_v55  ;;  %2296 = vmatpush1.bf16.msra.mxu0 %v4501_v16  ;;  %v1896_v55 = vrot.slane %v1895_v43, 4  ;;  %v1905_v16 = vrot.slane %v1903_v44, 4  ;;  %v2626_v41 = vrot.slane %v4564_v42, 5  ;;  %v3045_v42 = vld [vmem:[#allocation5 + $0x230] sm:$0xf] }
  0xe3   : > { %2297 = vmatprep.subr.bf16.mxu0 %v4506_v2  ;;  %v1918_v1 = vrot.slane %v1916_v54, 4  ;;  %v4471_v2 = vld [vmem:[%s5675_s27 + $0x5c] sm:$0x1]  ;;  %v5247_v54 = vld [vmem:[%s5675_s27 + $0x60] sm:$0xff]  }
  0xe4   : > { %v1901_v9 = vsel %vm5691_vm2, %v1896_v55, %v1900_v56  ;;  %v1909_v25 = vor.u32 %v1908_v52, %v1905_v16  ;;  %v1922_v13 = vshll.u32 %v4471_v2, 16  ;;  %v2628_v39 = vrot.slane %v2626_v41, 4  ;;  %v4568_v55 = vld [vmem:[%s5675_s27 + $0x20] sm:$0x1]  ;;  %v3512_v16 = vld [vmem:[#allocation5 + $0xb4] sm:$0xff] }
  0xe5   : > { %2819 = vmatpush1.bf16.msra.mxu1 %v4613_v14  ;;  %v1919_v11 = vor.u32 %v1918_v1, %v1914_v45  ;;  %v1927_v14 = vshrl.u32 %v4472_v4, 16  ;;  %v3513_v52 = vld [vmem:[#allocation5 + $0xf4] sm:$0xff]  ;;  %v3039_v1 = vld [vmem:[#allocation5 + $0xb0] sm:$0xf] }
  0xe6   : > { %2820 = vmatprep.subr.bf16.mxu1 %v4616_v12  ;;  %2298 = vmatpush1.bf16.msra.mxu0 %v4505_v49  ;;  %v5245_v12 = vld [vmem:[%s5675_s27 + $0x48] sm:$0xff]   ;;  %v6159_v49 = vcombine.low %v1891_v7, %v1901_v9  ;;  %v1910_v19 = vrot.slane %v1909_v25, 4  ;;  %v1924_v6 = vrot.slane %v1922_v13, 5  ;;  %v3040_v2 = vld [vmem:[#allocation5 + $0xf0] sm:$0xf]  ;;  %v2636_v9 = vrot.slane %v4568_v55, 5 }
  0xe7   : > { %1603 = vmatmul.mubr.bf16.gmra.mrb[44].mxu0 %v5243_v15  ;;  %2299 = vmatprep.subr.bf16.mxu0 %v4510_v30  ;;  %v1930_v15 = vshll.u32 %v4472_v4, 16  ;;  %v1920_v20 = vrot.slane %v1919_v11, 4  ;;  %v4474_v30 = vld [vmem:[%s5675_s27 + $0x68] sm:$0x1]  ;;  %v1929_v40 = vrot.slane %v1927_v14, 4  ;;  %v4749_v4 = vcombine.low %v6126_v34, %v6128_v38 }
  0xe8   : > { %2237 = vmatmul.mubr.bf16.gmra.mrb[44].mxu1 %v6121_v22  ;;  %1612 = vmatprep.mubr.bf16.mxu0 %v5448_v0  ;;  %v1946_v26 = vshll.u32 %v4474_v30, 16  ;;  %v1915_v27 = vsel %vm5691_vm2, %v1910_v19, %v1914_v45  ;;  %v4752_v25 = vcombine.high %v3512_v16, %v3513_v52  ;;  %v4570_v11 = vld [vmem:[%s5675_s27 + $0x28] sm:$0xf]  ;;  %v4569_v19 = vld [vmem:[%s5675_s27 + $0x24] sm:$0xe] }
  0xe9   : > { %2246 = vmatprep.mubr.bf16.mxu1 %v5448_v0  ;;  %2821 = vmatpush1.bf16.msra.mxu1 %v4615_v28  ;;  %v1932_v62 = vrot.slane %v1930_v15, 5  ;;  %v1925_v31 = vsel %vm5691_vm2, %v1920_v20, %v1924_v6  ;;  %v5246_v28 = vld [vmem:[%s5675_s27 + $0x54] sm:$0xff]   ;;  %v3514_v13 = vld [vmem:[#allocation5 + $0x134] sm:$0xff]  ;;  %v4678_v15 = vcombine.low %v3039_v1, %v3040_v2  ;;  %v4571_v20 = vld [vmem:[%s5675_s27 + $0x2c] sm:$0x1] }
  0xea   : > { %2822 = vmatprep.subr.bf16.mxu1 %v4618_v21  ;;  %2300 = vmatpush1.bf16.msra.mxu0 %v4509_v37  ;;  %v6170_v29 = vcombine.low %v1915_v27, %v1925_v31  ;;  %v1944_v37 = vrot.slane %v1943_v33, 4  ;;  %v1948_v21 = vrot.slane %v1946_v26, 5  ;;  %v3515_v14 = vld [vmem:[#allocation5 + $0x174] sm:$0xff]  ;;  %v3044_v26 = vld [vmem:[#allocation5 + $0x1f0] sm:$0xf]  ;;  %v4589_v27 = vrot.slane %v4569_v19, 9 }
  0xeb   : > { %2301 = vmatprep.subr.bf16.mxu0 %v4514_v46  ;;  %v1933_v32 = vor.u32 %v1932_v62, %v1929_v40  ;;  %v4563_v46 = vld [vmem:[%s5675_s27 + $0xc] sm:$0xe]  ;;  %v4754_v6 = vcombine.high %v3514_v13, %v3515_v14  ;;  %v3516_v30 = vld [vmem:[#allocation5 + $0x1b4] sm:$0xff]  ;;  %v4679_v62 = vcombine.low %v3041_v63, %v3042_v61  ;;  %v4753_v33 = vcombine.low %v3514_v13, %v3515_v14  ;;  %v4575_v14 = vld [vmem:[%s5675_s27 + $0x3c] sm:$0xe] }
  0xec   : > { %v1949_v44 = vsel %vm5691_vm2, %v1944_v37, %v1948_v21  ;;  %v4587_v48 = vrot.slane %v4563_v46, 9  ;;  %v3517_v40 = vld [vmem:[#allocation5 + $0x1f4] sm:$0xff]  ;;  %v4680_v21 = vcombine.low %v3043_v24, %v3044_v26  ;;  %v3052_v19 = vld [vmem:[#allocation5 + $0x3f0] sm:$0xf]  ;;  %v3951_v26 = vld [vmem:[#allocation5 + $0x3c] sm:$0xf] }
  0xed   : > { %2823 = vmatpush1.bf16.msra.mxu1 %v4617_v5  ;;  %v1934_v50 = vrot.slane %v1933_v32, 4  ;;  %v2629_v5 = vrot.slane %v4565_v53, 5  ;;  %v2643_v32 = vrot.slane %v4571_v20, 5  ;;  %v3519_v37 = vld [vmem:[#allocation5 + $0x274] sm:$0xff]  ;;  %v4755_v46 = vcombine.low %v3516_v30, %v3517_v40  ;;  %v4572_v53 = vld [vmem:[%s5675_s27 + $0x30] sm:$0xe] }
  0xee   : > { %2302 = vmatpush1.bf16.msra.mxu0 %v4513_v57  ;;  %3638 = vmatprep.subr.bf16.mxu1 %v4750_v58  ;;  %v2627_v56 = vsel %vm5781_vm5, %v4587_v48, %v2626_v41  ;;  %v2633_v58 = vrot.slane %v4567_v51, 5  ;;  %v3522_v2 = vld [vmem:[#allocation5 + $0x334] sm:$0xff]  ;;  %v4591_v20 = vrot.slane %v4575_v14, 9 }
  0xef   : > { %1613 = vmatmul.mubr.bf16.gmra.mrb[48].mxu0 %v5244_v60  ;;  %5046 = vmatprep.subr.bf16.mxu0 %v6142_v47  ;;  %v1939_v43 = vsel %vm5691_vm2, %v1934_v50, %v1938_v23  ;;  %v2630_v57 = vsel %vm5781_vm5, %v2628_v39, %v2629_v5  ;;  %v4566_v60 = vld [vmem:[%s5675_s27 + $0x18] sm:$0xe]  ;;  %v3518_v50 = vld [vmem:[#allocation5 + $0x234] sm:$0xff] }
  0xf0   : > { %2247 = vmatmul.mubr.bf16.gmra.mrb[48].mxu1 %v6144_v59  ;;  %1622 = vmatprep.mubr.bf16.mxu0 %v5448_v0  ;;  %v6183_v17 = vcombine.low %v1939_v43, %v1949_v44  ;;  %v4595_v45 = vcombine.low %v2627_v56, %v2630_v57  ;;  %v4588_v35 = vrot.slane %v4566_v60, 9  ;;  %v2635_v7 = vrot.slane %v2633_v58, 4  ;;  %v3046_v43 = vld [vmem:[#allocation5 + $0x270] sm:$0xf]  ;;  %v3520_v39 = vld [vmem:[#allocation5 + $0x2b4] sm:$0xff] }
  0xf1   : > { %2256 = vmatprep.mubr.bf16.mxu1 %v5448_v0  ;;  %v4758_v48 = vcombine.high %v3518_v50, %v3519_v37  ;;  %v3521_v5 = vld [vmem:[#allocation5 + $0x2f4] sm:$0xff]  ;;  %v4681_v51 = vcombine.low %v3045_v42, %v3046_v43  ;;  %v3047_v57 = vld [vmem:[#allocation5 + $0x2b0] sm:$0xf]  ;;  %v4590_v60 = vrot.slane %v4572_v53, 9 }
  0xf2   : > { %v2634_v34 = vsel %vm5781_vm5, %v4588_v35, %v2633_v58  ;;  %v2637_v38 = vsel %vm5781_vm5, %v2635_v7, %v2636_v9  ;;  %v3048_v58 = vld [vmem:[#allocation5 + $0x2f0] sm:$0xf]  ;;  %v4760_v1 = vcombine.high %v3520_v39, %v3521_v5 }
  0xf3   : > { %v4596_v23 = vcombine.low %v2634_v34, %v2637_v38  ;;  %v4682_v35 = vcombine.low %v3047_v57, %v3048_v58  ;;  %v3049_v7 = vld [vmem:[#allocation5 + $0x330] sm:$0xf]  ;;  %v3524_v34 = vld [vmem:[#allocation5 + $0x3b4] sm:$0xff]  ;;  %v4718_v57 = vld [vmem:[%s5675_s27 + $0x1c] sm:$0xf] }
  0xf4   : > { %v3050_v9 = vld [vmem:[#allocation5 + $0x370] sm:$0xf]  ;;  %v3525_v38 = vld [vmem:[#allocation5 + $0x3f4] sm:$0xff] }
  0xf5   : > { %v4683_v61 = vcombine.low %v3049_v7, %v3050_v9  ;;  %v4719_v7 = vld [vmem:[%s5675_s27 + $0x20] sm:$0x1] }
  0xf7   : > { %1623 = vmatmul.mubr.bf16.gmra.mrb[52].mxu0 %v5245_v12  ;;  %v2640_v12 = vrot.slane %v4570_v11, 5 }
  0xf8   : > { %2257 = vmatmul.mubr.bf16.gmra.mrb[52].mxu1 %v6159_v49  ;;  %1632 = vmatprep.mubr.bf16.mxu0 %v5448_v0 }
  0xf9   : > { %2266 = vmatprep.mubr.bf16.mxu1 %v5448_v0  ;;  %v2642_v31 = vrot.slane %v2640_v12, 4  ;;  %v2641_v44 = vsel %vm5781_vm5, %v4589_v27, %v2640_v12  ;;  %v3051_v12 = vld [vmem:[#allocation5 + $0x3b0] sm:$0xf]  ;;  %v3952_v27 = vld [vmem:[#allocation5 + $0x7c] sm:$0xf] }
  0xfa   : > { %v4684_v24 = vcombine.low %v3051_v12, %v3052_v19 }
  0xfb   : > { %v2644_v41 = vsel %vm5781_vm5, %v2642_v31, %v2643_v32 }
  0xfc   : > { %v4597_v56 = vcombine.low %v2641_v44, %v2644_v41  ;;  %v4582_v44 = vld [vmem:[%s5675_s27 + $0x58] sm:$0xf] }
  0xfd   : > { %v2668_v53 = vrot.slane %v4582_v44, 5 }
  0xff   : > { %1633 = vmatmul.mubr.bf16.gmra.mrb[56].mxu0 %v5246_v28  ;;  %v4573_v28 = vld [vmem:[%s5675_s27 + $0x34] sm:$0xf] }
 0x100   : > { %2267 = vmatmul.mubr.bf16.gmra.mrb[56].mxu1 %v6170_v29  ;;  %1642 = vmatprep.mubr.bf16.mxu0 %v5448_v0 }
 0x101   : > { %2276 = vmatprep.mubr.bf16.mxu1 %v5448_v0 }
 0x107   : > { %1643 = vmatmul.mubr.bf16.gmra.mrb[60].mxu0 %v5247_v54  ;;  %v4574_v54 = vld [vmem:[%s5675_s27 + $0x38] sm:$0x1] }
 0x108   : > { %2277 = vmatmul.mubr.bf16.gmra.mrb[60].mxu1 %v6183_v17  ;;  %2319 = vmatprep.mubr.bf16.mxu0 %v5448_v0 }
 0x109   : > { %2840 = vmatprep.mubr.bf16.mxu1 %v5448_v0 }
 0x10f   : > { %2320 = vmatmul.mubr.bf16.vlgmr.msra.gmra.mrb[64].mxu0 %v6061_v36  ;;  %v4751_v36 = vcombine.low %v3512_v16, %v3513_v52  ;;  %v2650_v16 = vrot.slane %v4574_v54, 5  ;;  %v4757_v52 = vcombine.low %v3518_v50, %v3519_v37  ;;  %v6238_v50 = vcombine.low %v3951_v26, %v3952_v27  ;;  %v4583_v54 = vld [vmem:[%s5675_s27 + $0x5c] sm:$0x1] }
 0x110   : > { %2841 = vmatmul.mubr.bf16.vlgmr.msra.gmra.mrb[64].mxu1 %v4595_v45  ;;  %2329 = vmatprep.mubr.bf16.mxu0 %v5448_v0  ;;  %v4576_v45 = vld [vmem:[%s5675_s27 + $0x40] sm:$0xf] }
 0x111   : > { %3639 = vmatpush1.bf16.msra.mxu1 %v4749_v4  ;;  %2850 = vmatprep.mubr.bf16.mxu1 %v5448_v0  ;;  %v3523_v4 = vld [vmem:[#allocation5 + $0x374] sm:$0xff]  ;;  %v2654_v13 = vrot.slane %v4576_v45, 5 }
 0x112   : > { %3640 = vmatprep.subr.bf16.mxu1 %v4752_v25  ;;  %5047 = vmatpush3.bf16.msra.mxu0 %v6142_v47  ;;  %v4756_v47 = vcombine.high %v3516_v30, %v3517_v40  ;;  %v4762_v63 = vcombine.high %v3522_v2, %v3523_v4  ;;  %v4761_v40 = vcombine.low %v3522_v2, %v3523_v4  ;;  %v3332_v2 = vshrl.u32 %v4718_v57, 16 }
 0x113   : > { %5048 = vmatprep.subr.bf16.mxu0 %v4678_v15  ;;  %v2655_v31 = vsel %vm5781_vm5, %v4591_v20, %v2654_v13 }
 0x114   : > { %v3334_v14 = vrot.slane %v3332_v2, 4  ;;  %v4725_v2 = vld [vmem:[%s5675_s27 + $0x38] sm:$0x1] }
 0x115   : > { %3641 = vmatpush1.bf16.msra.mxu1 %v4751_v36 }
 0x116   : > { %3642 = vmatprep.subr.bf16.mxu1 %v4754_v6  ;;  %5049 = vmatpush3.bf16.msra.mxu0 %v4678_v15  ;;  %v4577_v15 = vld [vmem:[%s5675_s27 + $0x44] sm:$0x1]  ;;  %v2656_v6 = vrot.slane %v2654_v13, 4 }
 0x117   : > { %2330 = vmatmul.mubr.bf16.gmra.mrb[68].mxu0 %v6077_v3  ;;  %5050 = vmatprep.subr.bf16.mxu0 %v4679_v62  ;;  %v2647_v3 = vrot.slane %v4573_v28, 5  ;;  %v2657_v30 = vrot.slane %v4577_v15, 5  ;;  %v4763_v28 = vcombine.low %v3524_v34, %v3525_v38  ;;  %v4720_v15 = vld [vmem:[%s5675_s27 + $0x24] sm:$0xf] }
 0x118   : > { %2851 = vmatmul.mubr.bf16.gmra.mrb[68].mxu1 %v4596_v23  ;;  %2339 = vmatprep.mubr.bf16.mxu0 %v5448_v0  ;;  %v4764_v23 = vcombine.high %v3524_v34, %v3525_v38  ;;  %v3338_v38 = vshll.u32 %v4719_v7, 16  ;;  %v3346_v12 = vshll.u32 %v4720_v15, 16 }
 0x119   : > { %2860 = vmatprep.mubr.bf16.mxu1 %v5448_v0  ;;  %3643 = vmatpush1.bf16.msra.mxu1 %v4753_v33  ;;  %v2649_v55 = vrot.slane %v2647_v3, 4  ;;  %v2648_v25 = vsel %vm5781_vm5, %v4590_v60, %v2647_v3  ;;  %v2658_v32 = vsel %vm5781_vm5, %v2656_v6, %v2657_v30  ;;  %v4584_v60 = vld [vmem:[%s5675_s27 + $0x60] sm:$0xe] }
 0x11a   : > { %3644 = vmatprep.subr.bf16.mxu1 %v4756_v47  ;;  %5051 = vmatpush3.bf16.msra.mxu0 %v4679_v62  ;;  %v4579_v62 = vld [vmem:[%s5675_s27 + $0x4c] sm:$0xf]  ;;  %v4580_v47 = vld [vmem:[%s5675_s27 + $0x50] sm:$0x1]  ;;  %v4599_v37 = vcombine.low %v2655_v31, %v2658_v32  ;;  %v4594_v4 = vrot.slane %v4584_v60, 9  ;;  %v3348_v26 = vrot.slane %v3346_v12, 5 }
 0x11b   : > { %5052 = vmatprep.subr.bf16.mxu0 %v4680_v21  ;;  %v2651_v11 = vsel %vm5781_vm5, %v2649_v55, %v2650_v16  ;;  %v2661_v33 = vrot.slane %v4579_v62, 5  ;;  %v2664_v43 = vrot.slane %v4580_v47, 5  ;;  %v3340_v31 = vrot.slane %v3338_v38, 5  ;;  %v4728_v38 = vld [vmem:[%s5675_s27 + $0x44] sm:$0x1] }
 0x11c   : > { %v4598_v36 = vcombine.low %v2648_v25, %v2651_v11 }
 0x11d   : > { %3645 = vmatpush1.bf16.msra.mxu1 %v4755_v46  ;;  %v2663_v42 = vrot.slane %v2661_v33, 4  ;;  %v4581_v46 = vld [vmem:[%s5675_s27 + $0x54] sm:$0xe] }
 0x11e   : > { %3646 = vmatprep.subr.bf16.mxu1 %v4758_v48  ;;  %5053 = vmatpush3.bf16.msra.mxu0 %v4680_v21 }
 0x11f   : > { %2340 = vmatmul.mubr.bf16.gmra.mrb[72].mxu0 %v6098_v10  ;;  %5054 = vmatprep.subr.bf16.mxu0 %v4681_v51  ;;  %v4759_v10 = vcombine.low %v3520_v39, %v3521_v5  ;;  %v2665_v3 = vsel %vm5781_vm5, %v2663_v42, %v2664_v43  ;;  %v2670_v39 = vrot.slane %v2668_v53, 4  ;;  %v2671_v5 = vrot.slane %v4583_v54, 5  ;;  %v3954_v42 = vld [vmem:[#allocation5 + $0xfc] sm:$0xf]  ;;  %v5249_v54 = vld [vmem:[%s5675_s27 + $0x24] sm:$0xff]  }
 0x120   : > { %2861 = vmatmul.mubr.bf16.gmra.mrb[72].mxu1 %v4597_v56  ;;  %2349 = vmatprep.mubr.bf16.mxu0 %v5448_v0  ;;  %v4585_v56 = vld [vmem:[%s5675_s27 + $0x64] sm:$0xf] }
 0x121   : > { %2870 = vmatprep.mubr.bf16.mxu1 %v5448_v0  ;;  %3647 = vmatpush1.bf16.msra.mxu1 %v4757_v52  ;;  %v2672_v52 = vsel %vm5781_vm5, %v2670_v39, %v2671_v5  ;;  %v2675_v45 = vrot.slane %v4585_v56, 5  ;;  %v4727_v39 = vld [vmem:[%s5675_s27 + $0x40] sm:$0xf] }
 0x122   : > { %3648 = vmatprep.subr.bf16.mxu1 %v4760_v1  ;;  %5055 = vmatpush3.bf16.msra.mxu0 %v4681_v51  ;;  %v4717_v51 = vld [vmem:[%s5675_s27 + $0x18] sm:$0xf]  ;;  %v3328_v1 = vshll.u32 %v4718_v57, 16  ;;  %v3955_v57 = vld [vmem:[#allocation5 + $0x13c] sm:$0xf]  ;;  %v3404_v7 = vshrl.u32 %v4727_v39, 16 }
 0x123   : > { %5056 = vmatprep.subr.bf16.mxu0 %v4682_v35  ;;  %v3319_v55 = vshrl.u32 %v4717_v51, 16  ;;  %v3322_v16 = vshll.u32 %v4717_v51, 16  ;;  %v2677_v11 = vrot.slane %v2675_v45, 4  ;;  %v5250_v51 = vld [vmem:[%s5675_s27 + $0x30] sm:$0xff]  }
 0x125   : > { %3649 = vmatpush1.bf16.msra.mxu1 %v4759_v10  ;;  %v3321_v9 = vrot.slane %v3319_v55, 4  ;;  %v3324_v25 = vrot.slane %v3322_v16, 5  ;;  %v3330_v10 = vrot.slane %v3328_v1, 5 }
 0x126   : > { %3650 = vmatprep.subr.bf16.mxu1 %v4762_v63  ;;  %5057 = vmatpush3.bf16.msra.mxu0 %v4682_v35  ;;  %v4721_v63 = vld [vmem:[%s5675_s27 + $0x28] sm:$0xf] }
 0x127   : > { %2350 = vmatmul.mubr.bf16.gmra.mrb[76].mxu0 %v6121_v22  ;;  %5058 = vmatprep.subr.bf16.mxu0 %v4683_v61  ;;  %v4578_v22 = vld [vmem:[%s5675_s27 + $0x48] sm:$0xe]  ;;  %v3325_v34 = vor.u32 %v3324_v25, %v3321_v9  ;;  %v3335_v20 = vor.u32 %v3334_v14, %v3330_v10  ;;  %v3356_v6 = vshrl.u32 %v4721_v63, 16 }
 0x128   : > { %2871 = vmatmul.mubr.bf16.gmra.mrb[76].mxu1 %v4598_v36  ;;  %2359 = vmatprep.mubr.bf16.mxu0 %v5448_v0  ;;  %v4592_v21 = vrot.slane %v4578_v22, 9  ;;  %v3343_v36 = vshrl.u32 %v4720_v15, 16  ;;  %v4724_v22 = vld [vmem:[%s5675_s27 + $0x34] sm:$0xf] }
 0x129   : > { %2880 = vmatprep.mubr.bf16.mxu1 %v5448_v0  ;;  %3651 = vmatpush1.bf16.msra.mxu1 %v4761_v40  ;;  %v5248_v40 = vld [vmem:[%s5675_s27 + $0x18] sm:$0xff]   ;;  %v3326_v62 = vrot.slane %v3325_v34, 4  ;;  %v3336_v27 = vrot.slane %v3335_v20, 4  ;;  %v3406_v20 = vrot.slane %v3404_v7, 4 }
 0x12a   : > { %3652 = vmatprep.subr.bf16.mxu1 %v4764_v23  ;;  %5059 = vmatpush3.bf16.msra.mxu0 %v4683_v61  ;;  %v2662_v41 = vsel %vm5781_vm5, %v4592_v21, %v2661_v33  ;;  %v2676_v61 = vsel %vm5781_vm5, %v4594_v4, %v2675_v45  ;;  %v4722_v23 = vld [vmem:[%s5675_s27 + $0x2c] sm:$0x1]  ;;  %v3358_v33 = vrot.slane %v3356_v6, 4 }
 0x12b   : > { %5060 = vmatprep.subr.bf16.mxu0 %v4684_v24  ;;  %v4600_v48 = vcombine.low %v2662_v41, %v2665_v3  ;;  %v3362_v47 = vshll.u32 %v4722_v23, 16  ;;  %v3953_v21 = vld [vmem:[#allocation5 + $0xbc] sm:$0xf]  ;;  %v3341_v3 = vsel %vm5691_vm2, %v3336_v27, %v3340_v31 }
 0x12c   : > { %v5252_v31 = vld [vmem:[%s5675_s27 + $0x48] sm:$0xff]  }
 0x12d   : > { %3653 = vmatpush1.bf16.msra.mxu1 %v4763_v28  ;;  %v4723_v28 = vld [vmem:[%s5675_s27 + $0x30] sm:$0xf]  ;;  %v3364_v56 = vrot.slane %v3362_v47, 5  ;;  %v3961_v47 = vld [vmem:[#allocation5 + $0x2bc] sm:$0xf] }
 0x12e   : > { %5061 = vmatpush3.bf16.msra.mxu0 %v4684_v24  ;;  %v3345_v24 = vrot.slane %v3343_v36, 4  ;;  %v3367_v44 = vshrl.u32 %v4723_v28, 16  ;;  %v3370_v41 = vshll.u32 %v4723_v28, 16  ;;  %v3960_v28 = vld [vmem:[#allocation5 + $0x27c] sm:$0xf] }
 0x12f   : > { %2360 = vmatmul.mubr.bf16.gmra.mrb[80].mxu0 %v6144_v59  ;;  %5078 = vmatprep.subr.bf16.mxu0 %v6238_v50  ;;  %v4593_v59 = vrot.slane %v4581_v46, 9  ;;  %v3376_v46 = vshll.u32 %v4724_v22, 16 }
 0x130   : > { %2881 = vmatmul.mubr.bf16.gmra.mrb[80].mxu1 %v4599_v37  ;;  %2369 = vmatprep.mubr.bf16.mxu0 %v5448_v0  ;;  %v3331_v37 = vsel %vm5691_vm2, %v3326_v62, %v3330_v10  ;;  %v3349_v43 = vor.u32 %v3348_v26, %v3345_v24  ;;  %v3372_v60 = vrot.slane %v3370_v41, 5  ;;  %v5251_v10 = vld [vmem:[%s5675_s27 + $0x3c] sm:$0xff]   ;;  %v3959_v26 = vld [vmem:[#allocation5 + $0x23c] sm:$0xf]  ;;  %v6315_v41 = vld [vmem:[%s5675_s27 + $0x28] sm:$0xf] }
 0x131   : > { %2890 = vmatprep.mubr.bf16.mxu1 %v5448_v0  ;;  %v2669_v58 = vsel %vm5781_vm5, %v4593_v59, %v2668_v53  ;;  %v3380_v53 = vshrl.u32 %v4724_v22, 16  ;;  %v4726_v59 = vld [vmem:[%s5675_s27 + $0x3c] sm:$0xf]  ;;  %v4741_v5 = vcombine.low %v3331_v37, %v3341_v3  ;;  %v6290_v45 = vrot.slane %v3376_v46, 5  ;;  %v3962_v37 = vld [vmem:[#allocation5 + $0x2fc] sm:$0xf] }
 0x132   : > { %v4601_v35 = vcombine.low %v2669_v58, %v2672_v52  ;;  %v3369_v58 = vrot.slane %v3367_v44, 4  ;;  %v3350_v55 = vrot.slane %v3349_v43, 4  ;;  %v3956_v52 = vld [vmem:[#allocation5 + $0x17c] sm:$0xf]  ;;  %v3394_v4 = vshll.u32 %v4726_v59, 16 }
 0x133   : > { %v3382_v1 = vrot.slane %v3380_v53, 4  ;;  %v4871_v9 = vcombine.low %v3955_v57, %v3956_v52  ;;  %v3410_v22 = vshll.u32 %v4728_v38, 16  ;;  %v4829_v43 = vld [vmem:[%s5675_s27 + $0x18] sm:$0xe]  ;;  %v3963_v3 = vld [vmem:[#allocation5 + $0x33c] sm:$0xf]  ;;  %v4874_v7 = vcombine.low %v3961_v47, %v3962_v37 }
 0x134   : > { %v3373_v25 = vor.u32 %v3372_v60, %v3369_v58  ;;  %v3396_v12 = vrot.slane %v3394_v4, 5  ;;  %v4831_v46 = vld [vmem:[%s5675_s27 + $0x20] sm:$0x1]  ;;  %v4834_v57 = vld [vmem:[%s5675_s27 + $0x2c] sm:$0x1] }
 0x135   : > { %v3383_v34 = vor.u32 %v3382_v1, %v6290_v45  ;;  %v6328_v60 = vrot.slane %v3410_v22, 5  ;;  %v6332_v52 = vld [vmem:[%s5675_s27 + $0x34] sm:$0xf]  ;;  %v6366_v22 = vld [vmem:[%s7043_s2] ss:$0 sm:$0xff] }
 0x136   : > { %v3374_v24 = vrot.slane %v3373_v25, 4  ;;  %v4732_v4 = vld [vmem:[%s5675_s27 + $0x54] sm:$0xf]  ;;  %v3911_v38 = vrot.slane %v6332_v52, 5 }
 0x137   : > { %2370 = vmatmul.mubr.bf16.gmra.mrb[84].mxu0 %v6159_v49  ;;  %v4586_v49 = vld [vmem:[%s5675_s27 + $0x68] sm:$0x1] }
 0x138   : > { %2891 = vmatmul.mubr.bf16.gmra.mrb[84].mxu1 %v4600_v48  ;;  %2379 = vmatprep.mubr.bf16.mxu0 %v5448_v0  ;;  %v2678_v13 = vrot.slane %v4586_v49, 5  ;;  %v4870_v48 = vcombine.low %v3953_v21, %v3954_v42  ;;  %v3391_v49 = vshrl.u32 %v4726_v59, 16  ;;  %v3913_v37 = vrot.slane %v3911_v38, 4 }
 0x139   : > { %2900 = vmatprep.mubr.bf16.mxu1 %v5448_v0 }
 0x13a   : > { %v2679_v19 = vsel %vm5781_vm5, %v2677_v11, %v2678_v13  ;;  %v4729_v11 = vld [vmem:[%s5675_s27 + $0x48] sm:$0xf]  ;;  %v4730_v13 = vld [vmem:[%s5675_s27 + $0x4c] sm:$0xf]  ;;  %v3393_v36 = vrot.slane %v3391_v49, 4  ;;  %v3900_v49 = vrot.slane %v4831_v46, 5 }
 0x13b   : > { %v4602_v30 = vcombine.low %v2676_v61, %v2679_v19  ;;  %v3958_v61 = vld [vmem:[#allocation5 + $0x1fc] sm:$0xf]  ;;  %v3415_v6 = vshrl.u32 %v4729_v11, 16  ;;  %v3428_v62 = vshrl.u32 %v4730_v13, 16  ;;  %v6380_v46 = vld [vmem:[%s5675_s27 + $0x40] sm:$0xf] }
 0x13c   : > { %v3397_v21 = vor.u32 %v3396_v12, %v3393_v36  ;;  %v4733_v36 = vld [vmem:[%s5675_s27 + $0x58] sm:$0xf]  ;;  %v3439_v12 = vshrl.u32 %v4732_v4, 16 }
 0x13d   : > { %v3417_v53 = vrot.slane %v3415_v6, 4  ;;  %v3430_v59 = vrot.slane %v3428_v62, 4 }
 0x13f   : > { %2380 = vmatmul.mubr.bf16.gmra.mrb[88].mxu0 %v6170_v29  ;;  %v3352_v29 = vshll.u32 %v4721_v63, 16  ;;  %v3957_v63 = vld [vmem:[#allocation5 + $0x1bc] sm:$0xf] }
 0x140   : > { %2901 = vmatmul.mubr.bf16.gmra.mrb[88].mxu1 %v4601_v35  ;;  %2389 = vmatprep.mubr.bf16.mxu0 %v5448_v0  ;;  %v3400_v35 = vshll.u32 %v4727_v39, 16  ;;  %v4872_v27 = vcombine.low %v3957_v63, %v3958_v61  ;;  %v3379_v39 = vsel %vm5691_vm2, %v3374_v24, %v6290_v45  ;;  %v3398_v45 = vrot.slane %v3397_v21, 4  ;;  %v4835_v61 = vld [vmem:[%s5675_s27 + $0x30] sm:$0xe] }
 0x141   : > { %2910 = vmatprep.mubr.bf16.mxu1 %v5448_v0  ;;  %v6275_v32 = vrot.slane %v3352_v29, 5  ;;  %v6308_v29 = vld [vmem:[%s5675_s27 + $0x1c] sm:$0xf]  ;;  %v3907_v63 = vrot.slane %v4834_v57, 5  ;;  %v3441_v21 = vrot.slane %v3439_v12, 4 }
 0x142   : > { %v6305_v19 = vrot.slane %v3400_v35, 5  ;;  %v3897_v44 = vrot.slane %v6308_v29, 5  ;;  %v5253_v35 = vld [vmem:[%s5675_s27 + $0x54] sm:$0xff]   ;;  %v4735_v57 = vld [vmem:[%s5675_s27 + $0x60] sm:$0xf] }
 0x143   : > { %v3355_v14 = vsel %vm5691_vm2, %v3350_v55, %v6275_v32  ;;  %v4853_v55 = vrot.slane %v4829_v43, 9 }
 0x144   : > { %v3407_v42 = vor.u32 %v3406_v20, %v6305_v19  ;;  %v3442_v20 = vshll.u32 %v4732_v4, 16  ;;  %v3403_v29 = vsel %vm5691_vm2, %v3398_v45, %v6305_v19  ;;  %v6401_v45 = vld [vmem:[%s5675_s27 + $0x44] sm:$0x1] }
 0x146   : > { %v3408_v1 = vrot.slane %v3407_v42, 4  ;;  %v3444_v42 = vrot.slane %v3442_v20, 5 }
 0x147   : > { %2390 = vmatmul.mubr.bf16.gmra.mrb[92].mxu0 %v6183_v17  ;;  %v3359_v17 = vor.u32 %v3358_v33, %v6275_v32  ;;  %v3384_v32 = vrot.slane %v3383_v34, 4  ;;  %v4837_v34 = vld [vmem:[%s5675_s27 + $0x38] sm:$0x1] }
 0x148   : > { %2911 = vmatmul.mubr.bf16.gmra.mrb[92].mxu1 %v4602_v30  ;;  %5062 = vmatprep.mubr.bf16.mxu0 %v5248_v40  ;;  %v3418_v30 = vshll.u32 %v4729_v11, 16  ;;  %v3424_v40 = vshll.u32 %v4730_v13, 16  ;;  %v3413_v6 = vsel %vm5691_vm2, %v3408_v1, %v6328_v60  ;;  %v4736_v1 = vld [vmem:[%s5675_s27 + $0x64] sm:$0xf] }
 0x149   : > { %3670 = vmatprep.mubr.bf16.mxu1 %v5448_v0  ;;  %v3360_v16 = vrot.slane %v3359_v17, 4  ;;  %v3964_v17 = vld [vmem:[#allocation5 + $0x37c] sm:$0xf] }
 0x14b   : > { %v3365_v15 = vsel %vm5691_vm2, %v3360_v16, %v3364_v56  ;;  %v4832_v56 = vld [vmem:[%s5675_s27 + $0x24] sm:$0xe]  ;;  %v3904_v16 = vrot.slane %v6315_v41, 5 }
 0x14c   : > { %v4742_v23 = vcombine.low %v3355_v14, %v3365_v15  ;;  %v6339_v14 = vcombine.low %v3963_v3, %v3964_v17  ;;  %v4854_v15 = vrot.slane %v4832_v56, 9  ;;  %v4734_v17 = vld [vmem:[%s5675_s27 + $0x5c] sm:$0x1]  ;;  %v4838_v56 = vld [vmem:[%s5675_s27 + $0x3c] sm:$0xe] }
 0x14e   : > { %v6361_v19 = vsel %vm5781_vm5, %v4854_v15, %v3904_v16  ;;  %v4841_v15 = vld [vmem:[%s5675_s27 + $0x48] sm:$0xe] }
 0x14f   : > { %5063 = vmatmul.mubr.bf16.vlgmr.msra.gmra.mrb[96].mxu0 %v5249_v54  ;;  %v3420_v54 = vrot.slane %v3418_v30, 5  ;;  %v3965_v30 = vld [vmem:[#allocation5 + $0x3bc] sm:$0xf] }
 0x150   : > { %3671 = vmatmul.mubr.bf16.vlgmr.msra.gmra.mrb[96].mxu1 %v4741_v5  ;;  %5079 = vmatpush3.bf16.msra.mxu0 %v6238_v50  ;;  %v3386_v50 = vshll.u32 %v4725_v2, 16  ;;  %v4873_v5 = vcombine.low %v3959_v26, %v3960_v28  ;;  %v3899_v2 = vrot.slane %v3897_v44, 4  ;;  %v3452_v28 = vshrl.u32 %v4733_v36, 16 }
 0x151   : > { %5080 = vmatprep.subr.bf16.mxu0 %v4870_v48  ;;  %5066 = vmatprep.mubr.bf16.mxu0 %v5250_v51  ;;  %v4731_v51 = vld [vmem:[%s5675_s27 + $0x50] sm:$0x1]  ;;  %v3421_v25 = vor.u32 %v3420_v54, %v3417_v53 }
 0x152   : > { %3680 = vmatprep.mubr.bf16.mxu1 %v5448_v0  ;;  %v3388_v33 = vrot.slane %v3386_v50, 5  ;;  %v3434_v13 = vshll.u32 %v4731_v51, 16  ;;  %v3906_v50 = vrot.slane %v3904_v16, 4  ;;  %v6357_v62 = vsel %vm5781_vm5, %v3899_v2, %v3900_v49 }
 0x153   : > { %v3422_v24 = vrot.slane %v3421_v25, 4  ;;  %v3454_v52 = vrot.slane %v3452_v28, 4  ;;  %v4842_v25 = vld [vmem:[%s5675_s27 + $0x4c] sm:$0xf] }
 0x154   : > { %5081 = vmatpush3.bf16.msra.mxu0 %v4870_v48  ;;  %v6318_v48 = vrot.slane %v3424_v40, 5  ;;  %v3389_v58 = vsel %vm5691_vm2, %v3384_v32, %v3388_v33  ;;  %v6353_v40 = vsel %vm5781_vm5, %v4853_v55, %v3897_v44  ;;  %v3914_v32 = vrot.slane %v4837_v34, 5  ;;  %v5255_v44 = vld [vmem:[%s5675_s27 + $0x6c] sm:$0xff]  }
 0x155   : > { %5082 = vmatprep.subr.bf16.mxu0 %v4871_v9  ;;  %v3448_v33 = vshll.u32 %v4733_v36, 16  ;;  %v6370_v47 = vsel %vm5781_vm5, %v3906_v50, %v3907_v63  ;;  %v4861_v3 = vcombine.low %v6353_v40, %v6357_v62  ;;  %v3463_v63 = vshrl.u32 %v4735_v57, 16  ;;  %v4737_v40 = vld [vmem:[%s5675_s27 + $0x68] sm:$0x1] }
 0x156   : > { %v3431_v11 = vor.u32 %v3430_v59, %v6318_v48  ;;  %v4744_v59 = vcombine.low %v3403_v29, %v3413_v6  ;;  %v4862_v16 = vcombine.low %v6361_v19, %v6370_v47  ;;  %v6407_v4 = vsel %vm5781_vm5, %v3913_v37, %v3914_v32  ;;  %v4843_v6 = vld [vmem:[%s5675_s27 + $0x50] sm:$0x1]  ;;  %v4738_v37 = vld [vmem:[%s5675_s27 + $0x6c] sm:$0xf] }
 0x157   : > { %5067 = vmatmul.mubr.bf16.gmra.mrb[100].mxu0 %v5251_v10  ;;  %v4743_v10 = vcombine.low %v3379_v39, %v3389_v58  ;;  %v3427_v39 = vsel %vm5691_vm2, %v3422_v24, %v6318_v48  ;;  %v6398_v48 = vrot.slane %v3448_v33, 5  ;;  %v4856_v50 = vrot.slane %v4838_v56, 9  ;;  %v4739_v56 = vld [vmem:[%s5675_s27 + $0x70] sm:$0xf] }
 0x158   : > { %3681 = vmatmul.mubr.bf16.gmra.mrb[100].mxu1 %v4742_v23  ;;  %5083 = vmatpush3.bf16.msra.mxu0 %v4871_v9  ;;  %v5254_v9 = vld [vmem:[%s5675_s27 + $0x60] sm:$0xff]   ;;  %v3966_v23 = vld [vmem:[#allocation5 + $0x3fc] sm:$0xf]  ;;  %v3432_v26 = vrot.slane %v3431_v11, 4  ;;  %v3476_v36 = vshrl.u32 %v4736_v1, 16  ;;  %v3921_v24 = vrot.slane %v6401_v45, 5 }
 0x159   : > { %5084 = vmatprep.subr.bf16.mxu0 %v4872_v27  ;;  %5070 = vmatprep.mubr.bf16.mxu0 %v5252_v31  ;;  %v4855_v31 = vrot.slane %v4835_v61, 9  ;;  %v6374_v41 = vcombine.low %v3965_v30, %v3966_v23  ;;  %v3466_v61 = vshll.u32 %v4735_v57, 16  ;;  %v3455_v29 = vor.u32 %v3454_v52, %v6398_v48 }
 0x15a   : > { %3690 = vmatprep.mubr.bf16.mxu1 %v5448_v0  ;;  %v3925_v30 = vrot.slane %v4842_v25, 5  ;;  %v3465_v33 = vrot.slane %v3463_v63, 4  ;;  %v3490_v25 = vshll.u32 %v4738_v37, 16 }
 0x15b   : > { %v6389_v51 = vsel %vm5781_vm5, %v4855_v31, %v3911_v38  ;;  %v3472_v38 = vshll.u32 %v4736_v1, 16  ;;  %v3468_v28 = vrot.slane %v3466_v61, 5  ;;  %v3482_v1 = vshll.u32 %v4737_v40, 16 }
 0x15c   : > { %5085 = vmatpush3.bf16.msra.mxu0 %v4872_v27  ;;  %v3436_v27 = vrot.slane %v3434_v13, 5  ;;  %v4863_v20 = vcombine.low %v6389_v51, %v6407_v4  ;;  %v4844_v51 = vld [vmem:[%s5675_s27 + $0x54] sm:$0xe] }
 0x15d   : > { %5086 = vmatprep.subr.bf16.mxu0 %v4873_v5  ;;  %v3469_v4 = vor.u32 %v3468_v28, %v3465_v33  ;;  %v3484_v19 = vrot.slane %v3482_v1, 5  ;;  %v4858_v47 = vrot.slane %v4844_v51, 9 }
 0x15f   : > { %5071 = vmatmul.mubr.bf16.gmra.mrb[104].mxu0 %v5253_v35  ;;  %v3445_v35 = vor.u32 %v3444_v42, %v3441_v21 }
 0x160   : > { %3691 = vmatmul.mubr.bf16.gmra.mrb[104].mxu1 %v4743_v10  ;;  %5087 = vmatpush3.bf16.msra.mxu0 %v4873_v5  ;;  %v3437_v5 = vsel %vm5691_vm2, %v3432_v26, %v3436_v27  ;;  %v4857_v26 = vrot.slane %v4841_v15, 9  ;;  %v3500_v15 = vshrl.u32 %v4739_v56, 16 }
 0x161   : > { %5088 = vmatprep.subr.bf16.mxu0 %v4874_v7  ;;  %5074 = vmatprep.mubr.bf16.mxu0 %v5254_v9  ;;  %v3918_v9 = vrot.slane %v6380_v46, 5  ;;  %v4745_v34 = vcombine.low %v3427_v39, %v3437_v5  ;;  %v6427_v62 = vrot.slane %v3445_v35, 4  ;;  %v6443_v46 = vrot.slane %v3472_v38, 5  ;;  %v4740_v38 = vld [vmem:[%s5675_s27 + $0x74] sm:$0x1] }
 0x162   : > { %v5000_v43 = vpop.f32.mrb[0].mxu0  ;;  %3700 = vmatprep.mubr.bf16.mxu1 %v5448_v0  ;;  %v869_v53 = vpop.f32.mrb[0].mxu1  ;;  %v3456_v39 = vrot.slane %v3455_v29, 4  ;;  %v3927_v5 = vrot.slane %v3925_v30, 4  ;;  %v3926_v45 = vsel %vm5781_vm5, %v4857_v26, %v3925_v30 }
 0x163   : > { %v387_v54 = vpop.f32.mrb[1].mxu0  ;;  %v6394_v60 = vpop.f32.mrb[1].mxu1  ;;  %v3920_v23 = vrot.slane %v3918_v9, 4  ;;  %v458_v27 = vadd.f32 %v5000_v43, %v6366_v22  ;;  %v3478_v43 = vrot.slane %v3476_v36, 4  ;;  %v4847_v36 = vld [vmem:[%s5675_s27 + $0x60] sm:$0xe] }
 0x164   : > { %v456_v58 = vadd.f32 %v6366_v22, %v387_v54  ;;  %v5001_v55 = vpop.f32.mrb[2].mxu0  ;;  %5089 = vmatpush3.bf16.msra.mxu0 %v4874_v7  ;;  %v873_v2 = vpop.f32.mrb[2].mxu1  ;;  %v3458_v7 = vshll.u32 %v4734_v17, 16  ;;  %v3928_v17 = vrot.slane %v4843_v6, 5  ;;  %v3470_v6 = vrot.slane %v3469_v4, 4 }
 0x165   : > { %v390_v49 = vpop.f32.mrb[3].mxu0  ;;  %5090 = vmatprep.subr.bf16.mxu0 %v6339_v14  ;;  %v6414_v10 = vpop.f32.mrb[3].mxu1  ;;  %v3922_v52 = vsel %vm5781_vm5, %v3920_v23, %v3921_v24 }
 0x166   : > { %v6411_v11 = vadd.f32 %v869_v53, %v456_v58  ;;  %v457_v13 = vadd.f32 %v6366_v22, %v390_v49  ;;  %v6436_v32 = vrot.slane %v3458_v7, 5  ;;  %v3487_v7 = vshrl.u32 %v4738_v37, 16 }
 0x167   : > { %5075 = vmatmul.mubr.bf16.gmra.mrb[108].mxu0 %v5255_v44  ;;  %v6441_v44 = vsel %vm5781_vm5, %v4856_v50, %v3918_v9  ;;  %v4848_v9 = vld [vmem:[%s5675_s27 + $0x64] sm:$0xf]  ;;  %v3929_v50 = vsel %vm5781_vm5, %v3927_v5, %v3928_v17  ;;  %v4851_v17 = vld [vmem:[%s5675_s27 + $0x70] sm:$0xf] }
 0x168   : > { %v6417_v12 = vadd.f32 %v873_v2, %v457_v13  ;;  %3701 = vmatmul.mubr.bf16.gmra.mrb[108].mxu1 %v4744_v59  ;;  %5091 = vmatpush3.bf16.msra.mxu0 %v6339_v14  ;;  %v6431_v14 = vld [vmem:[%s5675_s27 + $0x58] sm:$0xf]  ;;  %v3496_v13 = vshll.u32 %v4739_v56, 16  ;;  %v3461_v63 = vsel %vm5691_vm2, %v3456_v39, %v6436_v32  ;;  %v4864_v61 = vcombine.low %v6441_v44, %v3922_v52 }
 0x169   : > { %5092 = vmatprep.subr.bf16.mxu0 %v6374_v41  ;;  %3710 = vmatprep.mubr.bf16.mxu1 %v5448_v0  ;;  %v3932_v35 = vrot.slane %v6431_v14, 5  ;;  %v3939_v29 = vrot.slane %v4848_v9, 5  ;;  %v3489_v40 = vrot.slane %v3487_v7, 4  ;;  %v3492_v14 = vrot.slane %v3490_v25, 5  ;;  %v4850_v7 = vld [vmem:[%s5675_s27 + $0x6c] sm:$0xe] }
 0x16a   : > { %v6434_v31 = vpop.f32.mrb[4].mxu0  ;;  %5094 = vmatprep.mubr.bf16.mxu0 %v4861_v3  ;;  %v879_v21 = vpop.f32.mrb[4].mxu1  ;;  %v459_v3 = vadd.f32 %v5001_v55, %v6366_v22  ;;  %v3451_v55 = vsel %vm5691_vm2, %v6427_v62, %v6398_v48  ;;  %v3479_v48 = vor.u32 %v3478_v43, %v6443_v46  ;;  %v4849_v62 = vld [vmem:[%s5675_s27 + $0x68] sm:$0x1]  ;;  %v3502_v32 = vrot.slane %v3500_v15, 4 }
 0x16b   : > { %v403_v42 = vpop.f32.mrb[5].mxu0  ;;  %v6446_v53 = vadd.f32 %v879_v21, %v458_v27  ;;  %v6448_v54 = vpop.f32.mrb[5].mxu1  ;;  %v3934_v30 = vrot.slane %v3932_v35, 4  ;;  %v6489_v27 = vrot.slane %v3496_v13, 5  ;;  %v4746_v21 = vcombine.low %v3451_v55, %v3461_v63  ;;  %v4852_v9 = vld [vmem:[%s5675_s27 + $0x74] sm:$0x1] }
 0x16c   : > { %v6450_v59 = vpop.f32.mrb[6].mxu0  ;;  %5093 = vmatpush3.bf16.msra.mxu0 %v6374_v41  ;;  %v883_v57 = vpop.f32.mrb[6].mxu1  ;;  %v4846_v41 = vld [vmem:[%s5675_s27 + $0x5c] sm:$0x1]  ;;  %v3480_v26 = vrot.slane %v3479_v48, 4  ;;  %v4865_v44 = vcombine.low %v3926_v45, %v3929_v50  ;;  %v4859_v39 = vrot.slane %v4847_v36, 9  ;;  %v3933_v55 = vsel %vm5781_vm5, %v4858_v47, %v3932_v35 }
 0x16d   : > { %v406_v58 = vpop.f32.mrb[7].mxu0  ;;  %v6464_v2 = vadd.f32 %v883_v57, %v459_v3  ;;  %v6466_v49 = vpop.f32.mrb[7].mxu1  ;;  %v3941_v5 = vrot.slane %v3939_v29, 4  ;;  %v3942_v51 = vrot.slane %v4849_v62, 5  ;;  %v3506_v52 = vshll.u32 %v4740_v38, 16  ;;  %s5319_s27 = sshll.u32 %s5449_s25, 4  ;;  %s5320_s27 = int_to_ptr.vmem [resolvable:$false] %s5319_s27 }
 0x16e   : > { %v461_v33 = vadd.f32 %v6366_v22, %v406_v58  ;;  %v3475_v58 = vsel %vm5691_vm2, %v3470_v6, %v6443_v46  ;;  %v3485_v45 = vsel %vm5691_vm2, %v3480_v26, %v3484_v19  ;;  %v3503_v4 = vor.u32 %v3502_v32, %v6489_v27  ;;  %s5321_s29 = scalar_lea.vmem %s5320_s27, 16384  ;;  %p5322_p13 = scmp.lt.s32.totalorder %s6974_s19, %s5320_s27 }
 0x16f   : > { %5095 = vmatmul.mubr.bf16.vlgmr.msra.gmra.mrb[112].mxu0 %v4862_v16  ;;  %v3935_v16 = vrot.slane %v4846_v41, 5  ;;  %v3493_v41 = vor.u32 %v3492_v14, %v3489_v40  ;;  %v3946_v48 = vrot.slane %v4851_v17, 5  ;;  %v3940_v46 = vsel %vm5781_vm5, %v4859_v39, %v3939_v29  ;;  %p5323_p0 = scmp.lt.s32.totalorder %s5321_s29, %s5315_s24 }
 0x170   : > { %3711 = vmatmul.mubr.bf16.gmra.mrb[112].mxu1 %v4745_v34  ;;  %5098 = vmatprep.mubr.bf16.mxu0 %v4863_v20  ;;  %v460_v34 = vadd.f32 %v6366_v22, %v403_v42  ;;  %v3943_v35 = vsel %vm5781_vm5, %v3941_v5, %v3942_v51  ;;  %v462_v25 = vadd.f32 %v6434_v31, %v6366_v22  ;;  %v4860_v38 = vrot.slane %v4850_v7, 9 }
 0x171   : > { %3720 = vmatprep.mubr.bf16.mxu1 %v5448_v0  ;;  %v3936_v1 = vsel %vm5781_vm5, %v3934_v30, %v3935_v16  ;;  %v4747_v15 = vcombine.low %v3475_v58, %v3485_v45  ;;  %v3494_v47 = vrot.slane %v3493_v41, 4  ;;  %v3504_v16 = vrot.slane %v3503_v4, 4  ;;  %p5324_p2 = por %p5323_p0, %p5322_p13 }
 0x172   : > { %v6484_v20 = vpop.f32.mrb[8].mxu0  ;;  %v4866_v63 = vcombine.low %v3933_v55, %v3936_v1  ;;  %v3949_v36 = vrot.slane %v4852_v9, 5  ;;  %v463_v29 = vadd.f32 %v6450_v59, %v6366_v22  ;;  %v4867_v31 = vcombine.low %v3940_v46, %v3943_v35 }
 0x173   : > { %v889_v23 = vpop.f32.mrb[8].mxu1  ;;  %v6487_v24 = vpop.f32.mrb[9].mxu0  ;;  %v3948_v40 = vrot.slane %v3946_v48, 4  ;;  %v3499_v32 = vsel %vm5691_vm2, %v3494_v47, %v6489_v27  ;;  %v996_v17 = vadd.f32 %v6366_v22, %v6394_v60  ;;  %v466_v9 = vadd.f32 %v6484_v20, %v6366_v22  ;;  %p5325_p5 = pnand %p5324_p2, %p5318_p11 }
 0x174   : > { %v6492_v28 = vadd.f32 %v889_v23, %v460_v34  ;;  %v6494_v37 = vpop.f32.mrb[9].mxu1  ;;  %v6496_v42 = vpop.f32.mrb[10].mxu0  ;;  %v464_v27 = vadd.f32 %v6366_v22, %v6487_v24 }
 0x175   : > { %v893_v43 = vpop.f32.mrb[10].mxu1  ;;  %v422_v3 = vpop.f32.mrb[11].mxu0 }
 0x176   : > { %v6499_v56 = vadd.f32 %v893_v43, %v461_v33  ;;  %v6501_v57 = vpop.f32.mrb[11].mxu1  ;;  %v3947_v33 = vsel %vm5781_vm5, %v4860_v38, %v3946_v48  ;;  %v999_v43 = vadd.f32 %v6366_v22, %v6466_v49 }
 0x177   : > { %5099 = vmatmul.mubr.bf16.gmra.mrb[116].mxu0 %v4864_v61  ;;  %v3508_v61 = vrot.slane %v3506_v52, 5 }
 0x178   : > { %3721 = vmatmul.mubr.bf16.gmra.mrb[116].mxu1 %v4746_v21  ;;  %5102 = vmatprep.mubr.bf16.mxu0 %v4865_v44  ;;  %v3950_v21 = vsel %vm5781_vm5, %v3948_v40, %v3949_v36  ;;  %v998_v44 = vadd.f32 %v6366_v22, %v6448_v54  ;;  %v997_v54 = vadd.f32 %v6366_v22, %v6414_v10 }
 0x179   : > { %3730 = vmatprep.mubr.bf16.mxu1 %v5448_v0  ;;  %v3509_v59 = vsel %vm5691_vm2, %v3504_v16, %v3508_v61  ;;  %v4868_v58 = vcombine.low %v3947_v33, %v3950_v21  ;;  %v467_v61 = vadd.f32 %v6496_v42, %v6366_v22 }
 0x17a   : > { %v6522_v13 = vpop.f32.mrb[12].mxu0  ;;  %v4748_v51 = vcombine.low %v3499_v32, %v3509_v59 }
 0x17b   : > { %v899_v50 = vpop.f32.mrb[12].mxu1  ;;  %v6524_v19 = vpop.f32.mrb[13].mxu0 }
 0x17c   : > { %v6528_v34 = vadd.f32 %v899_v50, %v462_v25  ;;  %v901_v6 = vpop.f32.mrb[13].mxu1  ;;  %v6530_v30 = vpop.f32.mrb[14].mxu0  ;;  %v468_v42 = vadd.f32 %v6366_v22, %v6524_v19 }
 0x17d   : > { %v903_v62 = vpop.f32.mrb[14].mxu1  ;;  %v6532_v23 = vpop.f32.mrb[15].mxu0  ;;  %v1002_v10 = vadd.f32 %v6366_v22, %v901_v6 }
 0x17e   : > { %v6534_v26 = vadd.f32 %v903_v62, %v463_v29  ;;  %v905_v14 = vpop.f32.mrb[15].mxu1  ;;  %v469_v21 = vadd.f32 %v6366_v22, %v6532_v23  ;;  %v470_v23 = vadd.f32 %v6522_v13, %v6366_v22 }
 0x17f   : > { %5103 = vmatmul.mubr.bf16.gmra.mrb[120].mxu0 %v4866_v63  ;;  %v1003_v46 = vadd.f32 %v6366_v22, %v905_v14  ;;  %v1001_v63 = vadd.f32 %v6366_v22, %v6501_v57 }
 0x180   : > { %3731 = vmatmul.mubr.bf16.gmra.mrb[120].mxu1 %v4747_v15  ;;  %5106 = vmatprep.mubr.bf16.mxu0 %v4867_v31 }
 0x181   : > { %3740 = vmatprep.mubr.bf16.mxu1 %v5448_v0  ;;  %v465_v0 = vadd.f32 %v6366_v22, %v422_v3  ;;  %v1000_v3 = vadd.f32 %v6366_v22, %v6494_v37 }
 0x182   : > { %v5032_v18 = vpop.f32.mrb[16].mxu0 }
 0x183   : > { %v909_v39 = vpop.f32.mrb[16].mxu1  ;;  %v6554_v5 = vadd.f32 %v5032_v18, %v998_v44  ;;  %v1265_v8 = vpop.f32.mrb[17].mxu0 }
 0x184   : > { %v6559_v55 = vadd.f32 %v909_v39, %v464_v27  ;;  %v911_v60 = vpop.f32.mrb[17].mxu1  ;;  %v6561_v52 = vadd.f32 %v1265_v8, %v996_v17  ;;  %v5033_v24 = vpop.f32.mrb[18].mxu0 }
 0x185   : > { %v913_v45 = vpop.f32.mrb[18].mxu1  ;;  %v6563_v1 = vadd.f32 %v5033_v24, %v999_v43  ;;  %v1268_v49 = vpop.f32.mrb[19].mxu0  ;;  %v1004_v40 = vadd.f32 %v6366_v22, %v911_v60 }
 0x186   : > { %v6565_v41 = vadd.f32 %v913_v45, %v465_v0  ;;  %v915_v4 = vpop.f32.mrb[19].mxu1  ;;  %v6567_v7 = vadd.f32 %v1268_v49, %v997_v54  ;;  %v471_v49 = vadd.f32 %v6530_v30, %v6366_v22 }
 0x187   : > { %5107 = vmatmul.mubr.bf16.gmra.mrb[124].mxu0 %v4868_v58  ;;  %v1005_v44 = vadd.f32 %v6366_v22, %v915_v4 }
 0x188   : > { %3741 = vmatmul.mubr.bf16.gmra.mrb[124].mxu1 %v4748_v51 }
 0x18a   : > { %v5036_v48 = vpop.f32.mrb[20].mxu0 }
 0x18b   : > { %v919_v35 = vpop.f32.mrb[20].mxu1  ;;  %v6575_v25 = vadd.f32 %v5036_v48, %v1002_v10  ;;  %v1281_v15 = vpop.f32.mrb[21].mxu0 }
 0x18c   : > { %v6581_v50 = vadd.f32 %v919_v35, %v466_v9  ;;  %v921_v47 = vpop.f32.mrb[21].mxu1  ;;  %v6583_v37 = vadd.f32 %v1281_v15, %v1000_v3  ;;  %v5037_v16 = vpop.f32.mrb[22].mxu0 }
 0x18d   : > { %v923_v20 = vpop.f32.mrb[22].mxu1  ;;  %v6585_v38 = vadd.f32 %v5037_v16, %v1003_v46  ;;  %v1284_v36 = vpop.f32.mrb[23].mxu0  ;;  %v1006_v57 = vadd.f32 %v6366_v22, %v921_v47 }
 0x18e   : > { %v6587_v29 = vadd.f32 %v923_v20, %v467_v61  ;;  %v925_v6 = vpop.f32.mrb[23].mxu1  ;;  %v6589_v31 = vadd.f32 %v1284_v36, %v1001_v63 }
 0x18f   : > { %v1007_v14 = vadd.f32 %v6366_v22, %v925_v6 }
 0x192   : > { %v5040_v62 = vpop.f32.mrb[24].mxu0 }
 0x193   : > { %v929_v32 = vpop.f32.mrb[24].mxu1  ;;  %v6596_v59 = vadd.f32 %v5040_v62, %v1006_v57  ;;  %v1297_v33 = vpop.f32.mrb[25].mxu0 }
 0x194   : > { %v6601_v17 = vadd.f32 %v929_v32, %v468_v42  ;;  %v931_v27 = vpop.f32.mrb[25].mxu1  ;;  %v6603_v18 = vadd.f32 %v1297_v33, %v1004_v40  ;;  %v5041_v19 = vpop.f32.mrb[26].mxu0 }
 0x195   : > { %v933_v43 = vpop.f32.mrb[26].mxu1  ;;  %v6605_v39 = vadd.f32 %v5041_v19, %v1007_v14  ;;  %v1300_v8 = vpop.f32.mrb[27].mxu0  ;;  %v1008_v0 = vadd.f32 %v6366_v22, %v931_v27 }
 0x196   : > { %v6607_v51 = vadd.f32 %v933_v43, %v469_v21  ;;  %v935_v58 = vpop.f32.mrb[27].mxu1  ;;  %v6609_v54 = vadd.f32 %v1300_v8, %v1005_v44 }
 0x197   : > { %v1009_v4 = vadd.f32 %v6366_v22, %v935_v58 }
 0x19a   : > { %v5044_v60 = vpop.f32.mrb[28].mxu0 }
 0x19b   : > { %v939_v24 = vpop.f32.mrb[28].mxu1  ;;  %v1313_v45 = vpop.f32.mrb[29].mxu0 }
 0x19c   : > { %v6617_v10 = vadd.f32 %v939_v24, %v470_v23  ;;  %v941_v3 = vpop.f32.mrb[29].mxu1  ;;  %v6619_v9 = vadd.f32 %v1313_v45, %v1008_v0  ;;  %v5045_v48 = vpop.f32.mrb[30].mxu0 }
 0x19d   : > { %v1010_v46 = vadd.f32 %v6366_v22, %v941_v3  ;;  %v943_v13 = vpop.f32.mrb[30].mxu1  ;;  %v1316_v35 = vpop.f32.mrb[31].mxu0 }
 0x19e   : > { %v6623_v15 = vadd.f32 %v943_v13, %v471_v49  ;;  %v945_v63 = vpop.f32.mrb[31].mxu1  ;;  %v6625_v61 = vadd.f32 %v1316_v35, %v1009_v4 }
 0x19f   : > { %v6627_v47 = vadd.f32 %v5044_v60, %v1010_v46  ;;  %v1011_v30 = vadd.f32 %v6366_v22, %v945_v63 }
 0x1a1   : > { %v6632_v16 = vadd.f32 %v5045_v48, %v1011_v30 }
 0x1a2   : > { %v1574_v20 = vpop.f32.mrb[32].mxu0 }
 0x1a3   : > { %v1669_v36 = vadd.f32 %v1574_v20, %v6411_v11  ;;  %v2208_v6 = vpop.f32.mrb[32].mxu1  ;;  %v6635_v57 = vpop.f32.mrb[33].mxu0 }
 0x1a4   : > { %v2210_v42 = vpop.f32.mrb[33].mxu1  ;;  %v1578_v40 = vpop.f32.mrb[34].mxu0 }
 0x1a5   : > { %v2416_v62 = vadd.f32 %v2208_v6, %v1669_v36  ;;  %v6638_v14 = vadd.f32 %v2210_v42, %v6561_v52  ;;  %v1670_v32 = vadd.f32 %v1578_v40, %v6417_v12  ;;  %v2212_v33 = vpop.f32.mrb[34].mxu1  ;;  %v6641_v21 = vpop.f32.mrb[35].mxu0 }
 0x1a6   : > { %v2214_v44 = vpop.f32.mrb[35].mxu1 }
 0x1a7   : > { %2432 = vst [vmem:[%s6643_s26] sm:$0xff] %v2416_v62  ;;  %v2417_v11 = vadd.f32 %v2212_v33, %v1670_v32  ;;  %v6647_v27 = vadd.f32 %v2214_v44, %v6567_v7 }
 0x1a9   : > { %2433 = vst [vmem:[%s6643_s26 + $0x10] sm:$0xff] %v2417_v11 }
 0x1aa   : > { %v1584_v52 = vpop.f32.mrb[36].mxu0 }
 0x1ab   : > { %v1671_v19 = vadd.f32 %v1584_v52, %v6446_v53  ;;  %v2218_v12 = vpop.f32.mrb[36].mxu1  ;;  %v6651_v43 = vpop.f32.mrb[37].mxu0 }
 0x1ac   : > { %v2220_v8 = vpop.f32.mrb[37].mxu1  ;;  %v1588_v58 = vpop.f32.mrb[38].mxu0 }
 0x1ad   : > { %v2418_v23 = vadd.f32 %v2218_v12, %v1671_v19  ;;  %v6654_v0 = vadd.f32 %v2220_v8, %v6554_v5  ;;  %v1672_v60 = vadd.f32 %v1588_v58, %v6464_v2  ;;  %v2222_v24 = vpop.f32.mrb[38].mxu1  ;;  %v6657_v45 = vpop.f32.mrb[39].mxu0 }
 0x1ae   : > { %v2224_v7 = vpop.f32.mrb[39].mxu1 }
 0x1af   : > { %2434 = vst [vmem:[%s6643_s26 + $0x40] sm:$0xff] %v2418_v23  ;;  %v2419_v49 = vadd.f32 %v2222_v24, %v1672_v60  ;;  %v6661_v53 = vadd.f32 %v2224_v7, %v6563_v1 }
 0x1b1   : > { %2435 = vst [vmem:[%s6643_s26 + $0x50] sm:$0xff] %v2419_v49 }
 0x1b2   : > { %v1594_v4 = vpop.f32.mrb[40].mxu0 }
 0x1b3   : > { %v1673_v3 = vadd.f32 %v1594_v4, %v6492_v28  ;;  %v2228_v48 = vpop.f32.mrb[40].mxu1  ;;  %v6665_v5 = vpop.f32.mrb[41].mxu0 }
 0x1b4   : > { %v2230_v46 = vpop.f32.mrb[41].mxu1  ;;  %v1598_v2 = vpop.f32.mrb[42].mxu0 }
 0x1b5   : > { %v2420_v13 = vadd.f32 %v2228_v48, %v1673_v3  ;;  %v6668_v35 = vadd.f32 %v2230_v46, %v6583_v37  ;;  %v1674_v63 = vadd.f32 %v1598_v2, %v6499_v56  ;;  %v2232_v30 = vpop.f32.mrb[42].mxu1  ;;  %v6671_v20 = vpop.f32.mrb[43].mxu0 }
 0x1b6   : > { %v2234_v1 = vpop.f32.mrb[43].mxu1 }
 0x1b7   : > { %2436 = vst [vmem:[%s6643_s26 + $0x80] sm:$0xff] %v2420_v13  ;;  %v2421_v36 = vadd.f32 %v2232_v30, %v1674_v63  ;;  %v6675_v28 = vadd.f32 %v2234_v1, %v6589_v31 }
 0x1b9   : > { %2437 = vst [vmem:[%s6643_s26 + $0x90] sm:$0xff] %v2421_v36 }
 0x1ba   : > { %v1604_v6 = vpop.f32.mrb[44].mxu0 }
 0x1bb   : > { %v1675_v42 = vadd.f32 %v1604_v6, %v6528_v34  ;;  %v2238_v40 = vpop.f32.mrb[44].mxu1  ;;  %v6679_v37 = vpop.f32.mrb[45].mxu0 }
 0x1bc   : > { %v2240_v62 = vpop.f32.mrb[45].mxu1  ;;  %v1608_v56 = vpop.f32.mrb[46].mxu0 }
 0x1bd   : > { %v2422_v32 = vadd.f32 %v2238_v40, %v1675_v42  ;;  %v6682_v33 = vadd.f32 %v2240_v62, %v6575_v25  ;;  %v1676_v44 = vadd.f32 %v1608_v56, %v6534_v26  ;;  %v2242_v11 = vpop.f32.mrb[46].mxu1  ;;  %v6685_v52 = vpop.f32.mrb[47].mxu0 }
 0x1be   : > { %v2244_v31 = vpop.f32.mrb[47].mxu1 }
 0x1bf   : > { %2438 = vst [vmem:[%s6643_s26 + $0xc0] sm:$0xff] %v2422_v32  ;;  %v2423_v19 = vadd.f32 %v2242_v11, %v1676_v44  ;;  %v6689_v34 = vadd.f32 %v2244_v31, %v6585_v38 }
 0x1c1   : > { %2439 = vst [vmem:[%s6643_s26 + $0xd0] sm:$0xff] %v2423_v19 }
 0x1c2   : > { %v1614_v12 = vpop.f32.mrb[48].mxu0 }
 0x1c3   : > { %v1677_v8 = vadd.f32 %v1614_v12, %v6559_v55  ;;  %v2248_v58 = vpop.f32.mrb[48].mxu1  ;;  %v6693_v25 = vpop.f32.mrb[49].mxu0 }
 0x1c4   : > { %v2250_v23 = vpop.f32.mrb[49].mxu1  ;;  %v1618_v26 = vpop.f32.mrb[50].mxu0 }
 0x1c5   : > { %v2424_v60 = vadd.f32 %v2248_v58, %v1677_v8  ;;  %v6696_v24 = vadd.f32 %v2250_v23, %v6603_v18  ;;  %v1678_v7 = vadd.f32 %v1618_v26, %v6565_v41  ;;  %v2252_v49 = vpop.f32.mrb[50].mxu1  ;;  %v6699_v4 = vpop.f32.mrb[51].mxu0 }
 0x1c6   : > { %v2254_v38 = vpop.f32.mrb[51].mxu1 }
 0x1c7   : > { %2440 = vst [vmem:[%s6643_s26 + $0x100] sm:$0xff] %v2424_v60  ;;  %v2425_v3 = vadd.f32 %v2252_v49, %v1678_v7  ;;  %v6703_v55 = vadd.f32 %v2254_v38, %v6609_v54 }
 0x1c9   : > { %2441 = vst [vmem:[%s6643_s26 + $0x110] sm:$0xff] %v2425_v3 }
 0x1ca   : > { %v1624_v48 = vpop.f32.mrb[52].mxu0 }
 0x1cb   : > { %v1679_v46 = vadd.f32 %v1624_v48, %v6581_v50  ;;  %v2258_v2 = vpop.f32.mrb[52].mxu1  ;;  %v6707_v18 = vpop.f32.mrb[53].mxu0 }
 0x1cc   : > { %v2260_v13 = vpop.f32.mrb[53].mxu1  ;;  %v1628_v41 = vpop.f32.mrb[54].mxu0 }
 0x1cd   : > { %v2426_v63 = vadd.f32 %v2258_v2, %v1679_v46  ;;  %v6710_v30 = vadd.f32 %v2260_v13, %v6596_v59  ;;  %v1680_v1 = vadd.f32 %v1628_v41, %v6587_v29  ;;  %v2262_v36 = vpop.f32.mrb[54].mxu1  ;;  %v6713_v6 = vpop.f32.mrb[55].mxu0  ;;  %v1701_v2 = vadd.f32 %v6366_v22, %v6635_v57 }
 0x1ce   : > { %v2264_v54 = vpop.f32.mrb[55].mxu1 }
 0x1cf   : > { %2442 = vst [vmem:[%s6643_s26 + $0x140] sm:$0xff] %v2426_v63  ;;  %v2427_v42 = vadd.f32 %v2262_v36, %v1680_v1  ;;  %v6717_v50 = vadd.f32 %v2264_v54, %v6605_v39 }
 0x1d1   : > { %2443 = vst [vmem:[%s6643_s26 + $0x150] sm:$0xff] %v2427_v42 }
 0x1d2   : > { %v1634_v40 = vpop.f32.mrb[56].mxu0 }
 0x1d3   : > { %v1681_v62 = vadd.f32 %v1634_v40, %v6601_v17  ;;  %v2268_v56 = vpop.f32.mrb[56].mxu1  ;;  %v6721_v59 = vpop.f32.mrb[57].mxu0 }
 0x1d4   : > { %v2270_v32 = vpop.f32.mrb[57].mxu1  ;;  %v1638_v29 = vpop.f32.mrb[58].mxu0 }
 0x1d5   : > { %v2428_v44 = vadd.f32 %v2268_v56, %v1681_v62  ;;  %v6724_v11 = vadd.f32 %v2270_v32, %v6619_v9  ;;  %v1682_v31 = vadd.f32 %v1638_v29, %v6607_v51  ;;  %v2272_v19 = vpop.f32.mrb[58].mxu1  ;;  %v6727_v12 = vpop.f32.mrb[59].mxu0 }
 0x1d6   : > { %v2274_v39 = vpop.f32.mrb[59].mxu1 }
 0x1d7   : > { %2444 = vst [vmem:[%s6643_s26 + $0x180] sm:$0xff] %v2428_v44  ;;  %v2429_v8 = vadd.f32 %v2272_v19, %v1682_v31  ;;  %v6731_v17 = vadd.f32 %v2274_v39, %v6625_v61  ;;  %v1704_v31 = vadd.f32 %v6366_v22, %v6657_v45 }
 0x1d9   : > { %2445 = vst [vmem:[%s6643_s26 + $0x190] sm:$0xff] %v2429_v8 }
 0x1da   : > { %v1644_v58 = vpop.f32.mrb[60].mxu0 }
 0x1db   : > { %v1683_v23 = vadd.f32 %v1644_v58, %v6617_v10  ;;  %v2278_v26 = vpop.f32.mrb[60].mxu1  ;;  %v6735_v9 = vpop.f32.mrb[61].mxu0 }
 0x1dc   : > { %v2280_v60 = vpop.f32.mrb[61].mxu1  ;;  %v1648_v51 = vpop.f32.mrb[62].mxu0 }
 0x1dd   : > { %v2430_v7 = vadd.f32 %v2278_v26, %v1683_v23  ;;  %v6738_v49 = vadd.f32 %v2280_v60, %v6627_v47  ;;  %v1684_v38 = vadd.f32 %v1648_v51, %v6623_v15  ;;  %v2282_v3 = vpop.f32.mrb[62].mxu1  ;;  %v6741_v48 = vpop.f32.mrb[63].mxu0  ;;  %v1702_v47 = vadd.f32 %v6366_v22, %v6641_v21 }
 0x1de   : > { %v2284_v61 = vpop.f32.mrb[63].mxu1 }
 0x1df   : > { %2446 = vst [vmem:[%s6643_s26 + $0x1c0] sm:$0xff] %v2430_v7  ;;  %v2431_v46 = vadd.f32 %v2282_v3, %v1684_v38  ;;  %v6745_v10 = vadd.f32 %v2284_v61, %v6632_v16 }
 0x1e1   : > { %2447 = vst [vmem:[%s6643_s26 + $0x1d0] sm:$0xff] %v2431_v46 }
 0x1e2   : > { %v2321_v13 = vpop.f32.mrb[64].mxu0 }
 0x1e3   : > { %v6752_v15 = vadd.f32 %v2321_v13, %v1701_v2  ;;  %v2842_v41 = vpop.f32.mrb[64].mxu1  ;;  %v2323_v63 = vpop.f32.mrb[65].mxu0  ;;  %v1706_v2 = vadd.f32 %v6366_v22, %v6671_v20 }
 0x1e4   : > { %v2937_v1 = vadd.f32 %v2842_v41, %v6638_v14  ;;  %v2544_v36 = vadd.f32 %v6366_v22, %v2323_v63  ;;  %v2844_v54 = vpop.f32.mrb[65].mxu1  ;;  %v2325_v16 = vpop.f32.mrb[66].mxu0  ;;  %v1703_v14 = vadd.f32 %v6366_v22, %v6651_v43 }
 0x1e5   : > { %v6756_v42 = vadd.f32 %v2325_v16, %v1702_v47  ;;  %v2846_v40 = vpop.f32.mrb[66].mxu1  ;;  %v2327_v57 = vpop.f32.mrb[67].mxu0 }
 0x1e6   : > { %2953 = vst [vmem:[%s6643_s26 + $0x8] sm:$0xff] %v2937_v1  ;;  %v6759_v62 = vadd.f32 %v2844_v54, %v2544_v36  ;;  %v2938_v21 = vadd.f32 %v2846_v40, %v6647_v27  ;;  %v2545_v56 = vadd.f32 %v6366_v22, %v2327_v57  ;;  %v2848_v32 = vpop.f32.mrb[67].mxu1 }
 0x1e8   : > { %2954 = vst [vmem:[%s6643_s26 + $0x18] sm:$0xff] %v2938_v21  ;;  %v6764_v29 = vadd.f32 %v2848_v32, %v2545_v56 }
 0x1ea   : > { %v2331_v44 = vpop.f32.mrb[68].mxu0 }
 0x1eb   : > { %v6770_v19 = vadd.f32 %v2331_v44, %v1703_v14  ;;  %v2852_v39 = vpop.f32.mrb[68].mxu1  ;;  %v2333_v8 = vpop.f32.mrb[69].mxu0  ;;  %v1708_v14 = vadd.f32 %v6366_v22, %v6685_v52 }
 0x1ec   : > { %v2939_v27 = vadd.f32 %v2852_v39, %v6654_v0  ;;  %v2546_v58 = vadd.f32 %v6366_v22, %v2333_v8  ;;  %v2854_v23 = vpop.f32.mrb[69].mxu1  ;;  %v2335_v26 = vpop.f32.mrb[70].mxu0  ;;  %v1705_v0 = vadd.f32 %v6366_v22, %v6665_v5 }
 0x1ed   : > { %v6774_v60 = vadd.f32 %v2335_v26, %v1704_v31  ;;  %v2856_v51 = vpop.f32.mrb[70].mxu1  ;;  %v2337_v7 = vpop.f32.mrb[71].mxu0 }
 0x1ee   : > { %2955 = vst [vmem:[%s6643_s26 + $0x48] sm:$0xff] %v2939_v27  ;;  %v6777_v43 = vadd.f32 %v2854_v23, %v2546_v58  ;;  %v2940_v45 = vadd.f32 %v2856_v51, %v6661_v53  ;;  %v2547_v38 = vadd.f32 %v6366_v22, %v2337_v7  ;;  %v2858_v3 = vpop.f32.mrb[71].mxu1 }
 0x1f0   : > { %2956 = vst [vmem:[%s6643_s26 + $0x58] sm:$0xff] %v2940_v45  ;;  %v6782_v61 = vadd.f32 %v2858_v3, %v2547_v38 }
 0x1f2   : > { %v2341_v46 = vpop.f32.mrb[72].mxu0 }
 0x1f3   : > { %v6788_v13 = vadd.f32 %v2341_v46, %v1705_v0  ;;  %v2862_v47 = vpop.f32.mrb[72].mxu1  ;;  %v2343_v41 = vpop.f32.mrb[73].mxu0  ;;  %v1710_v0 = vadd.f32 %v6366_v22, %v6699_v4 }
 0x1f4   : > { %v2941_v53 = vadd.f32 %v2862_v47, %v6668_v35  ;;  %v2548_v63 = vadd.f32 %v6366_v22, %v2343_v41  ;;  %v2864_v1 = vpop.f32.mrb[73].mxu1  ;;  %v2345_v36 = vpop.f32.mrb[74].mxu0  ;;  %v1707_v35 = vadd.f32 %v6366_v22, %v6679_v37 }
 0x1f5   : > { %v6792_v54 = vadd.f32 %v2345_v36, %v1706_v2  ;;  %v2866_v16 = vpop.f32.mrb[74].mxu1  ;;  %v2347_v40 = vpop.f32.mrb[75].mxu0 }
 0x1f6   : > { %2957 = vst [vmem:[%s6643_s26 + $0x88] sm:$0xff] %v2941_v53  ;;  %v6795_v5 = vadd.f32 %v2864_v1, %v2548_v63  ;;  %v2942_v20 = vadd.f32 %v2866_v16, %v6675_v28  ;;  %v2549_v57 = vadd.f32 %v6366_v22, %v2347_v40  ;;  %v2868_v21 = vpop.f32.mrb[75].mxu1 }
 0x1f8   : > { %2958 = vst [vmem:[%s6643_s26 + $0x98] sm:$0xff] %v2942_v20  ;;  %v6800_v56 = vadd.f32 %v2868_v21, %v2549_v57 }
 0x1fa   : > { %v2351_v32 = vpop.f32.mrb[76].mxu0 }
 0x1fb   : > { %v6806_v44 = vadd.f32 %v2351_v32, %v1707_v35  ;;  %v2872_v31 = vpop.f32.mrb[76].mxu1  ;;  %v2353_v39 = vpop.f32.mrb[77].mxu0  ;;  %v1712_v35 = vadd.f32 %v6366_v22, %v6713_v6 }
 0x1fc   : > { %v2943_v28 = vadd.f32 %v2872_v31, %v6682_v33  ;;  %v2550_v8 = vadd.f32 %v6366_v22, %v2353_v39  ;;  %v2874_v27 = vpop.f32.mrb[77].mxu1  ;;  %v2355_v58 = vpop.f32.mrb[78].mxu0  ;;  %v1709_v33 = vadd.f32 %v6366_v22, %v6693_v25 }
 0x1fd   : > { %v6810_v23 = vadd.f32 %v2355_v58, %v1708_v14  ;;  %v2876_v26 = vpop.f32.mrb[78].mxu1  ;;  %v2357_v51 = vpop.f32.mrb[79].mxu0 }
 0x1fe   : > { %2959 = vst [vmem:[%s6643_s26 + $0xc8] sm:$0xff] %v2943_v28  ;;  %v6813_v37 = vadd.f32 %v2874_v27, %v2550_v8  ;;  %v2944_v52 = vadd.f32 %v2876_v26, %v6689_v34  ;;  %v2551_v7 = vadd.f32 %v6366_v22, %v2357_v51  ;;  %v2878_v45 = vpop.f32.mrb[79].mxu1  ;;  %v5256_v51 = vld [vmem:[%s7043_s2] ss:$0 sm:$0xff] }
 0x200   : > { %2960 = vst [vmem:[%s6643_s26 + $0xd8] sm:$0xff] %v2944_v52  ;;  %v6818_v38 = vadd.f32 %v2878_v45, %v2551_v7 }
 0x202   : > { %v2361_v3 = vpop.f32.mrb[80].mxu0 }
 0x203   : > { %v6824_v46 = vadd.f32 %v2361_v3, %v1709_v33  ;;  %v2882_v2 = vpop.f32.mrb[80].mxu1  ;;  %v2363_v47 = vpop.f32.mrb[81].mxu0  ;;  %v1714_v33 = vadd.f32 %v5256_v51, %v6727_v12 }
 0x204   : > { %v2945_v34 = vadd.f32 %v2882_v2, %v6696_v24  ;;  %v2552_v41 = vadd.f32 %v6366_v22, %v2363_v47  ;;  %v2884_v53 = vpop.f32.mrb[81].mxu1  ;;  %v2365_v63 = vpop.f32.mrb[82].mxu0  ;;  %v1711_v24 = vadd.f32 %v6366_v22, %v6707_v18 }
 0x205   : > { %v6828_v1 = vadd.f32 %v2365_v63, %v1710_v0  ;;  %v2886_v36 = vpop.f32.mrb[82].mxu1  ;;  %v2367_v16 = vpop.f32.mrb[83].mxu0 }
 0x206   : > { %2961 = vst [vmem:[%s6643_s26 + $0x108] sm:$0xff] %v2945_v34  ;;  %v6831_v25 = vadd.f32 %v2884_v53, %v2552_v41  ;;  %v2946_v4 = vadd.f32 %v2886_v36, %v6703_v55  ;;  %v2553_v40 = vadd.f32 %v6366_v22, %v2367_v16  ;;  %v2888_v20 = vpop.f32.mrb[83].mxu1 }
 0x208   : > { %2962 = vst [vmem:[%s6643_s26 + $0x118] sm:$0xff] %v2946_v4  ;;  %v6836_v57 = vadd.f32 %v2888_v20, %v2553_v40 }
 0x20a   : > { %v2371_v21 = vpop.f32.mrb[84].mxu0 }
 0x20b   : > { %v6842_v32 = vadd.f32 %v2371_v21, %v1711_v24  ;;  %v2892_v14 = vpop.f32.mrb[84].mxu1  ;;  %v2373_v31 = vpop.f32.mrb[85].mxu0  ;;  %v1716_v24 = vadd.f32 %v5256_v51, %v6741_v48 }
 0x20c   : > { %v2947_v55 = vadd.f32 %v2892_v14, %v6710_v30  ;;  %v2554_v39 = vadd.f32 %v6366_v22, %v2373_v31  ;;  %v2894_v28 = vpop.f32.mrb[85].mxu1  ;;  %v2375_v8 = vpop.f32.mrb[86].mxu0  ;;  %v1713_v30 = vadd.f32 %v5256_v51, %v6721_v59 }
 0x20d   : > { %v6846_v27 = vadd.f32 %v2375_v8, %v1712_v35  ;;  %v2896_v58 = vpop.f32.mrb[86].mxu1  ;;  %v2377_v26 = vpop.f32.mrb[87].mxu0 }
 0x20e   : > { %2963 = vst [vmem:[%s6643_s26 + $0x148] sm:$0xff] %v2947_v55  ;;  %v6849_v18 = vadd.f32 %v2894_v28, %v2554_v39  ;;  %v2948_v6 = vadd.f32 %v2896_v58, %v6717_v50  ;;  %v2555_v52 = vadd.f32 %v5256_v51, %v2377_v26  ;;  %v2898_v7 = vpop.f32.mrb[87].mxu1 }
 0x210   : > { %2964 = vst [vmem:[%s6643_s26 + $0x158] sm:$0xff] %v2948_v6  ;;  %v6856_v22 = vadd.f32 %v2898_v7, %v2555_v52 }
 0x212   : > { %v2381_v45 = vpop.f32.mrb[88].mxu0 }
 0x213   : > { %v6860_v3 = vadd.f32 %v2381_v45, %v1713_v30  ;;  %v2902_v0 = vpop.f32.mrb[88].mxu1  ;;  %v2383_v50 = vpop.f32.mrb[89].mxu0 }
 0x214   : > { %v2949_v2 = vadd.f32 %v2902_v0, %v6724_v11  ;;  %v2556_v47 = vadd.f32 %v5256_v51, %v2383_v50  ;;  %v2904_v34 = vpop.f32.mrb[89].mxu1  ;;  %v2385_v41 = vpop.f32.mrb[90].mxu0  ;;  %v1715_v11 = vadd.f32 %v5256_v51, %v6735_v9 }
 0x215   : > { %v6863_v53 = vadd.f32 %v2385_v41, %v1714_v33  ;;  %v2906_v63 = vpop.f32.mrb[90].mxu1  ;;  %v2387_v36 = vpop.f32.mrb[91].mxu0 }
 0x216   : > { %2965 = vst [vmem:[%s6643_s26 + $0x188] sm:$0xff] %v2949_v2  ;;  %v6866_v16 = vadd.f32 %v2904_v34, %v2556_v47  ;;  %v2950_v59 = vadd.f32 %v2906_v63, %v6731_v17  ;;  %v2557_v12 = vadd.f32 %v5256_v51, %v2387_v36  ;;  %v2908_v4 = vpop.f32.mrb[91].mxu1 }
 0x218   : > { %2966 = vst [vmem:[%s6643_s26 + $0x198] sm:$0xff] %v2950_v59  ;;  %v6870_v40 = vadd.f32 %v2908_v4, %v2557_v12 }
 0x21a   : > { %v2391_v20 = vpop.f32.mrb[92].mxu0 }
 0x21b   : > { %v6874_v21 = vadd.f32 %v2391_v20, %v1715_v11  ;;  %v2912_v35 = vpop.f32.mrb[92].mxu1  ;;  %v2393_v14 = vpop.f32.mrb[93].mxu0 }
 0x21c   : > { %v2951_v31 = vadd.f32 %v2912_v35, %v6738_v49  ;;  %v2558_v55 = vadd.f32 %v5256_v51, %v2393_v14  ;;  %v2914_v17 = vpop.f32.mrb[93].mxu1  ;;  %v2395_v39 = vpop.f32.mrb[94].mxu0 }
 0x21d   : > { %v6877_v28 = vadd.f32 %v2395_v39, %v1716_v24  ;;  %v2916_v8 = vpop.f32.mrb[94].mxu1  ;;  %v2397_v58 = vpop.f32.mrb[95].mxu0 }
 0x21e   : > { %2967 = vst [vmem:[%s6643_s26 + $0x1c8] sm:$0xff] %v2951_v31  ;;  %v6880_v26 = vadd.f32 %v2914_v17, %v2558_v55  ;;  %v2952_v9 = vadd.f32 %v2916_v8, %v6745_v10  ;;  %v2559_v48 = vadd.f32 %v5256_v51, %v2397_v58  ;;  %v2918_v6 = vpop.f32.mrb[95].mxu1 }
 0x220   : > { %2968 = vst [vmem:[%s6643_s26 + $0x1d8] sm:$0xff] %v2952_v9  ;;  %v6884_v52 = vadd.f32 %v2918_v6, %v2559_v48 }
 0x222   : > { %v5064_v7 = vpop.f32.mrb[96].mxu0 }
 0x223   : > { %v3264_v49 = vadd.f32 %v5064_v7, %v6770_v19  ;;  %v3672_v30 = vpop.f32.mrb[96].mxu1  ;;  %v3183_v45 = vpop.f32.mrb[97].mxu0 }
 0x224   : > { %v3262_v33 = vadd.f32 %v3183_v45, %v6752_v15  ;;  %v3674_v0 = vpop.f32.mrb[97].mxu1  ;;  %v5065_v50 = vpop.f32.mrb[98].mxu0 }
 0x225   : > { %v6889_v2 = vadd.f32 %v3674_v0, %v6759_v62  ;;  %v3265_v10 = vadd.f32 %v5065_v50, %v6774_v60  ;;  %v3676_v51 = vpop.f32.mrb[98].mxu1  ;;  %v3186_v47 = vpop.f32.mrb[99].mxu0 }
 0x226   : > { %v3767_v34 = vadd.f32 %v3672_v30, %v3262_v33  ;;  %v3263_v41 = vadd.f32 %v3186_v47, %v6756_v42  ;;  %v3678_v63 = vpop.f32.mrb[99].mxu1 }
 0x227   : > { %v6894_v19 = vadd.f32 %v3678_v63, %v6764_v29 }
 0x228   : > { %4781 = vst [vmem:[%s6643_s26 + $0x20] sm:$0xff] %v3767_v34  ;;  %v3768_v36 = vadd.f32 %v3676_v51, %v3263_v41 }
 0x22a   : > { %4782 = vst [vmem:[%s6643_s26 + $0x30] sm:$0xff] %v3768_v36  ;;  %v5068_v15 = vpop.f32.mrb[100].mxu0 }
 0x22b   : > { %v3268_v59 = vadd.f32 %v5068_v15, %v6806_v44  ;;  %v3682_v62 = vpop.f32.mrb[100].mxu1  ;;  %v3199_v12 = vpop.f32.mrb[101].mxu0 }
 0x22c   : > { %v3769_v60 = vadd.f32 %v3682_v62, %v3264_v49  ;;  %v3266_v4 = vadd.f32 %v3199_v12, %v6788_v13  ;;  %v3684_v11 = vpop.f32.mrb[101].mxu1  ;;  %v5069_v20 = vpop.f32.mrb[102].mxu0 }
 0x22d   : > { %v3817_v42 = vadd.f32 %v3684_v11, %v6777_v43  ;;  %v3269_v29 = vadd.f32 %v5069_v20, %v6810_v23  ;;  %v3686_v24 = vpop.f32.mrb[102].mxu1  ;;  %v3202_v35 = vpop.f32.mrb[103].mxu0 }
 0x22e   : > { %4783 = vst [vmem:[%s6643_s26 + $0x60] sm:$0xff] %v3769_v60  ;;  %v3770_v14 = vadd.f32 %v3686_v24, %v3265_v10  ;;  %v3267_v31 = vadd.f32 %v3202_v35, %v6792_v54  ;;  %v3688_v44 = vpop.f32.mrb[103].mxu1 }
 0x22f   : > { %v3818_v55 = vadd.f32 %v3688_v44, %v6782_v61 }
 0x230   : > { %4784 = vst [vmem:[%s6643_s26 + $0x70] sm:$0xff] %v3770_v14 }
 0x232   : > { %v5072_v17 = vpop.f32.mrb[104].mxu0 }
 0x233   : > { %v3272_v13 = vadd.f32 %v5072_v17, %v6842_v32  ;;  %v3692_v39 = vpop.f32.mrb[104].mxu1  ;;  %v3215_v8 = vpop.f32.mrb[105].mxu0 }
 0x234   : > { %v3771_v43 = vadd.f32 %v3692_v39, %v3266_v4  ;;  %v3270_v23 = vadd.f32 %v3215_v8, %v6824_v46  ;;  %v3694_v58 = vpop.f32.mrb[105].mxu1  ;;  %v5073_v9 = vpop.f32.mrb[106].mxu0 }
 0x235   : > { %v3819_v48 = vadd.f32 %v3694_v58, %v6795_v5  ;;  %v6910_v54 = vadd.f32 %v5073_v9, %v6846_v27  ;;  %v3696_v6 = vpop.f32.mrb[106].mxu1  ;;  %v3218_v7 = vpop.f32.mrb[107].mxu0 }
 0x236   : > { %4785 = vst [vmem:[%s6643_s26 + $0xa0] sm:$0xff] %v3771_v43  ;;  %v3772_v61 = vadd.f32 %v3696_v6, %v3267_v31  ;;  %v3271_v49 = vadd.f32 %v3218_v7, %v6828_v1  ;;  %v3698_v32 = vpop.f32.mrb[107].mxu1 }
 0x237   : > { %v3820_v30 = vadd.f32 %v3698_v32, %v6800_v56 }
 0x238   : > { %4786 = vst [vmem:[%s6643_s26 + $0xb0] sm:$0xff] %v3772_v61 }
 0x23a   : > { %v5076_v45 = vpop.f32.mrb[108].mxu0 }
 0x23b   : > { %v6917_v46 = vadd.f32 %v5076_v45, %v6874_v21  ;;  %v3702_v5 = vpop.f32.mrb[108].mxu1  ;;  %v3231_v33 = vpop.f32.mrb[109].mxu0 }
 0x23c   : > { %v3773_v27 = vadd.f32 %v3702_v5, %v3268_v59  ;;  %v3274_v0 = vadd.f32 %v3231_v33, %v6860_v3  ;;  %v3704_v50 = vpop.f32.mrb[109].mxu1  ;;  %v5077_v10 = vpop.f32.mrb[110].mxu0 }
 0x23d   : > { %v3821_v51 = vadd.f32 %v3704_v50, %v6813_v37  ;;  %v6922_v1 = vadd.f32 %v5077_v10, %v6877_v28  ;;  %v3706_v47 = vpop.f32.mrb[110].mxu1  ;;  %v3234_v56 = vpop.f32.mrb[111].mxu0 }
 0x23e   : > { %4787 = vst [vmem:[%s6643_s26 + $0xe0] sm:$0xff] %v3773_v27  ;;  %v3774_v34 = vadd.f32 %v3706_v47, %v3269_v29  ;;  %v6926_v21 = vadd.f32 %v3234_v56, %v6863_v53  ;;  %v3708_v41 = vpop.f32.mrb[111].mxu1 }
 0x23f   : > { %v3822_v63 = vadd.f32 %v3708_v41, %v6818_v38 }
 0x240   : > { %4788 = vst [vmem:[%s6643_s26 + $0xf0] sm:$0xff] %v3774_v34 }
 0x242   : > { %v5096_v3 = vpop.f32.mrb[112].mxu0 }
 0x243   : > { %v3712_v36 = vpop.f32.mrb[112].mxu1  ;;  %v4162_v37 = vadd.f32 %v5096_v3, %v3817_v42  ;;  %v4081_v28 = vpop.f32.mrb[113].mxu0 }
 0x244   : > { %v3775_v15 = vadd.f32 %v3712_v36, %v3270_v23  ;;  %v3714_v59 = vpop.f32.mrb[113].mxu1  ;;  %v4160_v62 = vadd.f32 %v4081_v28, %v6889_v2  ;;  %v5097_v12 = vpop.f32.mrb[114].mxu0 }
 0x245   : > { %4895 = vst [vmem:[%s6643_s26 + $0x68] sm:$0xff] %v4162_v37  ;;  %v3823_v53 = vadd.f32 %v3714_v59, %v6831_v25  ;;  %v3716_v60 = vpop.f32.mrb[114].mxu1  ;;  %v4163_v4 = vadd.f32 %v5097_v12, %v3818_v55  ;;  %v4084_v38 = vpop.f32.mrb[115].mxu0 }
 0x246   : > { %4789 = vst [vmem:[%s6643_s26 + $0x120] sm:$0xff] %v3775_v15  ;;  %4893 = vst [vmem:[%s6643_s26 + $0x28] sm:$0xff] %v4160_v62  ;;  %v3776_v11 = vadd.f32 %v3716_v60, %v3271_v49  ;;  %v3718_v20 = vpop.f32.mrb[115].mxu1  ;;  %v4161_v42 = vadd.f32 %v4084_v38, %v6894_v19 }
 0x247   : > { %4896 = vst [vmem:[%s6643_s26 + $0x78] sm:$0xff] %v4163_v4  ;;  %v3824_v29 = vadd.f32 %v3718_v20, %v6836_v57 }
 0x248   : > { %4790 = vst [vmem:[%s6643_s26 + $0x130] sm:$0xff] %v3776_v11  ;;  %4894 = vst [vmem:[%s6643_s26 + $0x38] sm:$0xff] %v4161_v42 }
 0x24a   : > { %v5100_v2 = vpop.f32.mrb[116].mxu0 }
 0x24b   : > { %v3722_v24 = vpop.f32.mrb[116].mxu1  ;;  %v4166_v25 = vadd.f32 %v5100_v2, %v3821_v51  ;;  %v4097_v35 = vpop.f32.mrb[117].mxu0 }
 0x24c   : > { %v3777_v14 = vadd.f32 %v3722_v24, %v3272_v13  ;;  %v3724_v31 = vpop.f32.mrb[117].mxu1  ;;  %v4164_v44 = vadd.f32 %v4097_v35, %v3819_v48  ;;  %v5101_v55 = vpop.f32.mrb[118].mxu0 }
 0x24d   : > { %4899 = vst [vmem:[%s6643_s26 + $0xe8] sm:$0xff] %v4166_v25  ;;  %v3825_v19 = vadd.f32 %v3724_v31, %v6849_v18  ;;  %v3726_v17 = vpop.f32.mrb[118].mxu1  ;;  %v4167_v57 = vadd.f32 %v5101_v55, %v3822_v63  ;;  %v4100_v39 = vpop.f32.mrb[119].mxu0 }
 0x24e   : > { %4791 = vst [vmem:[%s6643_s26 + $0x160] sm:$0xff] %v3777_v14  ;;  %4897 = vst [vmem:[%s6643_s26 + $0xa8] sm:$0xff] %v4164_v44  ;;  %v3778_v8 = vadd.f32 %v3726_v17, %v6910_v54  ;;  %v3728_v43 = vpop.f32.mrb[119].mxu1  ;;  %v4165_v23 = vadd.f32 %v4100_v39, %v3820_v30 }
 0x24f   : > { %4900 = vst [vmem:[%s6643_s26 + $0xf8] sm:$0xff] %v4167_v57  ;;  %v3826_v13 = vadd.f32 %v3728_v43, %v6856_v22 }
 0x250   : > { %4792 = vst [vmem:[%s6643_s26 + $0x170] sm:$0xff] %v3778_v8  ;;  %4898 = vst [vmem:[%s6643_s26 + $0xb8] sm:$0xff] %v4165_v23 }
 0x252   : > { %v5104_v58 = vpop.f32.mrb[120].mxu0 }
 0x253   : > { %v3732_v9 = vpop.f32.mrb[120].mxu1  ;;  %v4170_v18 = vadd.f32 %v5104_v58, %v3825_v19  ;;  %v4113_v48 = vpop.f32.mrb[121].mxu0 }
 0x254   : > { %v3779_v6 = vadd.f32 %v3732_v9, %v3274_v0  ;;  %v3734_v7 = vpop.f32.mrb[121].mxu1  ;;  %v4168_v61 = vadd.f32 %v4113_v48, %v3823_v53  ;;  %v5105_v54 = vpop.f32.mrb[122].mxu0 }
 0x255   : > { %4903 = vst [vmem:[%s6643_s26 + $0x168] sm:$0xff] %v4170_v18  ;;  %v3827_v22 = vadd.f32 %v3734_v7, %v6866_v16  ;;  %v3736_v49 = vpop.f32.mrb[122].mxu1  ;;  %v4171_v32 = vadd.f32 %v5105_v54, %v3826_v13  ;;  %v4116_v30 = vpop.f32.mrb[123].mxu0 }
 0x256   : > { %4793 = vst [vmem:[%s6643_s26 + $0x1a0] sm:$0xff] %v3779_v6  ;;  %4901 = vst [vmem:[%s6643_s26 + $0x128] sm:$0xff] %v4168_v61  ;;  %v3780_v45 = vadd.f32 %v3736_v49, %v6926_v21  ;;  %v3738_v5 = vpop.f32.mrb[123].mxu1  ;;  %v4169_v33 = vadd.f32 %v4116_v30, %v3824_v29 }
 0x257   : > { %4904 = vst [vmem:[%s6643_s26 + $0x178] sm:$0xff] %v4171_v32  ;;  %v3828_v27 = vadd.f32 %v3738_v5, %v6870_v40 }
 0x258   : > { %4794 = vst [vmem:[%s6643_s26 + $0x1b0] sm:$0xff] %v3780_v45  ;;  %4902 = vst [vmem:[%s6643_s26 + $0x138] sm:$0xff] %v4169_v33 }
 0x25a   : > { %v5108_v0 = vpop.f32.mrb[124].mxu0 }
 0x25b   : > { %v3742_v16 = vpop.f32.mrb[124].mxu1  ;;  %v4129_v50 = vpop.f32.mrb[125].mxu0 }
 0x25c   : > { %v3781_v10 = vadd.f32 %v3742_v16, %v6917_v46  ;;  %v3744_v51 = vpop.f32.mrb[125].mxu1  ;;  %v4172_v47 = vadd.f32 %v4129_v50, %v3827_v22  ;;  %v5109_v56 = vpop.f32.mrb[126].mxu0 }
 0x25d   : > { %v3829_v40 = vadd.f32 %v3744_v51, %v6880_v26  ;;  %v3746_v34 = vpop.f32.mrb[126].mxu1  ;;  %v4132_v21 = vpop.f32.mrb[127].mxu0 }
 0x25e   : > { %4795 = vst [vmem:[%s6643_s26 + $0x1e0] sm:$0xff] %v3781_v10  ;;  %v3782_v41 = vadd.f32 %v3746_v34, %v6922_v1  ;;  %v3748_v63 = vpop.f32.mrb[127].mxu1  ;;  %4905 = vst [vmem:[%s6643_s26 + $0x1a8] sm:$0xff] %v4172_v47  ;;  %v4173_v46 = vadd.f32 %v4132_v21, %v3828_v27 }
 0x25f   : > { %v4174_v3 = vadd.f32 %v5108_v0, %v3829_v40  ;;  %v3830_v36 = vadd.f32 %v3748_v63, %v6884_v52 }
 0x260   : > { %4796 = vst [vmem:[%s6643_s26 + $0x1f0] sm:$0xff] %v3782_v41  ;;  %4906 = vst [vmem:[%s6643_s26 + $0x1b8] sm:$0xff] %v4173_v46 }
 0x261   : > { %4907 = vst [vmem:[%s6643_s26 + $0x1e8] sm:$0xff] %v4174_v3  ;;  %v4175_v26 = vadd.f32 %v5109_v56, %v3830_v36 }
 0x263   : > { %4908 = vst [vmem:[%s6643_s26 + $0x1f8] sm:$0xff] %v4175_v26 }
 0x264   : > { %5328 = shalt.err (!%p5325_p5)
}
 0x265   : > { %s5329_s30 = scalar_lea.hbm %s6972_s6, 8192  ;;  %s5333_s26 = scalar_lea.hbm %s7044_s3, 32768 }
 0x266   : > { %p5330_p8 = scmp.ne.s32.totalorder %s6972_s6, %s5329_s30  ;;  %p5334_p6 = scmp.lt.u32.totalorder %s6972_s6, %s7044_s3 }
 0x267   : > { %p5335_p10 = scmp.lt.u32.totalorder %s5333_s26, %s5329_s30  ;;  %p5337_p4 = scmp.lt.u32.totalorder %s5329_s30, %s6972_s6 }
 0x268   : > { %p5331_p12 = pnand %p5330_p8, %p7079_p7 }
 0x269   : > { %p5336_p3 = por %p5335_p10, %p5334_p6 }
 0x26a   : > { %p5332_p1 = pneg %p5331_p12 }
 0x26b   : > { %p5338_p9 = por %p5337_p4, %p5336_p3 }
 0x26d   : > { %p5339_p11 = pnand %p5338_p9, %p5332_p1 }
 0x26f   : > { %5342 = shalt.err (!%p5339_p11)
}
 0x270   : > { %s5450_s8 = smov 256   ;;  %s5451_s9 = smov 16  }
 0x271   : > { %5119 = dma.vmem_to_hbm [thread:$0]  (%p7079_p7), %s6974_s19, 8192, %s6972_s6, %s6980_s5, %s5450_s8, %s5450_s8, %s5451_s9  }
 0x272 PF: > { %s7080_s20 = sld [smem:[#allocation11_spill]]  ;;  %s7081_s18 = sld [smem:[#allocation13_spill]] }
 0x273   : > { %p5136_p13 = scmp.ge.s32.totalorder %s5441_s22, 2 }
 0x278   : > { %s4224_s12 = sand.u32 1, %s7080_s20   ;;  %p7082_p0 = scmp.ne.s32.totalorder %s7081_s18, 0 }
 0x279   : > { %s4225_s10 = scalar_lea.sflag [#allocation4], %s4224_s12 }
 0x27a   : > { %p5130_p2 = pnand %p5136_p13, %p7082_p0 }
 0x27c   : > { %5396 = dma.done.wait (!%p5130_p2), %s4225_s10, 8192  }
 0x27d   : > { %5398 = vsyncadd (!%p5130_p2), %s4225_s10, 4294959104  ;;  %s20_s22 = sadd.s32 1, %s5441_s22   ;;  %s7083_s18 = sld [smem:[#allocation12_spill]] }
 0x27e   : > { %p17_p5 = scmp.ge.s32.totalorder %s20_s22, 6   ;;  %s7084_s20 = sld [smem:[#allocation14_spill]] }
 0x27f   : > { %s7085_s28 = sld [smem:[#allocation15_spill]]  ;;  %s7086_s12 = smov %s5405_s13 }
 0x280   : > { %s7087_s13 = smov %s5409_s14  ;;  %s7088_s14 = smov %s5610_s1 }
 0x281   : > { %s7089_s15 = smov %s5417_s16  ;;  %s7090_s16 = smov %s5421_s17 }
 0x282   : > { %s7091_s17 = smov %s5605_s7  ;;  %s7092_s19 = smov %s5437_s21 }
 0x283   :  { %19 = sbr.rel (!%p17_p5) target bundleno = 12 (0xc), region = 85 }
 0x285   : > { %s7093_s21 = smov %s7085_s28 }
 0x28a   :  { %4230 = vsyncpa [#allocation3], 1 }
 0x28b   :  { %4232 = vsyncpa [#allocation3 + $0x1], 1 }
 0x28c   :  { %4233 = vsyncpa [#allocation6], 1 }
 0x28d   :  { %4234 = vsyncpa [#allocation4], 1 }
 0x28e   :  { %4236 = vsyncpa [#allocation4 + $0x1], 1 }

</bundles_post_ra>
